<compile_context>
chip_gen: v6e
topology: v6e:2x2x1
jax: 0.10.0
libtpu: 0.0.40
codegen_flags: <defaults>
</compile_context>

<pallas_src>
import jax
import jax.numpy as jnp
from jax.experimental import pallas as pl
from jax.experimental.pallas import tpu as pltpu


# ----------------------------- fused encoder kernel ------------------------- #

def _encoder_kernel(a1_ref, w1_ref, b1_ref, w2_ref, b2_ref, w3_ref, b3_ref,
                    wr3_ref, wr1_ref, o_ref, p2_ref, xpad_ref, patch_ref):
    f32, bf16 = jnp.float32, jnp.bfloat16

    g, hw1, _ = a1_ref.shape            # images per step, conv_1 output pixels
    nh2 = w1_ref.shape[-1]              # num_hiddens // 2
    nh = w3_ref.shape[-1]               # num_hiddens
    n_layers = wr3_ref.shape[0]
    h = xpad_ref.shape[1] - 2           # conv_2 output spatial (8)
    w = xpad_ref.shape[2] - 2
    hw = h * w
    hp, wp = p2_ref.shape[2], p2_ref.shape[3]   # stride-2 phase grid (h+1, w+1)

    # ---- zero only the padding rings; interiors are fully rewritten below ---
    zr = jnp.zeros((g, 4, 1, wp, nh2), bf16)
    p2_ref[:, :, 0:1, :, :] = zr
    p2_ref[:, :, hp - 1:hp, :, :] = zr
    zc = jnp.zeros((g, 4, hp, 1, nh2), bf16)
    p2_ref[:, :, :, 0:1, :] = zc
    p2_ref[:, :, :, wp - 1:wp, :] = zc
    zr = jnp.zeros((g, 1, w + 2, nh), bf16)
    xpad_ref[:, 0:1, :, :] = zr
    xpad_ref[:, h + 1:h + 2, :, :] = zr
    zc = jnp.zeros((g, h + 2, 1, nh), bf16)
    xpad_ref[:, :, 0:1, :] = zc
    xpad_ref[:, :, w + 1:w + 2, :] = zc

    # ---- conv_1 (4x4, s2, p1) + ReLU: one matmul over prebuilt patches ------
    y1 = jnp.dot(a1_ref[...].reshape(g * hw1, -1), w1_ref[...],
                 preferred_element_type=f32)
    y1 = jnp.maximum(y1 + b1_ref[...], 0.0).astype(bf16)
    y1 = y1.reshape(g, 4, h, w, nh2)    # rows arrive already phase-ordered

    # scatter the 4 stride-2 parity phases into the padded phase scratch
    p2_ref[:, 0:1, 1:h + 1, 1:w + 1, :] = y1[:, 0:1]
    p2_ref[:, 1:2, 1:h + 1, 0:w, :] = y1[:, 1:2]
    p2_ref[:, 2:3, 0:h, 1:w + 1, :] = y1[:, 2:3]
    p2_ref[:, 3:4, 0:h, 0:w, :] = y1[:, 3:4]

    # ---- conv_2 (4x4, s2, p1) + ReLU: in-VMEM im2col, one K=16*nh2 matmul ---
    for kh in range(4):
        for kw in range(4):
            ph = 2 * (kh % 2) + (kw % 2)        # padded (row, col) parity phase
            dh, dw = kh // 2, kw // 2           # offset within the phase grid
            t = kh * 4 + kw
            patch_ref[:, t * nh2:(t + 1) * nh2] = (
                p2_ref[:, ph:ph + 1, dh:dh + h, dw:dw + w, :]
                .reshape(g * hw, nh2))
    y = jnp.dot(patch_ref[:, :16 * nh2], w2_ref[...],
                preferred_element_type=f32)
    y = jnp.maximum(y + b2_ref[...], 0.0)                   # (g*hw, nh) f32

    def conv3x3(x_f32, w_flat):
        # 3x3, s1, p1: one bf16 interior write, 9 tap slices packed into the
        # lane-contiguous patch scratch, one K=9*nh matmul (f32 accumulate).
        xpad_ref[:, 1:h + 1, 1:w + 1, :] = (
            x_f32.astype(bf16).reshape(g, h, w, nh))
        for kh in range(3):
            for kw in range(3):
                t = kh * 3 + kw
                patch_ref[:, t * nh:(t + 1) * nh] = (
                    xpad_ref[:, kh:kh + h, kw:kw + w, :].reshape(g * hw, nh))
        return jnp.dot(patch_ref[...], w_flat, preferred_element_type=f32)

    # ---- conv_3 (3x3, s1, p1) + bias, no activation --------------------------
    y = conv3x3(y, w3_ref[...]) + b3_ref[...]

    # ---- ResidualStack: x = x + conv1x1(relu(conv3x3(relu(x)))); final ReLU --
    for l in range(n_layers):
        hmid = jnp.maximum(conv3x3(jnp.maximum(y, 0.0), wr3_ref[l]), 0.0)
        y = y + jnp.dot(hmid.astype(bf16), wr1_ref[l],
                        preferred_element_type=f32)

    o_ref[...] = jnp.maximum(y, 0.0).reshape(g, hw, nh).astype(o_ref.dtype)


# ------------------------------ wrapper glue -------------------------------- #

def _conv1_patches(x_nhwc):
    """conv_1 (4x4, s2, p1) im2col with rows reordered into the 4 stride-2
    parity phases of the zero-padded conv_2 input.  Tap order (kh, kw) outer,
    channel inner.  Returns (N, H1*W1, 16*Cin) and (H2, W2)."""
    N, H, W, _ = x_nhwc.shape
    H1, W1 = H // 2, W // 2
    xp = jnp.pad(x_nhwc, ((0, 0), (1, 1), (1, 1), (0, 0)))
    cols = []
    for kh in range(4):
        for kw in range(4):
            cols.append(xp[:, kh:kh + 2 * H1:2, kw:kw + 2 * W1:2, :])
    p = jnp.concatenate(cols, axis=-1)                       # (N, H1, W1, 16*C)
    # phase order = (padded-row parity, padded-col parity):
    #   [odd rows & odd cols, odd & even, even & odd, even & even]
    p = jnp.stack([p[:, 1::2, 1::2], p[:, 1::2, 0::2],
                   p[:, 0::2, 1::2], p[:, 0::2, 0::2]], axis=1)
    return p.reshape(N, H1 * W1, -1), (H1 // 2, W1 // 2)


def encoder_forward(params, x_nchw):
    # NCHW (PyTorch) -> NHWC so channels sit on the 128-lane axis.
    x = jnp.transpose(x_nchw, (0, 2, 3, 1)).astype(jnp.bfloat16)
    N = x.shape[0]
    nh2 = params["w1"].shape[-1]          # num_hiddens // 2
    nh = params["w3"].shape[-1]           # num_hiddens
    L = len(params["res"])
    nrh = params["res"][0]["w3x3"].shape[-1]
    bf16, f32 = jnp.bfloat16, jnp.float32

    a1, (H2, W2) = _conv1_patches(x)      # (N, 4*H2*W2, 16*Cin) bf16
    hw1 = a1.shape[1]
    hw = H2 * W2

    # Flattened bf16 weights; K ordering = (kh, kw) outer / Cin inner, matching
    # the tap packing order inside the kernel.
    w1m = params["w1"].reshape(-1, nh2).astype(bf16)          # (16*Cin, nh2)
    b1 = params["b1"].reshape(1, nh2).astype(f32)
    w2m = params["w2"].reshape(-1, nh).astype(bf16)           # (16*nh2, nh)
    b2 = params["b2"].reshape(1, nh).astype(f32)
    w3m = params["w3"].reshape(-1, nh).astype(bf16)           # (9*nh, nh)
    b3 = params["b3"].reshape(1, nh).astype(f32)
    wr3 = jnp.stack([p["w3x3"].reshape(-1, nrh) for p in params["res"]]
                    ).astype(bf16)                            # (L, 9*nh, nrh)
    wr1 = jnp.stack([p["w1x1"].reshape(nrh, nh) for p in params["res"]]
                    ).astype(bf16)                            # (L, nrh, nh)

    # Images per grid step: pack more MXU rows when the batch allows, but keep
    # grid length >= 2 so both v7x TensorCores get work.
    g = max(1, N // 2)
    if N % g:
        g = 1

    flops = 2 * N * (hw1 * w1m.shape[0] * nh2 + hw * w2m.shape[0] * nh
                     + hw * w3m.shape[0] * nh
                     + L * (hw * w3m.shape[0] * nrh + hw * nrh * nh))
    bytes_accessed = (a1.size * 2 + N * hw * nh * 4
                      + (w1m.size + w2m.size + w3m.size + wr3.size + wr1.size) * 2)

    out = pl.pallas_call(
        _encoder_kernel,
        out_shape=jax.ShapeDtypeStruct((N, hw, nh), f32),
        grid=(N // g,),
        in_specs=[
            pl.BlockSpec((g, hw1, a1.shape[-1]), lambda i: (i, 0, 0)),
            pl.BlockSpec(w1m.shape, lambda i: (0, 0)),        # weights stay
            pl.BlockSpec(b1.shape, lambda i: (0, 0)),         # VMEM-resident
            pl.BlockSpec(w2m.shape, lambda i: (0, 0)),        # across steps
            pl.BlockSpec(b2.shape, lambda i: (0, 0)),
            pl.BlockSpec(w3m.shape, lambda i: (0, 0)),
            pl.BlockSpec(b3.shape, lambda i: (0, 0)),
            pl.BlockSpec(wr3.shape, lambda i: (0, 0, 0)),
            pl.BlockSpec(wr1.shape, lambda i: (0, 0, 0)),
        ],
        out_specs=pl.BlockSpec((g, hw, nh), lambda i: (i, 0, 0)),
        scratch_shapes=[
            pltpu.VMEM((g, 4, H2 + 1, W2 + 1, nh2), bf16),    # conv_2 phase fmap
            pltpu.VMEM((g, H2 + 2, W2 + 2, nh), bf16),        # 3x3 padded fmap
            pltpu.VMEM((g * hw, 9 * nh), bf16),               # im2col patch buf
        ],
        compiler_params=pltpu.CompilerParams(dimension_semantics=("parallel",)),
        cost_estimate=pl.CostEstimate(flops=flops, transcendentals=0,
                                      bytes_accessed=bytes_accessed),
    )(a1, w1m, b1, w2m, b2, w3m, b3, wr3, wr1)

    out = out.reshape(N, H2, W2, nh)
    return jnp.transpose(out, (0, 3, 1, 2))                   # back to NCHW


# ------------------------------ reference & params -------------------------- #

def encoder_reference(params, x_nchw):
    """Pure-JAX f32 reference with the exact PyTorch Encoder semantics."""
    dn = ("NHWC", "HWIO", "NHWC")

    def conv(x, w, stride, pad):
        return jax.lax.conv_general_dilated(
            x, w, (stride, stride), [(pad, pad), (pad, pad)],
            dimension_numbers=dn)

    x = jnp.transpose(x_nchw, (0, 2, 3, 1))
    y = jax.nn.relu(conv(x, params["w1"], 2, 1) + params["b1"])
    y = jax.nn.relu(conv(y, params["w2"], 2, 1) + params["b2"])
    y = conv(y, params["w3"], 1, 1) + params["b3"]
    for p in params["res"]:
        hmid = jax.nn.relu(conv(jax.nn.relu(y), p["w3x3"], 1, 1))
        y = y + conv(hmid, p["w1x1"], 1, 0)
    return jnp.transpose(jax.nn.relu(y), (0, 3, 1, 2))


def init_encoder_params(key, in_channels, num_hiddens, num_residual_layers,
                        num_residual_hiddens):
    def conv_w(k, kh, kw, cin, cout):
        scale = 1.0 / jnp.sqrt(cin * kh * kw)
        return jax.random.uniform(k, (kh, kw, cin, cout), jnp.float32, -scale, scale)

    keys = jax.random.split(key, 6 + 2 * num_residual_layers)
    params = {
        "w1": conv_w(keys[0], 4, 4, in_channels, num_hiddens // 2),
        "b1": jax.random.normal(keys[1], (num_hiddens // 2,), jnp.float32) * 0.01,
        "w2": conv_w(keys[2], 4, 4, num_hiddens // 2, num_hiddens),
        "b2": jax.random.normal(keys[3], (num_hiddens,), jnp.float32) * 0.01,
        "w3": conv_w(keys[4], 3, 3, num_hiddens, num_hiddens),
        "b3": jax.random.normal(keys[5], (num_hiddens,), jnp.float32) * 0.01,
        "res": [],
    }
    for i in range(num_residual_layers):
        params["res"].append({
            "w3x3": conv_w(keys[6 + 2 * i], 3, 3, num_hiddens, num_residual_hiddens),
            "w1x1": conv_w(keys[7 + 2 * i], 1, 1, num_residual_hiddens, num_hiddens),
        })
    return params


# ---------------------------------- main ------------------------------------ #

if __name__ == "__main__":
    in_channels = 3
    num_hiddens = 128
    num_residual_layers = 2
    num_residual_hiddens = 32

    key = jax.random.PRNGKey(0)
    k_param, k_x = jax.random.split(key)

    params = init_encoder_params(k_param, in_channels, num_hiddens,
                                 num_residual_layers, num_residual_hiddens)
    x = jax.random.normal(k_x, (2, in_channels, 32, 32), jnp.float32)   # NCHW

    fwd = jax.jit(encoder_forward)
    out = jax.block_until_ready(fwd(params, x))

    expected_shape = (2, num_hiddens, 8, 8)   # two stride-2 convs: 32 -> 16 -> 8
    assert out.shape == expected_shape, out.shape
    assert out.dtype == jnp.float32
    assert bool(jnp.all(out >= 0.0))          # final F.relu of the residual stack

    # Loose parity check vs. a pure-JAX f32 reference (kernel runs bf16 on MXU).
    ref = encoder_reference(params, x)
    max_err = float(jnp.max(jnp.abs(out - ref)))
    assert max_err < 0.15, max_err

    print("KERNEL_OK")
</pallas_src>

<mosaic_0001>
module attributes {stable_mosaic.version = 11 : i64} {
  func.func @_encoder_kernel(%arg0: i32, %arg1: memref<1x256x48xbf16, #tpu.memory_space<vmem>>, %arg2: memref<48x64xbf16, #tpu.memory_space<vmem>>, %arg3: memref<1x64xf32, #tpu.memory_space<vmem>>, %arg4: memref<1024x128xbf16, #tpu.memory_space<vmem>>, %arg5: memref<1x128xf32, #tpu.memory_space<vmem>>, %arg6: memref<1152x128xbf16, #tpu.memory_space<vmem>>, %arg7: memref<1x128xf32, #tpu.memory_space<vmem>>, %arg8: memref<2x1152x32xbf16, #tpu.memory_space<vmem>>, %arg9: memref<2x32x128xbf16, #tpu.memory_space<vmem>>, %arg10: memref<1x64x128xf32, #tpu.memory_space<vmem>>, %arg11: memref<1x4x9x9x64xbf16, #tpu.memory_space<vmem>>, %arg12: memref<1x10x10x128xbf16, #tpu.memory_space<vmem>>, %arg13: memref<64x1152xbf16, #tpu.memory_space<vmem>>) attributes {dimension_semantics = [#tpu.dimension_semantics<parallel>], iteration_bounds = array<i64: 2>, scalar_prefetch = 0 : i64, scratch_operands = 3 : i64, tpu.core_type = #tpu.core_type<tc>, window_params = [{transform_indices = @transform_0, window_bounds = array<i64: 1, 256, 48>}, {pipeline_mode = #tpu.pipeline_mode<synchronous>, transform_indices = @transform_1, window_bounds = array<i64: 48, 64>}, {pipeline_mode = #tpu.pipeline_mode<synchronous>, transform_indices = @transform_2, window_bounds = array<i64: 1, 64>}, {pipeline_mode = #tpu.pipeline_mode<synchronous>, transform_indices = @transform_3, window_bounds = array<i64: 1024, 128>}, {pipeline_mode = #tpu.pipeline_mode<synchronous>, transform_indices = @transform_4, window_bounds = array<i64: 1, 128>}, {pipeline_mode = #tpu.pipeline_mode<synchronous>, transform_indices = @transform_5, window_bounds = array<i64: 1152, 128>}, {pipeline_mode = #tpu.pipeline_mode<synchronous>, transform_indices = @transform_6, window_bounds = array<i64: 1, 128>}, {pipeline_mode = #tpu.pipeline_mode<synchronous>, transform_indices = @transform_7, window_bounds = array<i64: 2, 1152, 32>}, {pipeline_mode = #tpu.pipeline_mode<synchronous>, transform_indices = @transform_8, window_bounds = array<i64: 2, 32, 128>}, {transform_indices = @transform_9, window_bounds = array<i64: 1, 64, 128>}]} {
    %cst = arith.constant 0.000000e+00 : bf16
    %0 = vector.broadcast %cst : bf16 to vector<1x4x1x9x64xbf16>
    %c0 = arith.constant 0 : index
    %c0_0 = arith.constant 0 : index
    %c0_1 = arith.constant 0 : index
    %c0_2 = arith.constant 0 : index
    %c0_3 = arith.constant 0 : index
    %1 = vector.load %arg11[%c0, %c0_0, %c0_1, %c0_2, %c0_3] : memref<1x4x9x9x64xbf16, #tpu.memory_space<vmem>>, vector<1x4x1x9x64xbf16>
    tpu.vector_store %arg11[%c0, %c0_0, %c0_1, %c0_2, %c0_3], %0 {strides = array<i32>} : memref<1x4x9x9x64xbf16, #tpu.memory_space<vmem>>, vector<1x4x1x9x64xbf16>,
    %c0_4 = arith.constant 0 : index
    %c0_5 = arith.constant 0 : index
    %c8 = arith.constant 8 : index
    %c0_6 = arith.constant 0 : index
    %c0_7 = arith.constant 0 : index
    %2 = vector.load %arg11[%c0_4, %c0_5, %c8, %c0_6, %c0_7] : memref<1x4x9x9x64xbf16, #tpu.memory_space<vmem>>, vector<1x4x1x9x64xbf16>
    tpu.vector_store %arg11[%c0_4, %c0_5, %c8, %c0_6, %c0_7], %0 {strides = array<i32>} : memref<1x4x9x9x64xbf16, #tpu.memory_space<vmem>>, vector<1x4x1x9x64xbf16>,
    %cst_8 = arith.constant 0.000000e+00 : bf16
    %3 = vector.broadcast %cst_8 : bf16 to vector<1x4x9x1x64xbf16>
    %c0_9 = arith.constant 0 : index
    %c0_10 = arith.constant 0 : index
    %c0_11 = arith.constant 0 : index
    %c0_12 = arith.constant 0 : index
    %c0_13 = arith.constant 0 : index
    %4 = vector.load %arg11[%c0_9, %c0_10, %c0_11, %c0_12, %c0_13] : memref<1x4x9x9x64xbf16, #tpu.memory_space<vmem>>, vector<1x4x9x1x64xbf16>
    tpu.vector_store %arg11[%c0_9, %c0_10, %c0_11, %c0_12, %c0_13], %3 {strides = array<i32>} : memref<1x4x9x9x64xbf16, #tpu.memory_space<vmem>>, vector<1x4x9x1x64xbf16>,
    %c0_14 = arith.constant 0 : index
    %c0_15 = arith.constant 0 : index
    %c0_16 = arith.constant 0 : index
    %c8_17 = arith.constant 8 : index
    %c0_18 = arith.constant 0 : index
    %5 = vector.load %arg11[%c0_14, %c0_15, %c0_16, %c8_17, %c0_18] : memref<1x4x9x9x64xbf16, #tpu.memory_space<vmem>>, vector<1x4x9x1x64xbf16>
    tpu.vector_store %arg11[%c0_14, %c0_15, %c0_16, %c8_17, %c0_18], %3 {strides = array<i32>} : memref<1x4x9x9x64xbf16, #tpu.memory_space<vmem>>, vector<1x4x9x1x64xbf16>,
    %cst_19 = arith.constant 0.000000e+00 : bf16
    %6 = vector.broadcast %cst_19 : bf16 to vector<1x1x10x128xbf16>
    %c0_20 = arith.constant 0 : index
    %c0_21 = arith.constant 0 : index
    %c0_22 = arith.constant 0 : index
    %c0_23 = arith.constant 0 : index
    %7 = vector.load %arg12[%c0_20, %c0_21, %c0_22, %c0_23] : memref<1x10x10x128xbf16, #tpu.memory_space<vmem>>, vector<1x1x10x128xbf16>
    tpu.vector_store %arg12[%c0_20, %c0_21, %c0_22, %c0_23], %6 {strides = array<i32>} : memref<1x10x10x128xbf16, #tpu.memory_space<vmem>>, vector<1x1x10x128xbf16>,
    %c0_24 = arith.constant 0 : index
    %c9 = arith.constant 9 : index
    %c0_25 = arith.constant 0 : index
    %c0_26 = arith.constant 0 : index
    %8 = vector.load %arg12[%c0_24, %c9, %c0_25, %c0_26] : memref<1x10x10x128xbf16, #tpu.memory_space<vmem>>, vector<1x1x10x128xbf16>
    tpu.vector_store %arg12[%c0_24, %c9, %c0_25, %c0_26], %6 {strides = array<i32>} : memref<1x10x10x128xbf16, #tpu.memory_space<vmem>>, vector<1x1x10x128xbf16>,
    %cst_27 = arith.constant 0.000000e+00 : bf16
    %9 = vector.broadcast %cst_27 : bf16 to vector<1x10x1x128xbf16>
    %c0_28 = arith.constant 0 : index
    %c0_29 = arith.constant 0 : index
    %c0_30 = arith.constant 0 : index
    %c0_31 = arith.constant 0 : index
    %10 = vector.load %arg12[%c0_28, %c0_29, %c0_30, %c0_31] : memref<1x10x10x128xbf16, #tpu.memory_space<vmem>>, vector<1x10x1x128xbf16>
    tpu.vector_store %arg12[%c0_28, %c0_29, %c0_30, %c0_31], %9 {strides = array<i32>} : memref<1x10x10x128xbf16, #tpu.memory_space<vmem>>, vector<1x10x1x128xbf16>,
    %c0_32 = arith.constant 0 : index
    %c0_33 = arith.constant 0 : index
    %c9_34 = arith.constant 9 : index
    %c0_35 = arith.constant 0 : index
    %11 = vector.load %arg12[%c0_32, %c0_33, %c9_34, %c0_35] : memref<1x10x10x128xbf16, #tpu.memory_space<vmem>>, vector<1x10x1x128xbf16>
    tpu.vector_store %arg12[%c0_32, %c0_33, %c9_34, %c0_35], %9 {strides = array<i32>} : memref<1x10x10x128xbf16, #tpu.memory_space<vmem>>, vector<1x10x1x128xbf16>,
    %c0_36 = arith.constant 0 : index
    %c0_37 = arith.constant 0 : index
    %c0_38 = arith.constant 0 : index
    %12 = vector.load %arg1[%c0_36, %c0_37, %c0_38] : memref<1x256x48xbf16, #tpu.memory_space<vmem>>, vector<1x256x48xbf16>
    %13 = vector.shape_cast %12 : vector<1x256x48xbf16> to vector<256x48xbf16>
    %c0_39 = arith.constant 0 : index
    %c0_40 = arith.constant 0 : index
    %14 = vector.load %arg2[%c0_39, %c0_40] : memref<48x64xbf16, #tpu.memory_space<vmem>>, vector<48x64xbf16>
    %cst_41 = arith.constant dense<0.000000e+00> : vector<256x64xf32>
    %15 = tpu.matmul %13, %14, %cst_41 {dimension_numbers = #tpu.dot_dimension_numbers<[1], [0], [0], [1], [0, 0, 1, 1], [], []>} : vector<256x48xbf16>, vector<48x64xbf16>, vector<256x64xf32> -> vector<256x64xf32>
    %c0_42 = arith.constant 0 : index
    %c0_43 = arith.constant 0 : index
    %16 = vector.load %arg3[%c0_42, %c0_43] : memref<1x64xf32, #tpu.memory_space<vmem>>, vector<1x64xf32>
    %17 = vector.broadcast %16 : vector<1x64xf32> to vector<256x64xf32>
    %18 = arith.addf %15, %17 : vector<256x64xf32>
    %cst_44 = arith.constant 0.000000e+00 : f32
    %19 = vector.broadcast %cst_44 : f32 to vector<256x64xf32>
    %20 = arith.maximumf %18, %19 : vector<256x64xf32>
    %21 = arith.truncf %20 : vector<256x64xf32> to vector<256x64xbf16>
    %22 = vector.shape_cast %21 : vector<256x64xbf16> to vector<1x4x8x8x64xbf16>
    %23 = vector.extract_strided_slice %22 {offsets = [0, 0, 0, 0, 0], sizes = [1, 1, 8, 8, 64], strides = [1, 1, 1, 1, 1]} : vector<1x4x8x8x64xbf16> to vector<1x1x8x8x64xbf16>
    %c0_45 = arith.constant 0 : index
    %c0_46 = arith.constant 0 : index
    %c1 = arith.constant 1 : index
    %c1_47 = arith.constant 1 : index
    %c0_48 = arith.constant 0 : index
    %24 = vector.load %arg11[%c0_45, %c0_46, %c1, %c1_47, %c0_48] : memref<1x4x9x9x64xbf16, #tpu.memory_space<vmem>>, vector<1x1x8x8x64xbf16>
    tpu.vector_store %arg11[%c0_45, %c0_46, %c1, %c1_47, %c0_48], %23 {strides = array<i32>} : memref<1x4x9x9x64xbf16, #tpu.memory_space<vmem>>, vector<1x1x8x8x64xbf16>,
    %25 = vector.extract_strided_slice %22 {offsets = [0, 1, 0, 0, 0], sizes = [1, 1, 8, 8, 64], strides = [1, 1, 1, 1, 1]} : vector<1x4x8x8x64xbf16> to vector<1x1x8x8x64xbf16>
    %c0_49 = arith.constant 0 : index
    %c1_50 = arith.constant 1 : index
    %c1_51 = arith.constant 1 : index
    %c0_52 = arith.constant 0 : index
    %c0_53 = arith.constant 0 : index
    %26 = vector.load %arg11[%c0_49, %c1_50, %c1_51, %c0_52, %c0_53] : memref<1x4x9x9x64xbf16, #tpu.memory_space<vmem>>, vector<1x1x8x8x64xbf16>
    tpu.vector_store %arg11[%c0_49, %c1_50, %c1_51, %c0_52, %c0_53], %25 {strides = array<i32>} : memref<1x4x9x9x64xbf16, #tpu.memory_space<vmem>>, vector<1x1x8x8x64xbf16>,
    %27 = vector.extract_strided_slice %22 {offsets = [0, 2, 0, 0, 0], sizes = [1, 1, 8, 8, 64], strides = [1, 1, 1, 1, 1]} : vector<1x4x8x8x64xbf16> to vector<1x1x8x8x64xbf16>
    %c0_54 = arith.constant 0 : index
    %c2 = arith.constant 2 : index
    %c0_55 = arith.constant 0 : index
    %c1_56 = arith.constant 1 : index
    %c0_57 = arith.constant 0 : index
    %28 = vector.load %arg11[%c0_54, %c2, %c0_55, %c1_56, %c0_57] : memref<1x4x9x9x64xbf16, #tpu.memory_space<vmem>>, vector<1x1x8x8x64xbf16>
    tpu.vector_store %arg11[%c0_54, %c2, %c0_55, %c1_56, %c0_57], %27 {strides = array<i32>} : memref<1x4x9x9x64xbf16, #tpu.memory_space<vmem>>, vector<1x1x8x8x64xbf16>,
    %29 = vector.extract_strided_slice %22 {offsets = [0, 3, 0, 0, 0], sizes = [1, 1, 8, 8, 64], strides = [1, 1, 1, 1, 1]} : vector<1x4x8x8x64xbf16> to vector<1x1x8x8x64xbf16>
    %c0_58 = arith.constant 0 : index
    %c3 = arith.constant 3 : index
    %c0_59 = arith.constant 0 : index
    %c0_60 = arith.constant 0 : index
    %c0_61 = arith.constant 0 : index
    %30 = vector.load %arg11[%c0_58, %c3, %c0_59, %c0_60, %c0_61] : memref<1x4x9x9x64xbf16, #tpu.memory_space<vmem>>, vector<1x1x8x8x64xbf16>
    tpu.vector_store %arg11[%c0_58, %c3, %c0_59, %c0_60, %c0_61], %29 {strides = array<i32>} : memref<1x4x9x9x64xbf16, #tpu.memory_space<vmem>>, vector<1x1x8x8x64xbf16>,
    %c0_62 = arith.constant 0 : index
    %c0_63 = arith.constant 0 : index
    %c0_64 = arith.constant 0 : index
    %c0_65 = arith.constant 0 : index
    %c0_66 = arith.constant 0 : index
    %31 = vector.load %arg11[%c0_62, %c0_63, %c0_64, %c0_65, %c0_66] : memref<1x4x9x9x64xbf16, #tpu.memory_space<vmem>>, vector<1x1x8x8x64xbf16>
    %32 = vector.shape_cast %31 : vector<1x1x8x8x64xbf16> to vector<64x64xbf16>
    %c0_67 = arith.constant 0 : index
    %c0_68 = arith.constant 0 : index
    %33 = vector.load %arg13[%c0_67, %c0_68] : memref<64x1152xbf16, #tpu.memory_space<vmem>>, vector<64x64xbf16>
    tpu.vector_store %arg13[%c0_67, %c0_68], %32 {strides = array<i32>} : memref<64x1152xbf16, #tpu.memory_space<vmem>>, vector<64x64xbf16>,
    %c0_69 = arith.constant 0 : index
    %c1_70 = arith.constant 1 : index
    %c0_71 = arith.constant 0 : index
    %c0_72 = arith.constant 0 : index
    %c0_73 = arith.constant 0 : index
    %34 = vector.load %arg11[%c0_69, %c1_70, %c0_71, %c0_72, %c0_73] : memref<1x4x9x9x64xbf16, #tpu.memory_space<vmem>>, vector<1x1x8x8x64xbf16>
    %35 = vector.shape_cast %34 : vector<1x1x8x8x64xbf16> to vector<64x64xbf16>
    %c0_74 = arith.constant 0 : index
    %c64 = arith.constant 64 : index
    %36 = vector.load %arg13[%c0_74, %c64] : memref<64x1152xbf16, #tpu.memory_space<vmem>>, vector<64x64xbf16>
    tpu.vector_store %arg13[%c0_74, %c64], %35 {strides = array<i32>} : memref<64x1152xbf16, #tpu.memory_space<vmem>>, vector<64x64xbf16>,
    %c0_75 = arith.constant 0 : index
    %c0_76 = arith.constant 0 : index
    %c0_77 = arith.constant 0 : index
    %c1_78 = arith.constant 1 : index
    %c0_79 = arith.constant 0 : index
    %37 = vector.load %arg11[%c0_75, %c0_76, %c0_77, %c1_78, %c0_79] : memref<1x4x9x9x64xbf16, #tpu.memory_space<vmem>>, vector<1x1x8x8x64xbf16>
    %38 = vector.shape_cast %37 : vector<1x1x8x8x64xbf16> to vector<64x64xbf16>
    %c0_80 = arith.constant 0 : index
    %c128 = arith.constant 128 : index
    %39 = vector.load %arg13[%c0_80, %c128] : memref<64x1152xbf16, #tpu.memory_space<vmem>>, vector<64x64xbf16>
    tpu.vector_store %arg13[%c0_80, %c128], %38 {strides = array<i32>} : memref<64x1152xbf16, #tpu.memory_space<vmem>>, vector<64x64xbf16>,
    %c0_81 = arith.constant 0 : index
    %c1_82 = arith.constant 1 : index
    %c0_83 = arith.constant 0 : index
    %c1_84 = arith.constant 1 : index
    %c0_85 = arith.constant 0 : index
    %40 = vector.load %arg11[%c0_81, %c1_82, %c0_83, %c1_84, %c0_85] : memref<1x4x9x9x64xbf16, #tpu.memory_space<vmem>>, vector<1x1x8x8x64xbf16>
    %41 = vector.shape_cast %40 : vector<1x1x8x8x64xbf16> to vector<64x64xbf16>
    %c0_86 = arith.constant 0 : index
    %c192 = arith.constant 192 : index
    %42 = vector.load %arg13[%c0_86, %c192] : memref<64x1152xbf16, #tpu.memory_space<vmem>>, vector<64x64xbf16>
    tpu.vector_store %arg13[%c0_86, %c192], %41 {strides = array<i32>} : memref<64x1152xbf16, #tpu.memory_space<vmem>>, vector<64x64xbf16>,
    %c0_87 = arith.constant 0 : index
    %c2_88 = arith.constant 2 : index
    %c0_89 = arith.constant 0 : index
    %c0_90 = arith.constant 0 : index
    %c0_91 = arith.constant 0 : index
    %43 = vector.load %arg11[%c0_87, %c2_88, %c0_89, %c0_90, %c0_91] : memref<1x4x9x9x64xbf16, #tpu.memory_space<vmem>>, vector<1x1x8x8x64xbf16>
    %44 = vector.shape_cast %43 : vector<1x1x8x8x64xbf16> to vector<64x64xbf16>
    %c0_92 = arith.constant 0 : index
    %c256 = arith.constant 256 : index
    %45 = vector.load %arg13[%c0_92, %c256] : memref<64x1152xbf16, #tpu.memory_space<vmem>>, vector<64x64xbf16>
    tpu.vector_store %arg13[%c0_92, %c256], %44 {strides = array<i32>} : memref<64x1152xbf16, #tpu.memory_space<vmem>>, vector<64x64xbf16>,
    %c0_93 = arith.constant 0 : index
    %c3_94 = arith.constant 3 : index
    %c0_95 = arith.constant 0 : index
    %c0_96 = arith.constant 0 : index
    %c0_97 = arith.constant 0 : index
    %46 = vector.load %arg11[%c0_93, %c3_94, %c0_95, %c0_96, %c0_97] : memref<1x4x9x9x64xbf16, #tpu.memory_space<vmem>>, vector<1x1x8x8x64xbf16>
    %47 = vector.shape_cast %46 : vector<1x1x8x8x64xbf16> to vector<64x64xbf16>
    %c0_98 = arith.constant 0 : index
    %c320 = arith.constant 320 : index
    %48 = vector.load %arg13[%c0_98, %c320] : memref<64x1152xbf16, #tpu.memory_space<vmem>>, vector<64x64xbf16>
    tpu.vector_store %arg13[%c0_98, %c320], %47 {strides = array<i32>} : memref<64x1152xbf16, #tpu.memory_space<vmem>>, vector<64x64xbf16>,
    %c0_99 = arith.constant 0 : index
    %c2_100 = arith.constant 2 : index
    %c0_101 = arith.constant 0 : index
    %c1_102 = arith.constant 1 : index
    %c0_103 = arith.constant 0 : index
    %49 = vector.load %arg11[%c0_99, %c2_100, %c0_101, %c1_102, %c0_103] : memref<1x4x9x9x64xbf16, #tpu.memory_space<vmem>>, vector<1x1x8x8x64xbf16>
    %50 = vector.shape_cast %49 : vector<1x1x8x8x64xbf16> to vector<64x64xbf16>
    %c0_104 = arith.constant 0 : index
    %c384 = arith.constant 384 : index
    %51 = vector.load %arg13[%c0_104, %c384] : memref<64x1152xbf16, #tpu.memory_space<vmem>>, vector<64x64xbf16>
    tpu.vector_store %arg13[%c0_104, %c384], %50 {strides = array<i32>} : memref<64x1152xbf16, #tpu.memory_space<vmem>>, vector<64x64xbf16>,
    %c0_105 = arith.constant 0 : index
    %c3_106 = arith.constant 3 : index
    %c0_107 = arith.constant 0 : index
    %c1_108 = arith.constant 1 : index
    %c0_109 = arith.constant 0 : index
    %52 = vector.load %arg11[%c0_105, %c3_106, %c0_107, %c1_108, %c0_109] : memref<1x4x9x9x64xbf16, #tpu.memory_space<vmem>>, vector<1x1x8x8x64xbf16>
    %53 = vector.shape_cast %52 : vector<1x1x8x8x64xbf16> to vector<64x64xbf16>
    %c0_110 = arith.constant 0 : index
    %c448 = arith.constant 448 : index
    %54 = vector.load %arg13[%c0_110, %c448] : memref<64x1152xbf16, #tpu.memory_space<vmem>>, vector<64x64xbf16>
    tpu.vector_store %arg13[%c0_110, %c448], %53 {strides = array<i32>} : memref<64x1152xbf16, #tpu.memory_space<vmem>>, vector<64x64xbf16>,
    %c0_111 = arith.constant 0 : index
    %c0_112 = arith.constant 0 : index
    %c1_113 = arith.constant 1 : index
    %c0_114 = arith.constant 0 : index
    %c0_115 = arith.constant 0 : index
    %55 = vector.load %arg11[%c0_111, %c0_112, %c1_113, %c0_114, %c0_115] : memref<1x4x9x9x64xbf16, #tpu.memory_space<vmem>>, vector<1x1x8x8x64xbf16>
    %56 = vector.shape_cast %55 : vector<1x1x8x8x64xbf16> to vector<64x64xbf16>
    %c0_116 = arith.constant 0 : index
    %c512 = arith.constant 512 : index
    %57 = vector.load %arg13[%c0_116, %c512] : memref<64x1152xbf16, #tpu.memory_space<vmem>>, vector<64x64xbf16>
    tpu.vector_store %arg13[%c0_116, %c512], %56 {strides = array<i32>} : memref<64x1152xbf16, #tpu.memory_space<vmem>>, vector<64x64xbf16>,
    %c0_117 = arith.constant 0 : index
    %c1_118 = arith.constant 1 : index
    %c1_119 = arith.constant 1 : index
    %c0_120 = arith.constant 0 : index
    %c0_121 = arith.constant 0 : index
    %58 = vector.load %arg11[%c0_117, %c1_118, %c1_119, %c0_120, %c0_121] : memref<1x4x9x9x64xbf16, #tpu.memory_space<vmem>>, vector<1x1x8x8x64xbf16>
    %59 = vector.shape_cast %58 : vector<1x1x8x8x64xbf16> to vector<64x64xbf16>
    %c0_122 = arith.constant 0 : index
    %c576 = arith.constant 576 : index
    %60 = vector.load %arg13[%c0_122, %c576] : memref<64x1152xbf16, #tpu.memory_space<vmem>>, vector<64x64xbf16>
    tpu.vector_store %arg13[%c0_122, %c576], %59 {strides = array<i32>} : memref<64x1152xbf16, #tpu.memory_space<vmem>>, vector<64x64xbf16>,
    %c0_123 = arith.constant 0 : index
    %c0_124 = arith.constant 0 : index
    %c1_125 = arith.constant 1 : index
    %c1_126 = arith.constant 1 : index
    %c0_127 = arith.constant 0 : index
    %61 = vector.load %arg11[%c0_123, %c0_124, %c1_125, %c1_126, %c0_127] : memref<1x4x9x9x64xbf16, #tpu.memory_space<vmem>>, vector<1x1x8x8x64xbf16>
    %62 = vector.shape_cast %61 : vector<1x1x8x8x64xbf16> to vector<64x64xbf16>
    %c0_128 = arith.constant 0 : index
    %c640 = arith.constant 640 : index
    %63 = vector.load %arg13[%c0_128, %c640] : memref<64x1152xbf16, #tpu.memory_space<vmem>>, vector<64x64xbf16>
    tpu.vector_store %arg13[%c0_128, %c640], %62 {strides = array<i32>} : memref<64x1152xbf16, #tpu.memory_space<vmem>>, vector<64x64xbf16>,
    %c0_129 = arith.constant 0 : index
    %c1_130 = arith.constant 1 : index
    %c1_131 = arith.constant 1 : index
    %c1_132 = arith.constant 1 : index
    %c0_133 = arith.constant 0 : index
    %64 = vector.load %arg11[%c0_129, %c1_130, %c1_131, %c1_132, %c0_133] : memref<1x4x9x9x64xbf16, #tpu.memory_space<vmem>>, vector<1x1x8x8x64xbf16>
    %65 = vector.shape_cast %64 : vector<1x1x8x8x64xbf16> to vector<64x64xbf16>
    %c0_134 = arith.constant 0 : index
    %c704 = arith.constant 704 : index
    %66 = vector.load %arg13[%c0_134, %c704] : memref<64x1152xbf16, #tpu.memory_space<vmem>>, vector<64x64xbf16>
    tpu.vector_store %arg13[%c0_134, %c704], %65 {strides = array<i32>} : memref<64x1152xbf16, #tpu.memory_space<vmem>>, vector<64x64xbf16>,
    %c0_135 = arith.constant 0 : index
    %c2_136 = arith.constant 2 : index
    %c1_137 = arith.constant 1 : index
    %c0_138 = arith.constant 0 : index
    %c0_139 = arith.constant 0 : index
    %67 = vector.load %arg11[%c0_135, %c2_136, %c1_137, %c0_138, %c0_139] : memref<1x4x9x9x64xbf16, #tpu.memory_space<vmem>>, vector<1x1x8x8x64xbf16>
    %68 = vector.shape_cast %67 : vector<1x1x8x8x64xbf16> to vector<64x64xbf16>
    %c0_140 = arith.constant 0 : index
    %c768 = arith.constant 768 : index
    %69 = vector.load %arg13[%c0_140, %c768] : memref<64x1152xbf16, #tpu.memory_space<vmem>>, vector<64x64xbf16>
    tpu.vector_store %arg13[%c0_140, %c768], %68 {strides = array<i32>} : memref<64x1152xbf16, #tpu.memory_space<vmem>>, vector<64x64xbf16>,
    %c0_141 = arith.constant 0 : index
    %c3_142 = arith.constant 3 : index
    %c1_143 = arith.constant 1 : index
    %c0_144 = arith.constant 0 : index
    %c0_145 = arith.constant 0 : index
    %70 = vector.load %arg11[%c0_141, %c3_142, %c1_143, %c0_144, %c0_145] : memref<1x4x9x9x64xbf16, #tpu.memory_space<vmem>>, vector<1x1x8x8x64xbf16>
    %71 = vector.shape_cast %70 : vector<1x1x8x8x64xbf16> to vector<64x64xbf16>
    %c0_146 = arith.constant 0 : index
    %c832 = arith.constant 832 : index
    %72 = vector.load %arg13[%c0_146, %c832] : memref<64x1152xbf16, #tpu.memory_space<vmem>>, vector<64x64xbf16>
    tpu.vector_store %arg13[%c0_146, %c832], %71 {strides = array<i32>} : memref<64x1152xbf16, #tpu.memory_space<vmem>>, vector<64x64xbf16>,
    %c0_147 = arith.constant 0 : index
    %c2_148 = arith.constant 2 : index
    %c1_149 = arith.constant 1 : index
    %c1_150 = arith.constant 1 : index
    %c0_151 = arith.constant 0 : index
    %73 = vector.load %arg11[%c0_147, %c2_148, %c1_149, %c1_150, %c0_151] : memref<1x4x9x9x64xbf16, #tpu.memory_space<vmem>>, vector<1x1x8x8x64xbf16>
    %74 = vector.shape_cast %73 : vector<1x1x8x8x64xbf16> to vector<64x64xbf16>
    %c0_152 = arith.constant 0 : index
    %c896 = arith.constant 896 : index
    %75 = vector.load %arg13[%c0_152, %c896] : memref<64x1152xbf16, #tpu.memory_space<vmem>>, vector<64x64xbf16>
    tpu.vector_store %arg13[%c0_152, %c896], %74 {strides = array<i32>} : memref<64x1152xbf16, #tpu.memory_space<vmem>>, vector<64x64xbf16>,
    %c0_153 = arith.constant 0 : index
    %c3_154 = arith.constant 3 : index
    %c1_155 = arith.constant 1 : index
    %c1_156 = arith.constant 1 : index
    %c0_157 = arith.constant 0 : index
    %76 = vector.load %arg11[%c0_153, %c3_154, %c1_155, %c1_156, %c0_157] : memref<1x4x9x9x64xbf16, #tpu.memory_space<vmem>>, vector<1x1x8x8x64xbf16>
    %77 = vector.shape_cast %76 : vector<1x1x8x8x64xbf16> to vector<64x64xbf16>
    %c0_158 = arith.constant 0 : index
    %c960 = arith.constant 960 : index
    %78 = vector.load %arg13[%c0_158, %c960] : memref<64x1152xbf16, #tpu.memory_space<vmem>>, vector<64x64xbf16>
    tpu.vector_store %arg13[%c0_158, %c960], %77 {strides = array<i32>} : memref<64x1152xbf16, #tpu.memory_space<vmem>>, vector<64x64xbf16>,
    %c0_159 = arith.constant 0 : index
    %c0_160 = arith.constant 0 : index
    %79 = vector.load %arg13[%c0_159, %c0_160] : memref<64x1152xbf16, #tpu.memory_space<vmem>>, vector<64x1024xbf16>
    %c0_161 = arith.constant 0 : index
    %c0_162 = arith.constant 0 : index
    %80 = vector.load %arg4[%c0_161, %c0_162] : memref<1024x128xbf16, #tpu.memory_space<vmem>>, vector<1024x128xbf16>
    %cst_163 = arith.constant dense<0.000000e+00> : vector<64x128xf32>
    %81 = tpu.matmul %79, %80, %cst_163 {dimension_numbers = #tpu.dot_dimension_numbers<[1], [0], [0], [1], [0, 0, 1, 1], [], []>} : vector<64x1024xbf16>, vector<1024x128xbf16>, vector<64x128xf32> -> vector<64x128xf32>
    %c0_164 = arith.constant 0 : index
    %c0_165 = arith.constant 0 : index
    %82 = vector.load %arg5[%c0_164, %c0_165] : memref<1x128xf32, #tpu.memory_space<vmem>>, vector<1x128xf32>
    %83 = vector.broadcast %82 : vector<1x128xf32> to vector<64x128xf32>
    %84 = arith.addf %81, %83 : vector<64x128xf32>
    %cst_166 = arith.constant 0.000000e+00 : f32
    %85 = vector.broadcast %cst_166 : f32 to vector<64x128xf32>
    %86 = arith.maximumf %84, %85 : vector<64x128xf32>
    %c0_167 = arith.constant 0 : index
    %c0_168 = arith.constant 0 : index
    %87 = vector.load %arg6[%c0_167, %c0_168] : memref<1152x128xbf16, #tpu.memory_space<vmem>>, vector<1152x128xbf16>
    %88 = arith.truncf %86 : vector<64x128xf32> to vector<64x128xbf16>
    %89 = vector.shape_cast %88 : vector<64x128xbf16> to vector<1x8x8x128xbf16>
    %c0_169 = arith.constant 0 : index
    %c1_170 = arith.constant 1 : index
    %c1_171 = arith.constant 1 : index
    %c0_172 = arith.constant 0 : index
    %90 = vector.load %arg12[%c0_169, %c1_170, %c1_171, %c0_172] : memref<1x10x10x128xbf16, #tpu.memory_space<vmem>>, vector<1x8x8x128xbf16>
    tpu.vector_store %arg12[%c0_169, %c1_170, %c1_171, %c0_172], %89 {strides = array<i32>} : memref<1x10x10x128xbf16, #tpu.memory_space<vmem>>, vector<1x8x8x128xbf16>,
    %c0_173 = arith.constant 0 : index
    %c0_174 = arith.constant 0 : index
    %c0_175 = arith.constant 0 : index
    %c0_176 = arith.constant 0 : index
    %91 = vector.load %arg12[%c0_173, %c0_174, %c0_175, %c0_176] : memref<1x10x10x128xbf16, #tpu.memory_space<vmem>>, vector<1x8x8x128xbf16>
    %92 = vector.shape_cast %91 : vector<1x8x8x128xbf16> to vector<64x128xbf16>
    %c0_177 = arith.constant 0 : index
    %c0_178 = arith.constant 0 : index
    %93 = vector.load %arg13[%c0_177, %c0_178] : memref<64x1152xbf16, #tpu.memory_space<vmem>>, vector<64x128xbf16>
    tpu.vector_store %arg13[%c0_177, %c0_178], %92 {strides = array<i32>} : memref<64x1152xbf16, #tpu.memory_space<vmem>>, vector<64x128xbf16>,
    %c0_179 = arith.constant 0 : index
    %c0_180 = arith.constant 0 : index
    %c1_181 = arith.constant 1 : index
    %c0_182 = arith.constant 0 : index
    %94 = vector.load %arg12[%c0_179, %c0_180, %c1_181, %c0_182] : memref<1x10x10x128xbf16, #tpu.memory_space<vmem>>, vector<1x8x8x128xbf16>
    %95 = vector.shape_cast %94 : vector<1x8x8x128xbf16> to vector<64x128xbf16>
    %c0_183 = arith.constant 0 : index
    %c128_184 = arith.constant 128 : index
    %96 = vector.load %arg13[%c0_183, %c128_184] : memref<64x1152xbf16, #tpu.memory_space<vmem>>, vector<64x128xbf16>
    tpu.vector_store %arg13[%c0_183, %c128_184], %95 {strides = array<i32>} : memref<64x1152xbf16, #tpu.memory_space<vmem>>, vector<64x128xbf16>,
    %c0_185 = arith.constant 0 : index
    %c0_186 = arith.constant 0 : index
    %c2_187 = arith.constant 2 : index
    %c0_188 = arith.constant 0 : index
    %97 = vector.load %arg12[%c0_185, %c0_186, %c2_187, %c0_188] : memref<1x10x10x128xbf16, #tpu.memory_space<vmem>>, vector<1x8x8x128xbf16>
    %98 = vector.shape_cast %97 : vector<1x8x8x128xbf16> to vector<64x128xbf16>
    %c0_189 = arith.constant 0 : index
    %c256_190 = arith.constant 256 : index
    %99 = vector.load %arg13[%c0_189, %c256_190] : memref<64x1152xbf16, #tpu.memory_space<vmem>>, vector<64x128xbf16>
    tpu.vector_store %arg13[%c0_189, %c256_190], %98 {strides = array<i32>} : memref<64x1152xbf16, #tpu.memory_space<vmem>>, vector<64x128xbf16>,
    %c0_191 = arith.constant 0 : index
    %c1_192 = arith.constant 1 : index
    %c0_193 = arith.constant 0 : index
    %c0_194 = arith.constant 0 : index
    %100 = vector.load %arg12[%c0_191, %c1_192, %c0_193, %c0_194] : memref<1x10x10x128xbf16, #tpu.memory_space<vmem>>, vector<1x8x8x128xbf16>
    %101 = vector.shape_cast %100 : vector<1x8x8x128xbf16> to vector<64x128xbf16>
    %c0_195 = arith.constant 0 : index
    %c384_196 = arith.constant 384 : index
    %102 = vector.load %arg13[%c0_195, %c384_196] : memref<64x1152xbf16, #tpu.memory_space<vmem>>, vector<64x128xbf16>
    tpu.vector_store %arg13[%c0_195, %c384_196], %101 {strides = array<i32>} : memref<64x1152xbf16, #tpu.memory_space<vmem>>, vector<64x128xbf16>,
    %c0_197 = arith.constant 0 : index
    %c1_198 = arith.constant 1 : index
    %c1_199 = arith.constant 1 : index
    %c0_200 = arith.constant 0 : index
    %103 = vector.load %arg12[%c0_197, %c1_198, %c1_199, %c0_200] : memref<1x10x10x128xbf16, #tpu.memory_space<vmem>>, vector<1x8x8x128xbf16>
    %104 = vector.shape_cast %103 : vector<1x8x8x128xbf16> to vector<64x128xbf16>
    %c0_201 = arith.constant 0 : index
    %c512_202 = arith.constant 512 : index
    %105 = vector.load %arg13[%c0_201, %c512_202] : memref<64x1152xbf16, #tpu.memory_space<vmem>>, vector<64x128xbf16>
    tpu.vector_store %arg13[%c0_201, %c512_202], %104 {strides = array<i32>} : memref<64x1152xbf16, #tpu.memory_space<vmem>>, vector<64x128xbf16>,
    %c0_203 = arith.constant 0 : index
    %c1_204 = arith.constant 1 : index
    %c2_205 = arith.constant 2 : index
    %c0_206 = arith.constant 0 : index
    %106 = vector.load %arg12[%c0_203, %c1_204, %c2_205, %c0_206] : memref<1x10x10x128xbf16, #tpu.memory_space<vmem>>, vector<1x8x8x128xbf16>
    %107 = vector.shape_cast %106 : vector<1x8x8x128xbf16> to vector<64x128xbf16>
    %c0_207 = arith.constant 0 : index
    %c640_208 = arith.constant 640 : index
    %108 = vector.load %arg13[%c0_207, %c640_208] : memref<64x1152xbf16, #tpu.memory_space<vmem>>, vector<64x128xbf16>
    tpu.vector_store %arg13[%c0_207, %c640_208], %107 {strides = array<i32>} : memref<64x1152xbf16, #tpu.memory_space<vmem>>, vector<64x128xbf16>,
    %c0_209 = arith.constant 0 : index
    %c2_210 = arith.constant 2 : index
    %c0_211 = arith.constant 0 : index
    %c0_212 = arith.constant 0 : index
    %109 = vector.load %arg12[%c0_209, %c2_210, %c0_211, %c0_212] : memref<1x10x10x128xbf16, #tpu.memory_space<vmem>>, vector<1x8x8x128xbf16>
    %110 = vector.shape_cast %109 : vector<1x8x8x128xbf16> to vector<64x128xbf16>
    %c0_213 = arith.constant 0 : index
    %c768_214 = arith.constant 768 : index
    %111 = vector.load %arg13[%c0_213, %c768_214] : memref<64x1152xbf16, #tpu.memory_space<vmem>>, vector<64x128xbf16>
    tpu.vector_store %arg13[%c0_213, %c768_214], %110 {strides = array<i32>} : memref<64x1152xbf16, #tpu.memory_space<vmem>>, vector<64x128xbf16>,
    %c0_215 = arith.constant 0 : index
    %c2_216 = arith.constant 2 : index
    %c1_217 = arith.constant 1 : index
    %c0_218 = arith.constant 0 : index
    %112 = vector.load %arg12[%c0_215, %c2_216, %c1_217, %c0_218] : memref<1x10x10x128xbf16, #tpu.memory_space<vmem>>, vector<1x8x8x128xbf16>
    %113 = vector.shape_cast %112 : vector<1x8x8x128xbf16> to vector<64x128xbf16>
    %c0_219 = arith.constant 0 : index
    %c896_220 = arith.constant 896 : index
    %114 = vector.load %arg13[%c0_219, %c896_220] : memref<64x1152xbf16, #tpu.memory_space<vmem>>, vector<64x128xbf16>
    tpu.vector_store %arg13[%c0_219, %c896_220], %113 {strides = array<i32>} : memref<64x1152xbf16, #tpu.memory_space<vmem>>, vector<64x128xbf16>,
    %c0_221 = arith.constant 0 : index
    %c2_222 = arith.constant 2 : index
    %c2_223 = arith.constant 2 : index
    %c0_224 = arith.constant 0 : index
    %115 = vector.load %arg12[%c0_221, %c2_222, %c2_223, %c0_224] : memref<1x10x10x128xbf16, #tpu.memory_space<vmem>>, vector<1x8x8x128xbf16>
    %116 = vector.shape_cast %115 : vector<1x8x8x128xbf16> to vector<64x128xbf16>
    %c0_225 = arith.constant 0 : index
    %c1024 = arith.constant 1024 : index
    %117 = vector.load %arg13[%c0_225, %c1024] : memref<64x1152xbf16, #tpu.memory_space<vmem>>, vector<64x128xbf16>
    tpu.vector_store %arg13[%c0_225, %c1024], %116 {strides = array<i32>} : memref<64x1152xbf16, #tpu.memory_space<vmem>>, vector<64x128xbf16>,
    %c0_226 = arith.constant 0 : index
    %c0_227 = arith.constant 0 : index
    %118 = vector.load %arg13[%c0_226, %c0_227] : memref<64x1152xbf16, #tpu.memory_space<vmem>>, vector<64x1152xbf16>
    %cst_228 = arith.constant dense<0.000000e+00> : vector<64x128xf32>
    %119 = tpu.matmul %118, %87, %cst_228 {dimension_numbers = #tpu.dot_dimension_numbers<[1], [0], [0], [1], [0, 0, 1, 1], [], []>} : vector<64x1152xbf16>, vector<1152x128xbf16>, vector<64x128xf32> -> vector<64x128xf32>
    %c0_229 = arith.constant 0 : index
    %c0_230 = arith.constant 0 : index
    %120 = vector.load %arg7[%c0_229, %c0_230] : memref<1x128xf32, #tpu.memory_space<vmem>>, vector<1x128xf32>
    %121 = vector.broadcast %120 : vector<1x128xf32> to vector<64x128xf32>
    %122 = arith.addf %119, %121 : vector<64x128xf32>
    %cst_231 = arith.constant 0.000000e+00 : f32
    %123 = vector.broadcast %cst_231 : f32 to vector<64x128xf32>
    %124 = arith.maximumf %122, %123 : vector<64x128xf32>
    %c0_232 = arith.constant 0 : index
    %c0_233 = arith.constant 0 : index
    %c0_234 = arith.constant 0 : index
    %125 = vector.load %arg8[%c0_232, %c0_233, %c0_234] : memref<2x1152x32xbf16, #tpu.memory_space<vmem>>, vector<1x1152x32xbf16>
    %126 = vector.shape_cast %125 : vector<1x1152x32xbf16> to vector<1152x32xbf16>
    %127 = arith.truncf %124 : vector<64x128xf32> to vector<64x128xbf16>
    %128 = vector.shape_cast %127 : vector<64x128xbf16> to vector<1x8x8x128xbf16>
    %c0_235 = arith.constant 0 : index
    %c1_236 = arith.constant 1 : index
    %c1_237 = arith.constant 1 : index
    %c0_238 = arith.constant 0 : index
    %129 = vector.load %arg12[%c0_235, %c1_236, %c1_237, %c0_238] : memref<1x10x10x128xbf16, #tpu.memory_space<vmem>>, vector<1x8x8x128xbf16>
    tpu.vector_store %arg12[%c0_235, %c1_236, %c1_237, %c0_238], %128 {strides = array<i32>} : memref<1x10x10x128xbf16, #tpu.memory_space<vmem>>, vector<1x8x8x128xbf16>,
    %c0_239 = arith.constant 0 : index
    %c0_240 = arith.constant 0 : index
    %c0_241 = arith.constant 0 : index
    %c0_242 = arith.constant 0 : index
    %130 = vector.load %arg12[%c0_239, %c0_240, %c0_241, %c0_242] : memref<1x10x10x128xbf16, #tpu.memory_space<vmem>>, vector<1x8x8x128xbf16>
    %131 = vector.shape_cast %130 : vector<1x8x8x128xbf16> to vector<64x128xbf16>
    %c0_243 = arith.constant 0 : index
    %c0_244 = arith.constant 0 : index
    %132 = vector.load %arg13[%c0_243, %c0_244] : memref<64x1152xbf16, #tpu.memory_space<vmem>>, vector<64x128xbf16>
    tpu.vector_store %arg13[%c0_243, %c0_244], %131 {strides = array<i32>} : memref<64x1152xbf16, #tpu.memory_space<vmem>>, vector<64x128xbf16>,
    %c0_245 = arith.constant 0 : index
    %c0_246 = arith.constant 0 : index
    %c1_247 = arith.constant 1 : index
    %c0_248 = arith.constant 0 : index
    %133 = vector.load %arg12[%c0_245, %c0_246, %c1_247, %c0_248] : memref<1x10x10x128xbf16, #tpu.memory_space<vmem>>, vector<1x8x8x128xbf16>
    %134 = vector.shape_cast %133 : vector<1x8x8x128xbf16> to vector<64x128xbf16>
    %c0_249 = arith.constant 0 : index
    %c128_250 = arith.constant 128 : index
    %135 = vector.load %arg13[%c0_249, %c128_250] : memref<64x1152xbf16, #tpu.memory_space<vmem>>, vector<64x128xbf16>
    tpu.vector_store %arg13[%c0_249, %c128_250], %134 {strides = array<i32>} : memref<64x1152xbf16, #tpu.memory_space<vmem>>, vector<64x128xbf16>,
    %c0_251 = arith.constant 0 : index
    %c0_252 = arith.constant 0 : index
    %c2_253 = arith.constant 2 : index
    %c0_254 = arith.constant 0 : index
    %136 = vector.load %arg12[%c0_251, %c0_252, %c2_253, %c0_254] : memref<1x10x10x128xbf16, #tpu.memory_space<vmem>>, vector<1x8x8x128xbf16>
    %137 = vector.shape_cast %136 : vector<1x8x8x128xbf16> to vector<64x128xbf16>
    %c0_255 = arith.constant 0 : index
    %c256_256 = arith.constant 256 : index
    %138 = vector.load %arg13[%c0_255, %c256_256] : memref<64x1152xbf16, #tpu.memory_space<vmem>>, vector<64x128xbf16>
    tpu.vector_store %arg13[%c0_255, %c256_256], %137 {strides = array<i32>} : memref<64x1152xbf16, #tpu.memory_space<vmem>>, vector<64x128xbf16>,
    %c0_257 = arith.constant 0 : index
    %c1_258 = arith.constant 1 : index
    %c0_259 = arith.constant 0 : index
    %c0_260 = arith.constant 0 : index
    %139 = vector.load %arg12[%c0_257, %c1_258, %c0_259, %c0_260] : memref<1x10x10x128xbf16, #tpu.memory_space<vmem>>, vector<1x8x8x128xbf16>
    %140 = vector.shape_cast %139 : vector<1x8x8x128xbf16> to vector<64x128xbf16>
    %c0_261 = arith.constant 0 : index
    %c384_262 = arith.constant 384 : index
    %141 = vector.load %arg13[%c0_261, %c384_262] : memref<64x1152xbf16, #tpu.memory_space<vmem>>, vector<64x128xbf16>
    tpu.vector_store %arg13[%c0_261, %c384_262], %140 {strides = array<i32>} : memref<64x1152xbf16, #tpu.memory_space<vmem>>, vector<64x128xbf16>,
    %c0_263 = arith.constant 0 : index
    %c1_264 = arith.constant 1 : index
    %c1_265 = arith.constant 1 : index
    %c0_266 = arith.constant 0 : index
    %142 = vector.load %arg12[%c0_263, %c1_264, %c1_265, %c0_266] : memref<1x10x10x128xbf16, #tpu.memory_space<vmem>>, vector<1x8x8x128xbf16>
    %143 = vector.shape_cast %142 : vector<1x8x8x128xbf16> to vector<64x128xbf16>
    %c0_267 = arith.constant 0 : index
    %c512_268 = arith.constant 512 : index
    %144 = vector.load %arg13[%c0_267, %c512_268] : memref<64x1152xbf16, #tpu.memory_space<vmem>>, vector<64x128xbf16>
    tpu.vector_store %arg13[%c0_267, %c512_268], %143 {strides = array<i32>} : memref<64x1152xbf16, #tpu.memory_space<vmem>>, vector<64x128xbf16>,
    %c0_269 = arith.constant 0 : index
    %c1_270 = arith.constant 1 : index
    %c2_271 = arith.constant 2 : index
    %c0_272 = arith.constant 0 : index
    %145 = vector.load %arg12[%c0_269, %c1_270, %c2_271, %c0_272] : memref<1x10x10x128xbf16, #tpu.memory_space<vmem>>, vector<1x8x8x128xbf16>
    %146 = vector.shape_cast %145 : vector<1x8x8x128xbf16> to vector<64x128xbf16>
    %c0_273 = arith.constant 0 : index
    %c640_274 = arith.constant 640 : index
    %147 = vector.load %arg13[%c0_273, %c640_274] : memref<64x1152xbf16, #tpu.memory_space<vmem>>, vector<64x128xbf16>
    tpu.vector_store %arg13[%c0_273, %c640_274], %146 {strides = array<i32>} : memref<64x1152xbf16, #tpu.memory_space<vmem>>, vector<64x128xbf16>,
    %c0_275 = arith.constant 0 : index
    %c2_276 = arith.constant 2 : index
    %c0_277 = arith.constant 0 : index
    %c0_278 = arith.constant 0 : index
    %148 = vector.load %arg12[%c0_275, %c2_276, %c0_277, %c0_278] : memref<1x10x10x128xbf16, #tpu.memory_space<vmem>>, vector<1x8x8x128xbf16>
    %149 = vector.shape_cast %148 : vector<1x8x8x128xbf16> to vector<64x128xbf16>
    %c0_279 = arith.constant 0 : index
    %c768_280 = arith.constant 768 : index
    %150 = vector.load %arg13[%c0_279, %c768_280] : memref<64x1152xbf16, #tpu.memory_space<vmem>>, vector<64x128xbf16>
    tpu.vector_store %arg13[%c0_279, %c768_280], %149 {strides = array<i32>} : memref<64x1152xbf16, #tpu.memory_space<vmem>>, vector<64x128xbf16>,
    %c0_281 = arith.constant 0 : index
    %c2_282 = arith.constant 2 : index
    %c1_283 = arith.constant 1 : index
    %c0_284 = arith.constant 0 : index
    %151 = vector.load %arg12[%c0_281, %c2_282, %c1_283, %c0_284] : memref<1x10x10x128xbf16, #tpu.memory_space<vmem>>, vector<1x8x8x128xbf16>
    %152 = vector.shape_cast %151 : vector<1x8x8x128xbf16> to vector<64x128xbf16>
    %c0_285 = arith.constant 0 : index
    %c896_286 = arith.constant 896 : index
    %153 = vector.load %arg13[%c0_285, %c896_286] : memref<64x1152xbf16, #tpu.memory_space<vmem>>, vector<64x128xbf16>
    tpu.vector_store %arg13[%c0_285, %c896_286], %152 {strides = array<i32>} : memref<64x1152xbf16, #tpu.memory_space<vmem>>, vector<64x128xbf16>,
    %c0_287 = arith.constant 0 : index
    %c2_288 = arith.constant 2 : index
    %c2_289 = arith.constant 2 : index
    %c0_290 = arith.constant 0 : index
    %154 = vector.load %arg12[%c0_287, %c2_288, %c2_289, %c0_290] : memref<1x10x10x128xbf16, #tpu.memory_space<vmem>>, vector<1x8x8x128xbf16>
    %155 = vector.shape_cast %154 : vector<1x8x8x128xbf16> to vector<64x128xbf16>
    %c0_291 = arith.constant 0 : index
    %c1024_292 = arith.constant 1024 : index
    %156 = vector.load %arg13[%c0_291, %c1024_292] : memref<64x1152xbf16, #tpu.memory_space<vmem>>, vector<64x128xbf16>
    tpu.vector_store %arg13[%c0_291, %c1024_292], %155 {strides = array<i32>} : memref<64x1152xbf16, #tpu.memory_space<vmem>>, vector<64x128xbf16>,
    %c0_293 = arith.constant 0 : index
    %c0_294 = arith.constant 0 : index
    %157 = vector.load %arg13[%c0_293, %c0_294] : memref<64x1152xbf16, #tpu.memory_space<vmem>>, vector<64x1152xbf16>
    %cst_295 = arith.constant dense<0.000000e+00> : vector<64x32xf32>
    %158 = tpu.matmul %157, %126, %cst_295 {dimension_numbers = #tpu.dot_dimension_numbers<[1], [0], [0], [1], [0, 0, 1, 1], [], []>} : vector<64x1152xbf16>, vector<1152x32xbf16>, vector<64x32xf32> -> vector<64x32xf32>
    %cst_296 = arith.constant 0.000000e+00 : f32
    %159 = vector.broadcast %cst_296 : f32 to vector<64x32xf32>
    %160 = arith.maximumf %158, %159 : vector<64x32xf32>
    %161 = arith.truncf %160 : vector<64x32xf32> to vector<64x32xbf16>
    %c0_297 = arith.constant 0 : index
    %c0_298 = arith.constant 0 : index
    %c0_299 = arith.constant 0 : index
    %162 = vector.load %arg9[%c0_297, %c0_298, %c0_299] : memref<2x32x128xbf16, #tpu.memory_space<vmem>>, vector<1x32x128xbf16>
    %163 = vector.shape_cast %162 : vector<1x32x128xbf16> to vector<32x128xbf16>
    %cst_300 = arith.constant dense<0.000000e+00> : vector<64x128xf32>
    %164 = tpu.matmul %161, %163, %cst_300 {dimension_numbers = #tpu.dot_dimension_numbers<[1], [0], [0], [1], [0, 0, 1, 1], [], []>} : vector<64x32xbf16>, vector<32x128xbf16>, vector<64x128xf32> -> vector<64x128xf32>
    %165 = arith.addf %122, %164 : vector<64x128xf32>
    %cst_301 = arith.constant 0.000000e+00 : f32
    %166 = vector.broadcast %cst_301 : f32 to vector<64x128xf32>
    %167 = arith.maximumf %165, %166 : vector<64x128xf32>
    %c1_302 = arith.constant 1 : index
    %c0_303 = arith.constant 0 : index
    %c0_304 = arith.constant 0 : index
    %168 = vector.load %arg8[%c1_302, %c0_303, %c0_304] : memref<2x1152x32xbf16, #tpu.memory_space<vmem>>, vector<1x1152x32xbf16>
    %169 = vector.shape_cast %168 : vector<1x1152x32xbf16> to vector<1152x32xbf16>
    %170 = arith.truncf %167 : vector<64x128xf32> to vector<64x128xbf16>
    %171 = vector.shape_cast %170 : vector<64x128xbf16> to vector<1x8x8x128xbf16>
    %c0_305 = arith.constant 0 : index
    %c1_306 = arith.constant 1 : index
    %c1_307 = arith.constant 1 : index
    %c0_308 = arith.constant 0 : index
    %172 = vector.load %arg12[%c0_305, %c1_306, %c1_307, %c0_308] : memref<1x10x10x128xbf16, #tpu.memory_space<vmem>>, vector<1x8x8x128xbf16>
    tpu.vector_store %arg12[%c0_305, %c1_306, %c1_307, %c0_308], %171 {strides = array<i32>} : memref<1x10x10x128xbf16, #tpu.memory_space<vmem>>, vector<1x8x8x128xbf16>,
    %c0_309 = arith.constant 0 : index
    %c0_310 = arith.constant 0 : index
    %c0_311 = arith.constant 0 : index
    %c0_312 = arith.constant 0 : index
    %173 = vector.load %arg12[%c0_309, %c0_310, %c0_311, %c0_312] : memref<1x10x10x128xbf16, #tpu.memory_space<vmem>>, vector<1x8x8x128xbf16>
    %174 = vector.shape_cast %173 : vector<1x8x8x128xbf16> to vector<64x128xbf16>
    %c0_313 = arith.constant 0 : index
    %c0_314 = arith.constant 0 : index
    %175 = vector.load %arg13[%c0_313, %c0_314] : memref<64x1152xbf16, #tpu.memory_space<vmem>>, vector<64x128xbf16>
    tpu.vector_store %arg13[%c0_313, %c0_314], %174 {strides = array<i32>} : memref<64x1152xbf16, #tpu.memory_space<vmem>>, vector<64x128xbf16>,
    %c0_315 = arith.constant 0 : index
    %c0_316 = arith.constant 0 : index
    %c1_317 = arith.constant 1 : index
    %c0_318 = arith.constant 0 : index
    %176 = vector.load %arg12[%c0_315, %c0_316, %c1_317, %c0_318] : memref<1x10x10x128xbf16, #tpu.memory_space<vmem>>, vector<1x8x8x128xbf16>
    %177 = vector.shape_cast %176 : vector<1x8x8x128xbf16> to vector<64x128xbf16>
    %c0_319 = arith.constant 0 : index
    %c128_320 = arith.constant 128 : index
    %178 = vector.load %arg13[%c0_319, %c128_320] : memref<64x1152xbf16, #tpu.memory_space<vmem>>, vector<64x128xbf16>
    tpu.vector_store %arg13[%c0_319, %c128_320], %177 {strides = array<i32>} : memref<64x1152xbf16, #tpu.memory_space<vmem>>, vector<64x128xbf16>,
    %c0_321 = arith.constant 0 : index
    %c0_322 = arith.constant 0 : index
    %c2_323 = arith.constant 2 : index
    %c0_324 = arith.constant 0 : index
    %179 = vector.load %arg12[%c0_321, %c0_322, %c2_323, %c0_324] : memref<1x10x10x128xbf16, #tpu.memory_space<vmem>>, vector<1x8x8x128xbf16>
    %180 = vector.shape_cast %179 : vector<1x8x8x128xbf16> to vector<64x128xbf16>
    %c0_325 = arith.constant 0 : index
    %c256_326 = arith.constant 256 : index
    %181 = vector.load %arg13[%c0_325, %c256_326] : memref<64x1152xbf16, #tpu.memory_space<vmem>>, vector<64x128xbf16>
    tpu.vector_store %arg13[%c0_325, %c256_326], %180 {strides = array<i32>} : memref<64x1152xbf16, #tpu.memory_space<vmem>>, vector<64x128xbf16>,
    %c0_327 = arith.constant 0 : index
    %c1_328 = arith.constant 1 : index
    %c0_329 = arith.constant 0 : index
    %c0_330 = arith.constant 0 : index
    %182 = vector.load %arg12[%c0_327, %c1_328, %c0_329, %c0_330] : memref<1x10x10x128xbf16, #tpu.memory_space<vmem>>, vector<1x8x8x128xbf16>
    %183 = vector.shape_cast %182 : vector<1x8x8x128xbf16> to vector<64x128xbf16>
    %c0_331 = arith.constant 0 : index
    %c384_332 = arith.constant 384 : index
    %184 = vector.load %arg13[%c0_331, %c384_332] : memref<64x1152xbf16, #tpu.memory_space<vmem>>, vector<64x128xbf16>
    tpu.vector_store %arg13[%c0_331, %c384_332], %183 {strides = array<i32>} : memref<64x1152xbf16, #tpu.memory_space<vmem>>, vector<64x128xbf16>,
    %c0_333 = arith.constant 0 : index
    %c1_334 = arith.constant 1 : index
    %c1_335 = arith.constant 1 : index
    %c0_336 = arith.constant 0 : index
    %185 = vector.load %arg12[%c0_333, %c1_334, %c1_335, %c0_336] : memref<1x10x10x128xbf16, #tpu.memory_space<vmem>>, vector<1x8x8x128xbf16>
    %186 = vector.shape_cast %185 : vector<1x8x8x128xbf16> to vector<64x128xbf16>
    %c0_337 = arith.constant 0 : index
    %c512_338 = arith.constant 512 : index
    %187 = vector.load %arg13[%c0_337, %c512_338] : memref<64x1152xbf16, #tpu.memory_space<vmem>>, vector<64x128xbf16>
    tpu.vector_store %arg13[%c0_337, %c512_338], %186 {strides = array<i32>} : memref<64x1152xbf16, #tpu.memory_space<vmem>>, vector<64x128xbf16>,
    %c0_339 = arith.constant 0 : index
    %c1_340 = arith.constant 1 : index
    %c2_341 = arith.constant 2 : index
    %c0_342 = arith.constant 0 : index
    %188 = vector.load %arg12[%c0_339, %c1_340, %c2_341, %c0_342] : memref<1x10x10x128xbf16, #tpu.memory_space<vmem>>, vector<1x8x8x128xbf16>
    %189 = vector.shape_cast %188 : vector<1x8x8x128xbf16> to vector<64x128xbf16>
    %c0_343 = arith.constant 0 : index
    %c640_344 = arith.constant 640 : index
    %190 = vector.load %arg13[%c0_343, %c640_344] : memref<64x1152xbf16, #tpu.memory_space<vmem>>, vector<64x128xbf16>
    tpu.vector_store %arg13[%c0_343, %c640_344], %189 {strides = array<i32>} : memref<64x1152xbf16, #tpu.memory_space<vmem>>, vector<64x128xbf16>,
    %c0_345 = arith.constant 0 : index
    %c2_346 = arith.constant 2 : index
    %c0_347 = arith.constant 0 : index
    %c0_348 = arith.constant 0 : index
    %191 = vector.load %arg12[%c0_345, %c2_346, %c0_347, %c0_348] : memref<1x10x10x128xbf16, #tpu.memory_space<vmem>>, vector<1x8x8x128xbf16>
    %192 = vector.shape_cast %191 : vector<1x8x8x128xbf16> to vector<64x128xbf16>
    %c0_349 = arith.constant 0 : index
    %c768_350 = arith.constant 768 : index
    %193 = vector.load %arg13[%c0_349, %c768_350] : memref<64x1152xbf16, #tpu.memory_space<vmem>>, vector<64x128xbf16>
    tpu.vector_store %arg13[%c0_349, %c768_350], %192 {strides = array<i32>} : memref<64x1152xbf16, #tpu.memory_space<vmem>>, vector<64x128xbf16>,
    %c0_351 = arith.constant 0 : index
    %c2_352 = arith.constant 2 : index
    %c1_353 = arith.constant 1 : index
    %c0_354 = arith.constant 0 : index
    %194 = vector.load %arg12[%c0_351, %c2_352, %c1_353, %c0_354] : memref<1x10x10x128xbf16, #tpu.memory_space<vmem>>, vector<1x8x8x128xbf16>
    %195 = vector.shape_cast %194 : vector<1x8x8x128xbf16> to vector<64x128xbf16>
    %c0_355 = arith.constant 0 : index
    %c896_356 = arith.constant 896 : index
    %196 = vector.load %arg13[%c0_355, %c896_356] : memref<64x1152xbf16, #tpu.memory_space<vmem>>, vector<64x128xbf16>
    tpu.vector_store %arg13[%c0_355, %c896_356], %195 {strides = array<i32>} : memref<64x1152xbf16, #tpu.memory_space<vmem>>, vector<64x128xbf16>,
    %c0_357 = arith.constant 0 : index
    %c2_358 = arith.constant 2 : index
    %c2_359 = arith.constant 2 : index
    %c0_360 = arith.constant 0 : index
    %197 = vector.load %arg12[%c0_357, %c2_358, %c2_359, %c0_360] : memref<1x10x10x128xbf16, #tpu.memory_space<vmem>>, vector<1x8x8x128xbf16>
    %198 = vector.shape_cast %197 : vector<1x8x8x128xbf16> to vector<64x128xbf16>
    %c0_361 = arith.constant 0 : index
    %c1024_362 = arith.constant 1024 : index
    %199 = vector.load %arg13[%c0_361, %c1024_362] : memref<64x1152xbf16, #tpu.memory_space<vmem>>, vector<64x128xbf16>
    tpu.vector_store %arg13[%c0_361, %c1024_362], %198 {strides = array<i32>} : memref<64x1152xbf16, #tpu.memory_space<vmem>>, vector<64x128xbf16>,
    %c0_363 = arith.constant 0 : index
    %c0_364 = arith.constant 0 : index
    %200 = vector.load %arg13[%c0_363, %c0_364] : memref<64x1152xbf16, #tpu.memory_space<vmem>>, vector<64x1152xbf16>
    %cst_365 = arith.constant dense<0.000000e+00> : vector<64x32xf32>
    %201 = tpu.matmul %200, %169, %cst_365 {dimension_numbers = #tpu.dot_dimension_numbers<[1], [0], [0], [1], [0, 0, 1, 1], [], []>} : vector<64x1152xbf16>, vector<1152x32xbf16>, vector<64x32xf32> -> vector<64x32xf32>
    %cst_366 = arith.constant 0.000000e+00 : f32
    %202 = vector.broadcast %cst_366 : f32 to vector<64x32xf32>
    %203 = arith.maximumf %201, %202 : vector<64x32xf32>
    %204 = arith.truncf %203 : vector<64x32xf32> to vector<64x32xbf16>
    %c1_367 = arith.constant 1 : index
    %c0_368 = arith.constant 0 : index
    %c0_369 = arith.constant 0 : index
    %205 = vector.load %arg9[%c1_367, %c0_368, %c0_369] : memref<2x32x128xbf16, #tpu.memory_space<vmem>>, vector<1x32x128xbf16>
    %206 = vector.shape_cast %205 : vector<1x32x128xbf16> to vector<32x128xbf16>
    %cst_370 = arith.constant dense<0.000000e+00> : vector<64x128xf32>
    %207 = tpu.matmul %204, %206, %cst_370 {dimension_numbers = #tpu.dot_dimension_numbers<[1], [0], [0], [1], [0, 0, 1, 1], [], []>} : vector<64x32xbf16>, vector<32x128xbf16>, vector<64x128xf32> -> vector<64x128xf32>
    %208 = arith.addf %165, %207 : vector<64x128xf32>
    %cst_371 = arith.constant 0.000000e+00 : f32
    %209 = vector.broadcast %cst_371 : f32 to vector<64x128xf32>
    %210 = arith.maximumf %208, %209 : vector<64x128xf32>
    %211 = vector.shape_cast %210 : vector<64x128xf32> to vector<1x64x128xf32>
    %c0_372 = arith.constant 0 : index
    %c0_373 = arith.constant 0 : index
    %c0_374 = arith.constant 0 : index
    %212 = vector.load %arg10[%c0_372, %c0_373, %c0_374] : memref<1x64x128xf32, #tpu.memory_space<vmem>>, vector<1x64x128xf32>
    tpu.vector_store %arg10[%c0_372, %c0_373, %c0_374], %211 {strides = array<i32>} : memref<1x64x128xf32, #tpu.memory_space<vmem>>, vector<1x64x128xf32>,
    return
  }
  func.func @transform_0(%arg0: i32) -> (i32, i32, i32) {
    %c0_i32 = arith.constant 0 : i32
    %c0_i32_0 = arith.constant 0 : i32
    %c0_i32_1 = arith.constant 0 : i32
    return %arg0, %c0_i32, %c0_i32_0 : i32, i32, i32
  }
  func.func @transform_1(%arg0: i32) -> (i32, i32) {
    %c0_i32 = arith.constant 0 : i32
    %c0_i32_0 = arith.constant 0 : i32
    %c0_i32_1 = arith.constant 0 : i32
    return %c0_i32, %c0_i32_0 : i32, i32
  }
  func.func @transform_2(%arg0: i32) -> (i32, i32) {
    %c0_i32 = arith.constant 0 : i32
    %c0_i32_0 = arith.constant 0 : i32
    %c0_i32_1 = arith.constant 0 : i32
    return %c0_i32, %c0_i32_0 : i32, i32
  }
  func.func @transform_3(%arg0: i32) -> (i32, i32) {
    %c0_i32 = arith.constant 0 : i32
    %c0_i32_0 = arith.constant 0 : i32
    %c0_i32_1 = arith.constant 0 : i32
    return %c0_i32, %c0_i32_0 : i32, i32
  }
  func.func @transform_4(%arg0: i32) -> (i32, i32) {
    %c0_i32 = arith.constant 0 : i32
    %c0_i32_0 = arith.constant 0 : i32
    %c0_i32_1 = arith.constant 0 : i32
    return %c0_i32, %c0_i32_0 : i32, i32
  }
  func.func @transform_5(%arg0: i32) -> (i32, i32) {
    %c0_i32 = arith.constant 0 : i32
    %c0_i32_0 = arith.constant 0 : i32
    %c0_i32_1 = arith.constant 0 : i32
    return %c0_i32, %c0_i32_0 : i32, i32
  }
  func.func @transform_6(%arg0: i32) -> (i32, i32) {
    %c0_i32 = arith.constant 0 : i32
    %c0_i32_0 = arith.constant 0 : i32
    %c0_i32_1 = arith.constant 0 : i32
    return %c0_i32, %c0_i32_0 : i32, i32
  }
  func.func @transform_7(%arg0: i32) -> (i32, i32, i32) {
    %c0_i32 = arith.constant 0 : i32
    %c0_i32_0 = arith.constant 0 : i32
    %c0_i32_1 = arith.constant 0 : i32
    %c0_i32_2 = arith.constant 0 : i32
    return %c0_i32, %c0_i32_0, %c0_i32_1 : i32, i32, i32
  }
  func.func @transform_8(%arg0: i32) -> (i32, i32, i32) {
    %c0_i32 = arith.constant 0 : i32
    %c0_i32_0 = arith.constant 0 : i32
    %c0_i32_1 = arith.constant 0 : i32
    %c0_i32_2 = arith.constant 0 : i32
    return %c0_i32, %c0_i32_0, %c0_i32_1 : i32, i32, i32
  }
  func.func @transform_9(%arg0: i32) -> (i32, i32, i32) {
    %c0_i32 = arith.constant 0 : i32
    %c0_i32_0 = arith.constant 0 : i32
    %c0_i32_1 = arith.constant 0 : i32
    return %arg0, %c0_i32, %c0_i32_0 : i32, i32, i32
  }
}

</mosaic_0001>

<bundles_post_ra>
// kernel: encoder_forward.1
= control target key start
LH: loop header
LB: loop body
LE: loop exit
PB: predicated region body
PF: predicated region fallthrough
CT: control target
= control target key end

     0   :  { %14 = vsyncpa [#allocation6], 0  ;;  %s15670_s0 = inlined_call_operand.vmem [shape: bf16[2,256,48], index: 0, kind: input, shape index: {}]   ;;  %s15671_s1 = inlined_call_operand.vmem [shape: bf16[48,64], index: 1, kind: input, shape index: {}]   ;;  %s15672_s2 = inlined_call_operand.vmem [shape: f32[1,64], index: 2, kind: input, shape index: {}]   ;;  %s15673_s3 = inlined_call_operand.vmem [shape: bf16[1024,128], index: 3, kind: input, shape index: {}]   ;;  %s15674_s4 = inlined_call_operand.vmem [shape: f32[1,128], index: 4, kind: input, shape index: {}]   ;;  %s15675_s5 = inlined_call_operand.vmem [shape: bf16[1152,128], index: 5, kind: input, shape index: {}]   ;;  %s15676_s6 = inlined_call_operand.vmem [shape: f32[1,128], index: 6, kind: input, shape index: {}]   ;;  %s15677_s7 = inlined_call_operand.vmem [shape: bf16[2,1152,32], index: 7, kind: input, shape index: {}]   ;;  %s15678_s8 = inlined_call_operand.vmem [shape: bf16[2,32,128], index: 8, kind: input, shape index: {}]   ;;  %s15679_s9 = inlined_call_operand.hbm [shape: f32[2,64,128], index: 9, kind: output, shape index: {}]  }
   0x1   :  { %16 = vsyncpa [#allocation6 + $0x1], 0  ;;  %s12522_s30 = smov 0   ;;  %s12524_s10 = smov 0  }
   0x2   :  { %s12526_s11 = smov 0   ;;  %s12528_s12 = smov 0  }
   0x3 LB: > { %s12543_s13 = sadd.s32 4294967295, %s12465_s12   ;;  %s10229_s14 = sadd.s32 4294967294, %s12465_s12   ;;  %s12465_s12 = sphi %s12528_s12, %s15878_s12   ;;  %s12461_s11 = sphi %s12526_s11, %s15877_s11   ;;  %s12457_s10 = sphi %s12524_s10, %s15876_s10   ;;  %s12453_s30 = sphi %s12522_s30, %s15875_s30  }
   0x4   : > { %s12547_s15 = sadd.s32 1, %s12465_s12   ;;  %s223_s16 = sadd.s32 1, %s12461_s11 }
   0x5   : > { %s220_s17 = ssub.s32 %s12465_s12, %s12547_s15  ;;  %p233_p0 = scmp.ne.s32.totalorder %s12461_s11, %s12457_s10 }
   0x6   : > { %p221_p1 = scmp.eq.s32.totalorder %s220_s17, 0  ;;  %p234_p2 = scmp.eq.s32.totalorder %s12543_s13, 1 }
   0x7   : > { %p239_p3 = scmp.ne.s32.totalorder %s12457_s10, %s12453_s30  ;;  %p240_p4 = scmp.eq.s32.totalorder %s10229_s14, 1 }
   0x8   : > { %s12558_s18 = scalar_select %p221_p1, %s12461_s11, %s223_s16  }
   0x9   : > { %p12560_p5 = por %p234_p2, %p233_p0  ;;  %p12564_p6 = por %p240_p4, %p239_p3 }
   0xa   : > { %p10232_p7 = scmp.ge.s32.totalorder %s12465_s12, 1  ;;  %p290_p8 = scmp.lt.s32.totalorder %s12465_s12, 3 }
   0xc   : > { %p291_p9 = pnand %p10232_p7, %p290_p8 }
   0xe   : > { %294 = sbr.rel (%p291_p9) target bundleno = 2201 (0x899), region = 56 }
  0x13   : > { %v11933_v0 = vld [vmem:[%s15671_s1 + $0x10] sm:$0xff]   ;;  %p326_p10 = scmp.lt.s32.totalorder %s12543_s13, 1  ;;  %v11934_v1 = vld [vmem:[%s15671_s1 + $0x8] sm:$0xff]   ;;  %vm334_vm0 = vcmask 516096   ;;  %vm335_vm1 = vsmask.f32 256 }
  0x14   : > { %11752 = vmatprep.subr.bf16.mxu0 %v11933_v0  ;;  %v378_v2 = vld [vmem:[#allocation2 + $0x18] sm:$0x1]  ;;  %v11935_v3 = vld [vmem:[%s15671_s1] sm:$0xff]   ;;  %vm797_vm2 = vcmask 392192   ;;  %vm12582_vm3 = vmand %vm334_vm0, %vm335_vm1  ;;  %vm332_vm4 = vcmask 519168   ;;  %v12467_v24 = vmov 0  }
  0x15   : > { %s327_s25 = scalar_select %p326_p10, %s12543_s13, 1  ;;  %11753 = vmatpush3.bf16.msra.mxu0 %v11933_v0  ;;  %v486_v5 = vld [vmem:[#allocation2 + $0x1c] sm:$0x1]  ;;  %v379_v6 = vsel %vm12582_vm3, 0, %v378_v2  ;;  %353 = vst.msk [vmem:[#allocation2 + $0x40] sm:$0xf] %vm332_vm4, %v12467_v24 }
  0x16   : > { %11754 = vmatprep.subr.bf16.mxu0 %v11934_v1  ;;  %v487_v7 = vsel %vm12582_vm3, 0, %v486_v5  ;;  %380 = vst [vmem:[#allocation2 + $0x18] sm:$0x1] %v379_v6  ;;  %333 = vst.msk [vmem:[#allocation2] sm:$0xf] %vm332_vm4, %v12467_v24  ;;  %s12468_s17 = smov 64  }
  0x17   : > { %s10987_s28 = sshll.u32 %s327_s25, 7  ;;  %488 = vst [vmem:[#allocation2 + $0x1c] sm:$0x1] %v487_v7  ;;  %340 = vst.msk [vmem:[#allocation2 + $0x48] sm:$0xf] %vm332_vm4, %v12467_v24  ;;  %vm1486_vm10 = vcmask 1043968  }
  0x18   : > { %s12589_s16 = scalar_lea.vmem %s15670_s0, %s10987_s28  ;;  %344 = vst.msk [vmem:[#allocation2 + $0x90] sm:$0xf] %vm332_vm4, %v12467_v24  ;;  %348 = vst.msk [vmem:[#allocation2 + $0xd8] sm:$0xf] %vm332_vm4, %v12467_v24  ;;  %v372_v25 = vld [vmem:[#allocation2 + $0x8] sm:$0x1] }
  0x19   : > { %v11936_v8 = vld [vmem:[%s12589_s16] sm:$0xff]   ;;  %11755 = vmatpush3.bf16.msra.mxu0 %v11934_v1  ;;  %v11937_v9 = vld [vmem:[%s12589_s16 + $0x8] sm:$0xff]   ;;  %v11938_v10 = vld [vmem:[%s12589_s16 + $0x10] sm:$0xff]   ;;  %357 = vst.msk [vmem:[#allocation2 + $0x88] sm:$0xf] %vm332_vm4, %v12467_v24  ;;  %v373_v27 = vsel %vm12582_vm3, 0, %v372_v25 }
  0x1a   : > { %11756 = vmatprep.subr.bf16.mxu0 %v11935_v3  ;;  %11758 = vmatprep.mubr.msk.bf16.mxu0 %vm797_vm2, %v11936_v8  ;;  %v11939_v11 = vld [vmem:[%s12589_s16 + $0x18] sm:$0xff]   ;;  %v11940_v12 = vld [vmem:[%s12589_s16 + $0x20] sm:$0xff]   ;;  %v11941_v13 = vld [vmem:[%s12589_s16 + $0x28] sm:$0xff]   ;;  %361 = vst.msk [vmem:[#allocation2 + $0xd0] sm:$0xf] %vm332_vm4, %v12467_v24  ;;  %vm590_vm11 = vcmask 1040384  }
  0x1b   : > { %v11942_v14 = vld [vmem:[%s12589_s16 + $0x30] sm:$0xff]   ;;  %v11943_v15 = vld [vmem:[%s12589_s16 + $0x38] sm:$0xff]   ;;  %v11944_v16 = vld [vmem:[%s12589_s16 + $0x40] sm:$0xff]   ;;  %365 = vst.msk [vmem:[#allocation2 + $0x118] sm:$0xf] %vm332_vm4, %v12467_v24  ;;  %vm4378_vm14 = vcmask 1042432  }
  0x1c   : > { %v11945_v17 = vld [vmem:[%s12589_s16 + $0x48] sm:$0xff]   ;;  %v11946_v18 = vld [vmem:[%s12589_s16 + $0x50] sm:$0xff]   ;;  %v11947_v19 = vld [vmem:[%s12589_s16 + $0x58] sm:$0xff]   ;;  %585 = vst [vmem:[#allocation3] sm:$0xf] %v12467_v24  ;;  %vm4379_vm15 = vcmask 1046532  }
  0x1d   : > { %11757 = vmatpush3.bf16.msra.mxu0 %v11935_v3  ;;  %v11948_v20 = vld [vmem:[%s12589_s16 + $0x60] sm:$0xff]   ;;  %v11949_v21 = vld [vmem:[%s12589_s16 + $0x68] sm:$0xff]   ;;  %v11950_v22 = vld [vmem:[%s12589_s16 + $0x70] sm:$0xff]   ;;  %586 = vst [vmem:[#allocation3 + $0x4] sm:$0x1] %v12467_v24  ;;  %s323_s26 = sand.u32 1, %s12457_s10  }
  0x1e   : > { %v11951_v23 = vld [vmem:[%s12589_s16 + $0x78] sm:$0xff]   ;;  %588 = vst [vmem:[#allocation3 + $0x48] sm:$0xf] %v12467_v24  ;;  %589 = vst [vmem:[#allocation3 + $0x4c] sm:$0x1] %v12467_v24  ;;  %s10233_s27 = sshll.u32 %s323_s26, 6 }
  0x1f   : > { %v480_v26 = vld [vmem:[#allocation2 + $0xc] sm:$0x1]  ;;  %374 = vst [vmem:[#allocation2 + $0x8] sm:$0x1] %v373_v27  ;;  %v381_v29 = vld [vmem:[#allocation2 + $0x20] sm:$0x1]  ;;  %vm13258_vm12 = vmand %vm590_vm11, %vm335_vm1 }
  0x20   : > { %11759 = vmatmul.mubr.msk.bf16.vlgmr.msra.gmra.mxu0 %vm797_vm2, %v11937_v9  ;;  %v481_v28 = vsel %vm12582_vm3, 0, %v480_v26  ;;  %v489_v30 = vld [vmem:[#allocation2 + $0x24] sm:$0x1]  ;;  %v341_v31 = vld [vmem:[#allocation2 + $0x4c] sm:$0x1]  ;;  %v382_v32 = vsel %vm12582_vm3, 0, %v381_v29  ;;  %vm13682_vm0 = vmor %vm4378_vm14, %vm4379_vm15 }
  0x21   : > { %11762 = vmatprep.mubr.msk.bf16.mxu0 %vm797_vm2, %v11938_v10  ;;  %482 = vst [vmem:[#allocation2 + $0xc] sm:$0x1] %v481_v28  ;;  %v490_v33 = vsel %vm12582_vm3, 0, %v489_v30  ;;  %v354_v34 = vld [vmem:[#allocation2 + $0x44] sm:$0x1]  ;;  %v342_v35 = vsel %vm12582_vm3, 0, %v341_v31 }
  0x22   : > { %383 = vst [vmem:[#allocation2 + $0x20] sm:$0x1] %v382_v32  ;;  %491 = vst [vmem:[#allocation2 + $0x24] sm:$0x1] %v490_v33  ;;  %v355_v36 = vsel %vm12582_vm3, 0, %v354_v34  ;;  %v12000_v4 = vld [vmem:[%s15673_s3 + $0xd8] sm:$0xff]  }
  0x23   : > { %343 = vst [vmem:[#allocation2 + $0x4c] sm:$0x1] %v342_v35  ;;  %v375_v37 = vld [vmem:[#allocation2 + $0x10] sm:$0x1]  ;;  %v483_v38 = vld [vmem:[#allocation2 + $0x14] sm:$0x1] }
  0x24   : > { %356 = vst [vmem:[#allocation2 + $0x44] sm:$0x1] %v355_v36  ;;  %v376_v39 = vsel %vm12582_vm3, 0, %v375_v37  ;;  %v484_v40 = vsel %vm12582_vm3, 0, %v483_v38  ;;  %v390_v41 = vld [vmem:[#allocation2 + $0x38] sm:$0x1] }
  0x25   : > { %377 = vst [vmem:[#allocation2 + $0x10] sm:$0x1] %v376_v39  ;;  %485 = vst [vmem:[#allocation2 + $0x14] sm:$0x1] %v484_v40  ;;  %v498_v42 = vld [vmem:[#allocation2 + $0x3c] sm:$0x1] }
  0x26   : > { %v391_v43 = vsel %vm12582_vm3, 0, %v390_v41  ;;  %v499_v44 = vsel %vm12582_vm3, 0, %v498_v42  ;;  %v396_v45 = vld [vmem:[#allocation2 + $0x48] sm:$0x1]  ;;  %v492_v48 = vld [vmem:[#allocation2 + $0x2c] sm:$0x1] }
  0x27   : > { %392 = vst [vmem:[#allocation2 + $0x38] sm:$0x1] %v391_v43  ;;  %500 = vst [vmem:[#allocation2 + $0x3c] sm:$0x1] %v499_v44  ;;  %v397_v46 = vsel %vm12582_vm3, 0, %v396_v45  ;;  %v493_v50 = vsel %vm12582_vm3, 0, %v492_v48 }
  0x28   : > { %11763 = vmatmul.mubr.msk.bf16.gmra.mxu0 %vm797_vm2, %v11939_v11  ;;  %v384_v47 = vld [vmem:[#allocation2 + $0x28] sm:$0x1]  ;;  %398 = vst [vmem:[#allocation2 + $0x48] sm:$0x1] %v397_v46  ;;  %494 = vst [vmem:[#allocation2 + $0x2c] sm:$0x1] %v493_v50 }
  0x29   : > { %11766 = vmatprep.mubr.msk.bf16.mxu0 %vm797_vm2, %v11940_v12  ;;  %v385_v49 = vsel %vm12582_vm3, 0, %v384_v47  ;;  %v393_v52 = vld [vmem:[#allocation2 + $0x40] sm:$0x1]  ;;  %v387_v57 = vld [vmem:[#allocation2 + $0x30] sm:$0x1]  ;;  %v15722_v12 = vmov 0 }
  0x2a   : > { %v504_v51 = vld [vmem:[#allocation2 + $0x4c] sm:$0x1]  ;;  %386 = vst [vmem:[#allocation2 + $0x28] sm:$0x1] %v385_v49  ;;  %v394_v54 = vsel %vm12582_vm3, 0, %v393_v52  ;;  %v388_v59 = vsel %vm12582_vm3, 0, %v387_v57 }
  0x2b   : > { %v501_v53 = vld [vmem:[#allocation2 + $0x44] sm:$0x1]  ;;  %v505_v56 = vsel %vm12582_vm3, 0, %v504_v51  ;;  %395 = vst [vmem:[#allocation2 + $0x40] sm:$0x1] %v394_v54  ;;  %vm4136_vm1 = vcmask 1043456  }
  0x2c   : > { %v502_v55 = vsel %vm12582_vm3, 0, %v501_v53  ;;  %506 = vst [vmem:[#allocation2 + $0x4c] sm:$0x1] %v505_v56  ;;  %v495_v58 = vld [vmem:[#allocation2 + $0x34] sm:$0x1]  ;;  %s325_s28 = scalar_lea.vmem [#allocation5], %s10233_s27 }
  0x2d   : > { %503 = vst [vmem:[#allocation2 + $0x44] sm:$0x1] %v502_v55  ;;  %v496_v60 = vsel %vm12582_vm3, 0, %v495_v58  ;;  %389 = vst [vmem:[#allocation2 + $0x30] sm:$0x1] %v388_v59  ;;  %s11044_s29 = sshll.u32 %s12543_s13, 10 }
  0x2e   : > { %497 = vst [vmem:[#allocation2 + $0x34] sm:$0x1] %v496_v60  ;;  %v405_v62 = vld [vmem:[#allocation2 + $0x60] sm:$0x1]  ;;  %v399_v2 = vld [vmem:[#allocation2 + $0x50] sm:$0x1]  ;;  %s15624_s22 = scalar_lea.hbm %s15679_s9, %s11044_s29 }
  0x2f   : > { %v1642_v61 = vld [vmem:[#allocation2 + $0x48] sm:$0xf]  ;;  %v406_v1 = vsel %vm12582_vm3, 0, %v405_v62  ;;  %v400_v6 = vsel %vm12582_vm3, 0, %v399_v2  ;;  %vm1511_vm5 = vsmask.f32 3328 }
  0x30   : > { %11767 = vmatmul.mubr.msk.bf16.gmra.mxu0 %vm797_vm2, %v11941_v13  ;;  %v1659_v63 = vshrl.u32 %v1642_v61, 16  ;;  %v1662_v0 = vshll.u32 %v1642_v61, 16  ;;  %407 = vst [vmem:[#allocation2 + $0x60] sm:$0x1] %v406_v1  ;;  %401 = vst [vmem:[#allocation2 + $0x50] sm:$0x1] %v400_v6 }
  0x31   : > { %11770 = vmatprep.mubr.msk.bf16.mxu0 %vm797_vm2, %v11942_v14  ;;  %v408_v10 = vld [vmem:[#allocation2 + $0x68] sm:$0x1]  ;;  %vm1512_vm6 = vsmask.f32 7440  ;;  %v402_v14 = vld [vmem:[#allocation2 + $0x58] sm:$0x1] }
  0x32   : > { %v1661_v3 = vrot.slane %v1659_v63, 4  ;;  %v1664_v5 = vrot.slane %v1662_v0, 5  ;;  %v409_v11 = vsel %vm12582_vm3, 0, %v408_v10  ;;  %vm12677_vm7 = vmor %vm1511_vm5, %vm1512_vm6  ;;  %v414_v27 = vld [vmem:[#allocation2 + $0x78] sm:$0x1]  ;;  %s10167_s14 = sshll.u32 %s325_s28, 4  ;;  %s15626_s14 = int_to_ptr.vmem [resolvable:$true] %s10167_s14 }
  0x33   : > { %v1643_v7 = vld [vmem:[#allocation2 + $0x4c] sm:$0x1]  ;;  %v15723_v12 = vsel %vm12677_vm7, 4294967295, %v15722_v12  ;;  %410 = vst [vmem:[#allocation2 + $0x68] sm:$0x1] %v409_v11  ;;  %v415_v29 = vsel %vm12582_vm3, 0, %v414_v27 }
  0x34   : > { %v1665_v8 = vor.u32 %v1664_v5, %v1661_v3  ;;  %v1668_v9 = vshll.u32 %v1643_v7, 16  ;;  %15724 = vst [vmem:[#allocation8_spill] sm:$0xff] %v15723_v12  ;;  %v345_v28 = vld [vmem:[#allocation2 + $0x94] sm:$0x1]  ;;  %v429_v30 = vld [vmem:[#allocation2 + $0xa0] sm:$0x1] }
  0x35   : > { %v537_v31 = vld [vmem:[#allocation2 + $0xa4] sm:$0x1]  ;;  %v346_v32 = vsel %vm12582_vm3, 0, %v345_v28  ;;  %416 = vst [vmem:[#allocation2 + $0x78] sm:$0x1] %v415_v29  ;;  %v430_v33 = vsel %vm12582_vm3, 0, %v429_v30 }
  0x36   : > { %v1666_v13 = vrot.slane %v1665_v8, 4  ;;  %v538_v34 = vsel %vm12582_vm3, 0, %v537_v31  ;;  %347 = vst [vmem:[#allocation2 + $0x94] sm:$0x1] %v346_v32  ;;  %v507_v35 = vld [vmem:[#allocation2 + $0x54] sm:$0x1] }
  0x37   : > { %431 = vst [vmem:[#allocation2 + $0xa0] sm:$0x1] %v430_v33  ;;  %539 = vst [vmem:[#allocation2 + $0xa4] sm:$0x1] %v538_v34  ;;  %v508_v36 = vsel %vm12582_vm3, 0, %v507_v35  ;;  %s15630_s13 = scalar_lea.sflag [#allocation6], %s323_s26 }
  0x38   : > { %11771 = vmatmul.mubr.msk.bf16.gmra.mxu0 %vm797_vm2, %v11943_v15  ;;  %v1670_v15 = vrot.slane %v1668_v9, 5  ;;  %509 = vst [vmem:[#allocation2 + $0x54] sm:$0x1] %v508_v36  ;;  %v423_v37 = vld [vmem:[#allocation2 + $0x90] sm:$0x1]  ;;  %s12405_s23 = scalar_lea.vmem %s15626_s14, 1024 }
  0x39   : > { %11774 = vmatprep.mubr.msk.bf16.mxu0 %vm797_vm2, %v11944_v16  ;;  %v1446_v16 = vld [vmem:[#allocation2 + $0x48] sm:$0xf]  ;;  %v424_v38 = vsel %vm12582_vm3, 0, %v423_v37  ;;  %v540_v42 = vld [vmem:[#allocation2 + $0xac] sm:$0x1]  ;;  %p12406_p11 = scmp.ne.s32.totalorder %s15626_s14, %s12405_s23  ;;  %s12469_s24 = smov [#allocation5]  }
  0x3a   : > { %1462 = vrot.lane.b32.xlu0 %v1446_v16, %s12468_s17  ;;  %425 = vst [vmem:[#allocation2 + $0x90] sm:$0x1] %v424_v38  ;;  %v432_v39 = vld [vmem:[#allocation2 + $0xa8] sm:$0x1]  ;;  %v426_v43 = vld [vmem:[#allocation2 + $0x98] sm:$0x1] }
  0x3b   : > { %v433_v40 = vsel %vm12582_vm3, 0, %v432_v39  ;;  %v541_v45 = vsel %vm12582_vm3, 0, %v540_v42  ;;  %v427_v46 = vsel %vm12582_vm3, 0, %v426_v43  ;;  %v534_v47 = vld [vmem:[#allocation2 + $0x9c] sm:$0x1]  ;;  %p12407_p12 = pnand %p12406_p11, %p12560_p5 }
  0x3c   : > { %434 = vst [vmem:[#allocation2 + $0xa8] sm:$0x1] %v433_v40  ;;  %542 = vst [vmem:[#allocation2 + $0xac] sm:$0x1] %v541_v45  ;;  %v535_v48 = vsel %vm12582_vm3, 0, %v534_v47 }
  0x3d   : > { %v531_v41 = vld [vmem:[#allocation2 + $0x94] sm:$0x1]  ;;  %428 = vst [vmem:[#allocation2 + $0x98] sm:$0x1] %v427_v46  ;;  %536 = vst [vmem:[#allocation2 + $0x9c] sm:$0x1] %v535_v48  ;;  %p12408_p13 = pneg %p12407_p12 }
  0x3e   : > { %v532_v44 = vsel %vm12582_vm3, 0, %v531_v41  ;;  %v441_v49 = vld [vmem:[#allocation2 + $0xc0] sm:$0x1]  ;;  %v435_v50 = vld [vmem:[#allocation2 + $0xb0] sm:$0x1] }
  0x3f   : > { %533 = vst [vmem:[#allocation2 + $0x94] sm:$0x1] %v532_v44  ;;  %v442_v51 = vsel %vm12582_vm3, 0, %v441_v49  ;;  %v436_v52 = vsel %vm12582_vm3, 0, %v435_v50  ;;  %v444_v53 = vld [vmem:[#allocation2 + $0xc8] sm:$0x1] }
  0x40   : > { %11775 = vmatmul.mubr.msk.bf16.gmra.mxu0 %vm797_vm2, %v11945_v17  ;;  %v403_v17 = vsel %vm12582_vm3, 0, %v402_v14  ;;  %443 = vst [vmem:[#allocation2 + $0xc0] sm:$0x1] %v442_v51  ;;  %437 = vst [vmem:[#allocation2 + $0xb0] sm:$0x1] %v436_v52  ;;  %v445_v54 = vsel %vm12582_vm3, 0, %v444_v53 }
  0x41   : > { %11778 = vmatprep.mubr.msk.bf16.mxu0 %vm797_vm2, %v11946_v18  ;;  %v513_v18 = vld [vmem:[#allocation2 + $0x64] sm:$0x1]  ;;  %404 = vst [vmem:[#allocation2 + $0x58] sm:$0x1] %v403_v17  ;;  %v543_v56 = vld [vmem:[#allocation2 + $0xb4] sm:$0x1] }
  0x42   : > { %v549_v55 = vld [vmem:[#allocation2 + $0xc4] sm:$0x1]  ;;  %446 = vst [vmem:[#allocation2 + $0xc8] sm:$0x1] %v445_v54  ;;  %v552_v57 = vld [vmem:[#allocation2 + $0xcc] sm:$0x1] }
  0x43   : > { %v550_v58 = vsel %vm12582_vm3, 0, %v549_v55  ;;  %v544_v59 = vsel %vm12582_vm3, 0, %v543_v56  ;;  %v553_v60 = vsel %vm12582_vm3, 0, %v552_v57  ;;  %v516_v61 = vld [vmem:[#allocation2 + $0x6c] sm:$0x1] }
  0x44   : > { %551 = vst [vmem:[#allocation2 + $0xc4] sm:$0x1] %v550_v58  ;;  %545 = vst [vmem:[#allocation2 + $0xb4] sm:$0x1] %v544_v59  ;;  %v517_v62 = vsel %vm12582_vm3, 0, %v516_v61 }
  0x45   : > { %554 = vst [vmem:[#allocation2 + $0xcc] sm:$0x1] %v553_v60  ;;  %518 = vst [vmem:[#allocation2 + $0x6c] sm:$0x1] %v517_v62  ;;  %v438_v63 = vld [vmem:[#allocation2 + $0xb8] sm:$0x1] }
  0x46   : > { %v546_v0 = vld [vmem:[#allocation2 + $0xbc] sm:$0x1]  ;;  %v439_v1 = vsel %vm12582_vm3, 0, %v438_v63  ;;  %v525_v6 = vld [vmem:[#allocation2 + $0x84] sm:$0x1] }
  0x47   : > { %v547_v2 = vsel %vm12582_vm3, 0, %v546_v0  ;;  %v510_v3 = vld [vmem:[#allocation2 + $0x5c] sm:$0x1]  ;;  %440 = vst [vmem:[#allocation2 + $0xb8] sm:$0x1] %v439_v1  ;;  %v526_v7 = vsel %vm12582_vm3, 0, %v525_v6 }
  0x48   : > { %11779 = vmatmul.mubr.msk.bf16.gmra.mxu0 %vm797_vm2, %v11947_v19  ;;  %v1671_v19 = vsel %vm12677_vm7, %v1666_v13, %v1670_v15  ;;  %548 = vst [vmem:[#allocation2 + $0xbc] sm:$0x1] %v547_v2  ;;  %v511_v5 = vsel %vm12582_vm3, 0, %v510_v3  ;;  %v456_v8 = vld [vmem:[#allocation2 + $0xe8] sm:$0x1] }
  0x49   : > { %11782 = vmatprep.mubr.msk.bf16.mxu0 %vm797_vm2, %v11948_v20  ;;  %v514_v20 = vsel %vm12582_vm3, 0, %v513_v18  ;;  %1770 = vrot.lane.b32.xlu1 %v1671_v19, %s12468_s17  ;;  %512 = vst [vmem:[#allocation2 + $0x5c] sm:$0x1] %v511_v5  ;;  %v450_v9 = vld [vmem:[#allocation2 + $0xd8] sm:$0x1]  ;;  %v457_v11 = vsel %vm12582_vm3, 0, %v456_v8 }
  0x4a   : > { %515 = vst [vmem:[#allocation2 + $0x64] sm:$0x1] %v514_v20  ;;  %v459_v10 = vld [vmem:[#allocation2 + $0xf0] sm:$0x1]  ;;  %527 = vst [vmem:[#allocation2 + $0x84] sm:$0x1] %v526_v7 }
  0x4b   : > { %v451_v13 = vsel %vm12582_vm3, 0, %v450_v9  ;;  %v460_v14 = vsel %vm12582_vm3, 0, %v459_v10  ;;  %458 = vst [vmem:[#allocation2 + $0xe8] sm:$0x1] %v457_v11  ;;  %v519_v15 = vld [vmem:[#allocation2 + $0x74] sm:$0x1] }
  0x4c   : > { %452 = vst [vmem:[#allocation2 + $0xd8] sm:$0x1] %v451_v13  ;;  %461 = vst [vmem:[#allocation2 + $0xf0] sm:$0x1] %v460_v14  ;;  %v453_v16 = vld [vmem:[#allocation2 + $0xe0] sm:$0x1] }
  0x4d   : > { %v520_v17 = vsel %vm12582_vm3, 0, %v519_v15  ;;  %v454_v18 = vsel %vm12582_vm3, 0, %v453_v16  ;;  %v522_v19 = vld [vmem:[#allocation2 + $0x7c] sm:$0x1]  ;;  %v465_v27 = vld [vmem:[#allocation2 + $0x100] sm:$0x1] }
  0x4e   : > { %521 = vst [vmem:[#allocation2 + $0x74] sm:$0x1] %v520_v17  ;;  %455 = vst [vmem:[#allocation2 + $0xe0] sm:$0x1] %v454_v18  ;;  %v523_v20 = vsel %vm12582_vm3, 0, %v522_v19  ;;  %v466_v28 = vsel %vm12582_vm3, 0, %v465_v27 }
  0x4f   : > { %524 = vst [vmem:[#allocation2 + $0x7c] sm:$0x1] %v523_v20  ;;  %467 = vst [vmem:[#allocation2 + $0x100] sm:$0x1] %v466_v28  ;;  %v349_v29 = vld [vmem:[#allocation2 + $0xdc] sm:$0x1] }
  0x50   : > { %11783 = vmatmul.mubr.msk.bf16.gmra.mxu0 %vm797_vm2, %v11949_v21  ;;  %v417_v21 = vld [vmem:[#allocation2 + $0x80] sm:$0x1]  ;;  %v350_v30 = vsel %vm12582_vm3, 0, %v349_v29  ;;  %v358_v31 = vld [vmem:[#allocation2 + $0x8c] sm:$0x1] }
  0x51   : > { %11786 = vmatprep.mubr.msk.bf16.mxu0 %vm797_vm2, %v11950_v22  ;;  %v411_v22 = vld [vmem:[#allocation2 + $0x70] sm:$0x1]  ;;  %v418_v24 = vsel %vm12582_vm3, 0, %v417_v21  ;;  %v468_v21 = vld [vmem:[#allocation2 + $0x108] sm:$0x1]  ;;  %v359_v32 = vsel %vm12582_vm3, 0, %v358_v31 }
  0x52   : > { %v412_v25 = vsel %vm12582_vm3, 0, %v411_v22  ;;  %419 = vst [vmem:[#allocation2 + $0x80] sm:$0x1] %v418_v24  ;;  %v469_v22 = vsel %vm12582_vm3, 0, %v468_v21  ;;  %351 = vst [vmem:[#allocation2 + $0xdc] sm:$0x1] %v350_v30 }
  0x53   : > { %413 = vst [vmem:[#allocation2 + $0x70] sm:$0x1] %v412_v25  ;;  %470 = vst [vmem:[#allocation2 + $0x108] sm:$0x1] %v469_v22  ;;  %v471_v25 = vld [vmem:[#allocation2 + $0x110] sm:$0x1] }
  0x54   : > { %360 = vst [vmem:[#allocation2 + $0x8c] sm:$0x1] %v359_v32  ;;  %v564_v33 = vld [vmem:[#allocation2 + $0xec] sm:$0x1]  ;;  %v567_v34 = vld [vmem:[#allocation2 + $0xf4] sm:$0x1] }
  0x55   : > { %v565_v36 = vsel %vm12582_vm3, 0, %v564_v33  ;;  %v568_v37 = vsel %vm12582_vm3, 0, %v567_v34  ;;  %v561_v39 = vld [vmem:[#allocation2 + $0xe4] sm:$0x1]  ;;  %v2379_v42 = vld [vmem:[#allocation2 + $0x54] sm:$0x1] }
  0x56   : > { %v1649_v40 = vld [vmem:[#allocation2 + $0x64] sm:$0x1]  ;;  %566 = vst [vmem:[#allocation2 + $0xec] sm:$0x1] %v565_v36  ;;  %569 = vst [vmem:[#allocation2 + $0xf4] sm:$0x1] %v568_v37 }
  0x57   : > { %v562_v41 = vsel %vm12582_vm3, 0, %v561_v39  ;;  %v1645_v43 = vld [vmem:[#allocation2 + $0x54] sm:$0x1]  ;;  %v1651_v44 = vld [vmem:[#allocation2 + $0x6c] sm:$0x1]  ;;  %v1710_v47 = vshll.u32 %v1649_v40, 16 }
  0x58   : > { %11787 = vmatmul.mubr.msk.bf16.gmra.mxu0 %vm797_vm2, %v11951_v23  ;;  %v420_v23 = vld [vmem:[#allocation2 + $0x88] sm:$0x1]  ;;  %563 = vst [vmem:[#allocation2 + $0xe4] sm:$0x1] %v562_v41  ;;  %v2381_v45 = vld [vmem:[#allocation2 + $0x5c] sm:$0x1] }
  0x59   : > { %v421_v26 = vsel %vm12582_vm3, 0, %v420_v23  ;;  %v462_v23 = vld [vmem:[#allocation2 + $0xf8] sm:$0x1]  ;;  %v558_v35 = vld [vmem:[#allocation2 + $0xdc] sm:$0x1]  ;;  %v2404_v49 = vshll.u32 %v2379_v42, 16 }
  0x5a   : > { %422 = vst [vmem:[#allocation2 + $0x88] sm:$0x1] %v421_v26  ;;  %v463_v24 = vsel %vm12582_vm3, 0, %v462_v23  ;;  %v472_v26 = vsel %vm12582_vm3, 0, %v471_v25  ;;  %v559_v38 = vsel %vm12582_vm3, 0, %v558_v35  ;;  %v1682_v50 = vshll.u32 %v1645_v43, 16 }
  0x5b   : > { %464 = vst [vmem:[#allocation2 + $0xf8] sm:$0x1] %v463_v24  ;;  %473 = vst [vmem:[#allocation2 + $0x110] sm:$0x1] %v472_v26  ;;  %v528_v46 = vld [vmem:[#allocation2 + $0x8c] sm:$0x1] }
  0x5c   : > { %560 = vst [vmem:[#allocation2 + $0xdc] sm:$0x1] %v559_v38  ;;  %v529_v48 = vsel %vm12582_vm3, 0, %v528_v46  ;;  %v1724_v51 = vshll.u32 %v1651_v44, 16  ;;  %v2418_v52 = vshll.u32 %v2381_v45, 16  ;;  %v12773_v53 = vrot.slane %v1710_v47, 5 }
  0x5d   : > { %530 = vst [vmem:[#allocation2 + $0x8c] sm:$0x1] %v529_v48  ;;  %v1647_v54 = vld [vmem:[#allocation2 + $0x5c] sm:$0x1]  ;;  %v1657_v55 = vld [vmem:[#allocation2 + $0x84] sm:$0x1] }
  0x5e   : > { %v1653_v56 = vld [vmem:[#allocation2 + $0x74] sm:$0x1]  ;;  %v1655_v57 = vld [vmem:[#allocation2 + $0x7c] sm:$0x1]  ;;  %v2383_v58 = vld [vmem:[#allocation2 + $0x64] sm:$0x1] }
  0x5f   : > { %v2385_v59 = vld [vmem:[#allocation2 + $0x6c] sm:$0x1]  ;;  %v12775_v60 = vrot.slane %v2404_v49, 5  ;;  %v12777_v61 = vrot.slane %v1682_v50, 5  ;;  %v12779_v62 = vrot.slane %v1724_v51, 5  ;;  %v12781_v63 = vrot.slane %v2418_v52, 5 }
  0x60   : > { %v1766_v0 = vshll.u32 %v1657_v55, 16  ;;  %v1696_v1 = vshll.u32 %v1647_v54, 16  ;;  %v1738_v2 = vshll.u32 %v1653_v56, 16  ;;  %v1752_v3 = vshll.u32 %v1655_v57, 16  ;;  %v2387_v14 = vld [vmem:[#allocation2 + $0x74] sm:$0x1] }
  0x61   : > { %v2432_v5 = vshll.u32 %v2383_v58, 16  ;;  %v2446_v6 = vshll.u32 %v2385_v59, 16  ;;  %v2751_v15 = vld [vmem:[#allocation2 + $0xec] sm:$0x1]  ;;  %v2460_v19 = vshll.u32 %v2387_v14, 16 }
  0x62   : > { %v12783_v7 = vrot.slane %v1766_v0, 5  ;;  %v12785_v8 = vrot.slane %v1696_v1, 5  ;;  %v12787_v9 = vrot.slane %v1738_v2, 5  ;;  %v12789_v10 = vrot.slane %v1752_v3, 5  ;;  %v2015_v16 = vld [vmem:[#allocation2 + $0xec] sm:$0x1] }
  0x63   : > { %v12791_v11 = vrot.slane %v2432_v5, 5  ;;  %v12793_v13 = vrot.slane %v2446_v6, 5  ;;  %v576_v17 = vld [vmem:[#allocation2 + $0x10c] sm:$0x1]  ;;  %v12800_v20 = vld [vmem:[%s15672_s2] ss:$0 sm:$0xff] }
  0x64   : > { %v577_v18 = vsel %vm12582_vm3, 0, %v576_v17  ;;  %v2017_v21 = vld [vmem:[#allocation2 + $0xf4] sm:$0x1]  ;;  %v2788_v23 = vshll.u32 %v2751_v15, 16  ;;  %v2011_v25 = vld [vmem:[#allocation2 + $0xdc] sm:$0x1] }
  0x65   : > { %578 = vst [vmem:[#allocation2 + $0x10c] sm:$0x1] %v577_v18  ;;  %v579_v22 = vld [vmem:[#allocation2 + $0x114] sm:$0x1]  ;;  %v570_v26 = vld [vmem:[#allocation2 + $0xfc] sm:$0x1] }
  0x66   : > { %v580_v24 = vsel %vm12582_vm3, 0, %v579_v22  ;;  %vm622_vm8 = vsmask.f32 7938  ;;  %v2064_v27 = vshll.u32 %v2015_v16, 16  ;;  %v2013_v28 = vld [vmem:[#allocation2 + $0xe4] sm:$0x1] }
  0x67   : > { %581 = vst [vmem:[#allocation2 + $0x114] sm:$0x1] %v580_v24  ;;  %v571_v29 = vsel %vm12582_vm3, 0, %v570_v26  ;;  %v2389_v30 = vld [vmem:[#allocation2 + $0x7c] sm:$0x1]  ;;  %v2078_v34 = vshll.u32 %v2017_v21, 16  ;;  %vm12833_vm9 = vmand %vm332_vm4, %vm622_vm8 }
  0x68   : > { %572 = vst [vmem:[#allocation2 + $0xfc] sm:$0x1] %v571_v29  ;;  %v573_v32 = vld [vmem:[#allocation2 + $0x104] sm:$0x1]  ;;  %v2036_v39 = vshll.u32 %v2011_v25, 16  ;;  %v12810_v40 = vrot.slane %v2460_v19, 5  ;;  %vm13269_vm13 = vmand %vm590_vm11, %vm622_vm8 }
  0x69   : > { %v574_v35 = vsel %vm12582_vm3, 0, %v573_v32  ;;  %v2050_v42 = vshll.u32 %v2013_v28, 16  ;;  %v2474_v43 = vshll.u32 %v2389_v30, 16  ;;  %v12813_v47 = vrot.slane %v2788_v23, 5  ;;  %v12815_v48 = vld [vmem:[#allocation2 + $0x84] sm:$0x1]  ;;  %vm13961_vm2 = vmand %vm4136_vm1, %vm622_vm8 }
  0x6a   : > { %575 = vst [vmem:[#allocation2 + $0x104] sm:$0x1] %v574_v35  ;;  %v12817_v50 = vrot.slane %v2064_v27, 5  ;;  %v12819_v51 = vrot.slane %v2078_v34, 5  ;;  %v12821_v56 = vrot.slane %v2036_v39, 5  ;;  %v2488_v3 = vshll.u32 %v12815_v48, 16 }
  0x6b   : > { %v12823_v57 = vld [vmem:[#allocation2 + $0x8c] sm:$0x1]  ;;  %v1246_v58 = vld [vmem:[#allocation2 + $0x18] sm:$0xf]  ;;  %v12826_v1 = vrot.slane %v2050_v42, 5  ;;  %v12828_v2 = vrot.slane %v2474_v43, 5 }
  0x6c   : > { %v1249_v14 = vld [vmem:[#allocation2 + $0x1c] sm:$0x1]  ;;  %v1234_v19 = vld [vmem:[#allocation2 + $0x8] sm:$0xf]  ;;  %v1237_v21 = vld [vmem:[#allocation2 + $0xc] sm:$0x1] }
  0x6d   : > { %v2502_v25 = vshll.u32 %v12823_v57, 16  ;;  %v1252_v39 = vld [vmem:[#allocation2 + $0x20] sm:$0xf] }
  0xe0   : > { %v11760_v31 = vpop.f32.mrf.mxu0 }
  0xe1   : > { %v889_v33 = vadd.f32 %v11760_v31, %v12800_v20 }
  0xe2   : > { %v880_v36 = vpop.f32.mrf.mxu0 }
  0xe3   : > { %v1009_v37 = vmax.f32 %v889_v33, 0.0  ;;  %v881_v38 = vadd.f32 %v12800_v20, %v880_v36 }
  0xe4   : > { %v11761_v41 = vpop.f32.mrf.mxu0 }
  0xe5   : > { %v10990_v44 = vpack.c.bf16 %v1009_v37, %v1009_v37  ;;  %v1007_v45 = vmax.f32 %v881_v38, 0.0  ;;  %v892_v46 = vadd.f32 %v11761_v41, %v12800_v20  ;;  %v1255_v41 = vld [vmem:[#allocation2 + $0x24] sm:$0x1] }
  0xe6   : > { %v883_v49 = vpop.f32.mrf.mxu0 }
  0xe7   : > { %v1168_v52 = vshrl.u32 %v10990_v44, 16  ;;  %v10988_v54 = vpack.c.bf16 %v1007_v45, %v1007_v45  ;;  %v1010_v55 = vmax.f32 %v892_v46, 0.0  ;;  %v884_v59 = vadd.f32 %v12800_v20, %v883_v49 }
  0xe8   : > { %v11764_v0 = vpop.f32.mrf.mxu0  ;;  %v1171_v6 = vshll.u32 %v10990_v44, 16 }
  0xe9   : > { %v1170_v5 = vrot.slane %v1168_v52, 7  ;;  %v1152_v15 = vshrl.u32 %v10988_v54, 16  ;;  %v10991_v16 = vpack.c.bf16 %v1010_v55, %v1010_v55  ;;  %v1155_v18 = vshll.u32 %v10988_v54, 16  ;;  %v1240_v54 = vld [vmem:[#allocation2 + $0x10] sm:$0xf] }
  0xea   : > { %v1008_v22 = vmax.f32 %v884_v59, 0.0  ;;  %v905_v23 = vadd.f32 %v11764_v0, %v12800_v20  ;;  %v896_v24 = vpop.f32.mrf.mxu0  ;;  %v1243_v55 = vld [vmem:[#allocation2 + $0x14] sm:$0x1] }
  0xeb   : > { %v1173_v26 = vor.u32 %v1171_v6, %v1170_v5  ;;  %v1174_v27 = vrot.slane %v1170_v5, 4  ;;  %v1154_v28 = vrot.slane %v1152_v15, 7  ;;  %v1176_v29 = vshrl.u32 %v10991_v16, 16 }
  0xec   : > { %v1179_v30 = vshll.u32 %v10991_v16, 16  ;;  %v10989_v31 = vpack.c.bf16 %v1008_v22, %v1008_v22  ;;  %v1013_v32 = vmax.f32 %v905_v23, 0.0  ;;  %v897_v33 = vadd.f32 %v12800_v20, %v896_v24  ;;  %v11765_v34 = vpop.f32.mrf.mxu0 }
  0xed   : > { %v1247_v35 = vsel %vm12833_vm9, %v1173_v26, %v1246_v58  ;;  %v1250_v36 = vsel %vm12582_vm3, %v1174_v27, %v1249_v14  ;;  %v1157_v37 = vor.u32 %v1155_v18, %v1154_v28  ;;  %v1158_v38 = vrot.slane %v1154_v28, 4  ;;  %v1270_v27 = vld [vmem:[#allocation2 + $0x38] sm:$0xf]  ;;  %v1273_v28 = vld [vmem:[#allocation2 + $0x3c] sm:$0x1] }
  0xee   : > { %1248 = vst [vmem:[#allocation2 + $0x18] sm:$0xf] %v1247_v35  ;;  %1251 = vst [vmem:[#allocation2 + $0x1c] sm:$0x1] %v1250_v36  ;;  %v1178_v42 = vrot.slane %v1176_v29, 7  ;;  %v1160_v43 = vshrl.u32 %v10989_v31, 16  ;;  %v10994_v45 = vpack.c.bf16 %v1013_v32, %v1013_v32  ;;  %v899_v46 = vpop.f32.mrf.mxu0  ;;  %v908_v59 = vadd.f32 %v11765_v34, %v12800_v20 }
  0xef   : > { %v1163_v44 = vshll.u32 %v10989_v31, 16  ;;  %v1235_v49 = vsel %vm12833_vm9, %v1157_v37, %v1234_v19  ;;  %v1238_v52 = vsel %vm12582_vm3, %v1158_v38, %v1237_v21  ;;  %v1011_v58 = vmax.f32 %v897_v33, 0.0  ;;  %v1258_v36 = vld [vmem:[#allocation2 + $0x28] sm:$0xf] }
  0xf0   : > { %1236 = vst [vmem:[#allocation2 + $0x8] sm:$0xf] %v1235_v49  ;;  %1239 = vst [vmem:[#allocation2 + $0xc] sm:$0x1] %v1238_v52  ;;  %v1181_v0 = vor.u32 %v1179_v30, %v1178_v42  ;;  %v1182_v5 = vrot.slane %v1178_v42, 4  ;;  %v1162_v6 = vrot.slane %v1160_v43, 7  ;;  %v11768_v15 = vpop.f32.mrf.mxu0  ;;  %v900_v19 = vadd.f32 %v12800_v20, %v899_v46 }
  0xf1   : > { %v1200_v14 = vshrl.u32 %v10994_v45, 16  ;;  %v1203_v16 = vshll.u32 %v10994_v45, 16  ;;  %v10992_v18 = vpack.c.bf16 %v1011_v58, %v1011_v58  ;;  %v1014_v22 = vmax.f32 %v908_v59, 0.0  ;;  %v1261_v46 = vld [vmem:[#allocation2 + $0x2c] sm:$0x1] }
  0xf2   : > { %v1253_v21 = vsel %vm12833_vm9, %v1181_v0, %v1252_v39  ;;  %v1256_v23 = vsel %vm12582_vm3, %v1182_v5, %v1255_v41  ;;  %v1165_v24 = vor.u32 %v1163_v44, %v1162_v6  ;;  %v1166_v26 = vrot.slane %v1162_v6, 4  ;;  %v912_v29 = vpop.f32.mrf.mxu0 }
  0xf3   : > { %1254 = vst [vmem:[#allocation2 + $0x20] sm:$0xf] %v1253_v21  ;;  %1257 = vst [vmem:[#allocation2 + $0x24] sm:$0x1] %v1256_v23  ;;  %v1202_v30 = vrot.slane %v1200_v14, 7  ;;  %v1184_v31 = vshrl.u32 %v10992_v18, 16  ;;  %v10995_v33 = vpack.c.bf16 %v1014_v22, %v1014_v22  ;;  %v921_v38 = vadd.f32 %v11768_v15, %v12800_v20 }
  0xf4   : > { %v1187_v32 = vshll.u32 %v10992_v18, 16  ;;  %v1241_v34 = vsel %vm12833_vm9, %v1165_v24, %v1240_v54  ;;  %v1244_v35 = vsel %vm12582_vm3, %v1166_v26, %v1243_v55  ;;  %v1012_v37 = vmax.f32 %v900_v19, 0.0  ;;  %v11769_v39 = vpop.f32.mrf.mxu0 }
  0xf5   : > { %1242 = vst [vmem:[#allocation2 + $0x10] sm:$0xf] %v1241_v34  ;;  %1245 = vst [vmem:[#allocation2 + $0x14] sm:$0x1] %v1244_v35  ;;  %v1205_v41 = vor.u32 %v1203_v16, %v1202_v30  ;;  %v1206_v42 = vrot.slane %v1202_v30, 4  ;;  %v1186_v43 = vrot.slane %v1184_v31, 7  ;;  %v913_v54 = vadd.f32 %v12800_v20, %v912_v29 }
  0xf6   : > { %v1208_v44 = vshrl.u32 %v10995_v33, 16  ;;  %v2172_v45 = vld [vmem:[#allocation2 + $0x18] sm:$0xf]  ;;  %v1211_v49 = vshll.u32 %v10995_v33, 16  ;;  %v10993_v52 = vpack.c.bf16 %v1012_v37, %v1012_v37  ;;  %v1017_v58 = vmax.f32 %v921_v38, 0.0  ;;  %v915_v59 = vpop.f32.mrf.mxu0 }
  0xf7   : > { %2180 = vst.msk [vmem:[#allocation4 + $0x58] sm:$0xf] %vm332_vm4, %v2172_v45  ;;  %v1432_v55 = vld [vmem:[#allocation2 + $0x18] sm:$0xf]  ;;  %v1271_v0 = vsel %vm12833_vm9, %v1205_v41, %v1270_v27  ;;  %v1274_v5 = vsel %vm12582_vm3, %v1206_v42, %v1273_v28  ;;  %v1189_v6 = vor.u32 %v1187_v32, %v1186_v43  ;;  %v1190_v14 = vrot.slane %v1186_v43, 4 }
  0xf8   : > { %1440 = vst.msk [vmem:[#allocation4 + $0x6c] sm:$0xf] %vm332_vm4, %v1432_v55  ;;  %v1430_v15 = vld [vmem:[#allocation2 + $0x8] sm:$0xf]  ;;  %1272 = vst [vmem:[#allocation2 + $0x38] sm:$0xf] %v1271_v0  ;;  %v10998_v21 = vpack.c.bf16 %v1017_v58, %v1017_v58  ;;  %v11772_v23 = vpop.f32.mrf.mxu0  ;;  %v924_v30 = vadd.f32 %v11769_v39, %v12800_v20  ;;  %v916_v35 = vadd.f32 %v12800_v20, %v915_v59 }
  0xf9   : > { %v2170_v16 = vld [vmem:[#allocation2 + $0x8] sm:$0xf]  ;;  %1275 = vst [vmem:[#allocation2 + $0x3c] sm:$0x1] %v1274_v5  ;;  %v1210_v18 = vrot.slane %v1208_v44, 7  ;;  %v1192_v22 = vshrl.u32 %v10993_v52, 16  ;;  %v1259_v24 = vsel %vm12833_vm9, %v1189_v6, %v1258_v36  ;;  %v1262_v26 = vsel %vm12582_vm3, %v1190_v14, %v1261_v46 }
  0xfa   : > { %v1195_v19 = vshll.u32 %v10993_v52, 16  ;;  %1438 = vst.msk [vmem:[#allocation4 + $0x24] sm:$0xf] %vm332_vm4, %v1430_v15  ;;  %2178 = vst.msk [vmem:[#allocation4 + $0x10] sm:$0xf] %vm332_vm4, %v2170_v16  ;;  %v1015_v29 = vmax.f32 %v913_v54, 0.0  ;;  %v928_v37 = vpop.f32.mrf.mxu0  ;;  %v937_v43 = vadd.f32 %v11772_v23, %v12800_v20 }
  0xfb   : > { %v1276_v27 = vld [vmem:[#allocation2 + $0x40] sm:$0xf]  ;;  %v1279_v28 = vld [vmem:[#allocation2 + $0x44] sm:$0x1]  ;;  %1260 = vst [vmem:[#allocation2 + $0x28] sm:$0xf] %v1259_v24  ;;  %v1213_v31 = vor.u32 %v1211_v49, %v1210_v18  ;;  %v929_v44 = vadd.f32 %v12800_v20, %v928_v37 }
  0xfc   : > { %1263 = vst [vmem:[#allocation2 + $0x2c] sm:$0x1] %v1262_v26  ;;  %v1214_v32 = vrot.slane %v1210_v18, 4  ;;  %v1194_v33 = vrot.slane %v1192_v22, 7  ;;  %v1264_v34 = vld [vmem:[#allocation2 + $0x30] sm:$0xf]  ;;  %v10996_v41 = vpack.c.bf16 %v1015_v29, %v1015_v29  ;;  %v11773_v58 = vpop.f32.mrf.mxu0 }
  0xfd   : > { %1285 = vst.msk [vmem:[#allocation2 + $0x60] sm:$0xf] %vm332_vm4, %v10998_v21  ;;  %v1433_v36 = vld [vmem:[#allocation2 + $0x20] sm:$0xf]  ;;  %v1267_v38 = vld [vmem:[#allocation2 + $0x34] sm:$0x1]  ;;  %v1277_v45 = vsel %vm12833_vm9, %v1213_v31, %v1276_v27  ;;  %v940_v18 = vadd.f32 %v11773_v58, %v12800_v20 }
  0xfe   : > { %v1018_v42 = vmax.f32 %v924_v30, 0.0  ;;  %v12877_v39 = vld [vmem:[#allocation2 + $0xe4] sm:$0x1]  ;;  %1441 = vst.msk [vmem:[#allocation4 + $0x90] sm:$0xf] %vm332_vm4, %v1433_v36  ;;  %v1280_v46 = vsel %vm12582_vm3, %v1214_v32, %v1279_v28  ;;  %v1197_v49 = vor.u32 %v1195_v19, %v1194_v33  ;;  %v1198_v52 = vrot.slane %v1194_v33, 4  ;;  %v931_v22 = vpop.f32.mrf.mxu0 }
  0xff   : > { %v2023_v54 = vld [vmem:[#allocation2 + $0x10c] sm:$0x1]  ;;  %v2753_v59 = vld [vmem:[#allocation2 + $0xf4] sm:$0x1]  ;;  %1278 = vst [vmem:[#allocation2 + $0x40] sm:$0xf] %v1277_v45  ;;  %v932_v27 = vadd.f32 %v12800_v20, %v931_v22 }
 0x100   : > { %1281 = vst [vmem:[#allocation2 + $0x44] sm:$0x1] %v1280_v46  ;;  %1283 = vst.msk [vmem:[#allocation2 + $0x50] sm:$0xf] %vm332_vm4, %v10996_v41  ;;  %v10999_v55 = vpack.c.bf16 %v1018_v42, %v1018_v42  ;;  %v1016_v0 = vmax.f32 %v916_v35, 0.0  ;;  %v1021_v5 = vmax.f32 %v937_v43, 0.0  ;;  %v1265_v15 = vsel %vm12833_vm9, %v1197_v49, %v1264_v34  ;;  %v11776_v32 = vpop.f32.mrf.mxu0 }
 0x101   : > { %v1019_v6 = vmax.f32 %v929_v44, 0.0  ;;  %v337_v14 = vld [vmem:[#allocation2 + $0x4] sm:$0x1]  ;;  %v1268_v16 = vsel %vm12582_vm3, %v1198_v52, %v1267_v38  ;;  %v2774_v19 = vshll.u32 %v12877_v39, 16  ;;  %v2171_v21 = vld [vmem:[#allocation2 + $0x10] sm:$0xf]  ;;  %v953_v41 = vadd.f32 %v11776_v32, %v12800_v20 }
 0x102   : > { %1266 = vst [vmem:[#allocation2 + $0x30] sm:$0xf] %v1265_v15  ;;  %1269 = vst [vmem:[#allocation2 + $0x34] sm:$0x1] %v1268_v16  ;;  %v10997_v23 = vpack.c.bf16 %v1016_v0, %v1016_v0  ;;  %v11002_v24 = vpack.c.bf16 %v1021_v5, %v1021_v5  ;;  %v2025_v28 = vld [vmem:[#allocation2 + $0x114] sm:$0x1]  ;;  %v944_v44 = vpop.f32.mrf.mxu0 }
 0x103   : > { %1286 = vst.msk [vmem:[#allocation2 + $0x68] sm:$0xf] %vm332_vm4, %v10999_v55  ;;  %v11000_v26 = vpack.c.bf16 %v1019_v6, %v1019_v6  ;;  %2179 = vst.msk [vmem:[#allocation4 + $0x34] sm:$0xf] %vm332_vm4, %v2171_v21  ;;  %v1436_v29 = vld [vmem:[#allocation2 + $0x38] sm:$0xf]  ;;  %v945_v48 = vadd.f32 %v12800_v20, %v944_v44 }
 0x104   : > { %v1431_v30 = vld [vmem:[#allocation2 + $0x10] sm:$0xf]  ;;  %v1022_v31 = vmax.f32 %v940_v18, 0.0  ;;  %v2120_v33 = vshll.u32 %v2023_v54, 16  ;;  %v2802_v34 = vshll.u32 %v2753_v59, 16  ;;  %v338_v35 = vsel %vm12582_vm3, 0, %v337_v14  ;;  %v11777_v0 = vpop.f32.mrf.mxu0 }
 0x105   : > { %1444 = vst.msk [vmem:[#allocation4 + $0xfc] sm:$0xf] %vm332_vm4, %v1436_v29  ;;  %1439 = vst.msk [vmem:[#allocation4 + $0x48] sm:$0xf] %vm332_vm4, %v1431_v30  ;;  %v1020_v37 = vmax.f32 %v932_v27, 0.0  ;;  %v12904_v42 = vrot.slane %v2488_v3, 5  ;;  %v956_v16 = vadd.f32 %v11777_v0, %v12800_v20 }
 0x106   : > { %1284 = vst.msk [vmem:[#allocation2 + $0x58] sm:$0xf] %vm332_vm4, %v10997_v23  ;;  %1289 = vst.msk [vmem:[#allocation2 + $0x80] sm:$0xf] %vm332_vm4, %v11002_v24  ;;  %v2188_v36 = vld [vmem:[#allocation2 + $0x60] sm:$0xf]  ;;  %v11003_v43 = vpack.c.bf16 %v1022_v31, %v1022_v31 }
 0x107   : > { %1287 = vst.msk [vmem:[#allocation2 + $0x70] sm:$0xf] %vm332_vm4, %v11000_v26  ;;  %v1449_v38 = vld [vmem:[#allocation2 + $0x60] sm:$0xf]  ;;  %339 = vst [vmem:[#allocation2 + $0x4] sm:$0x1] %v338_v35  ;;  %2206 = vrot.lane.b32.xlu0 %v2188_v36, %s12468_s17  ;;  %v11001_v52 = vpack.c.bf16 %v1020_v37, %v1020_v37 }
 0x108   : > { %1468 = vrot.lane.b32.xlu1 %v1449_v38, %s12468_s17  ;;  %v1648_v39 = vld [vmem:[#allocation2 + $0x60] sm:$0xf]  ;;  %v2134_v45 = vshll.u32 %v2025_v28, 16  ;;  %v12908_v46 = vld [vmem:[#allocation2 + $0xfc] sm:$0x1]  ;;  %v12912_v49 = vrot.slane %v2502_v25, 5 }
 0x109   : > { %v1025_v58 = vmax.f32 %v953_v41, 0.0  ;;  %v1701_v3 = vshrl.u32 %v1648_v39, 16  ;;  %v11952_v54 = vld [vmem:[%s15673_s3 + $0x78] sm:$0xff]   ;;  %v1434_v59 = vld [vmem:[#allocation2 + $0x28] sm:$0xf]  ;;  %v1704_v5 = vshll.u32 %v1648_v39, 16 }
 0x10a   : > { %1290 = vst.msk [vmem:[#allocation2 + $0x88] sm:$0xf] %vm332_vm4, %v11003_v43  ;;  %v1447_v55 = vld [vmem:[#allocation2 + $0x50] sm:$0xf]  ;;  %v12919_v6 = vrot.slane %v2774_v19, 5  ;;  %v12921_v57 = vrot.slane %v2120_v33, 5  ;;  %11064 = vmatprep.subr.bf16.mxu1 %v11952_v54  ;;  %v947_v19 = vpop.f32.mrf.mxu0 }
 0x10b   : > { %v12923_v25 = vrot.slane %v2802_v34, 5  ;;  %1442 = vst.msk [vmem:[#allocation4 + $0xb4] sm:$0xf] %vm332_vm4, %v1434_v59  ;;  %1288 = vst.msk [vmem:[#allocation2 + $0x78] sm:$0xf] %vm332_vm4, %v11001_v52  ;;  %v11006_v14 = vpack.c.bf16 %v1025_v58, %v1025_v58  ;;  %v1023_v15 = vmax.f32 %v945_v48, 0.0  ;;  %1464 = vrot.lane.b32.xlu0 %v1447_v55, %s12468_s17  ;;  %v948_v37 = vadd.f32 %v12800_v20, %v947_v19 }
 0x10c   : > { %v1703_v18 = vrot.slane %v1701_v3, 4  ;;  %v12928_v22 = vld [vmem:[#allocation2 + $0x50] sm:$0xf]  ;;  %v1706_v23 = vrot.slane %v1704_v5, 5  ;;  %v12934_v26 = vrot.slane %v2134_v45, 5  ;;  %v2092_v27 = vshll.u32 %v12908_v46, 16  ;;  %v11780_v36 = vpop.f32.mrf.mxu0 }
 0x10d   : > { %v12930_v21 = vld [vmem:[#allocation2 + $0x50] sm:$0xf]  ;;  %v2395_v24 = vshrl.u32 %v12928_v22, 16  ;;  %v1308_v28 = vshrl.u32 %v11006_v14, 16  ;;  %v1311_v29 = vshll.u32 %v11006_v14, 16  ;;  %v11004_v30 = vpack.c.bf16 %v1023_v15, %v1023_v15  ;;  %v11953_v32 = vld [vmem:[%s15673_s3 + $0x38] sm:$0xff]  }
 0x10e   : > { %v1026_v31 = vmax.f32 %v956_v16, 0.0  ;;  %v1384_v33 = vld [vmem:[#allocation2 + $0xa0] sm:$0xf]  ;;  %v1387_v34 = vld [vmem:[#allocation2 + $0xa4] sm:$0x1]  ;;  %v1707_v38 = vor.u32 %v1706_v23, %v1703_v18  ;;  %v2398_v41 = vshll.u32 %v12928_v22, 16  ;;  %11065 = vmatpush3.bf16.msra.mxu1 %v11953_v32  ;;  %v969_v54 = vadd.f32 %v11780_v36, %v12800_v20  ;;  %v960_v55 = vpop.f32.mrf.mxu0 }
 0x10f   : > { %v2187_v35 = vld [vmem:[#allocation2 + $0x58] sm:$0xf]  ;;  %v1673_v43 = vshrl.u32 %v12930_v21, 16  ;;  %v1310_v44 = vrot.slane %v1308_v28, 7  ;;  %v1292_v39 = vshrl.u32 %v11004_v30, 16  ;;  %v1295_v45 = vshll.u32 %v11004_v30, 16 }
 0x110   : > { %v11007_v52 = vpack.c.bf16 %v1026_v31, %v1026_v31  ;;  %2204 = vrot.lane.b32.xlu1 %v2187_v35, %s12468_s17  ;;  %v2186_v58 = vld [vmem:[#allocation2 + $0x50] sm:$0xf]  ;;  %v1024_v3 = vmax.f32 %v948_v37, 0.0  ;;  %v1453_v59 = vld [vmem:[#allocation2 + $0x80] sm:$0xf]  ;;  %v12949_v0 = vrot.slane %v1707_v38, 4  ;;  %v11781_v37 = vpop.f32.mrf.mxu0 }
 0x111   : > { %v11954_v48 = vld [vmem:[%s15673_s3 + $0x70] sm:$0xff]   ;;  %2202 = vrot.lane.b32.xlu0 %v2186_v58, %s12468_s17  ;;  %v12951_v5 = vrot.slane %v2395_v24, 4  ;;  %v11955_v14 = vld [vmem:[%s15673_s3 + $0x178] sm:$0xff]   ;;  %v1313_v15 = vor.u32 %v1311_v29, %v1310_v44  ;;  %v1314_v16 = vrot.slane %v1310_v44, 4  ;;  %v1294_v18 = vrot.slane %v1292_v39, 7 }
 0x112   : > { %v1316_v19 = vshrl.u32 %v11007_v52, 16  ;;  %11066 = vmatprep.subr.bf16.mxu1 %v11954_v48  ;;  %v11956_v23 = vld [vmem:[%s15673_s3 + $0x30] sm:$0xff]   ;;  %v1319_v31 = vshll.u32 %v11007_v52, 16  ;;  %v11005_v32 = vpack.c.bf16 %v1024_v3, %v1024_v3  ;;  %v1029_v35 = vmax.f32 %v969_v54, 0.0  ;;  %11144 = vmatprep.subr.bf16.mxu0 %v11955_v14  ;;  %v1450_v39 = vld [vmem:[#allocation2 + $0x68] sm:$0xf] }
 0x113   : > { %v1372_v28 = vld [vmem:[#allocation2 + $0x90] sm:$0xf]  ;;  %v1375_v30 = vld [vmem:[#allocation2 + $0x94] sm:$0x1]  ;;  %v961_v24 = vadd.f32 %v12800_v20, %v960_v55  ;;  %v1385_v29 = vsel %vm12833_vm9, %v1313_v15, %v1384_v33  ;;  %v1388_v36 = vsel %vm12582_vm3, %v1314_v16, %v1387_v34  ;;  %v1297_v38 = vor.u32 %v1295_v45, %v1294_v18  ;;  %11067 = vmatpush3.bf16.msra.mxu1 %v11956_v23  ;;  %v11957_v52 = vld [vmem:[%s15673_s3 + $0x138] sm:$0xff]   ;;  %v963_v33 = vpop.f32.mrf.mxu0 }
 0x114   : > { %v1298_v44 = vrot.slane %v1294_v18, 4  ;;  %1476 = vrot.lane.b32.xlu1 %v1453_v59, %s12468_s17  ;;  %1386 = vst [vmem:[#allocation2 + $0xa0] sm:$0xf] %v1385_v29  ;;  %1389 = vst [vmem:[#allocation2 + $0xa4] sm:$0x1] %v1388_v36  ;;  %v1318_v58 = vrot.slane %v1316_v19, 7  ;;  %v11010_v54 = vpack.c.bf16 %v1029_v35, %v1029_v35  ;;  %v972_v16 = vadd.f32 %v11781_v37, %v12800_v20 }
 0x115   : > { %v1300_v48 = vshrl.u32 %v11005_v32, 16  ;;  %v1303_v3 = vshll.u32 %v11005_v32, 16  ;;  %1470 = vrot.lane.b32.xlu0 %v1450_v39, %s12468_s17  ;;  %v11958_v34 = vld [vmem:[%s15673_s3 + $0x68] sm:$0xff]   ;;  %v1373_v45 = vsel %vm12833_vm9, %v1297_v38, %v1372_v28  ;;  %v1027_v15 = vmax.f32 %v961_v24, 0.0  ;;  %11145 = vmatpush3.bf16.msra.mxu0 %v11957_v52  ;;  %v11959_v18 = vld [vmem:[%s15673_s3 + $0x170] sm:$0xff]   ;;  %v11784_v29 = vpop.f32.mrf.mxu0 }
 0x116   : > { %v1376_v59 = vsel %vm12582_vm3, %v1298_v44, %v1375_v30  ;;  %v1390_v55 = vld [vmem:[#allocation2 + $0xa8] sm:$0xf]  ;;  %v1393_v14 = vld [vmem:[#allocation2 + $0xac] sm:$0x1]  ;;  %1374 = vst [vmem:[#allocation2 + $0x90] sm:$0xf] %v1373_v45  ;;  %v1321_v19 = vor.u32 %v1319_v31, %v1318_v58  ;;  %11068 = vmatprep.subr.bf16.mxu1 %v11958_v34  ;;  %v1713_v44 = vsel %vm12677_vm7, %v12949_v0, %v12773_v53 }
 0x117   : > { %1377 = vst [vmem:[#allocation2 + $0x94] sm:$0x1] %v1376_v59  ;;  %v1322_v23 = vrot.slane %v1318_v58, 4  ;;  %v1302_v32 = vrot.slane %v1300_v48, 7  ;;  %v1378_v35 = vld [vmem:[#allocation2 + $0x98] sm:$0xf]  ;;  %v11008_v36 = vpack.c.bf16 %v1027_v15, %v1027_v15  ;;  %11146 = vmatprep.subr.bf16.mxu0 %v11959_v18 }
 0x118   : > { %v1340_v28 = vshrl.u32 %v11010_v54, 16  ;;  %v11960_v30 = vld [vmem:[%s15673_s3 + $0x28] sm:$0xff]   ;;  %v1381_v24 = vld [vmem:[#allocation2 + $0x9c] sm:$0x1]  ;;  %v1343_v37 = vshll.u32 %v11010_v54, 16  ;;  %v1030_v38 = vmax.f32 %v972_v16, 0.0  ;;  %v1391_v39 = vsel %vm12833_vm9, %v1321_v19, %v1390_v55  ;;  %1776 = vrot.lane.b32.xlu1 %v1713_v44, %s12468_s17  ;;  %v976_v54 = vpop.f32.mrf.mxu0 }
 0x119   : > { %v1448_v31 = vld [vmem:[#allocation2 + $0x58] sm:$0xf]  ;;  %v1394_v52 = vsel %vm12582_vm3, %v1322_v23, %v1393_v14  ;;  %v1305_v58 = vor.u32 %v1303_v3, %v1302_v32  ;;  %v1306_v48 = vrot.slane %v1302_v32, 4  ;;  %v11961_v34 = vld [vmem:[%s15673_s3 + $0x130] sm:$0xff]   ;;  %1392 = vst [vmem:[#allocation2 + $0xa8] sm:$0xf] %v1391_v39  ;;  %11069 = vmatpush3.bf16.msra.mxu1 %v11960_v30  ;;  %v964_v23 = vadd.f32 %v12800_v20, %v963_v33 }
 0x11a   : > { %1466 = vrot.lane.b32.xlu0 %v1448_v31, %s12468_s17  ;;  %1395 = vst [vmem:[#allocation2 + $0xac] sm:$0x1] %v1394_v52  ;;  %v1342_v53 = vrot.slane %v1340_v28, 7  ;;  %v1408_v0 = vld [vmem:[#allocation2 + $0xc0] sm:$0xf]  ;;  %v1324_v45 = vshrl.u32 %v11008_v36, 16  ;;  %v11011_v55 = vpack.c.bf16 %v1030_v38, %v1030_v38  ;;  %v985_v32 = vadd.f32 %v11784_v29, %v12800_v20  ;;  %v11785_v28 = vpop.f32.mrf.mxu0  ;;  %11147 = vmatpush3.bf16.msra.mxu0 %v11961_v34 }
 0x11b   : > { %v1327_v59 = vshll.u32 %v11008_v36, 16  ;;  %v11962_v3 = vld [vmem:[%s15673_s3 + $0x60] sm:$0xff]   ;;  %v1379_v14 = vsel %vm12833_vm9, %v1305_v58, %v1378_v35  ;;  %v1382_v15 = vsel %vm12582_vm3, %v1306_v48, %v1381_v24  ;;  %v1396_v18 = vld [vmem:[#allocation2 + $0xb0] sm:$0xf]  ;;  %v1399_v19 = vld [vmem:[#allocation2 + $0xb4] sm:$0x1]  ;;  %v977_v33 = vadd.f32 %v12800_v20, %v976_v54 }
 0x11c   : > { %v1411_v16 = vld [vmem:[#allocation2 + $0xc4] sm:$0x1]  ;;  %1380 = vst [vmem:[#allocation2 + $0x98] sm:$0xf] %v1379_v14  ;;  %1383 = vst [vmem:[#allocation2 + $0x9c] sm:$0x1] %v1382_v15  ;;  %v1345_v30 = vor.u32 %v1343_v37, %v1342_v53  ;;  %11070 = vmatprep.subr.bf16.mxu1 %v11962_v3 }
 0x11d   : > { %v1346_v36 = vrot.slane %v1342_v53, 4  ;;  %v1326_v38 = vrot.slane %v1324_v45, 7  ;;  %v1348_v44 = vshrl.u32 %v11011_v55, 16  ;;  %v1451_v31 = vld [vmem:[#allocation2 + $0x70] sm:$0xf]  ;;  %v11963_v35 = vld [vmem:[%s15673_s3 + $0x168] sm:$0xff]   ;;  %v979_v45 = vpop.f32.mrf.mxu0 }
 0x11e   : > { %v1351_v24 = vshll.u32 %v11011_v55, 16  ;;  %v1028_v39 = vmax.f32 %v964_v23, 0.0  ;;  %v1033_v52 = vmax.f32 %v985_v32, 0.0  ;;  %1472 = vrot.lane.b32.xlu1 %v1451_v31, %s12468_s17  ;;  %v11964_v29 = vld [vmem:[%s15673_s3 + $0x20] sm:$0xff]   ;;  %v11965_v37 = vld [vmem:[%s15673_s3 + $0x128] sm:$0xff]   ;;  %v11966_v58 = vld [vmem:[%s15673_s3 + $0x58] sm:$0xff]   ;;  %v1409_v48 = vsel %vm12833_vm9, %v1345_v30, %v1408_v0  ;;  %11148 = vmatprep.subr.bf16.mxu0 %v11963_v35 }
 0x11f   : > { %v1412_v34 = vsel %vm12582_vm3, %v1346_v36, %v1411_v16  ;;  %v1329_v53 = vor.u32 %v1327_v59, %v1326_v38  ;;  %v1330_v54 = vrot.slane %v1326_v38, 4  ;;  %v11967_v55 = vld [vmem:[%s15673_s3 + $0x160] sm:$0xff]   ;;  %1410 = vst [vmem:[#allocation2 + $0xc0] sm:$0xf] %v1409_v48  ;;  %v1350_v3 = vrot.slane %v1348_v44, 7  ;;  %11071 = vmatpush3.bf16.msra.mxu1 %v11964_v29  ;;  %11149 = vmatpush3.bf16.msra.mxu0 %v11965_v37  ;;  %v11968_v0 = vld [vmem:[%s15673_s3 + $0x18] sm:$0xff]   ;;  %v13039_v31 = vpop.f32.mrf.mxu0 }
 0x120   : > { %1413 = vst [vmem:[#allocation2 + $0xc4] sm:$0x1] %v1412_v34  ;;  %v1414_v14 = vld [vmem:[#allocation2 + $0xc8] sm:$0xf]  ;;  %v11009_v15 = vpack.c.bf16 %v1028_v39, %v1028_v39  ;;  %v11014_v23 = vpack.c.bf16 %v1033_v52, %v1033_v52  ;;  %v1031_v32 = vmax.f32 %v977_v33, 0.0  ;;  %v11969_v59 = vld [vmem:[%s15673_s3 + $0x120] sm:$0xff]   ;;  %v988_v44 = vadd.f32 %v11785_v28, %v12800_v20  ;;  %11072 = vmatprep.subr.bf16.mxu1 %v11966_v58 }
 0x121   : > { %v1397_v16 = vsel %vm12833_vm9, %v1329_v53, %v1396_v18  ;;  %v1400_v30 = vsel %vm12582_vm3, %v1330_v54, %v1399_v19  ;;  %v1417_v36 = vld [vmem:[#allocation2 + $0xcc] sm:$0x1]  ;;  %v2400_v38 = vrot.slane %v2398_v41, 5  ;;  %11150 = vmatprep.subr.bf16.mxu0 %v11967_v55  ;;  %v11970_v35 = vld [vmem:[%s15673_s3 + $0x50] sm:$0xff]   ;;  %v11971_v18 = vld [vmem:[%s15673_s3 + $0x158] sm:$0xff]   ;;  %v1353_v19 = vor.u32 %v1351_v24, %v1350_v3 }
 0x122   : > { %1398 = vst [vmem:[#allocation2 + $0xb0] sm:$0xf] %v1397_v16  ;;  %1401 = vst [vmem:[#allocation2 + $0xb4] sm:$0x1] %v1400_v30  ;;  %v1354_v39 = vrot.slane %v1350_v3, 4  ;;  %v1332_v22 = vshrl.u32 %v11009_v15, 16  ;;  %v11012_v33 = vpack.c.bf16 %v1031_v32, %v1031_v32  ;;  %v1001_v17 = vadd.f32 %v13039_v31, %v12800_v20 }
 0x123   : > { %v1335_v41 = vshll.u32 %v11009_v15, 16  ;;  %1423 = vst.msk [vmem:[#allocation2 + $0xe8] sm:$0xf] %vm332_vm4, %v11014_v23  ;;  %v1650_v28 = vld [vmem:[#allocation2 + $0x68] sm:$0xf]  ;;  %v2401_v29 = vor.u32 %v2400_v38, %v12951_v5  ;;  %v1034_v37 = vmax.f32 %v988_v44, 0.0  ;;  %v1415_v34 = vsel %vm12833_vm9, %v1353_v19, %v1414_v14  ;;  %11073 = vmatpush3.bf16.msra.mxu1 %v11968_v0  ;;  %11151 = vmatpush3.bf16.msra.mxu0 %v11969_v59 }
 0x124   : > { %v1402_v52 = vld [vmem:[#allocation2 + $0xb8] sm:$0xf]  ;;  %v1675_v58 = vrot.slane %v1673_v43, 4  ;;  %v1435_v48 = vld [vmem:[#allocation2 + $0x30] sm:$0xf]  ;;  %v1418_v24 = vsel %vm12582_vm3, %v1354_v39, %v1417_v36  ;;  %v1334_v53 = vrot.slane %v1332_v22, 7  ;;  %v980_v15 = vadd.f32 %v12800_v20, %v979_v45  ;;  %11074 = vmatprep.subr.bf16.mxu1 %v11970_v35  ;;  %11152 = vmatprep.subr.bf16.mxu0 %v11971_v18 }
 0x125   : > { %v1676_v54 = vshll.u32 %v12930_v21, 16  ;;  %v2380_v55 = vld [vmem:[#allocation2 + $0x58] sm:$0xf]  ;;  %v11972_v5 = vld [vmem:[%s15673_s3 + $0x10] sm:$0xff]   ;;  %1443 = vst.msk [vmem:[#allocation4 + $0xd8] sm:$0xf] %vm332_vm4, %v1435_v48  ;;  %v11015_v14 = vpack.c.bf16 %v1034_v37, %v1034_v37  ;;  %v992_v21 = vpop.f32.mrf.mxu0 }
 0x126   : > { %1416 = vst [vmem:[#allocation2 + $0xc8] sm:$0xf] %v1415_v34  ;;  %1419 = vst [vmem:[#allocation2 + $0xcc] sm:$0x1] %v1418_v24  ;;  %v1405_v43 = vld [vmem:[#allocation2 + $0xbc] sm:$0x1]  ;;  %v1337_v59 = vor.u32 %v1335_v41, %v1334_v53 }
 0x127   : > { %1421 = vst.msk [vmem:[#allocation2 + $0xd8] sm:$0xf] %vm332_vm4, %v11012_v33  ;;  %v2402_v3 = vrot.slane %v2401_v29, 4  ;;  %v1715_v23 = vshrl.u32 %v1650_v28, 16  ;;  %v11973_v32 = vld [vmem:[%s15673_s3 + $0x118] sm:$0xff]   ;;  %v11974_v0 = vld [vmem:[%s15673_s3 + $0x48] sm:$0xff]   ;;  %11075 = vmatpush3.bf16.msra.mxu1 %v11972_v5 }
 0x128   : > { %v1338_v16 = vrot.slane %v1334_v53, 4  ;;  %v1678_v30 = vrot.slane %v1676_v54, 5  ;;  %v1718_v36 = vshll.u32 %v1650_v28, 16  ;;  %v11975_v45 = vld [vmem:[%s15673_s3 + $0x150] sm:$0xff]   ;;  %1424 = vst.msk [vmem:[#allocation2 + $0xf0] sm:$0xf] %vm332_vm4, %v11015_v14  ;;  %v1403_v39 = vsel %vm12833_vm9, %v1337_v59, %v1402_v52  ;;  %v11789_v52 = vpop.f32.mrf.mxu0  ;;  %11153 = vmatpush3.bf16.msra.mxu0 %v11973_v32  ;;  %11076 = vmatprep.subr.bf16.mxu1 %v11974_v0 }
 0x129   : > { %v2407_v38 = vsel %vm12677_vm7, %v2402_v3, %v12775_v60  ;;  %v1032_v44 = vmax.f32 %v980_v15, 0.0  ;;  %v1717_v35 = vrot.slane %v1715_v23, 4  ;;  %v2409_v18 = vshrl.u32 %v2380_v55, 16  ;;  %v1656_v19 = vld [vmem:[#allocation2 + $0x80] sm:$0xf]  ;;  %v11976_v60 = vld [vmem:[%s15673_s3 + $0x8] sm:$0xff]   ;;  %11154 = vmatprep.subr.bf16.mxu0 %v11975_v45 }
 0x12a   : > { %v1406_v22 = vsel %vm12582_vm3, %v1338_v16, %v1405_v43  ;;  %2506 = vrot.lane.b32.xlu0 %v2407_v38, %s12468_s17  ;;  %v1679_v41 = vor.u32 %v1678_v30, %v1675_v58  ;;  %v1720_v28 = vrot.slane %v1718_v36, 5  ;;  %v1646_v33 = vld [vmem:[#allocation2 + $0x58] sm:$0xf]  ;;  %1404 = vst [vmem:[#allocation2 + $0xb8] sm:$0xf] %v1403_v39  ;;  %v2412_v48 = vshll.u32 %v2380_v55, 16  ;;  %v995_v38 = vpop.f32.mrf.mxu0 }
 0x12b   : > { %1407 = vst [vmem:[#allocation2 + $0xbc] sm:$0x1] %v1406_v22  ;;  %v11013_v29 = vpack.c.bf16 %v1032_v44, %v1032_v44  ;;  %v2411_v37 = vrot.slane %v2409_v18, 4  ;;  %v11977_v58 = vld [vmem:[%s15673_s3 + $0x110] sm:$0xff]   ;;  %v1757_v53 = vshrl.u32 %v1656_v19, 16  ;;  %v1760_v54 = vshll.u32 %v1656_v19, 16  ;;  %11077 = vmatpush3.bf16.msra.mxu1 %v11976_v60 }
 0x12c   : > { %v1680_v34 = vrot.slane %v1679_v41, 4  ;;  %v1721_v24 = vor.u32 %v1720_v28, %v1717_v35  ;;  %v11978_v5 = vld [vmem:[%s15673_s3 + $0x40] sm:$0xff]   ;;  %v11979_v20 = vld [vmem:[%s15673_s3 + $0x148] sm:$0xff]   ;;  %v2414_v31 = vrot.slane %v2412_v48, 5  ;;  %v1037_v55 = vmax.f32 %v1001_v17, 0.0  ;;  %11155 = vmatpush3.bf16.msra.mxu0 %v11977_v58 }
 0x12d   : > { %1422 = vst.msk [vmem:[#allocation2 + $0xe0] sm:$0xf] %vm332_vm4, %v11013_v29  ;;  %v12404_v43 = vld [vmem:[%s15672_s2] ss:$0 sm:$0xff]  ;;  %v1687_v14 = vshrl.u32 %v1646_v33, 16  ;;  %v1759_v32 = vrot.slane %v1757_v53, 4  ;;  %11078 = vmatprep.subr.bf16.mxu1 %v11978_v5  ;;  %11156 = vmatprep.subr.bf16.mxu0 %v11979_v20 }
 0x12e   : > { %v993_v3 = vadd.f32 %v12404_v43, %v992_v21  ;;  %v1685_v15 = vsel %vm12677_vm7, %v1680_v34, %v12777_v61  ;;  %v1722_v23 = vrot.slane %v1721_v24, 4  ;;  %v1762_v0 = vrot.slane %v1760_v54, 5  ;;  %v1652_v59 = vld [vmem:[#allocation2 + $0x70] sm:$0xf]  ;;  %v11980_v16 = vld [vmem:[%s15673_s3] sm:$0xff]   ;;  %v11981_v61 = vld [vmem:[%s15673_s3 + $0x108] sm:$0xff]  }
 0x12f   : > { %1772 = vrot.lane.b32.xlu1 %v1685_v15, %s12468_s17  ;;  %v2415_v30 = vor.u32 %v2414_v31, %v2411_v37  ;;  %v11018_v36 = vpack.c.bf16 %v1037_v55, %v1037_v55  ;;  %v1689_v21 = vrot.slane %v1687_v14, 4  ;;  %v1690_v18 = vshll.u32 %v1646_v33, 16  ;;  %v1654_v39 = vld [vmem:[#allocation2 + $0x78] sm:$0xf]  ;;  %v11982_v22 = vld [vmem:[%s15673_s3 + $0x140] sm:$0xff]   ;;  %11079 = vmatpush3.bf16.msra.mxu1 %v11980_v16 }
 0x130   : > { %v1035_v45 = vmax.f32 %v993_v3, 0.0  ;;  %v1727_v44 = vsel %vm12677_vm7, %v1722_v23, %v12779_v62  ;;  %v1763_v35 = vor.u32 %v1762_v0, %v1759_v32  ;;  %v1004_v19 = vadd.f32 %v12404_v43, %v11789_v52  ;;  %v2021_v17 = vld [vmem:[#allocation2 + $0x104] sm:$0x1]  ;;  %v2750_v53 = vld [vmem:[#allocation2 + $0xe8] sm:$0xf]  ;;  %11157 = vmatpush3.bf16.msra.mxu0 %v11981_v61 }
 0x131   : > { %1778 = vrot.lane.b32.xlu0 %v1727_v44, %s12468_s17  ;;  %v2416_v41 = vrot.slane %v2415_v30, 4  ;;  %1427 = vst.msk [vmem:[#allocation2 + $0x108] sm:$0xf] %vm332_vm4, %v11018_v36  ;;  %v1729_v60 = vshrl.u32 %v1652_v59, 16  ;;  %v1732_v29 = vshll.u32 %v1652_v59, 16  ;;  %v1692_v62 = vrot.slane %v1690_v18, 5  ;;  %11158 = vmatprep.subr.bf16.mxu0 %v11982_v22 }
 0x132   : > { %v11016_v28 = vpack.c.bf16 %v1035_v45, %v1035_v45  ;;  %v1764_v37 = vrot.slane %v1763_v35, 4  ;;  %v1038_v48 = vmax.f32 %v1004_v19, 0.0  ;;  %v996_v33 = vadd.f32 %v12404_v43, %v995_v38  ;;  %v11983_v54 = vld [vmem:[%s15673_s3 + $0x100] sm:$0xff]   ;;  %v1452_v5 = vld [vmem:[#allocation2 + $0x78] sm:$0xf] }
 0x133   : > { %v2421_v52 = vsel %vm12677_vm7, %v2416_v41, %v12781_v63  ;;  %v1731_v58 = vrot.slane %v1729_v60, 4  ;;  %v1734_v34 = vrot.slane %v1732_v29, 5  ;;  %v1743_v24 = vshrl.u32 %v1654_v39, 16  ;;  %v2014_v43 = vld [vmem:[#allocation2 + $0xe8] sm:$0xf] }
 0x134   : > { %1425 = vst.msk [vmem:[#allocation2 + $0xf8] sm:$0xf] %vm332_vm4, %v11016_v28  ;;  %2508 = vrot.lane.b32.xlu1 %v2421_v52, %s12468_s17  ;;  %v1693_v20 = vor.u32 %v1692_v62, %v1689_v21  ;;  %v11019_v31 = vpack.c.bf16 %v1038_v48, %v1038_v48  ;;  %v1036_v55 = vmax.f32 %v996_v33, 0.0  ;;  %v13126_v63 = vrot.slane %v2092_v27, 5  ;;  %v13128_v3 = vld [vmem:[#allocation2 + $0xfc] sm:$0x1]  ;;  %11159 = vmatpush3.bf16.msra.mxu0 %v11983_v54 }
 0x135   : > { %1474 = vrot.lane.b32.xlu0 %v1452_v5, %s12468_s17  ;;  %v1735_v14 = vor.u32 %v1734_v34, %v1731_v58  ;;  %v1745_v15 = vrot.slane %v1743_v24, 4  ;;  %v1746_v23 = vshll.u32 %v1654_v39, 16  ;;  %v2016_v32 = vld [vmem:[#allocation2 + $0xf0] sm:$0xf]  ;;  %v2106_v0 = vshll.u32 %v2021_v17, 16  ;;  %v11990_v48 = vld [vmem:[%s15673_s3 + $0xf8] sm:$0xff]  }
 0x136   : > { %v1694_v59 = vrot.slane %v1693_v20, 4  ;;  %1428 = vst.msk [vmem:[#allocation2 + $0x110] sm:$0xf] %vm332_vm4, %v11019_v31  ;;  %v11017_v16 = vpack.c.bf16 %v1036_v55, %v1036_v55  ;;  %v2779_v30 = vshrl.u32 %v2750_v53, 16  ;;  %v2782_v36 = vshll.u32 %v2750_v53, 16  ;;  %11104 = vmatprep.subr.bf16.mxu1 %v11990_v48 }
 0x137   : > { %v2010_v45 = vld [vmem:[#allocation2 + $0xd8] sm:$0xf]  ;;  %v1769_v46 = vsel %vm12677_vm7, %v1764_v37, %v12783_v7  ;;  %v1736_v27 = vrot.slane %v1735_v14, 4  ;;  %v1748_v21 = vrot.slane %v1746_v23, 5  ;;  %v2055_v38 = vshrl.u32 %v2014_v43, 16 }
 0x138   : > { %v2540_v61 = vld [vmem:[#allocation2 + $0xa0] sm:$0xf]  ;;  %1784 = vrot.lane.b32.xlu1 %v1769_v46, %s12468_s17  ;;  %v1699_v44 = vsel %vm12677_vm7, %v1694_v59, %v12785_v8  ;;  %1426 = vst.msk [vmem:[#allocation2 + $0x100] sm:$0xf] %vm332_vm4, %v11017_v16  ;;  %v2058_v35 = vshll.u32 %v2014_v43, 16  ;;  %v2069_v18 = vshrl.u32 %v2016_v32, 16 }
 0x139   : > { %v2012_v19 = vld [vmem:[#allocation2 + $0xe0] sm:$0xf]  ;;  %v13140_v39 = vld [vmem:[#allocation2 + $0x10c] sm:$0x1]  ;;  %2548 = vst.msk [vmem:[#allocation4 + $0x3c] sm:$0xf] %vm332_vm4, %v2540_v61  ;;  %1774 = vrot.lane.b32.xlu0 %v1699_v44, %s12468_s17  ;;  %v1749_v7 = vor.u32 %v1748_v21, %v1745_v15  ;;  %v1741_v33 = vsel %vm12677_vm7, %v1736_v27, %v12787_v9 }
 0x13a   : > { %v2072_v22 = vshll.u32 %v2016_v32, 16  ;;  %v2382_v41 = vld [vmem:[#allocation2 + $0x60] sm:$0xf]  ;;  %v13144_v28 = vrot.slane %v2106_v0, 5  ;;  %v2816_v60 = vshll.u32 %v13128_v3, 16  ;;  %v2781_v29 = vrot.slane %v2779_v30, 4 }
 0x13b   : > { %v2784_v8 = vrot.slane %v2782_v36, 5  ;;  %v2027_v37 = vshrl.u32 %v2010_v45, 16  ;;  %v2030_v62 = vshll.u32 %v2010_v45, 16  ;;  %v1750_v17 = vrot.slane %v1749_v7, 4  ;;  %v2748_v5 = vld [vmem:[#allocation2 + $0xe0] sm:$0xf] }
 0x13c   : > { %v2057_v52 = vrot.slane %v2055_v38, 4  ;;  %v2041_v58 = vshrl.u32 %v2012_v19, 16  ;;  %1780 = vrot.lane.b32.xlu1 %v1741_v33, %s12468_s17  ;;  %v2060_v34 = vrot.slane %v2058_v35, 5  ;;  %v2071_v24 = vrot.slane %v2069_v18, 4  ;;  %v2557_v31 = vld [vmem:[#allocation2 + $0xe8] sm:$0xf] }
 0x13d   : > { %v2074_v53 = vrot.slane %v2072_v22, 5  ;;  %v2044_v54 = vshll.u32 %v2012_v19, 16  ;;  %v1755_v20 = vsel %vm12677_vm7, %v1750_v17, %v12789_v10  ;;  %v2423_v55 = vshrl.u32 %v2382_v41, 16  ;;  %v2384_v43 = vld [vmem:[#allocation2 + $0x68] sm:$0xf] }
 0x13e   : > { %v2844_v9 = vshll.u32 %v13140_v39, 16  ;;  %1782 = vrot.lane.b32.xlu0 %v1755_v20, %s12468_s17  ;;  %v2029_v3 = vrot.slane %v2027_v37, 4  ;;  %v2032_v14 = vrot.slane %v2030_v62, 5  ;;  %v2043_v15 = vrot.slane %v2041_v58, 4  ;;  %v1820_v30 = vld [vmem:[#allocation2 + $0xe8] sm:$0xf] }
 0x13f   : > { %v2046_v23 = vrot.slane %v2044_v54, 5  ;;  %v2785_v32 = vor.u32 %v2784_v8, %v2781_v29  ;;  %v2426_v0 = vshll.u32 %v2382_v41, 16  ;;  %v2765_v59 = vshrl.u32 %v2748_v5, 16  ;;  %v2022_v27 = vld [vmem:[#allocation2 + $0x108] sm:$0xf] }
 0x140   : > { %v13159_v16 = vrot.slane %v2816_v60, 5  ;;  %2574 = vrot.lane.b32.xlu1 %v2557_v31, %s12468_s17  ;;  %v2061_v10 = vor.u32 %v2060_v34, %v2057_v52  ;;  %v2075_v36 = vor.u32 %v2074_v53, %v2071_v24  ;;  %v2768_v45 = vshll.u32 %v2748_v5, 16  ;;  %v2024_v35 = vld [vmem:[#allocation2 + $0x110] sm:$0xf]  ;;  %v1818_v41 = vld [vmem:[#allocation2 + $0xd8] sm:$0xf] }
 0x141   : > { %v2437_v46 = vshrl.u32 %v2384_v43, 16  ;;  %v2425_v21 = vrot.slane %v2423_v55, 4  ;;  %v2428_v38 = vrot.slane %v2426_v0, 5  ;;  %v2767_v61 = vrot.slane %v2765_v59, 4  ;;  %v1821_v18 = vld [vmem:[#allocation2 + $0xf0] sm:$0xf] }
 0x142   : > { %v2440_v44 = vshll.u32 %v2384_v43, 16  ;;  %1838 = vrot.lane.b32.xlu0 %v1820_v30, %s12468_s17  ;;  %v2033_v19 = vor.u32 %v2032_v14, %v2029_v3  ;;  %v2047_v39 = vor.u32 %v2046_v23, %v2043_v15  ;;  %v2770_v7 = vrot.slane %v2768_v45, 5  ;;  %v2018_v62 = vld [vmem:[#allocation2 + $0xf8] sm:$0xf]  ;;  %v1804_v58 = vld [vmem:[#allocation2 + $0xa0] sm:$0xf] }
 0x143   : > { %v2439_v22 = vrot.slane %v2437_v46, 4  ;;  %v2786_v60 = vrot.slane %v2785_v32, 4  ;;  %v2111_v8 = vshrl.u32 %v2022_v27, 16  ;;  %v2114_v37 = vshll.u32 %v2022_v27, 16  ;;  %v1819_v34 = vld [vmem:[#allocation2 + $0xe0] sm:$0xf] }
 0x144   : > { %v2442_v29 = vrot.slane %v2440_v44, 5  ;;  %1840 = vrot.lane.b32.xlu1 %v1821_v18, %s12468_s17  ;;  %v13164_v48 = vrot.slane %v2061_v10, 4  ;;  %v2125_v33 = vshrl.u32 %v2024_v35, 16  ;;  %v2128_v17 = vshll.u32 %v2024_v35, 16  ;;  %v2020_v20 = vld [vmem:[#allocation2 + $0x100] sm:$0xf] }
 0x145   : > { %v13166_v52 = vrot.slane %v2844_v9, 5  ;;  %v13168_v24 = vrot.slane %v2075_v36, 4  ;;  %v2429_v53 = vor.u32 %v2428_v38, %v2425_v21  ;;  %v2771_v54 = vor.u32 %v2770_v7, %v2767_v61  ;;  %1812 = vst.msk [vmem:[#allocation4 + $0x50] sm:$0xf] %vm332_vm4, %v1804_v58  ;;  %v1805_v31 = vld [vmem:[#allocation2 + $0xa8] sm:$0xf] }
 0x146   : > { %v2443_v5 = vor.u32 %v2442_v29, %v2439_v22  ;;  %1834 = vrot.lane.b32.xlu0 %v1818_v41, %s12468_s17  ;;  %v13172_v55 = vrot.slane %v2033_v19, 4  ;;  %v13174_v43 = vrot.slane %v2047_v39, 4  ;;  %v2113_v3 = vrot.slane %v2111_v8, 4  ;;  %v2752_v14 = vld [vmem:[#allocation2 + $0xf0] sm:$0xf] }
 0x147   : > { %v2083_v9 = vshrl.u32 %v2018_v62, 16  ;;  %1813 = vst.msk [vmem:[#allocation4 + $0x74] sm:$0xf] %vm332_vm4, %v1805_v31  ;;  %v1802_v15 = vld [vmem:[#allocation2 + $0x90] sm:$0xf]  ;;  %v2791_v32 = vsel %vm12677_vm7, %v2786_v60, %v12813_v47  ;;  %v2116_v0 = vrot.slane %v2114_v37, 5  ;;  %v2067_v36 = vsel %vm12677_vm7, %v13164_v48, %v12817_v50 }
 0x148   : > { %v2556_v23 = vld [vmem:[#allocation2 + $0xe0] sm:$0xf]  ;;  %v2086_v59 = vshll.u32 %v2018_v62, 16  ;;  %1810 = vst.msk [vmem:[#allocation4 + $0x8] sm:$0xf] %vm332_vm4, %v1802_v15  ;;  %1836 = vrot.lane.b32.xlu1 %v1819_v34, %s12468_s17  ;;  %v2127_v45 = vrot.slane %v2125_v33, 4  ;;  %v2081_v50 = vsel %vm12677_vm7, %v13168_v24, %v12819_v51  ;;  %v2039_v18 = vsel %vm12677_vm7, %v13172_v55, %v12821_v56 }
 0x149   : > { %v1803_v30 = vld [vmem:[#allocation2 + $0x98] sm:$0xf]  ;;  %v2130_v46 = vrot.slane %v2128_v17, 5  ;;  %v2085_v27 = vrot.slane %v2083_v9, 4  ;;  %v13188_v47 = vrot.slane %v2429_v53, 4  ;;  %v13190_v38 = vrot.slane %v2771_v54, 4 }
 0x14a   : > { %v2539_v10 = vld [vmem:[#allocation2 + $0x98] sm:$0xf]  ;;  %1811 = vst.msk [vmem:[#allocation4 + $0x2c] sm:$0xf] %vm332_vm4, %v1803_v30  ;;  %v13192_v61 = vrot.slane %v2443_v5, 4  ;;  %v2088_v44 = vrot.slane %v2086_v59, 5  ;;  %2572 = vrot.lane.b32.xlu0 %v2556_v23, %s12468_s17  ;;  %v2053_v41 = vsel %vm12677_vm7, %v13174_v43, %v12826_v1  ;;  %v2117_v60 = vor.u32 %v2116_v0, %v2113_v3 }
 0x14b   : > { %v2754_v21 = vld [vmem:[#allocation2 + $0xf8] sm:$0xf]  ;;  %2547 = vst.msk [vmem:[#allocation4 + $0x18] sm:$0xf] %vm332_vm4, %v2539_v10  ;;  %v1808_v35 = vld [vmem:[#allocation2 + $0xc0] sm:$0xf]  ;;  %v2131_v62 = vor.u32 %v2130_v46, %v2127_v45  ;;  %v2435_v34 = vsel %vm12677_vm7, %v13188_v47, %v12791_v11  ;;  %v2777_v24 = vsel %vm12677_vm7, %v13190_v38, %v12919_v6 }
 0x14c   : > { %v2097_v19 = vshrl.u32 %v2020_v20, 16  ;;  %v2100_v39 = vshll.u32 %v2020_v20, 16  ;;  %v2386_v7 = vld [vmem:[#allocation2 + $0x70] sm:$0xf]  ;;  %1816 = vst.msk [vmem:[#allocation4 + $0xe0] sm:$0xf] %vm332_vm4, %v1808_v35  ;;  %2878 = vrot.lane.b32.xlu1 %v2791_v32, %s12468_s17  ;;  %v2089_v48 = vor.u32 %v2088_v44, %v2085_v27  ;;  %v2449_v53 = vsel %vm12677_vm7, %v13192_v61, %v12793_v13 }
 0x14d   : > { %v1809_v22 = vld [vmem:[#allocation2 + $0xc8] sm:$0xf]  ;;  %v2793_v29 = vshrl.u32 %v2752_v14, 16  ;;  %v2796_v8 = vshll.u32 %v2752_v14, 16  ;;  %v2388_v51 = vld [vmem:[#allocation2 + $0x78] sm:$0xf] }
 0x14e   : > { %1817 = vst.msk [vmem:[#allocation4 + $0x104] sm:$0xf] %vm332_vm4, %v1809_v22  ;;  %v1824_v37 = vld [vmem:[#allocation2 + $0x108] sm:$0xf]  ;;  %v2807_v33 = vshrl.u32 %v2754_v21, 16  ;;  %v2810_v17 = vshll.u32 %v2754_v21, 16 }
 0x14f   : > { %v1825_v58 = vld [vmem:[#allocation2 + $0x110] sm:$0xf]  ;;  %v2451_v54 = vshrl.u32 %v2386_v7, 16  ;;  %v2758_v5 = vld [vmem:[#allocation2 + $0x108] sm:$0xf]  ;;  %1846 = vrot.lane.b32.xlu0 %v1824_v37, %s12468_s17  ;;  %v2099_v31 = vrot.slane %v2097_v19, 4 }
 0x150   : > { %v2390_v20 = vld [vmem:[#allocation2 + $0x80] sm:$0xf]  ;;  %v2102_v3 = vrot.slane %v2100_v39, 5  ;;  %v2454_v9 = vshll.u32 %v2386_v7, 16  ;;  %v2465_v14 = vshrl.u32 %v2388_v51, 16  ;;  %v13223_v23 = vrot.slane %v2117_v60, 4  ;;  %1848 = vrot.lane.b32.xlu1 %v1825_v58, %s12468_s17 }
 0x151   : > { %v1806_v15 = vld [vmem:[#allocation2 + $0xb0] sm:$0xf]  ;;  %v2795_v32 = vrot.slane %v2793_v29, 4  ;;  %v2798_v0 = vrot.slane %v2796_v8, 5  ;;  %v2468_v59 = vshll.u32 %v2388_v51, 16  ;;  %v13227_v10 = vrot.slane %v2131_v62, 4 }
 0x152   : > { %1814 = vst.msk [vmem:[#allocation4 + $0x98] sm:$0xf] %vm332_vm4, %v1806_v15  ;;  %v1807_v30 = vld [vmem:[#allocation2 + $0xb8] sm:$0xf]  ;;  %v13229_v45 = vrot.slane %v2089_v48, 4  ;;  %v2809_v46 = vrot.slane %v2807_v33, 4  ;;  %v2103_v7 = vor.u32 %v2102_v3, %v2099_v31 }
 0x153   : > { %v2812_v27 = vrot.slane %v2810_v17, 5  ;;  %1815 = vst.msk [vmem:[#allocation4 + $0xbc] sm:$0xf] %vm332_vm4, %v1807_v30  ;;  %v2453_v21 = vrot.slane %v2451_v54, 4  ;;  %v2456_v44 = vrot.slane %v2454_v9, 5  ;;  %v2835_v35 = vshrl.u32 %v2758_v5, 16  ;;  %2142 = vrot.lane.b32.xlu0 %v2067_v36, %s12468_s17 }
 0x154   : > { %v2838_v19 = vshll.u32 %v2758_v5, 16  ;;  %v477_v39 = vld [vmem:[#allocation2 + $0x4] sm:$0x1]  ;;  %v2467_v22 = vrot.slane %v2465_v14, 4  ;;  %v2470_v60 = vrot.slane %v2468_v59, 5  ;;  %v2479_v29 = vshrl.u32 %v2390_v20, 16  ;;  %2144 = vrot.lane.b32.xlu1 %v2081_v50, %s12468_s17 }
 0x155   : > { %v369_v8 = vld [vmem:[#allocation2] sm:$0x1]  ;;  %v2799_v51 = vor.u32 %v2798_v0, %v2795_v32  ;;  %v2837_v37 = vrot.slane %v2835_v35, 4  ;;  %v2482_v48 = vshll.u32 %v2390_v20, 16  ;;  %v1822_v58 = vld [vmem:[#allocation2 + $0xf8] sm:$0xf]  ;;  %v2123_v54 = vsel %vm12677_vm7, %v13223_v23, %v12921_v57 }
 0x156   : > { %v2840_v62 = vrot.slane %v2838_v19, 5  ;;  %v592_v33 = vld [vmem:[#allocation3] sm:$0x1]  ;;  %v2137_v36 = vsel %vm12677_vm7, %v13227_v10, %v12934_v26  ;;  %v2813_v5 = vor.u32 %v2812_v27, %v2809_v46  ;;  %v478_v31 = vsel %vm12582_vm3, 0, %v477_v39  ;;  %v2392_v20 = vld [vmem:[#allocation2 + $0x88] sm:$0xf] }
 0x157   : > { %v2756_v17 = vld [vmem:[#allocation2 + $0x100] sm:$0xf]  ;;  %v2457_v3 = vor.u32 %v2456_v44, %v2453_v21  ;;  %v2481_v9 = vrot.slane %v2479_v29, 4  ;;  %v2484_v50 = vrot.slane %v2482_v48, 5  ;;  %479 = vst [vmem:[#allocation2 + $0x4] sm:$0x1] %v478_v31  ;;  %1842 = vrot.lane.b32.xlu0 %v1822_v58, %s12468_s17  ;;  %v2471_v0 = vor.u32 %v2470_v60, %v2467_v22 }
 0x158   : > { %v370_v14 = vsel %vm12582_vm3, 0, %v369_v8  ;;  %v2173_v15 = vld [vmem:[#allocation2 + $0x20] sm:$0xf]  ;;  %v13247_v32 = vrot.slane %v2103_v7, 4  ;;  %v624_v59 = vld [vmem:[#allocation3 + $0x4] sm:$0x1]  ;;  %v2095_v21 = vsel %vm12677_vm7, %v13229_v45, %v13126_v63  ;;  %v2841_v35 = vor.u32 %v2840_v62, %v2837_v37 }
 0x159   : > { %371 = vst [vmem:[#allocation2] sm:$0x1] %v370_v14  ;;  %v2757_v30 = vld [vmem:[#allocation2 + $0x104] sm:$0x1]  ;;  %v2821_v46 = vshrl.u32 %v2756_v17, 16  ;;  %v13254_v44 = vrot.slane %v2799_v51, 4  ;;  %v2485_v48 = vor.u32 %v2484_v50, %v2481_v9 }
 0x15a   : > { %2181 = vst.msk [vmem:[#allocation4 + $0x7c] sm:$0xf] %vm332_vm4, %v2173_v15  ;;  %v1823_v27 = vld [vmem:[#allocation2 + $0x100] sm:$0xf]  ;;  %v15727_v19 = vmov 0  ;;  %v2824_v39 = vshll.u32 %v2756_v17, 16 }
 0x15b   : > { %v15728_v19 = vsel %vm13258_vm12, 4294967295, %v15727_v19  ;;  %v474_v7 = vld [vmem:[#allocation2 + $0x118] sm:$0x1]  ;;  %1844 = vrot.lane.b32.xlu1 %v1823_v27, %s12468_s17  ;;  %v13263_v22 = vrot.slane %v2813_v5, 4  ;;  %v593_v60 = vsel %vm13258_vm12, 0, %v592_v33  ;;  %v2823_v8 = vrot.slane %v2821_v46, 4  ;;  %2138 = vrot.lane.b32.xlu0 %v2039_v18, %s12468_s17 }
 0x15c   : > { %15729 = vst [vmem:[#allocation9_spill] sm:$0xff] %v15728_v19  ;;  %v2493_v51 = vshrl.u32 %v2392_v20, 16  ;;  %v366_v37 = vld [vmem:[#allocation2 + $0x11c] sm:$0x1]  ;;  %v13273_v62 = vrot.slane %v2457_v3, 4  ;;  %v625_v17 = vsel %vm13269_vm13, 0, %v624_v59  ;;  %v2109_v33 = vsel %vm12677_vm7, %v13247_v32, %v13144_v28 }
 0x15d   : > { %594 = vst [vmem:[#allocation3] sm:$0x1] %v593_v60  ;;  %v2826_v58 = vrot.slane %v2824_v39, 5  ;;  %v2760_v5 = vld [vmem:[#allocation2 + $0x110] sm:$0xf]  ;;  %v13287_v31 = vrot.slane %v2471_v0, 4  ;;  %v2819_v46 = vsel %vm12677_vm7, %v13263_v22, %v13159_v16 }
 0x15e   : > { %626 = vst [vmem:[#allocation3 + $0x4] sm:$0x1] %v625_v17  ;;  %v2496_v3 = vshll.u32 %v2392_v20, 16  ;;  %v475_v9 = vsel %vm12582_vm3, 0, %v474_v7  ;;  %v13291_v50 = vrot.slane %v2841_v35, 4  ;;  %v2830_v15 = vshll.u32 %v2757_v30, 16 }
 0x15f   : > { %v2827_v14 = vor.u32 %v2826_v58, %v2823_v8  ;;  %v2495_v59 = vrot.slane %v2493_v51, 4  ;;  %476 = vst [vmem:[#allocation2 + $0x118] sm:$0x1] %v475_v9  ;;  %2140 = vrot.lane.b32.xlu1 %v2053_v41, %s12468_s17  ;;  %v1496_v56 = vld [vmem:[#allocation2 + $0x4] sm:$0x1]  ;;  %v2849_v18 = vshrl.u32 %v2760_v5, 16  ;;  %v2805_v30 = vsel %vm12677_vm7, %v13254_v44, %v12923_v25  ;;  %2510 = vrot.lane.b32.xlu0 %v2435_v34, %s12468_s17  ;;  %v1463_v8 = vpop.permute.xlu0 %1462 }
 0x160   : > { %v2498_v55 = vrot.slane %v2496_v3, 5  ;;  %v2852_v20 = vshll.u32 %v2760_v5, 16  ;;  %v367_v0 = vsel %vm12582_vm3, 0, %v366_v37  ;;  %v2463_v1 = vsel %vm12677_vm7, %v13273_v62, %v12810_v40  ;;  %v1495_v41 = vld [vmem:[#allocation2] sm:$0xf]  ;;  %v12069_v29 = vld [vmem:[%s15675_s5 + $0xc8] sm:$0xff]  }
 0x161   : > { %v13313_v43 = vrot.slane %v2485_v48, 4  ;;  %v1429_v27 = vld [vmem:[#allocation2] sm:$0xf]  ;;  %368 = vst [vmem:[#allocation2 + $0x11c] sm:$0x1] %v367_v0  ;;  %v2477_v35 = vsel %vm12677_vm7, %v13287_v31, %v12828_v2  ;;  %v1524_v39 = vshll.u32 %v1496_v56, 16 }
 0x162   : > { %v1515_v7 = vshrl.u32 %v1495_v41, 16  ;;  %v1518_v60 = vshll.u32 %v1495_v41, 16  ;;  %1437 = vst.msk [vmem:[#allocation4] sm:$0xf] %vm332_vm4, %v1429_v27  ;;  %v2761_v51 = vld [vmem:[#allocation2 + $0x114] sm:$0x1]  ;;  %v2499_v34 = vor.u32 %v2498_v55, %v2495_v59 }
 0x163   : > { %v2189_v37 = vld [vmem:[#allocation2 + $0x68] sm:$0xf]  ;;  %1487 = vst.msk [vmem:[#allocation4] sm:$0xf] %vm1486_vm10, %v1463_v8  ;;  %v13331_v11 = vrot.slane %v2827_v14, 4  ;;  %v13333_v47 = vrot.slane %v2830_v15, 5  ;;  %2876 = vrot.lane.b32.xlu0 %v2777_v24, %s12468_s17 }
 0x164   : > { %v1501_v17 = vld [vmem:[#allocation2 + $0x18] sm:$0xf]  ;;  %2208 = vrot.lane.b32.xlu1 %v2189_v37, %s12468_s17  ;;  %v1517_v58 = vrot.slane %v1515_v7, 4  ;;  %v1520_v5 = vrot.slane %v1518_v60, 5  ;;  %v4202_v3 = vld [vmem:[#allocation3] sm:$0xf] }
 0x165   : > { %v2851_v9 = vrot.slane %v2849_v18, 4  ;;  %v2854_v56 = vrot.slane %v2852_v20, 5  ;;  %v4203_v41 = vld [vmem:[#allocation3 + $0x4] sm:$0x1]  ;;  %v4219_v27 = vshrl.u32 %v4202_v3, 16  ;;  %v4222_v14 = vshll.u32 %v4202_v3, 16 }
 0x166   : > { %v2858_v8 = vshll.u32 %v2761_v51, 16  ;;  %v1526_v15 = vrot.slane %v1524_v39, 5  ;;  %v1521_v59 = vor.u32 %v1520_v5, %v1517_v58  ;;  %v4228_v55 = vshll.u32 %v4203_v41, 16  ;;  %v2762_v18 = vld [vmem:[#allocation2 + $0x118] sm:$0xf] }
 0x167   : > { %v1502_v20 = vld [vmem:[#allocation2 + $0x1c] sm:$0x1]  ;;  %v1557_v7 = vshrl.u32 %v1501_v17, 16  ;;  %v4221_v60 = vrot.slane %v4219_v27, 4  ;;  %v4224_v37 = vrot.slane %v4222_v14, 5  ;;  %v2863_v3 = vshrl.u32 %v2762_v18, 16  ;;  %2150 = vrot.lane.b32.xlu0 %v2123_v54, %s12468_s17 }
 0x168   : > { %v2234_v0 = vld [vmem:[#allocation2 + $0x8] sm:$0xf]  ;;  %2512 = vrot.lane.b32.xlu1 %v2449_v53, %s12468_s17  ;;  %v1522_v6 = vrot.slane %v1521_v59, 4  ;;  %v13356_v38 = vrot.slane %v2499_v34, 4  ;;  %v2855_v24 = vor.u32 %v2854_v56, %v2851_v9  ;;  %v582_v39 = vld [vmem:[#allocation2 + $0x11c] sm:$0x1]  ;;  %v1771_v56 = vpop.permute.xlu1 %1770 }
 0x169   : > { %v2866_v58 = vshll.u32 %v2762_v18, 16  ;;  %v2235_v5 = vld [vmem:[#allocation2 + $0xc] sm:$0x1]  ;;  %v4225_v41 = vor.u32 %v4224_v37, %v4221_v60  ;;  %v13358_v27 = vrot.slane %v4228_v55, 5  ;;  %v583_v14 = vsel %vm12582_vm3, 0, %v582_v39 }
 0x16a   : > { %v2865_v51 = vrot.slane %v2863_v3, 4  ;;  %v1497_v48 = vld [vmem:[#allocation2 + $0x8] sm:$0xf]  ;;  %v1527_v13 = vsel %vm12677_vm7, %v1522_v6, %v1526_v15  ;;  %584 = vst [vmem:[#allocation2 + $0x11c] sm:$0x1] %v583_v14  ;;  %v1559_v53 = vrot.slane %v1557_v7, 4 }
 0x16b   : > { %v2868_v61 = vrot.slane %v2866_v58, 5  ;;  %v1560_v34 = vshll.u32 %v1501_v17, 16  ;;  %v1503_v9 = vld [vmem:[#allocation2 + $0x20] sm:$0xf]  ;;  %1634 = vst.msk [vmem:[#allocation4 + $0x4] sm:$0xf] %vm332_vm4, %v1527_v13  ;;  %2146 = vrot.lane.b32.xlu0 %v2095_v21, %s12468_s17 }
 0x16c   : > { %v4226_v59 = vrot.slane %v4225_v41, 4  ;;  %v1566_v55 = vshll.u32 %v1502_v20, 16  ;;  %v2251_v18 = vshrl.u32 %v2234_v0, 16  ;;  %v2254_v60 = vshll.u32 %v2234_v0, 16  ;;  %v1498_v37 = vld [vmem:[#allocation2 + $0xc] sm:$0x1]  ;;  %2152 = vrot.lane.b32.xlu1 %v2137_v36, %s12468_s17 }
 0x16d   : > { %v13371_v3 = vld [vmem:[#allocation2 + $0x10] sm:$0xf]  ;;  %1794 = vst.msk [vmem:[#allocation4 + $0x4] sm:$0xf] %vm1486_vm10, %v1771_v56  ;;  %v13380_v57 = vrot.slane %v2855_v24, 4  ;;  %v13382_v23 = vrot.slane %v2858_v8, 5  ;;  %v2505_v0 = vsel %vm12677_vm7, %v13356_v38, %v12912_v49  ;;  %v2869_v36 = vor.u32 %v2868_v61, %v2865_v51 }
 0x16e   : > { %v1562_v54 = vrot.slane %v1560_v34, 5  ;;  %v1529_v17 = vshrl.u32 %v1497_v48, 16  ;;  %v2541_v15 = vld [vmem:[#allocation2 + $0xa8] sm:$0xf]  ;;  %v2253_v20 = vrot.slane %v2251_v18, 4  ;;  %v2256_v7 = vrot.slane %v2254_v60, 5 }
 0x16f   : > { %v2260_v6 = vshll.u32 %v2235_v5, 16  ;;  %2549 = vst.msk [vmem:[#allocation4 + $0x60] sm:$0xf] %vm332_vm4, %v2541_v15  ;;  %v2542_v26 = vld [vmem:[#allocation2 + $0xb0] sm:$0xf]  ;;  %v4231_v10 = vsel %vm12677_vm7, %v4226_v59, %v13358_v27  ;;  %v1568_v24 = vrot.slane %v1566_v55, 5 }
 0x170   : > { %v1563_v8 = vor.u32 %v1562_v54, %v1559_v53  ;;  %v1504_v39 = vld [vmem:[#allocation2 + $0x24] sm:$0x1]  ;;  %2550 = vst.msk [vmem:[#allocation4 + $0x84] sm:$0xf] %vm332_vm4, %v2542_v26  ;;  %v2257_v58 = vor.u32 %v2256_v7, %v2253_v20  ;;  %v1531_v5 = vrot.slane %v1529_v17, 4  ;;  %v1532_v41 = vshll.u32 %v1497_v48, 16  ;;  %2148 = vrot.lane.b32.xlu1 %v2109_v33, %s12468_s17 }
 0x171   : > { %v1571_v14 = vshrl.u32 %v1503_v9, 16  ;;  %v2237_v13 = vld [vmem:[#allocation2 + $0x14] sm:$0x1]  ;;  %v1509_v34 = vld [vmem:[#allocation2 + $0x38] sm:$0xf]  ;;  %v1538_v21 = vshll.u32 %v1498_v37, 16 }
 0x172   : > { %v2558_v63 = vld [vmem:[#allocation2 + $0xf0] sm:$0xf]  ;;  %v1564_v45 = vrot.slane %v1563_v8, 4  ;;  %v1574_v51 = vshll.u32 %v1503_v9, 16  ;;  %v2265_v27 = vshrl.u32 %v13371_v3, 16  ;;  %v2258_v56 = vrot.slane %v2257_v58, 4 }
 0x173   : > { %v1510_v61 = vld [vmem:[#allocation2 + $0x3c] sm:$0x1]  ;;  %v4186_v53 = vld [vmem:[#allocation3] sm:$0xf]  ;;  %v2262_v48 = vrot.slane %v2260_v6, 5  ;;  %v1534_v59 = vrot.slane %v1532_v41, 5  ;;  %2576 = vrot.lane.b32.xlu0 %v2558_v63, %s12468_s17 }
 0x174   : > { %v1573_v55 = vrot.slane %v1571_v14, 4  ;;  %v2559_v18 = vld [vmem:[#allocation2 + $0xf8] sm:$0xf]  ;;  %v13407_v60 = vrot.slane %v2869_v36, 4  ;;  %v1569_v28 = vsel %vm12677_vm7, %v1564_v45, %v1568_v24  ;;  %v1576_v32 = vrot.slane %v1574_v51, 5  ;;  %v13411_v37 = vld [vmem:[#allocation4] sm:$0xff] }
 0x175   : > { %v1580_v33 = vshll.u32 %v1504_v39, 16  ;;  %1637 = vst.msk [vmem:[#allocation4 + $0x70] sm:$0xf] %vm332_vm4, %v1569_v28  ;;  %v2263_v9 = vsel %vm12677_vm7, %v2258_v56, %v2262_v48  ;;  %v1535_v54 = vor.u32 %v1534_v59, %v1531_v5  ;;  %v2267_v17 = vrot.slane %v2265_v27, 4  ;;  %v1499_v20 = vld [vmem:[#allocation2 + $0x10] sm:$0xf]  ;;  %2578 = vrot.lane.b32.xlu1 %v2559_v18, %s12468_s17 }
 0x176   : > { %v2268_v15 = vshll.u32 %v13371_v3, 16  ;;  %v1500_v7 = vld [vmem:[#allocation2 + $0x14] sm:$0x1]  ;;  %v2174_v6 = vld [vmem:[#allocation2 + $0x28] sm:$0xf]  ;;  %v1540_v26 = vrot.slane %v1538_v21, 5  ;;  %v1577_v36 = vor.u32 %v1576_v32, %v1573_v55 }
 0x177   : > { %4194 = vst [vmem:[#allocation4] sm:$0xf] %v4186_v53  ;;  %4338 = vst [vmem:[#allocation4 + $0x4] sm:$0xf] %v4231_v10  ;;  %v2274_v8 = vshll.u32 %v2237_v13, 16  ;;  %v1613_v24 = vshrl.u32 %v1509_v34, 16  ;;  %2880 = vrot.lane.b32.xlu0 %v2805_v30, %s12468_s17 }
 0x178   : > { %2370 = vst.msk [vmem:[#allocation4 + $0x14] sm:$0xf] %vm332_vm4, %v2263_v9  ;;  %2182 = vst.msk [vmem:[#allocation4 + $0xa0] sm:$0xf] %vm332_vm4, %v2174_v6  ;;  %v2175_v39 = vld [vmem:[#allocation2 + $0x30] sm:$0xf] }
 0x179   : > { %v1536_v58 = vrot.slane %v1535_v54, 4  ;;  %v2270_v5 = vrot.slane %v2268_v15, 5  ;;  %v1616_v41 = vshll.u32 %v1509_v34, 16  ;;  %v1622_v3 = vshll.u32 %v1510_v61, 16  ;;  %v1505_v14 = vld [vmem:[#allocation2 + $0x28] sm:$0xf]  ;;  %2882 = vrot.lane.b32.xlu1 %v2819_v46, %s12468_s17  ;;  %v2207_v31 = vpop.permute.xlu0 %2206 }
 0x17a   : > { %2183 = vst.msk [vmem:[#allocation4 + $0xc4] sm:$0xf] %vm332_vm4, %v2175_v39  ;;  %v1578_v10 = vrot.slane %v1577_v36, 4  ;;  %v1582_v13 = vrot.slane %v1580_v33, 5  ;;  %v2276_v63 = vrot.slane %v2274_v8, 5  ;;  %v1615_v45 = vrot.slane %v1613_v24, 4 }
 0x17b   : > { %v1506_v21 = vld [vmem:[#allocation2 + $0x2c] sm:$0x1]  ;;  %v2190_v51 = vld [vmem:[#allocation2 + $0x70] sm:$0xf]  ;;  %v6202_v27 = vld [vmem:[#allocation3] sm:$0xf]  ;;  %v1541_v34 = vsel %vm12677_vm7, %v1536_v58, %v1540_v26  ;;  %v2271_v61 = vor.u32 %v2270_v5, %v2267_v17 }
 0x17c   : > { %v1618_v53 = vrot.slane %v1616_v41, 5  ;;  %v1624_v56 = vrot.slane %v1622_v3, 5  ;;  %v1507_v48 = vld [vmem:[#allocation2 + $0x30] sm:$0xf]  ;;  %1635 = vst.msk [vmem:[#allocation4 + $0x28] sm:$0xf] %vm332_vm4, %v1541_v34  ;;  %v1583_v25 = vsel %vm12677_vm7, %v1578_v10, %v1582_v13  ;;  %2210 = vrot.lane.b32.xlu0 %v2190_v51, %s12468_s17 }
 0x17d   : > { %v1543_v44 = vshrl.u32 %v1499_v20, 16  ;;  %v1546_v30 = vshll.u32 %v1499_v20, 16  ;;  %v1552_v59 = vshll.u32 %v1500_v7, 16  ;;  %v1508_v55 = vld [vmem:[#allocation2 + $0x34] sm:$0x1]  ;;  %v2272_v32 = vrot.slane %v2271_v61, 4 }
 0x17e   : > { %v2606_v18 = vld [vmem:[#allocation2 + $0xa0] sm:$0xf]  ;;  %v2543_v28 = vld [vmem:[#allocation2 + $0xb8] sm:$0xf]  ;;  %1638 = vst.msk [vmem:[#allocation4 + $0x94] sm:$0xf] %vm332_vm4, %v1583_v25  ;;  %v1619_v33 = vor.u32 %v1618_v53, %v1615_v45 }
 0x17f   : > { %v1585_v9 = vshrl.u32 %v1505_v14, 16  ;;  %v1588_v54 = vshll.u32 %v1505_v14, 16  ;;  %2551 = vst.msk [vmem:[#allocation4 + $0xa8] sm:$0xf] %vm332_vm4, %v2543_v28  ;;  %v2544_v16 = vld [vmem:[#allocation2 + $0xc0] sm:$0xf]  ;;  %v2277_v26 = vsel %vm12677_vm7, %v2272_v32, %v2276_v63 }
 0x180   : > { %v1545_v22 = vrot.slane %v1543_v44, 4  ;;  %v1548_v46 = vrot.slane %v1546_v30, 5  ;;  %v1554_v17 = vrot.slane %v1552_v59, 5  ;;  %v1594_v15 = vshll.u32 %v1506_v21, 16  ;;  %2552 = vst.msk [vmem:[#allocation4 + $0xcc] sm:$0xf] %vm332_vm4, %v2544_v16  ;;  %2514 = vrot.lane.b32.xlu0 %v2463_v1, %s12468_s17 }
 0x181   : > { %v2176_v20 = vld [vmem:[#allocation2 + $0x38] sm:$0xf]  ;;  %v13442_v6 = vld [vmem:[#allocation4] sm:$0xff]  ;;  %v1620_v36 = vrot.slane %v1619_v33, 4  ;;  %v1587_v8 = vrot.slane %v1585_v9, 4  ;;  %v1590_v24 = vrot.slane %v1588_v54, 5 }
 0x182   : > { %v2191_v7 = vld [vmem:[#allocation2 + $0x78] sm:$0xf]  ;;  %2184 = vst.msk [vmem:[#allocation4 + $0xe8] sm:$0xf] %vm332_vm4, %v2176_v20  ;;  %6210 = vst [vmem:[#allocation4] sm:$0xf] %v6202_v27  ;;  %v1549_v39 = vor.u32 %v1548_v46, %v1545_v22 }
 0x183   : > { %2212 = vrot.lane.b32.xlu1 %v2191_v7, %s12468_s17  ;;  %2371 = vst.msk [vmem:[#allocation4 + $0x38] sm:$0xf] %vm332_vm4, %v2277_v26  ;;  %v1596_v58 = vrot.slane %v1594_v15, 5  ;;  %v1599_v5 = vshrl.u32 %v1507_v48, 16  ;;  %v1602_v41 = vshll.u32 %v1507_v48, 16  ;;  %v1625_v14 = vsel %vm12677_vm7, %v1620_v36, %v1624_v56 }
 0x184   : > { %v2607_v3 = vld [vmem:[#allocation2 + $0xa4] sm:$0x1]  ;;  %v1591_v10 = vor.u32 %v1590_v24, %v1587_v8  ;;  %v1608_v13 = vshll.u32 %v1508_v55, 16  ;;  %v2635_v63 = vshrl.u32 %v2606_v18, 16  ;;  %v1870_v45 = vld [vmem:[#allocation2 + $0xa0] sm:$0xf] }
 0x185   : > { %v1871_v21 = vld [vmem:[#allocation2 + $0xa4] sm:$0x1]  ;;  %1641 = vst.msk [vmem:[#allocation4 + $0x100] sm:$0xf] %vm332_vm4, %v1625_v14  ;;  %v1550_v51 = vrot.slane %v1549_v39, 4  ;;  %v1601_v27 = vrot.slane %v1599_v5, 4 }
 0x186   : > { %v1604_v34 = vrot.slane %v1602_v41, 5  ;;  %v2638_v61 = vshll.u32 %v2606_v18, 16  ;;  %v2177_v53 = vld [vmem:[#allocation2 + $0x40] sm:$0xf]  ;;  %v1592_v48 = vrot.slane %v1591_v10, 4  ;;  %v1610_v25 = vrot.slane %v1608_v13, 5 }
 0x187   : > { %v2560_v56 = vld [vmem:[#allocation2 + $0x100] sm:$0xf]  ;;  %v2637_v44 = vrot.slane %v2635_v63, 4  ;;  %v2644_v30 = vshll.u32 %v2607_v3, 16  ;;  %v1872_v59 = vld [vmem:[#allocation2 + $0xa8] sm:$0xf]  ;;  %2516 = vrot.lane.b32.xlu1 %v2477_v35, %s12468_s17  ;;  %v1555_v40 = vsel %vm12677_vm7, %v1550_v51, %v1554_v17  ;;  %v1469_v35 = vpop.permute.xlu1 %1468 }
 0x188   : > { %2185 = vst.msk [vmem:[#allocation4 + $0x10c] sm:$0xf] %vm332_vm4, %v2177_v53  ;;  %v1605_v62 = vor.u32 %v1604_v34, %v1601_v27  ;;  %v2640_v1 = vrot.slane %v2638_v61, 5  ;;  %v1911_v55 = vshrl.u32 %v1870_v45, 16  ;;  %v1873_v18 = vld [vmem:[#allocation2 + $0xac] sm:$0x1]  ;;  %v1597_v33 = vsel %vm12677_vm7, %v1592_v48, %v1596_v58  ;;  %2580 = vrot.lane.b32.xlu0 %v2560_v56, %s12468_s17  ;;  %v1465_v34 = vpop.permute.xlu0 %1464 }
 0x189   : > { %v1866_v28 = vld [vmem:[#allocation2 + $0x90] sm:$0xf]  ;;  %v2561_v32 = vld [vmem:[#allocation2 + $0x108] sm:$0xf]  ;;  %1636 = vst.msk [vmem:[#allocation4 + $0x4c] sm:$0xf] %vm332_vm4, %v1555_v40 }
 0x18a   : > { %v2646_v9 = vrot.slane %v2644_v30, 5  ;;  %v1914_v54 = vshll.u32 %v1870_v45, 16  ;;  %v1920_v16 = vshll.u32 %v1871_v21, 16  ;;  %v1867_v22 = vld [vmem:[#allocation2 + $0x94] sm:$0x1]  ;;  %v1606_v46 = vrot.slane %v1605_v62, 4 }
 0x18b   : > { %v1868_v2 = vld [vmem:[#allocation2 + $0x98] sm:$0xf]  ;;  %1639 = vst.msk [vmem:[#allocation4 + $0xb8] sm:$0xf] %vm332_vm4, %v1597_v33  ;;  %v2641_v17 = vor.u32 %v2640_v1, %v2637_v44  ;;  %v1913_v15 = vrot.slane %v1911_v55, 4  ;;  %v1925_v20 = vshrl.u32 %v1872_v59, 16  ;;  %2582 = vrot.lane.b32.xlu1 %v2561_v32, %s12468_s17  ;;  %v15732_v62 = vsel %vm12677_vm7, %v13291_v50, %v13166_v52  ;;  %v2205_v33 = vpop.permute.xlu1 %2204 }
 0x18c   : > { %v2545_v7 = vld [vmem:[#allocation2 + $0xc8] sm:$0xf]  ;;  %v2192_v26 = vld [vmem:[#allocation2 + $0x80] sm:$0xf]  ;;  %2228 = vst.msk [vmem:[#allocation4 + $0x58] sm:$0xf] %vm1486_vm10, %v2207_v31  ;;  %v1611_v5 = vsel %vm12677_vm7, %v1606_v46, %v1610_v25  ;;  %v15733_v52 = vsel %vm12677_vm7, %v13313_v43, %v12904_v42 }
 0x18d   : > { %1490 = vst.msk [vmem:[#allocation4 + $0x6c] sm:$0xf] %vm1486_vm10, %v1469_v35  ;;  %v1916_v36 = vrot.slane %v1914_v54, 5  ;;  %v1922_v8 = vrot.slane %v1920_v16, 5  ;;  %v1928_v24 = vshll.u32 %v1872_v59, 16  ;;  %v1934_v39 = vshll.u32 %v1873_v18, 16  ;;  %2214 = vrot.lane.b32.xlu0 %v2192_v26, %s12468_s17  ;;  %v2203_v35 = vpop.permute.xlu0 %2202 }
 0x18e   : > { %v1869_v58 = vld [vmem:[#allocation2 + $0x9c] sm:$0x1]  ;;  %2553 = vst.msk [vmem:[#allocation4 + $0xf0] sm:$0xf] %vm332_vm4, %v2545_v7  ;;  %v2642_v41 = vrot.slane %v2641_v17, 4  ;;  %v1927_v3 = vrot.slane %v1925_v20, 4 }
 0x18f   : > { %v1883_v14 = vshrl.u32 %v1866_v28, 16  ;;  %v2238_v10 = vld [vmem:[#allocation2 + $0x18] sm:$0xf]  ;;  %v13478_v13 = vld [vmem:[#allocation2 + $0x11c] sm:$0x1]  ;;  %v1917_v63 = vor.u32 %v1916_v36, %v1913_v15  ;;  %v1930_v45 = vrot.slane %v1928_v24, 5  ;;  %2886 = vrot.lane.b32.xlu1 %v15732_v62, %s12468_s17 }
 0x190   : > { %1640 = vst.msk [vmem:[#allocation4 + $0xdc] sm:$0xf] %vm332_vm4, %v1611_v5  ;;  %v1936_v21 = vrot.slane %v1934_v39, 5  ;;  %v1886_v51 = vshll.u32 %v1866_v28, 16  ;;  %v2239_v27 = vld [vmem:[#allocation2 + $0x1c] sm:$0x1]  ;;  %v2647_v61 = vsel %vm12677_vm7, %v2642_v41, %v2646_v9  ;;  %v1477_v41 = vpop.permute.xlu1 %1476 }
 0x191   : > { %v1885_v53 = vrot.slane %v1883_v14, 4  ;;  %v1892_v56 = vshll.u32 %v1867_v22, 16  ;;  %v1897_v48 = vshrl.u32 %v1868_v2, 16  ;;  %v2604_v25 = vld [vmem:[#allocation2 + $0x98] sm:$0xf]  ;;  %v1918_v44 = vrot.slane %v1917_v63, 4  ;;  %2518 = vrot.lane.b32.xlu0 %v15733_v52, %s12468_s17 }
 0x192   : > { %1488 = vst.msk [vmem:[#allocation4 + $0x24] sm:$0xf] %vm1486_vm10, %v1465_v34  ;;  %v1931_v30 = vor.u32 %v1930_v45, %v1927_v3  ;;  %v1888_v59 = vrot.slane %v1886_v51, 5  ;;  %v1900_v40 = vshll.u32 %v1868_v2, 16  ;;  %v1906_v18 = vshll.u32 %v1869_v58, 16  ;;  %v1471_v45 = vpop.permute.xlu0 %1470 }
 0x193   : > { %2741 = vst.msk [vmem:[#allocation4 + $0x40] sm:$0xf] %vm332_vm4, %v2647_v61  ;;  %v1894_v1 = vrot.slane %v1892_v56, 5  ;;  %v1899_v55 = vrot.slane %v1897_v48, 4  ;;  %v2279_v28 = vshrl.u32 %v2238_v10, 16  ;;  %v1923_v9 = vsel %vm12677_vm7, %v1918_v44, %v1922_v8 }
 0x194   : > { %v2193_v32 = vld [vmem:[#allocation2 + $0x88] sm:$0xf]  ;;  %v1932_v54 = vrot.slane %v1931_v30, 4  ;;  %v1889_v16 = vor.u32 %v1888_v59, %v1885_v53  ;;  %v1902_v22 = vrot.slane %v1900_v40, 5  ;;  %v2605_v2 = vld [vmem:[#allocation2 + $0x9c] sm:$0x1]  ;;  %v15734_v63 = vsel %vm12677_vm7, %v13331_v11, %v13333_v47 }
 0x195   : > { %v2240_v31 = vld [vmem:[#allocation2 + $0x20] sm:$0xf]  ;;  %2227 = vst.msk [vmem:[#allocation4 + $0x34] sm:$0xf] %vm1486_vm10, %v2205_v33  ;;  %v2872_v50 = vshll.u32 %v13478_v13, 16  ;;  %v2281_v46 = vrot.slane %v2279_v28, 4  ;;  %2216 = vrot.lane.b32.xlu1 %v2193_v32, %s12468_s17  ;;  %2884 = vrot.lane.b32.xlu0 %v15734_v63, %s12468_s17  ;;  %v1777_v33 = vpop.permute.xlu1 %1776 }
 0x196   : > { %2004 = vst.msk [vmem:[#allocation4 + $0x54] sm:$0xf] %vm332_vm4, %v1923_v9  ;;  %v2282_v17 = vshll.u32 %v2238_v10, 16  ;;  %v2288_v15 = vshll.u32 %v2239_v27, 16  ;;  %v2241_v20 = vld [vmem:[#allocation2 + $0x24] sm:$0x1]  ;;  %v1937_v26 = vsel %vm12677_vm7, %v1932_v54, %v1936_v21  ;;  %v1903_v42 = vor.u32 %v1902_v22, %v1899_v55  ;;  %v1467_v9 = vpop.permute.xlu0 %1466 }
 0x197   : > { %v1878_v7 = vld [vmem:[#allocation2 + $0xc0] sm:$0xf]  ;;  %2226 = vst.msk [vmem:[#allocation4 + $0x10] sm:$0xf] %vm1486_vm10, %v2203_v35  ;;  %v1890_v36 = vrot.slane %v1889_v16, 4  ;;  %v2621_v43 = vshrl.u32 %v2604_v25, 16  ;;  %v2861_v22 = vsel %vm12677_vm7, %v13380_v57, %v13382_v23 }
 0x198   : > { %2005 = vst.msk [vmem:[#allocation4 + $0x78] sm:$0xf] %vm332_vm4, %v1937_v26  ;;  %v1908_v8 = vrot.slane %v1906_v18, 5  ;;  %v2284_v24 = vrot.slane %v2282_v17, 5  ;;  %v2624_v39 = vshll.u32 %v2604_v25, 16  ;;  %v2630_v58 = vshll.u32 %v2605_v2, 16 }
 0x199   : > { %v1879_v5 = vld [vmem:[#allocation2 + $0xc4] sm:$0x1]  ;;  %v1895_v3 = vsel %vm12677_vm7, %v1890_v36, %v1894_v1  ;;  %v1904_v14 = vrot.slane %v1903_v42, 4  ;;  %v2623_v10 = vrot.slane %v2621_v43, 4  ;;  %v2293_v13 = vshrl.u32 %v2240_v31, 16  ;;  %2520 = vrot.lane.b32.xlu1 %v2505_v0, %s12468_s17  ;;  %v1473_v36 = vpop.permute.xlu1 %1472 }
 0x19a   : > { %1494 = vst.msk [vmem:[#allocation4 + $0xfc] sm:$0xf] %vm1486_vm10, %v1477_v41  ;;  %v2285_v21 = vor.u32 %v2284_v24, %v2281_v46  ;;  %v2290_v51 = vrot.slane %v2288_v15, 5  ;;  %v2626_v27 = vrot.slane %v2624_v39, 5  ;;  %v2296_v34 = vshll.u32 %v2240_v31, 16 }
 0x19b   : > { %2002 = vst.msk [vmem:[#allocation4 + $0xc] sm:$0xf] %vm332_vm4, %v1895_v3  ;;  %v2562_v61 = vld [vmem:[#allocation2 + $0x110] sm:$0xf]  ;;  %v2563_v53 = vld [vmem:[#allocation2 + $0x118] sm:$0xf]  ;;  %v1909_v56 = vsel %vm12677_vm7, %v1904_v14, %v1908_v8 }
 0x19c   : > { %1491 = vst.msk [vmem:[#allocation4 + $0x90] sm:$0xf] %vm1486_vm10, %v1471_v45  ;;  %v2295_v48 = vrot.slane %v2293_v13, 4  ;;  %v2302_v25 = vshll.u32 %v2241_v20, 16  ;;  %v1967_v11 = vshrl.u32 %v1878_v7, 16  ;;  %v2286_v44 = vrot.slane %v2285_v21, 4  ;;  %2584 = vrot.lane.b32.xlu0 %v2562_v61, %s12468_s17 }
 0x19d   : > { %v1880_v47 = vld [vmem:[#allocation2 + $0xc8] sm:$0xf]  ;;  %2003 = vst.msk [vmem:[#allocation4 + $0x30] sm:$0xf] %vm332_vm4, %v1909_v56  ;;  %v2627_v30 = vor.u32 %v2626_v27, %v2623_v10  ;;  %v2298_v59 = vrot.slane %v2296_v34, 5  ;;  %v1970_v40 = vshll.u32 %v1878_v7, 16  ;;  %2586 = vrot.lane.b32.xlu1 %v2563_v53, %s12468_s17 }
 0x19e   : > { %v1881_v62 = vld [vmem:[#allocation2 + $0xcc] sm:$0x1]  ;;  %v1874_v1 = vld [vmem:[#allocation2 + $0xb0] sm:$0xf]  ;;  %v2874_v55 = vrot.slane %v2872_v50, 5  ;;  %v2632_v18 = vrot.slane %v2630_v58, 5  ;;  %v2291_v49 = vsel %vm12677_vm7, %v2286_v44, %v2290_v51 }
 0x19f   : > { %v1969_v28 = vrot.slane %v1967_v11, 4  ;;  %v1976_v32 = vshll.u32 %v1879_v5, 16  ;;  %v2628_v38 = vrot.slane %v2627_v30, 4  ;;  %v2299_v0 = vor.u32 %v2298_v59, %v2295_v48  ;;  %v1875_v16 = vld [vmem:[#allocation2 + $0xb4] sm:$0x1] }
 0x1a0   : > { %v1972_v54 = vrot.slane %v1970_v40, 5  ;;  %1797 = vst.msk [vmem:[#allocation4 + $0x70] sm:$0xf] %vm1486_vm10, %v1777_v33  ;;  %1489 = vst.msk [vmem:[#allocation4 + $0x48] sm:$0xf] %vm1486_vm10, %v1467_v9  ;;  %v2304_v2 = vrot.slane %v2302_v25, 5  ;;  %v2875_v57 = vsel %vm12677_vm7, %v13407_v60, %v2874_v55  ;;  %2888 = vrot.lane.b32.xlu0 %v2861_v22, %s12468_s17 }
 0x1a1   : > { %2372 = vst.msk [vmem:[#allocation4 + $0x5c] sm:$0xf] %vm332_vm4, %v2291_v49  ;;  %v1978_v31 = vrot.slane %v1976_v32, 5  ;;  %v1876_v52 = vld [vmem:[#allocation2 + $0xb8] sm:$0xf]  ;;  %v2633_v50 = vsel %vm12677_vm7, %v2628_v38, %v2632_v18  ;;  %v2300_v35 = vrot.slane %v2299_v0, 4  ;;  %2890 = vrot.lane.b32.xlu1 %v2875_v57, %s12468_s17 }
 0x1a2   : > { %v1973_v46 = vor.u32 %v1972_v54, %v1969_v28  ;;  %v1981_v17 = vshrl.u32 %v1880_v47, 16  ;;  %v1877_v15 = vld [vmem:[#allocation2 + $0xbc] sm:$0x1]  ;;  %v2608_v20 = vld [vmem:[#allocation2 + $0xa8] sm:$0xf]  ;;  %v1984_v23 = vshll.u32 %v1880_v47, 16 }
 0x1a3   : > { %2740 = vst.msk [vmem:[#allocation4 + $0x1c] sm:$0xf] %vm332_vm4, %v2633_v50  ;;  %v1990_v7 = vshll.u32 %v1881_v62, 16  ;;  %v1939_v26 = vshrl.u32 %v1874_v1, 16  ;;  %v2305_v42 = vsel %vm12677_vm7, %v2300_v35, %v2304_v2  ;;  %v1942_v24 = vshll.u32 %v1874_v1, 16  ;;  %s12409_s17 = sshll.u32 %s12469_s24, 4  ;;  %s12410_s17 = int_to_ptr.vmem [resolvable:$false] %s12409_s17 }
 0x1a4   : > { %v1974_v43 = vrot.slane %v1973_v46, 4  ;;  %v1983_v8 = vrot.slane %v1981_v17, 4  ;;  %v2609_v39 = vld [vmem:[#allocation2 + $0xac] sm:$0x1]  ;;  %1492 = vst.msk [vmem:[#allocation4 + $0xb4] sm:$0xf] %vm1486_vm10, %v1473_v36  ;;  %v2507_v17 = vpop.permute.xlu0 %2506  ;;  %p12412_p0 = scmp.lt.s32.totalorder %s15626_s14, %s12410_s17 }
 0x1a5   : > { %2373 = vst.msk [vmem:[#allocation4 + $0x80] sm:$0xf] %vm332_vm4, %v2305_v42  ;;  %v1986_v60 = vrot.slane %v1984_v23, 5  ;;  %v1992_v58 = vrot.slane %v1990_v7, 5  ;;  %v1941_v5 = vrot.slane %v1939_v26, 4  ;;  %v1948_v41 = vshll.u32 %v1875_v16, 16 }
 0x1a6   : > { %v2610_v3 = vld [vmem:[#allocation2 + $0xb0] sm:$0xf]  ;;  %v1979_v14 = vsel %vm12677_vm7, %v1974_v43, %v1978_v31  ;;  %v1944_v10 = vrot.slane %v1942_v24, 5  ;;  %v1953_v13 = vshrl.u32 %v1876_v52, 16  ;;  %v1956_v63 = vshll.u32 %v1876_v52, 16  ;;  %s12411_s25 = scalar_lea.vmem %s12410_s17, 2048 }
 0x1a7   : > { %v2611_v45 = vld [vmem:[#allocation2 + $0xb4] sm:$0x1]  ;;  %2008 = vst.msk [vmem:[#allocation4 + $0xe4] sm:$0xf] %vm332_vm4, %v1979_v14  ;;  %v1987_v21 = vor.u32 %v1986_v60, %v1983_v8  ;;  %v1950_v51 = vrot.slane %v1948_v41, 5  ;;  %v1962_v27 = vshll.u32 %v1877_v15, 16  ;;  %p12413_p1 = scmp.lt.s32.totalorder %s12411_s25, %s12405_s23 }
 0x1a8   : > { %v2649_v34 = vshrl.u32 %v2608_v20, 16  ;;  %v1945_v61 = vor.u32 %v1944_v10, %v1941_v5  ;;  %v1955_v53 = vrot.slane %v1953_v13, 4  ;;  %v1958_v56 = vrot.slane %v1956_v63, 5  ;;  %v2242_v25 = vld [vmem:[#allocation2 + $0x28] sm:$0xf] }
 0x1a9   : > { %v2652_v48 = vshll.u32 %v2608_v20, 16  ;;  %v1988_v11 = vrot.slane %v1987_v21, 4  ;;  %v1964_v47 = vrot.slane %v1962_v27, 5  ;;  %v2658_v30 = vshll.u32 %v2609_v39, 16  ;;  %v2243_v59 = vld [vmem:[#allocation2 + $0x2c] sm:$0x1]  ;;  %p12414_p2 = por %p12413_p1, %p12412_p0 }
 0x1aa   : > { %v2651_v44 = vrot.slane %v2649_v34, 4  ;;  %v2244_v40 = vld [vmem:[#allocation2 + $0x30] sm:$0xf]  ;;  %v1946_v62 = vrot.slane %v1945_v61, 4  ;;  %v1959_v1 = vor.u32 %v1958_v56, %v1955_v53  ;;  %v2663_v18 = vshrl.u32 %v2610_v3, 16 }
 0x1ab   : > { %v2654_v55 = vrot.slane %v2652_v48, 5  ;;  %v1993_v28 = vsel %vm12677_vm7, %v1988_v11, %v1992_v58  ;;  %v2660_v32 = vrot.slane %v2658_v30, 5  ;;  %v2666_v33 = vshll.u32 %v2610_v3, 16  ;;  %v2245_v49 = vld [vmem:[#allocation2 + $0x34] sm:$0x1]  ;;  %p12415_p3 = pnand %p12414_p2, %p12408_p13 }
 0x1ac   : > { %v2672_v9 = vshll.u32 %v2611_v45, 16  ;;  %2009 = vst.msk [vmem:[#allocation4 + $0x108] sm:$0xf] %vm332_vm4, %v1993_v28  ;;  %v1951_v38 = vsel %vm12677_vm7, %v1946_v62, %v1950_v51  ;;  %v1960_v0 = vrot.slane %v1959_v1, 4  ;;  %v2665_v16 = vrot.slane %v2663_v18, 4  ;;  %v1773_v51 = vpop.permute.xlu1 %1772 }
 0x1ad   : > { %v2655_v54 = vor.u32 %v2654_v55, %v2651_v44  ;;  %v2614_v22 = vld [vmem:[#allocation2 + $0xc0] sm:$0xf]  ;;  %2006 = vst.msk [vmem:[#allocation4 + $0x9c] sm:$0xf] %vm332_vm4, %v1951_v38  ;;  %v2668_v2 = vrot.slane %v2666_v33, 5  ;;  %v2307_v52 = vshrl.u32 %v2242_v25, 16  ;;  %v1779_v44 = vpop.permute.xlu0 %1778 }
 0x1ae   : > { %v2674_v31 = vrot.slane %v2672_v9, 5  ;;  %v2310_v50 = vshll.u32 %v2242_v25, 16  ;;  %v2615_v35 = vld [vmem:[#allocation2 + $0xc4] sm:$0x1]  ;;  %v2246_v46 = vld [vmem:[#allocation2 + $0x38] sm:$0xf]  ;;  %v1965_v15 = vsel %vm12677_vm7, %v1960_v0, %v1964_v47 }
 0x1af   : > { %v2656_v20 = vrot.slane %v2655_v54, 4  ;;  %v2316_v57 = vshll.u32 %v2243_v59, 16  ;;  %v2321_v23 = vshrl.u32 %v2244_v40, 16  ;;  %2530 = vst.msk [vmem:[#allocation4 + $0x14] sm:$0xf] %vm1486_vm10, %v2507_v17  ;;  %v2669_v7 = vor.u32 %v2668_v2, %v2665_v16 }
 0x1b0   : > { %2007 = vst.msk [vmem:[#allocation4 + $0xc0] sm:$0xf] %vm332_vm4, %v1965_v15  ;;  %v2309_v26 = vrot.slane %v2307_v52, 4  ;;  %v2312_v36 = vrot.slane %v2310_v50, 5  ;;  %v2324_v42 = vshll.u32 %v2244_v40, 16  ;;  %v2330_v24 = vshll.u32 %v2245_v49, 16  ;;  %v2509_v54 = vpop.permute.xlu1 %2508 }
 0x1b1   : > { %v2661_v43 = vsel %vm12677_vm7, %v2656_v20, %v2660_v32  ;;  %v2323_v8 = vrot.slane %v2321_v23, 4  ;;  %v2247_v39 = vld [vmem:[#allocation2 + $0x3c] sm:$0x1]  ;;  %v2612_v60 = vld [vmem:[#allocation2 + $0xb8] sm:$0xf]  ;;  %v2670_v58 = vrot.slane %v2669_v7, 4  ;;  %v1475_v52 = vpop.permute.xlu0 %1474 }
 0x1b2   : > { %2742 = vst.msk [vmem:[#allocation4 + $0x64] sm:$0xf] %vm332_vm4, %v2661_v43  ;;  %v2313_v5 = vor.u32 %v2312_v36, %v2309_v26  ;;  %v2326_v41 = vrot.slane %v2324_v42, 5  ;;  %v2691_v3 = vshrl.u32 %v2614_v22, 16  ;;  %v2318_v14 = vrot.slane %v2316_v57, 5 }
 0x1b3   : > { %v2694_v10 = vshll.u32 %v2614_v22, 16  ;;  %v2700_v13 = vshll.u32 %v2615_v35, 16  ;;  %v2335_v63 = vshrl.u32 %v2246_v46, 16  ;;  %v2613_v45 = vld [vmem:[#allocation2 + $0xbc] sm:$0x1]  ;;  %v2675_v27 = vsel %vm12677_vm7, %v2670_v58, %v2674_v31 }
 0x1b4   : > { %v2248_v21 = vld [vmem:[#allocation2 + $0x40] sm:$0xf]  ;;  %v2314_v34 = vrot.slane %v2313_v5, 4  ;;  %v2327_v61 = vor.u32 %v2326_v41, %v2323_v8  ;;  %v2693_v53 = vrot.slane %v2691_v3, 4  ;;  %1795 = vst.msk [vmem:[#allocation4 + $0x28] sm:$0xf] %vm1486_vm10, %v1773_v51 }
 0x1b5   : > { %2743 = vst.msk [vmem:[#allocation4 + $0x88] sm:$0xf] %vm332_vm4, %v2675_v27  ;;  %v2332_v56 = vrot.slane %v2330_v24, 5  ;;  %v2696_v48 = vrot.slane %v2694_v10, 5  ;;  %v2337_v25 = vrot.slane %v2335_v63, 4  ;;  %v2338_v11 = vshll.u32 %v2246_v46, 16  ;;  %v1775_v10 = vpop.permute.xlu0 %1774 }
 0x1b6   : > { %v447_v47 = vld [vmem:[#allocation2 + $0xd0] sm:$0x1]  ;;  %v2319_v30 = vsel %vm12677_vm7, %v2314_v34, %v2318_v14  ;;  %v2328_v59 = vrot.slane %v2327_v61, 4  ;;  %v2344_v40 = vshll.u32 %v2247_v39, 16  ;;  %v2677_v62 = vshrl.u32 %v2612_v60, 16  ;;  %v11991_v41 = vld [vmem:[%s15673_s3 + $0xb8] sm:$0xff]  }
 0x1b7   : > { %v2616_v1 = vld [vmem:[#allocation2 + $0xc8] sm:$0xf]  ;;  %1798 = vst.msk [vmem:[#allocation4 + $0x94] sm:$0xf] %vm1486_vm10, %v1779_v44  ;;  %v2697_v55 = vor.u32 %v2696_v48, %v2693_v53  ;;  %v2702_v18 = vrot.slane %v2700_v13, 5  ;;  %v2340_v28 = vrot.slane %v2338_v11, 5 }
 0x1b8   : > { %2374 = vst.msk [vmem:[#allocation4 + $0xa4] sm:$0xf] %vm332_vm4, %v2319_v30  ;;  %v2680_v32 = vshll.u32 %v2612_v60, 16  ;;  %v2249_v33 = vld [vmem:[#allocation2 + $0x44] sm:$0x1]  ;;  %v2333_v9 = vsel %vm12677_vm7, %v2328_v59, %v2332_v56  ;;  %v2679_v49 = vrot.slane %v2677_v62, 4  ;;  %v1785_v60 = vpop.permute.xlu1 %1784 }
 0x1b9   : > { %v2686_v38 = vshll.u32 %v2613_v45, 16  ;;  %v2349_v0 = vshrl.u32 %v2248_v21, 16  ;;  %2375 = vst.msk [vmem:[#allocation4 + $0xc8] sm:$0xf] %vm332_vm4, %v2333_v9  ;;  %v2698_v16 = vrot.slane %v2697_v55, 4  ;;  %v2341_v22 = vor.u32 %v2340_v28, %v2337_v25  ;;  %v11992_v13 = vld [vmem:[%s15673_s3 + $0xf0] sm:$0xff]  }
 0x1ba   : > { %v2682_v2 = vrot.slane %v2680_v32, 5  ;;  %v13578_v31 = vld [vmem:[#allocation2 + $0xcc] sm:$0x1]  ;;  %2531 = vst.msk [vmem:[#allocation4 + $0x38] sm:$0xf] %vm1486_vm10, %v2509_v54  ;;  %v2346_v50 = vrot.slane %v2344_v40, 5  ;;  %v1783_v32 = vpop.permute.xlu0 %1782 }
 0x1bb   : > { %v2351_v35 = vrot.slane %v2349_v0, 4  ;;  %v2352_v46 = vshll.u32 %v2248_v21, 16  ;;  %v448_v17 = vsel %vm12582_vm3, 0, %v447_v47  ;;  %v362_v15 = vld [vmem:[#allocation2 + $0xd4] sm:$0x1]  ;;  %v2703_v23 = vsel %vm12677_vm7, %v2698_v16, %v2702_v18  ;;  %v2910_v51 = vld [vmem:[#allocation4 + $0x10] sm:$0xff] }
 0x1bc   : > { %v619_v20 = vld [vmem:[#allocation3 + $0x48] sm:$0x1]  ;;  %v651_v57 = vld [vmem:[#allocation3 + $0x4c] sm:$0x1]  ;;  %1493 = vst.msk [vmem:[#allocation4 + $0xd8] sm:$0xf] %vm1486_vm10, %v1475_v52  ;;  %v2683_v26 = vor.u32 %v2682_v2, %v2679_v49  ;;  %v1781_v44 = vpop.permute.xlu1 %1780 }
 0x1bd   : > { %v2342_v7 = vrot.slane %v2341_v22, 4  ;;  %449 = vst [vmem:[#allocation2 + $0xd0] sm:$0x1] %v448_v17  ;;  %v2705_v36 = vshrl.u32 %v2616_v1, 16  ;;  %v2912_v42 = vld [vmem:[#allocation4 + $0x24] sm:$0xff]  ;;  %v2688_v43 = vrot.slane %v2686_v38, 5 }
 0x1be   : > { %2745 = vst.msk [vmem:[#allocation4 + $0xd0] sm:$0xf] %vm332_vm4, %v2703_v23  ;;  %v2354_v8 = vrot.slane %v2352_v46, 5  ;;  %v2358_v24 = vshll.u32 %v2249_v33, 16  ;;  %v2708_v39 = vshll.u32 %v2616_v1, 16  ;;  %v10306_v58 = vcombine.high %v13411_v37, %v2912_v42  ;;  %v11993_v27 = vld [vmem:[%s15673_s3 + $0xb0] sm:$0xff]   ;;  %v1839_v2 = vpop.permute.xlu0 %1838 }
 0x1bf   : > { %v10305_v5 = vcombine.low %v13411_v37, %v2912_v42  ;;  %v2347_v3 = vsel %vm12677_vm7, %v2342_v7, %v2346_v50  ;;  %v2684_v14 = vrot.slane %v2683_v26, 4  ;;  %1801 = vst.msk [vmem:[#allocation4 + $0x100] sm:$0xf] %vm1486_vm10, %v1785_v60  ;;  %v2707_v45 = vrot.slane %v2705_v36, 4  ;;  %1796 = vst.msk [vmem:[#allocation4 + $0x4c] sm:$0xf] %vm1486_vm10, %v1775_v10 }
 0x1c0   : > { %2376 = vst.msk [vmem:[#allocation4 + $0xec] sm:$0xf] %vm332_vm4, %v2347_v3  ;;  %v2355_v63 = vor.u32 %v2354_v8, %v2351_v35  ;;  %v2710_v37 = vrot.slane %v2708_v39, 5  ;;  %v2714_v21 = vshll.u32 %v13578_v31, 16  ;;  %3651 = vmatprep.mubr.bf16.mxu1 %v10306_v58  ;;  %v363_v61 = vsel %vm12582_vm3, 0, %v362_v15  ;;  %v11996_v48 = vld [vmem:[%s15673_s3 + $0xe8] sm:$0xff]   ;;  %v2575_v9 = vpop.permute.xlu1 %2574 }
 0x1c1   : > { %v2689_v34 = vsel %vm12677_vm7, %v2684_v14, %v2688_v43  ;;  %v620_v53 = vsel %vm13258_vm12, 0, %v619_v20  ;;  %v652_v56 = vsel %vm13269_vm13, 0, %v651_v57  ;;  %3652 = vmatmul.mubr.bf16.vlgmr.msra.gmra.mxu1 %v10305_v5  ;;  %v2360_v11 = vrot.slane %v2358_v24, 5  ;;  %364 = vst [vmem:[#allocation2 + $0xd4] sm:$0x1] %v363_v61  ;;  %v2914_v30 = vld [vmem:[#allocation4 + $0x34] sm:$0xff] }
 0x1c2   : > { %2744 = vst.msk [vmem:[#allocation4 + $0xac] sm:$0xf] %vm332_vm4, %v2689_v34  ;;  %v2356_v25 = vrot.slane %v2355_v63, 4  ;;  %v2711_v47 = vor.u32 %v2710_v37, %v2707_v45  ;;  %621 = vst [vmem:[#allocation3 + $0x48] sm:$0x1] %v620_v53  ;;  %11105 = vmatpush3.bf16.msra.mxu1 %v11991_v41  ;;  %v10309_v40 = vcombine.low %v2910_v51, %v2914_v30  ;;  %v2716_v18 = vrot.slane %v2714_v21, 5  ;;  %v1835_v23 = vpop.permute.xlu0 %1834 }
 0x1c3   : > { %653 = vst [vmem:[#allocation3 + $0x4c] sm:$0x1] %v652_v56  ;;  %v11984_v59 = vld [vmem:[#allocation4 + $0x14] ss:$36 sps:$4 sm:$0xff]   ;;  %1799 = vst.msk [vmem:[#allocation4 + $0xb8] sm:$0xf] %vm1486_vm10, %v1781_v44  ;;  %11106 = vmatprep.subr.bf16.mxu1 %v11992_v13 }
 0x1c4   : > { %v2361_v62 = vsel %vm12677_vm7, %v2356_v25, %v2360_v11  ;;  %v2546_v1 = vld [vmem:[#allocation2 + $0xd0] sm:$0xf]  ;;  %v2712_v55 = vrot.slane %v2711_v47, 4  ;;  %3781 = vmatprep.mubr.bf16.mxu0 %v11984_v59  ;;  %1800 = vst.msk [vmem:[#allocation4 + $0xdc] sm:$0xf] %vm1486_vm10, %v1783_v32  ;;  %v2920_v49 = vld [vmem:[#allocation4 + $0x6c] sm:$0xff]  ;;  %v1841_v46 = vpop.permute.xlu1 %1840 }
 0x1c5   : > { %v2618_v28 = vld [vmem:[#allocation2 + $0xd0] sm:$0xf]  ;;  %2377 = vst.msk [vmem:[#allocation4 + $0x110] sm:$0xf] %vm332_vm4, %v2361_v62  ;;  %2554 = vst.msk [vmem:[#allocation4 + $0x114] sm:$0xf] %vm332_vm4, %v2546_v1  ;;  %3782 = vmatmul.mubr.bf16.vlgmr.msra.gmra.mxu0 %v10309_v40 }
 0x1c6   : > { %v2717_v33 = vsel %vm12677_vm7, %v2712_v55, %v2716_v18  ;;  %11107 = vmatpush3.bf16.msra.mxu1 %v11993_v27  ;;  %v11997_v38 = vld [vmem:[%s15673_s3 + $0xa8] sm:$0xff]   ;;  %v2719_v0 = vshrl.u32 %v2618_v28, 16  ;;  %v2722_v54 = vshll.u32 %v2618_v28, 16  ;;  %2597 = vst.msk [vmem:[#allocation4 + $0x3c] sm:$0xf] %vm1486_vm10, %v2575_v9  ;;  %v2916_v16 = vld [vmem:[#allocation4 + $0x48] sm:$0xff]  ;;  %v2573_v39 = vpop.permute.xlu0 %2572 }
 0x1c7   : > { %2746 = vst.msk [vmem:[#allocation4 + $0xf4] sm:$0xf] %vm332_vm4, %v2717_v33  ;;  %v11986_v22 = vld [vmem:[#allocation4 + $0x4c] ss:$36 sps:$4 sm:$0xff]   ;;  %11108 = vmatprep.subr.bf16.mxu1 %v11996_v48  ;;  %v10313_v31 = vcombine.low %v2916_v16, %v2920_v49  ;;  %v12002_v43 = vld [vmem:[%s15673_s3 + $0xd0] sm:$0xff]   ;;  %v12004_v3 = vld [vmem:[%s15673_s3 + $0xc8] sm:$0xff]  }
 0x1c8   : > { %v11998_v52 = vld [vmem:[%s15673_s3 + $0xe0] sm:$0xff]   ;;  %v555_v50 = vld [vmem:[#allocation2 + $0xd4] sm:$0x1]  ;;  %1860 = vst.msk [vmem:[#allocation4 + $0x50] sm:$0xf] %vm1486_vm10, %v1839_v2  ;;  %3659 = vmatprep.mubr.bf16.mxu1 %v11986_v22  ;;  %v2721_v15 = vrot.slane %v2719_v0, 4  ;;  %v1837_v42 = vpop.permute.xlu1 %1836 }
 0x1c9   : > { %v556_v35 = vsel %vm12582_vm3, 0, %v555_v50  ;;  %3660 = vmatmul.mubr.bf16.gmra.mxu1 %v10313_v31  ;;  %v2724_v20 = vrot.slane %v2722_v54, 5  ;;  %1861 = vst.msk [vmem:[#allocation4 + $0x74] sm:$0xf] %vm1486_vm10, %v1841_v46  ;;  %v11999_v57 = vld [vmem:[%s15673_s3 + $0xa0] sm:$0xff]   ;;  %v12001_v26 = vld [vmem:[%s15673_s3 + $0x98] sm:$0xff]  }
 0x1ca   : > { %v11988_v17 = vld [vmem:[#allocation4 + $0x94] ss:$36 sps:$4 sm:$0xff]   ;;  %557 = vst [vmem:[#allocation2 + $0xd4] sm:$0x1] %v556_v35  ;;  %11109 = vmatpush3.bf16.msra.mxu1 %v11997_v38  ;;  %1858 = vst.msk [vmem:[#allocation4 + $0x8] sm:$0xf] %vm1486_vm10, %v1835_v23  ;;  %v1847_v13 = vpop.permute.xlu0 %1846 }
 0x1cb   : > { %3667 = vmatprep.mubr.bf16.mxu1 %v11988_v17  ;;  %11110 = vmatprep.subr.bf16.mxu1 %v11998_v52  ;;  %v2928_v7 = vld [vmem:[#allocation4 + $0xb4] sm:$0xff]  ;;  %v2725_v8 = vor.u32 %v2724_v20, %v2721_v15  ;;  %1859 = vst.msk [vmem:[#allocation4 + $0x2c] sm:$0xf] %vm1486_vm10, %v1837_v42  ;;  %v11994_v24 = vld [vmem:[#allocation4 + $0xdc] ss:$36 sps:$4 sm:$0xff]   ;;  %v12010_v25 = vld [vmem:[%s15673_s3 + $0x1f8] sm:$0xff]  }
 0x1cc   : > { %v2924_v36 = vld [vmem:[#allocation4 + $0x90] sm:$0xff]  ;;  %2596 = vst.msk [vmem:[#allocation4 + $0x18] sm:$0xf] %vm1486_vm10, %v2573_v39  ;;  %v12003_v58 = vld [vmem:[%s15673_s3 + $0x90] sm:$0xff]   ;;  %v2879_v41 = vpop.permute.xlu1 %2878  ;;  %v2932_v63 = vld [vmem:[#allocation4 + $0xd8] sm:$0xff]  ;;  %v15735_v62 = vmov 0 }
 0x1cd   : > { %v10321_v60 = vcombine.low %v2924_v36, %v2928_v7  ;;  %v2726_v14 = vrot.slane %v2725_v8, 4  ;;  %2901 = vst.msk [vmem:[#allocation4 + $0x40] sm:$0xf] %vm1486_vm10, %v2879_v41  ;;  %1864 = vst.msk [vmem:[#allocation4 + $0xe0] sm:$0xf] %vm1486_vm10, %v1847_v13  ;;  %v2936_v37 = vld [vmem:[#allocation4 + $0xfc] sm:$0xff] }
 0x1ce   : > { %11111 = vmatpush3.bf16.msra.mxu1 %v11999_v57  ;;  %v12005_v21 = vld [vmem:[%s15673_s3 + $0x88] sm:$0xff]   ;;  %v12006_v27 = vld [vmem:[%s15673_s3 + $0xc0] sm:$0xff]   ;;  %v2143_v61 = vpop.permute.xlu0 %2142  ;;  %v10329_v53 = vcombine.low %v2932_v63, %v2936_v37  ;;  %v15736_v62 = vsel %vm13682_vm0, 4294967295, %v15735_v62  ;;  %v12011_v49 = vld [vmem:[%s15673_s3 + $0x1b8] sm:$0xff]   ;;  %vm7931_vm3 = vcmask 261120  }
 0x1cf   : > { %11112 = vmatprep.subr.bf16.mxu1 %v12000_v4  ;;  %2164 = vst.msk [vmem:[#allocation4 + $0x54] sm:$0xf] %vm1486_vm10, %v2143_v61  ;;  %v12007_v56 = vld [vmem:[%s15673_s3 + $0x80] sm:$0xff]   ;;  %15737 = vst [vmem:[#allocation10_spill] sm:$0xff] %v15736_v62  ;;  %v12014_v38 = vld [vmem:[%s15673_s3 + $0x1f0] sm:$0xff]  }
 0x1d0   : > { %v1849_v51 = vpop.permute.xlu1 %1848  ;;  %v4346_v47 = vld [vmem:[#allocation3] sm:$0xe]  ;;  %v4347_v44 = vld [vmem:[#allocation3 + $0x4] sm:$0x1]  ;;  %v12015_v52 = vld [vmem:[%s15673_s3 + $0x1b0] sm:$0xff]  }
 0x1d1   : > { %v2619_v5 = vld [vmem:[#allocation2 + $0xd4] sm:$0x1]  ;;  %3668 = vmatmul.mubr.bf16.gmra.mxu1 %v10321_v60  ;;  %1865 = vst.msk [vmem:[#allocation4 + $0x104] sm:$0xf] %vm1486_vm10, %v1849_v51  ;;  %v10409_v1 = vrot.slane %v4346_v47, 9  ;;  %v4383_v55 = vrot.slane %v4347_v44, 5 }
 0x1d2   : > { %v2728_v10 = vshll.u32 %v2619_v5, 16  ;;  %3675 = vmatprep.mubr.bf16.mxu1 %v11994_v24  ;;  %11113 = vmatpush3.bf16.msra.mxu1 %v12001_v26  ;;  %v1843_v11 = vpop.permute.xlu0 %1842  ;;  %v12018_v50 = vld [vmem:[%s15673_s3 + $0x1e8] sm:$0xff]   ;;  %v12020_v23 = vld [vmem:[%s15673_s3 + $0x1e0] sm:$0xff]   ;;  %v12024_v39 = vld [vmem:[%s15673_s3 + $0x1d8] sm:$0xff]  }
 0x1d3   : > { %11114 = vmatprep.subr.bf16.mxu1 %v12002_v43  ;;  %1862 = vst.msk [vmem:[#allocation4 + $0x98] sm:$0xf] %vm1486_vm10, %v1843_v11  ;;  %v4384_v9 = vsel %vm13682_vm0, %v10409_v1, %v4383_v55  ;;  %v12019_v57 = vld [vmem:[%s15673_s3 + $0x1a8] sm:$0xff]   ;;  %v12021_v24 = vld [vmem:[%s15673_s3 + $0x1a0] sm:$0xff]   ;;  %v12025_v5 = vld [vmem:[%s15673_s3 + $0x198] sm:$0xff]  }
 0x1d4   : > { %v2730_v45 = vrot.slane %v2728_v10, 5  ;;  %v2145_v48 = vpop.permute.xlu1 %2144  ;;  %v12028_v41 = vld [vmem:[%s15673_s3 + $0x1d0] sm:$0xff]   ;;  %v12031_v61 = vld [vmem:[%s15673_s3 + $0x188] sm:$0xff]   ;;  %v10433_v62 = vld [vmem:[%s15676_s6] ss:$0 sm:$0xff] }
 0x1d5   : > { %2165 = vst.msk [vmem:[#allocation4 + $0x78] sm:$0xf] %vm1486_vm10, %v2145_v48  ;;  %v12029_v37 = vld [vmem:[%s15673_s3 + $0x190] sm:$0xff]  }
 0x1d6   : > { %v2731_v34 = vsel %vm12677_vm7, %v2726_v14, %v2730_v45  ;;  %11115 = vmatpush3.bf16.msra.mxu1 %v12003_v58  ;;  %v2139_v59 = vpop.permute.xlu0 %2138  ;;  %v2917_v46 = vld [vmem:[#allocation4 + $0x50] sm:$0xff]  ;;  %v2915_v1 = vld [vmem:[#allocation4 + $0x3c] sm:$0xff] }
 0x1d7   : > { %2747 = vst.msk [vmem:[#allocation4 + $0x118] sm:$0xf] %vm332_vm4, %v2731_v34  ;;  %11116 = vmatprep.subr.bf16.mxu1 %v12004_v3 }
 0x1d8   : > { %v1845_v30 = vpop.permute.xlu1 %1844  ;;  %2162 = vst.msk [vmem:[#allocation4 + $0xc] sm:$0xf] %vm1486_vm10, %v2139_v59 }
 0x1d9   : > { %3676 = vmatmul.mubr.bf16.gmra.mxu1 %v10329_v53  ;;  %1863 = vst.msk [vmem:[#allocation4 + $0xbc] sm:$0xf] %vm1486_vm10, %v1845_v30  ;;  %v12034_v53 = vld [vmem:[%s15673_s3 + $0x1c0] sm:$0xff]  }
 0x1da   : > { %11117 = vmatpush3.bf16.msra.mxu1 %v12005_v21  ;;  %v2511_v18 = vpop.permute.xlu0 %2510  ;;  %v12030_v21 = vld [vmem:[%s15673_s3 + $0x1c8] sm:$0xff]   ;;  %v12035_v30 = vld [vmem:[%s15673_s3 + $0x180] sm:$0xff]  }
 0x1db   : > { %11118 = vmatprep.subr.bf16.mxu1 %v12006_v27  ;;  %2532 = vst.msk [vmem:[#allocation4 + $0x5c] sm:$0xf] %vm1486_vm10, %v2511_v18 }
 0x1dc   : > { %v2141_v40 = vpop.permute.xlu1 %2140  ;;  %v12012_v31 = vld [vmem:[#allocation4 + $0x54] ss:$36 sps:$4 sm:$0xff]  }
 0x1dd   : > { %2163 = vst.msk [vmem:[#allocation4 + $0x30] sm:$0xf] %vm1486_vm10, %v2141_v40  ;;  %v2921_v17 = vld [vmem:[#allocation4 + $0x74] sm:$0xff] }
 0x1de   : > { %11119 = vmatpush3.bf16.msra.mxu1 %v12007_v56  ;;  %v2877_v32 = vpop.permute.xlu0 %2876  ;;  %v10315_v36 = vcombine.low %v2917_v46, %v2921_v17 }
 0x1df   : > { %11184 = vmatprep.subr.bf16.mxu1 %v12010_v25  ;;  %v2909_v33 = vld [vmem:[#allocation4 + $0x8] sm:$0xff]  ;;  %2900 = vst.msk [vmem:[#allocation4 + $0x1c] sm:$0xf] %vm1486_vm10, %v2877_v32 }
 0x1e0   : > { %v2209_v28 = vpop.permute.xlu1 %2208  ;;  %4421 = vst [vmem:[#allocation4 + $0x8] sm:$0xf] %v4384_v9 }
 0x1e1   : > { %2229 = vst.msk [vmem:[#allocation4 + $0x7c] sm:$0xf] %vm1486_vm10, %v2209_v28 }
 0x1e2   : > { %v2151_v2 = vpop.permute.xlu0 %2150  ;;  %v2918_v20 = vld [vmem:[#allocation4 + $0x58] sm:$0xff] }
 0x1e3   : > { %2168 = vst.msk [vmem:[#allocation4 + $0xe4] sm:$0xf] %vm1486_vm10, %v2151_v2 }
 0x1e4   : > { %v2513_v0 = vpop.permute.xlu1 %2512  ;;  %v2913_v54 = vld [vmem:[#allocation4 + $0x2c] sm:$0xff] }
 0x1e5   : > { %v12008_v16 = vld [vmem:[#allocation4 + $0xc] ss:$36 sps:$4 sm:$0xff]   ;;  %2533 = vst.msk [vmem:[#allocation4 + $0x80] sm:$0xf] %vm1486_vm10, %v2513_v0  ;;  %v10307_v22 = vcombine.low %v2909_v33, %v2913_v54  ;;  %v4700_v0 = vld [vmem:[#allocation3 + $0x48] sm:$0xf] }
 0x1e6   : > { %3716 = vmatprep.mubr.bf16.mxu1 %v12008_v16  ;;  %v2147_v15 = vpop.permute.xlu0 %2146  ;;  %v12032_v25 = vld [vmem:[#allocation4 + $0x1c] ss:$36 sps:$4 sm:$0xff]   ;;  %v4801_v2 = vshrl.u32 %v4700_v0, 16 }
 0x1e7   : > { %3717 = vmatmul.mubr.bf16.vlgmr.msra.gmra.mxu1 %v10307_v22  ;;  %2166 = vst.msk [vmem:[#allocation4 + $0x9c] sm:$0xf] %vm1486_vm10, %v2147_v15  ;;  %v2911_v59 = vld [vmem:[#allocation4 + $0x18] sm:$0xff] }
 0x1e8   : > { %v2153_v35 = vpop.permute.xlu1 %2152  ;;  %11185 = vmatpush3.bf16.msra.mxu1 %v12011_v49  ;;  %3724 = vmatprep.mubr.bf16.mxu1 %v12012_v31  ;;  %v10311_v9 = vcombine.low %v2911_v59, %v2915_v1  ;;  %v4804_v31 = vshll.u32 %v4700_v0, 16  ;;  %v4803_v17 = vrot.slane %v4801_v2, 4  ;;  %v12046_v1 = vld [vmem:[%s15675_s5 + $0xf8] sm:$0xff]  }
 0x1e9   : > { %2169 = vst.msk [vmem:[#allocation4 + $0x108] sm:$0xf] %vm1486_vm10, %v2153_v35  ;;  %11186 = vmatprep.subr.bf16.mxu1 %v12014_v38  ;;  %v12050_v2 = vld [vmem:[%s15675_s5 + $0x38] sm:$0xff]  }
 0x1ea   : > { %v2577_v43 = vpop.permute.xlu0 %2576  ;;  %v2933_v56 = vld [vmem:[#allocation4 + $0xe0] sm:$0xff]  ;;  %v4806_v15 = vrot.slane %v4804_v31, 5 }
 0x1eb   : > { %2598 = vst.msk [vmem:[#allocation4 + $0x60] sm:$0xf] %vm1486_vm10, %v2577_v43  ;;  %v12051_v31 = vld [vmem:[%s15675_s5 + $0xb0] sm:$0xff]  }
 0x1ec   : > { %v2149_v4 = vpop.permute.xlu1 %2148  ;;  %11187 = vmatpush3.bf16.msra.mxu1 %v12015_v52  ;;  %v2922_v7 = vld [vmem:[#allocation4 + $0x7c] sm:$0xff] }
 0x1ed   : > { %v12016_v26 = vld [vmem:[#allocation4 + $0x5c] ss:$36 sps:$4 sm:$0xff]   ;;  %2167 = vst.msk [vmem:[#allocation4 + $0xc0] sm:$0xf] %vm1486_vm10, %v2149_v4  ;;  %11188 = vmatprep.subr.bf16.mxu1 %v12018_v50  ;;  %v10317_v42 = vcombine.low %v2918_v20, %v2922_v7  ;;  %v4807_v7 = vor.u32 %v4806_v15, %v4803_v17 }
 0x1ee   : > { %3789 = vmatprep.mubr.bf16.mxu0 %v12016_v26  ;;  %v2881_v60 = vpop.permute.xlu0 %2880  ;;  %v2925_v58 = vld [vmem:[#allocation4 + $0x98] sm:$0xff] }
 0x1ef   : > { %3725 = vmatmul.mubr.bf16.gmra.mxu1 %v10315_v36  ;;  %3790 = vmatmul.mubr.bf16.gmra.mxu0 %v10317_v42  ;;  %2902 = vst.msk [vmem:[#allocation4 + $0x64] sm:$0xf] %vm1486_vm10, %v2881_v60  ;;  %v4701_v20 = vld [vmem:[#allocation3 + $0x4c] sm:$0x1] }
 0x1f0   : > { %v2579_v8 = vpop.permute.xlu1 %2578  ;;  %11189 = vmatpush3.bf16.msra.mxu1 %v12019_v57  ;;  %v12026_v13 = vld [vmem:[#allocation4 + $0xe4] ss:$36 sps:$4 sm:$0xff]   ;;  %v6712_v57 = vld [vmem:[#allocation3 + $0x48] sm:$0xf]  ;;  %v4810_v26 = vshll.u32 %v4701_v20, 16 }
 0x1f1   : > { %2599 = vst.msk [vmem:[#allocation4 + $0x84] sm:$0xf] %vm1486_vm10, %v2579_v8  ;;  %11190 = vmatprep.subr.bf16.mxu1 %v12020_v23  ;;  %v2937_v27 = vld [vmem:[#allocation4 + $0x104] sm:$0xff]  ;;  %v6813_v36 = vshrl.u32 %v6712_v57, 16  ;;  %v6816_v42 = vshll.u32 %v6712_v57, 16 }
 0x1f2   : > { %v2211_v45 = vpop.permute.xlu0 %2210  ;;  %v10331_v11 = vcombine.low %v2933_v56, %v2937_v27 }
 0x1f3   : > { %2230 = vst.msk [vmem:[#allocation4 + $0xa0] sm:$0xf] %vm1486_vm10, %v2211_v45 }
 0x1f4   : > { %v2883_v3 = vpop.permute.xlu1 %2882  ;;  %11191 = vmatpush3.bf16.msra.mxu1 %v12021_v24  ;;  %v2929_v14 = vld [vmem:[#allocation4 + $0xbc] sm:$0xff] }
 0x1f5   : > { %v12022_v10 = vld [vmem:[#allocation4 + $0x9c] ss:$36 sps:$4 sm:$0xff]   ;;  %2903 = vst.msk [vmem:[#allocation4 + $0x88] sm:$0xf] %vm1486_vm10, %v2883_v3  ;;  %11192 = vmatprep.subr.bf16.mxu1 %v12024_v39  ;;  %v10323_v63 = vcombine.low %v2925_v58, %v2929_v14  ;;  %v4808_v58 = vrot.slane %v4807_v7, 4  ;;  %v6818_v3 = vrot.slane %v6816_v42, 5 }
 0x1f6   : > { %3732 = vmatprep.mubr.bf16.mxu1 %v12022_v10  ;;  %v2515_v34 = vpop.permute.xlu0 %2514  ;;  %v2919_v52 = vld [vmem:[#allocation4 + $0x60] sm:$0xff]  ;;  %v6713_v14 = vld [vmem:[#allocation3 + $0x4c] sm:$0x1]  ;;  %v4677_v10 = vld [vmem:[#allocation3 + $0x48] sm:$0xf] }
 0x1f7   : > { %3733 = vmatmul.mubr.bf16.gmra.mxu1 %v10323_v63  ;;  %2534 = vst.msk [vmem:[#allocation4 + $0xa4] sm:$0xf] %vm1486_vm10, %v2515_v34  ;;  %v6822_v45 = vshll.u32 %v6713_v14, 16  ;;  %v12054_v7 = vld [vmem:[%s15675_s5 + $0x30] sm:$0xff]   ;;  %v12057_v42 = vld [vmem:[%s15675_s5 + $0xe0] sm:$0xff]  }
 0x1f8   : > { %v2213_v51 = vpop.permute.xlu1 %2212  ;;  %11193 = vmatpush3.bf16.msra.mxu1 %v12025_v5  ;;  %3740 = vmatprep.mubr.bf16.mxu1 %v12026_v13  ;;  %v4812_v5 = vrot.slane %v4810_v26, 5  ;;  %v12055_v26 = vld [vmem:[%s15675_s5 + $0xa8] sm:$0xff]  }
 0x1f9   : > { %2231 = vst.msk [vmem:[#allocation4 + $0xc4] sm:$0xf] %vm1486_vm10, %v2213_v51  ;;  %11194 = vmatprep.subr.bf16.mxu1 %v12028_v41  ;;  %v6815_v41 = vrot.slane %v6813_v36, 4  ;;  %v12056_v36 = vld [vmem:[%s15675_s5 + $0x68] sm:$0xff]  }
 0x1fa   : > { %v2581_v47 = vpop.permute.xlu0 %2580  ;;  %v4813_v13 = vsel %vm12677_vm7, %v4808_v58, %v4812_v5 }
 0x1fb   : > { %2600 = vst.msk [vmem:[#allocation4 + $0xa8] sm:$0xf] %vm1486_vm10, %v2581_v47  ;;  %v6819_v63 = vor.u32 %v6818_v3, %v6815_v41 }
 0x1fc   : > { %v2517_v48 = vpop.permute.xlu1 %2516  ;;  %11195 = vmatpush3.bf16.msra.mxu1 %v12029_v37  ;;  %v12038_v38 = vld [vmem:[#allocation4 + $0x64] ss:$36 sps:$4 sm:$0xff]  }
 0x1fd   : > { %2535 = vst.msk [vmem:[#allocation4 + $0xc8] sm:$0xf] %vm1486_vm10, %v2517_v48  ;;  %11196 = vmatprep.subr.bf16.mxu1 %v12030_v21  ;;  %v2923_v16 = vld [vmem:[#allocation4 + $0x84] sm:$0xff]  ;;  %v6820_v34 = vrot.slane %v6819_v63, 4  ;;  %v595_v48 = vld [vmem:[#allocation3 + $0x8] sm:$0x1] }
 0x1fe   : > { %v2926_v18 = vld [vmem:[#allocation4 + $0xa0] sm:$0xff]  ;;  %v10319_v35 = vcombine.low %v2919_v52, %v2923_v16  ;;  %v12059_v63 = vld [vmem:[%s15675_s5 + $0xa0] sm:$0xff]  }
 0x1ff   : > { %3741 = vmatmul.mubr.bf16.gmra.mxu1 %v10331_v11  ;;  %v2215_v40 = vpop.permute.xlu0 %2214  ;;  %v596_v11 = vsel %vm13258_vm12, 0, %v595_v48  ;;  %v12052_v52 = vld [vmem:[%s15675_s5 + $0x70] sm:$0xff]  }
 0x200   : > { %v2583_v44 = vpop.permute.xlu1 %2582  ;;  %11197 = vmatpush3.bf16.msra.mxu1 %v12031_v61  ;;  %3846 = vmatprep.mubr.bf16.mxu1 %v12032_v25  ;;  %2232 = vst.msk [vmem:[#allocation4 + $0xe8] sm:$0xf] %vm1486_vm10, %v2215_v40  ;;  %v6824_v61 = vrot.slane %v6822_v45, 5  ;;  %v627_v25 = vld [vmem:[#allocation3 + $0xc] sm:$0x1]  ;;  %v12060_v45 = vld [vmem:[%s15675_s5 + $0x60] sm:$0xff]  }
 0x201   : > { %2601 = vst.msk [vmem:[#allocation4 + $0xcc] sm:$0xf] %vm1486_vm10, %v2583_v44  ;;  %11198 = vmatprep.subr.bf16.mxu1 %v12034_v53  ;;  %v628_v47 = vsel %vm13269_vm13, 0, %v627_v25  ;;  %597 = vst [vmem:[#allocation3 + $0x8] sm:$0x1] %v596_v11  ;;  %v12062_v11 = vld [vmem:[%s15675_s5 + $0x20] sm:$0xff]  }
 0x202   : > { %v6825_v53 = vsel %vm12677_vm7, %v6820_v34, %v6824_v61  ;;  %629 = vst [vmem:[#allocation3 + $0xc] sm:$0x1] %v628_v47  ;;  %v598_v44 = vld [vmem:[#allocation3 + $0x10] sm:$0x1]  ;;  %v12063_v47 = vld [vmem:[%s15675_s5 + $0x98] sm:$0xff]  }
 0x203   : > { %v2519_v49 = vpop.permute.xlu0 %2518  ;;  %v599_v59 = vsel %vm13258_vm12, 0, %v598_v44  ;;  %v12064_v44 = vld [vmem:[%s15675_s5 + $0x58] sm:$0xff]  }
 0x204   : > { %v2887_v55 = vpop.permute.xlu1 %2886  ;;  %11199 = vmatpush3.bf16.msra.mxu1 %v12035_v30  ;;  %v2930_v28 = vld [vmem:[#allocation4 + $0xc4] sm:$0xff]  ;;  %2536 = vst.msk [vmem:[#allocation4 + $0xec] sm:$0xf] %vm1486_vm10, %v2519_v49  ;;  %600 = vst [vmem:[#allocation3 + $0x10] sm:$0x1] %v599_v59 }
 0x205   : > { %v12036_v32 = vld [vmem:[#allocation4 + $0xa4] ss:$36 sps:$4 sm:$0xff]   ;;  %2905 = vst.msk [vmem:[#allocation4 + $0xd0] sm:$0xf] %vm1486_vm10, %v2887_v55  ;;  %v10325_v33 = vcombine.low %v2926_v18, %v2930_v28  ;;  %v633_v18 = vld [vmem:[#allocation3 + $0x1c] sm:$0x1]  ;;  %11264 = vmatprep.subr.bf16.mxu1 %v12046_v1 }
 0x206   : > { %3797 = vmatprep.mubr.bf16.mxu0 %v12036_v32  ;;  %v630_v30 = vld [vmem:[#allocation3 + $0x14] sm:$0x1]  ;;  %v601_v55 = vld [vmem:[#allocation3 + $0x18] sm:$0x1]  ;;  %v634_v32 = vsel %vm13269_vm13, 0, %v633_v18 }
 0x207   : > { %3798 = vmatmul.mubr.bf16.gmra.mxu0 %v10325_v33  ;;  %3847 = vmatmul.mubr.bf16.vlgmr.msra.gmra.mxu1 %v10311_v9  ;;  %v2885_v22 = vpop.permute.xlu0 %2884  ;;  %v631_v40 = vsel %vm13269_vm13, 0, %v630_v30  ;;  %v602_v28 = vsel %vm13258_vm12, 0, %v601_v55  ;;  %635 = vst [vmem:[#allocation3 + $0x1c] sm:$0x1] %v634_v32  ;;  %v12047_v33 = vld [vmem:[%s15675_s5 + $0xb8] sm:$0xff]   ;;  %v12049_v49 = vld [vmem:[%s15675_s5 + $0xf0] sm:$0xff]  }
 0x208   : > { %v2217_v54 = vpop.permute.xlu1 %2216  ;;  %3854 = vmatprep.mubr.bf16.mxu1 %v12038_v38  ;;  %2904 = vst.msk [vmem:[#allocation4 + $0xac] sm:$0xf] %vm1486_vm10, %v2885_v22  ;;  %v12045_v60 = vld [vmem:[#allocation4 + $0xa8] ss:$36 sps:$4 sm:$0xff]   ;;  %632 = vst [vmem:[#allocation3 + $0x14] sm:$0x1] %v631_v40  ;;  %11265 = vmatpush3.bf16.msra.mxu1 %v12047_v33 }
 0x209   : > { %2233 = vst.msk [vmem:[#allocation4 + $0x10c] sm:$0xf] %vm1486_vm10, %v2217_v54  ;;  %603 = vst [vmem:[#allocation3 + $0x18] sm:$0x1] %v602_v28  ;;  %v12048_v9 = vld [vmem:[%s15675_s5 + $0x78] sm:$0xff]   ;;  %11266 = vmatprep.subr.bf16.mxu1 %v12049_v49  ;;  %v12065_v30 = vld [vmem:[%s15675_s5 + $0xd0] sm:$0xff]  }
 0x20a   : > { %v604_v38 = vld [vmem:[#allocation3 + $0x20] sm:$0x1]  ;;  %11224 = vmatprep.subr.bf16.mxu0 %v12048_v9  ;;  %v636_v54 = vld [vmem:[#allocation3 + $0x24] sm:$0x1]  ;;  %v12066_v28 = vld [vmem:[%s15675_s5 + $0x18] sm:$0xff]  }
 0x20b   : > { %v605_v0 = vsel %vm13258_vm12, 0, %v604_v38  ;;  %v637_v16 = vsel %vm13269_vm13, 0, %v636_v54  ;;  %11225 = vmatpush3.bf16.msra.mxu0 %v12050_v2  ;;  %v616_v59 = vld [vmem:[#allocation3 + $0x40] sm:$0x1]  ;;  %v648_v40 = vld [vmem:[#allocation3 + $0x44] sm:$0x1] }
 0x20c   : > { %v2521_v50 = vpop.permute.xlu1 %2520  ;;  %606 = vst [vmem:[#allocation3 + $0x20] sm:$0x1] %v605_v0  ;;  %638 = vst [vmem:[#allocation3 + $0x24] sm:$0x1] %v637_v16  ;;  %11267 = vmatpush3.bf16.msra.mxu1 %v12051_v31  ;;  %11226 = vmatprep.subr.bf16.mxu0 %v12052_v52  ;;  %v617_v55 = vsel %vm13258_vm12, 0, %v616_v59  ;;  %v649_v18 = vsel %vm13269_vm13, 0, %v648_v40 }
 0x20d   : > { %2537 = vst.msk [vmem:[#allocation4 + $0x110] sm:$0xf] %vm1486_vm10, %v2521_v50  ;;  %v12053_v50 = vld [vmem:[%s15675_s5 + $0xe8] sm:$0xff]   ;;  %618 = vst [vmem:[#allocation3 + $0x40] sm:$0x1] %v617_v55  ;;  %v12067_v32 = vld [vmem:[%s15675_s5 + $0x90] sm:$0xff]  }
 0x20e   : > { %v2585_v46 = vpop.permute.xlu0 %2584  ;;  %11268 = vmatprep.subr.bf16.mxu1 %v12053_v50  ;;  %650 = vst [vmem:[#allocation3 + $0x44] sm:$0x1] %v649_v18  ;;  %v12068_v33 = vld [vmem:[%s15675_s5 + $0x50] sm:$0xff]   ;;  %v12071_v38 = vld [vmem:[%s15675_s5 + $0x88] sm:$0xff]   ;;  %v12073_v54 = vld [vmem:[%s15675_s5 + $0xc0] sm:$0xff]  }
 0x20f   : > { %2602 = vst.msk [vmem:[#allocation4 + $0xf0] sm:$0xf] %vm1486_vm10, %v2585_v46  ;;  %3855 = vmatmul.mubr.bf16.gmra.mxu1 %v10319_v35  ;;  %v12040_v43 = vld [vmem:[#allocation4 + $0xac] ss:$36 sps:$4 sm:$0xff]   ;;  %v607_v35 = vld [vmem:[#allocation3 + $0x28] sm:$0x1]  ;;  %11227 = vmatpush3.bf16.msra.mxu0 %v12054_v7 }
 0x210   : > { %v2587_v23 = vpop.permute.xlu1 %2586  ;;  %3862 = vmatprep.mubr.bf16.mxu1 %v12040_v43  ;;  %v12044_v39 = vld [vmem:[#allocation4 + $0xe8] ss:$36 sps:$4 sm:$0xff]   ;;  %v639_v46 = vld [vmem:[#allocation3 + $0x2c] sm:$0x1]  ;;  %v608_v15 = vsel %vm13258_vm12, 0, %v607_v35  ;;  %11269 = vmatpush3.bf16.msra.mxu1 %v12055_v26  ;;  %v12070_v49 = vld [vmem:[%s15675_s5 + $0x10] sm:$0xff]  }
 0x211   : > { %2603 = vst.msk [vmem:[#allocation4 + $0x114] sm:$0xf] %vm1486_vm10, %v2587_v23  ;;  %v640_v20 = vsel %vm13269_vm13, 0, %v639_v46  ;;  %609 = vst [vmem:[#allocation3 + $0x28] sm:$0x1] %v608_v15  ;;  %11228 = vmatprep.subr.bf16.mxu0 %v12056_v36  ;;  %11270 = vmatprep.subr.bf16.mxu1 %v12057_v42  ;;  %v12072_v0 = vld [vmem:[%s15675_s5 + $0x48] sm:$0xff]  }
 0x212   : > { %v2889_v4 = vpop.permute.xlu0 %2888  ;;  %641 = vst [vmem:[#allocation3 + $0x2c] sm:$0x1] %v640_v20  ;;  %v12074_v31 = vld [vmem:[%s15675_s5 + $0x8] sm:$0xff]   ;;  %v12075_v52 = vld [vmem:[%s15675_s5 + $0x80] sm:$0xff]   ;;  %v12080_v35 = vld [vmem:[%s15675_s5 + $0x1f8] sm:$0xff]  }
 0x213   : > { %2906 = vst.msk [vmem:[#allocation4 + $0xf4] sm:$0xf] %vm1486_vm10, %v2889_v4  ;;  %v12078_v50 = vld [vmem:[%s15675_s5 + $0x40] sm:$0xff]   ;;  %v12083_v7 = vld [vmem:[%s15675_s5 + $0x178] sm:$0xff]  }
 0x214   : > { %v2891_v8 = vpop.permute.xlu1 %2890  ;;  %v12042_v24 = vld [vmem:[#allocation4 + $0xec] ss:$36 sps:$4 sm:$0xff]   ;;  %11271 = vmatpush3.bf16.msra.mxu1 %v12059_v63 }
 0x215   : > { %2907 = vst.msk [vmem:[#allocation4 + $0x118] sm:$0xf] %vm1486_vm10, %v2891_v8  ;;  %3805 = vmatprep.mubr.bf16.mxu0 %v12042_v24  ;;  %v610_v8 = vld [vmem:[#allocation3 + $0x30] sm:$0x1]  ;;  %v642_v24 = vld [vmem:[#allocation3 + $0x34] sm:$0x1] }
 0x216   : > { %3806 = vmatmul.mubr.bf16.gmra.mxu0 %v12044_v39  ;;  %v611_v39 = vsel %vm13258_vm12, 0, %v610_v8  ;;  %v12081_v20 = vld [vmem:[%s15675_s5] sm:$0xff]  }
 0x217   : > { %3863 = vmatmul.mubr.bf16.gmra.mxu1 %v12045_v60  ;;  %v643_v60 = vsel %vm13269_vm13, 0, %v642_v24  ;;  %612 = vst [vmem:[#allocation3 + $0x30] sm:$0x1] %v611_v39 }
 0x218   : > { %644 = vst [vmem:[#allocation3 + $0x34] sm:$0x1] %v643_v60 }
 0x21a   : > { %v2935_v21 = vld [vmem:[#allocation4 + $0xf0] sm:$0xff] }
 0x21c   : > { %v2939_v37 = vld [vmem:[#allocation4 + $0x114] sm:$0xff] }
 0x21d   : > { %4685 = vst [vmem:[#allocation4 + $0x114] sm:$0xf] %v4677_v10  ;;  %4829 = vst [vmem:[#allocation4 + $0x118] sm:$0xf] %v4813_v13  ;;  %v10336_v51 = vcombine.high %v2935_v21, %v2939_v37  ;;  %v10335_v27 = vcombine.low %v2935_v21, %v2939_v37  ;;  %v12058_v13 = vld [vmem:[%s15675_s5 + $0x28] sm:$0xff]   ;;  %v12061_v37 = vld [vmem:[%s15675_s5 + $0xd8] sm:$0xff]  }
 0x21e   : > { %v613_v21 = vld [vmem:[#allocation3 + $0x38] sm:$0x1]  ;;  %11229 = vmatpush3.bf16.msra.mxu0 %v12058_v13  ;;  %11272 = vmatprep.subr.bf16.mxu1 %v12061_v37 }
 0x21f   : > { %3870 = vmatprep.mubr.bf16.mxu1 %v10336_v51  ;;  %v645_v51 = vld [vmem:[#allocation3 + $0x3c] sm:$0x1]  ;;  %v614_v34 = vsel %vm13258_vm12, 0, %v613_v21  ;;  %11230 = vmatprep.subr.bf16.mxu0 %v12060_v45 }
 0x220   : > { %3871 = vmatmul.mubr.bf16.gmra.mxu1 %v10335_v27  ;;  %v646_v61 = vsel %vm13269_vm13, 0, %v645_v51  ;;  %615 = vst [vmem:[#allocation3 + $0x38] sm:$0x1] %v614_v34  ;;  %v13941_v51 = vld [vmem:[%s15674_s4] ss:$0 sm:$0xff] }
 0x221   : > { %647 = vst [vmem:[#allocation3 + $0x3c] sm:$0x1] %v646_v61  ;;  %11273 = vmatpush3.bf16.msra.mxu1 %v12063_v47 }
 0x222   : > { %11231 = vmatpush3.bf16.msra.mxu0 %v12062_v11  ;;  %11274 = vmatprep.subr.bf16.mxu1 %v12065_v30 }
 0x223   : > { %11232 = vmatprep.subr.bf16.mxu0 %v12064_v44 }
 0x224   : > { %v13766_v56 = vld [vmem:[#allocation4 + $0x114] sm:$0xff] }
 0x225   : > { %15738 = vst [vmem:[#allocation11_spill] sm:$0xff] %v13766_v56  ;;  %6841 = vst [vmem:[#allocation4 + $0x118] sm:$0xf] %v6825_v53  ;;  %11275 = vmatpush3.bf16.msra.mxu1 %v12067_v32 }
 0x226   : > { %11233 = vmatpush3.bf16.msra.mxu0 %v12066_v28  ;;  %11276 = vmatprep.subr.bf16.mxu1 %v12069_v29 }
 0x227   : > { %11234 = vmatprep.subr.bf16.mxu0 %v12068_v33 }
 0x229   : > { %11277 = vmatpush3.bf16.msra.mxu1 %v12071_v38 }
 0x22a   : > { %11235 = vmatpush3.bf16.msra.mxu0 %v12070_v49  ;;  %11278 = vmatprep.subr.bf16.mxu1 %v12073_v54 }
 0x22b   : > { %11236 = vmatprep.subr.bf16.mxu0 %v12072_v0 }
 0x22d   : > { %11279 = vmatpush3.bf16.msra.mxu1 %v12075_v52 }
 0x22e   : > { %11237 = vmatpush3.bf16.msra.mxu0 %v12074_v31  ;;  %11344 = vmatprep.subr.bf16.mxu1 %v12080_v35 }
 0x22f   : > { %11238 = vmatprep.subr.bf16.mxu0 %v12078_v50 }
 0x232   : > { %11239 = vmatpush3.bf16.msra.mxu0 %v12081_v20 }
 0x233   : > { %11304 = vmatprep.subr.bf16.mxu0 %v12083_v7 }
 0x281   : > { %v13796_v22 = vpop.f32.mrf.mxu1 }
 0x283   : > { %v13810_v17 = vpop.f32.mrf.mxu1 }
 0x284   : > { %v11082_v21 = vadd.f32 %v13810_v17, %v13796_v22 }
 0x285   : > { %v13816_v57 = vpop.f32.mrf.mxu1  ;;  %v11160_v42 = vpop.f32.mrf.mxu0 }
 0x286   : > { %v3654_v11 = vadd.f32 %v11082_v21, %v13941_v51 }
 0x287   : > { %v13818_v23 = vpop.f32.mrf.mxu1  ;;  %v11161_v39 = vpop.f32.mrf.mxu0 }
 0x288   : > { %v11085_v47 = vadd.f32 %v13818_v23, %v13816_v57  ;;  %v11162_v55 = vadd.f32 %v11161_v39, %v11160_v42 }
 0x289   : > { %v13820_v4 = vpop.f32.mrf.mxu1 }
 0x28a   : > { %v3657_v40 = vadd.f32 %v11085_v47, %v13941_v51 }
 0x28b   : > { %v13834_v43 = vpop.f32.mrf.mxu1 }
 0x28c   : > { %v11088_v18 = vadd.f32 %v13834_v43, %v13820_v4 }
 0x28d   : > { %v13840_v58 = vpop.f32.mrf.mxu1 }
 0x28e   : > { %v3662_v23 = vadd.f32 %v11088_v18, %v13941_v51 }
 0x28f   : > { %v13842_v5 = vpop.f32.mrf.mxu1 }
 0x291   : > { %v11092_v41 = vpop.f32.mrf.mxu1 }
 0x293   : > { %v11093_v3 = vpop.f32.mrf.mxu1 }
 0x294   : > { %v13844_v14 = vadd.f32 %v11093_v3, %v11092_v41  ;;  %v11163_v3 = vpop.f32.mrf.mxu0 }
 0x295   : > { %v13846_v10 = vpop.f32.mrf.mxu1 }
 0x296   : > { %v11164_v45 = vpop.f32.mrf.mxu0 }
 0x297   : > { %v13860_v27 = vpop.f32.mrf.mxu1  ;;  %v11165_v57 = vadd.f32 %v11164_v45, %v11163_v3 }
 0x299   : > { %v11098_v53 = vpop.f32.mrf.mxu1 }
 0x29b   : > { %v11099_v48 = vpop.f32.mrf.mxu1 }
 0x29c   : > { %v13866_v25 = vadd.f32 %v11099_v48, %v11098_v53 }
 0x29d   : > { %v13880_v1 = vpop.f32.mrf.mxu1 }
 0x29f   : > { %v13898_v9 = vpop.f32.mrf.mxu1 }
 0x2a7   : > { %v11120_v16 = vpop.f32.mrf.mxu1 }
 0x2a9   : > { %v11121_v2 = vpop.f32.mrf.mxu1 }
 0x2aa   : > { %v11122_v53 = vadd.f32 %v11121_v2, %v11120_v16  ;;  %v11091_v16 = vadd.f32 %v13842_v5, %v13840_v58 }
 0x2ab   : > { %v11123_v46 = vpop.f32.mrf.mxu1 }
 0x2ac   : > { %v3719_v22 = vadd.f32 %v11122_v53, %v3654_v11 }
 0x2ad   : > { %v11124_v15 = vpop.f32.mrf.mxu1 }
 0x2ae   : > { %v11125_v17 = vadd.f32 %v11124_v15, %v11123_v46  ;;  %v3784_v49 = vadd.f32 %v11162_v55, %v3719_v22 }
 0x2af   : > { %v11126_v26 = vpop.f32.mrf.mxu1  ;;  %v11166_v34 = vpop.f32.mrf.mxu0 }
 0x2b0   : > { %v3722_v33 = vadd.f32 %v11125_v17, %v3657_v40  ;;  %v4141_v40 = vld [vmem:[#allocation3 + $0xc] sm:$0x1] }
 0x2b1   : > { %v11127_v36 = vpop.f32.mrf.mxu1  ;;  %v11167_v44 = vpop.f32.mrf.mxu0 }
 0x2b2   : > { %v11128_v29 = vadd.f32 %v11127_v36, %v11126_v26  ;;  %v3787_v35 = vadd.f32 %v11165_v57, %v3722_v33  ;;  %v11168_v20 = vadd.f32 %v11167_v44, %v11166_v34  ;;  %v3665_v36 = vadd.f32 %v11091_v16, %v13941_v51 }
 0x2b3   : > { %v11129_v8 = vpop.f32.mrf.mxu1  ;;  %v11169_v28 = vpop.f32.mrf.mxu0  ;;  %v15739_v34 = vmov 0  ;;  %v3670_v44 = vadd.f32 %v13844_v14, %v13941_v51  ;;  %v11097_v16 = vadd.f32 %v13860_v27, %v13846_v10 }
 0x2b4   : > { %v3727_v52 = vadd.f32 %v11128_v29, %v3662_v23  ;;  %v15740_v34 = vsel %vm13961_vm2, 4294967295, %v15739_v34 }
 0x2b5   : > { %v11130_v24 = vpop.f32.mrf.mxu1  ;;  %v11170_v2 = vpop.f32.mrf.mxu0  ;;  %15741 = vst [vmem:[#allocation12_spill] sm:$0xff] %v15740_v34 }
 0x2b6   : > { %v11131_v43 = vadd.f32 %v11130_v24, %v11129_v8  ;;  %v3792_v39 = vadd.f32 %v11168_v20, %v3727_v52  ;;  %v11171_v17 = vadd.f32 %v11170_v2, %v11169_v28  ;;  %v4144_v2 = vld [vmem:[#allocation3 + $0x10] sm:$0xf]  ;;  %v11103_v20 = vadd.f32 %v13898_v9, %v13880_v1 }
 0x2b7   : > { %v11132_v60 = vpop.f32.mrf.mxu1 }
 0x2b8   : > { %v3730_v5 = vadd.f32 %v11131_v43, %v3665_v36 }
 0x2b9   : > { %v11133_v41 = vpop.f32.mrf.mxu1 }
 0x2ba   : > { %v11134_v21 = vadd.f32 %v11133_v41, %v11132_v60  ;;  %v3795_v33 = vadd.f32 %v11171_v17, %v3730_v5  ;;  %v4845_v5 = vld [vmem:[#allocation3 + $0x4c] sm:$0x1] }
 0x2bb   : > { %v13930_v13 = vpop.f32.mrf.mxu1 }
 0x2bc   : > { %v3735_v29 = vadd.f32 %v11134_v21, %v3670_v44 }
 0x2bd   : > { %v13932_v63 = vpop.f32.mrf.mxu1 }
 0x2bf   : > { %v13934_v37 = vpop.f32.mrf.mxu1 }
 0x2c1   : > { %v13943_v61 = vpop.f32.mrf.mxu1 }
 0x2c3   : > { %v13945_v48 = vpop.f32.mrf.mxu1 }
 0x2c5   : > { %v13950_v30 = vpop.f32.mrf.mxu1 }
 0x2c7   : > { %v11200_v59 = vpop.f32.mrf.mxu1  ;;  %v11172_v46 = vpop.f32.mrf.mxu0 }
 0x2c9   : > { %v11201_v32 = vpop.f32.mrf.mxu1  ;;  %v11173_v53 = vpop.f32.mrf.mxu0 }
 0x2ca   : > { %v11202_v38 = vadd.f32 %v11201_v32, %v11200_v59  ;;  %v4138_v59 = vld [vmem:[#allocation3 + $0x8] sm:$0xf]  ;;  %v11174_v60 = vadd.f32 %v11173_v53, %v11172_v46 }
 0x2cb   : > { %v11203_v0 = vpop.f32.mrf.mxu1 }
 0x2cc   : > { %v3849_v54 = vadd.f32 %v11202_v38, %v3784_v49  ;;  %v11175_v49 = vpop.f32.mrf.mxu0 }
 0x2cd   : > { %v11204_v31 = vpop.f32.mrf.mxu1 }
 0x2ce   : > { %v3879_v50 = vmax.f32 %v3849_v54, 0.0  ;;  %v11205_v4 = vadd.f32 %v11204_v31, %v11203_v0  ;;  %v4147_v31 = vld [vmem:[#allocation3 + $0x14] sm:$0x1] }
 0x2cf   : > { %v11206_v15 = vpop.f32.mrf.mxu1 }
 0x2d0   : > { %v11020_v7 = vpack.c.bf16 %v3879_v50, %v3879_v50  ;;  %v3852_v26 = vadd.f32 %v11205_v4, %v3787_v35  ;;  %v3800_v4 = vadd.f32 %v11174_v60, %v3735_v29 }
 0x2d1   : > { %v11207_v42 = vpop.f32.mrf.mxu1 }
 0x2d2   : > { %v4056_v3 = vshrl.u32 %v11020_v7, 16  ;;  %v3880_v45 = vmax.f32 %v3852_v26, 0.0  ;;  %v11208_v58 = vadd.f32 %v11207_v42, %v11206_v15  ;;  %v4059_v22 = vshll.u32 %v11020_v7, 16  ;;  %v11176_v26 = vpop.f32.mrf.mxu0 }
 0x2d3   : > { %v11209_v11 = vpop.f32.mrf.mxu1  ;;  %v11137_v7 = vadd.f32 %v13932_v63, %v13930_v13  ;;  %v4892_v13 = vrot.slane %v4845_v5, 5  ;;  %v3673_v63 = vadd.f32 %v11097_v16, %v13941_v51  ;;  %v11177_v53 = vadd.f32 %v11176_v26, %v11175_v49 }
 0x2d4   : > { %v4058_v47 = vrot.slane %v4056_v3, 7  ;;  %v11021_v8 = vpack.c.bf16 %v3880_v45, %v3880_v45  ;;  %v3857_v24 = vadd.f32 %v11208_v58, %v3792_v39  ;;  %v4844_v58 = vld [vmem:[#allocation3 + $0x48] sm:$0xe] }
 0x2d5   : > { %v11210_v55 = vpop.f32.mrf.mxu1  ;;  %v10432_v21 = vrot.slane %v4844_v58, 9 }
 0x2d6   : > { %v4061_v41 = vor.u32 %v4059_v22, %v4058_v47  ;;  %v4062_v18 = vrot.slane %v4058_v47, 4  ;;  %v4064_v32 = vshrl.u32 %v11021_v8, 16  ;;  %v3881_v38 = vmax.f32 %v3857_v24, 0.0  ;;  %v4153_v24 = vld [vmem:[#allocation3 + $0x1c] sm:$0x1] }
 0x2d7   : > { %v11211_v0 = vadd.f32 %v11210_v55, %v11209_v11  ;;  %v11212_v57 = vpop.f32.mrf.mxu1  ;;  %v4067_v54 = vshll.u32 %v11021_v8, 16  ;;  %v4150_v11 = vld [vmem:[#allocation3 + $0x18] sm:$0xf]  ;;  %v3738_v55 = vadd.f32 %v11137_v7, %v3673_v63  ;;  %v4893_v29 = vsel %vm13682_vm0, %v10432_v21, %v4892_v13 }
 0x2d8   : > { %v4139_v23 = vsel %vm13961_vm2, %v4061_v41, %v4138_v59  ;;  %v4142_v14 = vsel %vm13258_vm12, %v4062_v18, %v4141_v40  ;;  %v4066_v28 = vrot.slane %v4064_v32, 7  ;;  %v11022_v52 = vpack.c.bf16 %v3881_v38, %v3881_v38  ;;  %v13989_v32 = vpop.f32.mrf.mxu0  ;;  %4909 = vst [vmem:[#allocation4 + $0x11c] sm:$0xf] %v4893_v29 }
 0x2d9   : > { %4140 = vst [vmem:[#allocation3 + $0x8] sm:$0xf] %v4139_v23  ;;  %4143 = vst [vmem:[#allocation3 + $0xc] sm:$0x1] %v4142_v14  ;;  %v3860_v50 = vadd.f32 %v11211_v0, %v3795_v33  ;;  %v11213_v35 = vpop.f32.mrf.mxu1  ;;  %v13984_v59 = vadd.f32 %v13866_v25, %v13941_v51  ;;  %v13987_v40 = vadd.f32 %v11103_v20, %v13941_v51 }
 0x2da   : > { %v4069_v43 = vor.u32 %v4067_v54, %v4066_v28  ;;  %v4070_v46 = vrot.slane %v4066_v28, 4  ;;  %v11214_v15 = vadd.f32 %v11213_v35, %v11212_v57  ;;  %v4072_v36 = vshrl.u32 %v11022_v52, 16  ;;  %v4156_v35 = vld [vmem:[#allocation3 + $0x20] sm:$0xf]  ;;  %v11179_v26 = vpop.f32.mrf.mxu0 }
 0x2db   : > { %v3882_v10 = vmax.f32 %v3860_v50, 0.0  ;;  %v4075_v39 = vshll.u32 %v11022_v52, 16  ;;  %v11215_v45 = vpop.f32.mrf.mxu1  ;;  %v3803_v50 = vadd.f32 %v11177_v53, %v3738_v55 }
 0x2dc   : > { %v4145_v27 = vsel %vm13961_vm2, %v4069_v43, %v4144_v2  ;;  %v4148_v42 = vsel %vm13258_vm12, %v4070_v46, %v4147_v31  ;;  %v3865_v3 = vadd.f32 %v11214_v15, %v3800_v4  ;;  %v4074_v1 = vrot.slane %v4072_v36, 7 }
 0x2dd   : > { %4146 = vst [vmem:[#allocation3 + $0x10] sm:$0xf] %v4145_v27  ;;  %4149 = vst [vmem:[#allocation3 + $0x14] sm:$0x1] %v4148_v42  ;;  %v11023_v9 = vpack.c.bf16 %v3882_v10, %v3882_v10  ;;  %v11216_v33 = vpop.f32.mrf.mxu1  ;;  %v13999_v2 = vadd.f32 %v13943_v61, %v13934_v37 }
 0x2de   : > { %v3883_v47 = vmax.f32 %v3865_v3, 0.0  ;;  %v4077_v22 = vor.u32 %v4075_v39, %v4074_v1  ;;  %v4078_v8 = vrot.slane %v4074_v1, 4  ;;  %v11217_v4 = vadd.f32 %v11216_v33, %v11215_v45  ;;  %v4159_v1 = vld [vmem:[#allocation3 + $0x24] sm:$0x1] }
 0x2df   : > { %v4080_v44 = vshrl.u32 %v11023_v9, 16  ;;  %v4083_v17 = vshll.u32 %v11023_v9, 16  ;;  %v11143_v33 = vadd.f32 %v13950_v30, %v13945_v48 }
 0x2e0   : > { %v4204_v60 = vld [vmem:[#allocation3 + $0x8] sm:$0xf]  ;;  %v4205_v41 = vld [vmem:[#allocation3 + $0xc] sm:$0x1]  ;;  %v4151_v28 = vsel %vm13961_vm2, %v4077_v22, %v4150_v11  ;;  %v4154_v54 = vsel %vm13258_vm12, %v4078_v8, %v4153_v24  ;;  %v14013_v27 = vpack.c.bf16 %v3883_v47, %v3883_v47  ;;  %v3868_v48 = vadd.f32 %v11217_v4, %v3803_v50 }
 0x2e1   : > { %v4348_v18 = vld [vmem:[#allocation3 + $0x8] sm:$0xe]  ;;  %v4233_v49 = vshrl.u32 %v4204_v60, 16  ;;  %v4236_v38 = vshll.u32 %v4204_v60, 16  ;;  %v4242_v0 = vshll.u32 %v4205_v41, 16  ;;  %v4082_v16 = vrot.slane %v4080_v44, 7  ;;  %v11181_v44 = vpop.f32.mrf.mxu0 }
 0x2e2   : > { %v4349_v57 = vld [vmem:[#allocation3 + $0xc] sm:$0x1]  ;;  %v10410_v23 = vrot.slane %v4348_v18, 9  ;;  %v4445_v14 = vld [vmem:[#allocation3 + $0x8] sm:$0xf] }
 0x2e3   : > { %v4387_v25 = vrot.slane %v4349_v57, 5  ;;  %v4446_v51 = vld [vmem:[#allocation3 + $0xc] sm:$0x1]  ;;  %v4462_v31 = vshrl.u32 %v4445_v14, 16  ;;  %v14001_v52 = vld [vmem:[#allocation3 + $0x8] sm:$0xe]  ;;  %v4085_v7 = vor.u32 %v4083_v17, %v4082_v16  ;;  %v14033_v17 = vpop.f32.mrf.mxu1 }
 0x2e4   : > { %4152 = vst [vmem:[#allocation3 + $0x18] sm:$0xf] %v4151_v28  ;;  %4155 = vst [vmem:[#allocation3 + $0x1c] sm:$0x1] %v4154_v54  ;;  %v14003_v43 = vrot.slane %v4233_v49, 4  ;;  %v4465_v46 = vshll.u32 %v4445_v14, 16 }
 0x2e5   : > { %v4471_v15 = vshll.u32 %v4446_v51, 16  ;;  %v14005_v20 = vld [vmem:[#allocation3 + $0xc] sm:$0x1]  ;;  %v14007_v36 = vrot.slane %v4236_v38, 5  ;;  %v14009_v37 = vrot.slane %v4242_v0, 5  ;;  %v4388_v42 = vsel %vm13682_vm0, %v10410_v23, %v4387_v25 }
 0x2e6   : > { %v4206_v61 = vld [vmem:[#allocation3 + $0x10] sm:$0xf]  ;;  %v14011_v10 = vld [vmem:[#allocation3 + $0x14] sm:$0x1]  ;;  %v14017_v39 = vrot.slane %v4462_v31, 4  ;;  %v14022_v9 = vrot.slane %v4465_v46, 5  ;;  %v4157_v53 = vsel %vm13961_vm2, %v4085_v7, %v4156_v35  ;;  %v14047_v0 = vadd.f32 %v11179_v26, %v13989_v32  ;;  %v11219_v7 = vpop.f32.mrf.mxu1 }
 0x2e7   : > { %v4247_v45 = vshrl.u32 %v4206_v61, 16  ;;  %v4250_v58 = vshll.u32 %v4206_v61, 16  ;;  %v14020_v5 = vld [vmem:[#allocation3 + $0x10] sm:$0xe]  ;;  %4422 = vst [vmem:[#allocation4 + $0x2c] sm:$0xf] %v4388_v42  ;;  %v11220_v11 = vadd.f32 %v11219_v7, %v14033_v17 }
 0x2e8   : > { %v14024_v21 = vrot.slane %v4471_v15, 5  ;;  %v4447_v63 = vld [vmem:[#allocation3 + $0x10] sm:$0xf]  ;;  %v14031_v22 = vld [vmem:[#allocation3 + $0x14] sm:$0x1]  ;;  %v4086_v18 = vrot.slane %v4082_v16, 4  ;;  %v11182_v15 = vpop.f32.mrf.mxu0 }
 0x2e9   : > { %15743 = vst [vmem:[#allocation14_spill] sm:$0xff] %v14031_v22  ;;  %v4476_v8 = vshrl.u32 %v4447_v63, 16  ;;  %v4479_v24 = vshll.u32 %v4447_v63, 16  ;;  %4158 = vst [vmem:[#allocation3 + $0x20] sm:$0xf] %v4157_v53  ;;  %v14035_v55 = vrot.slane %v4247_v45, 4 }
 0x2ea   : > { %15742 = vst [vmem:[#allocation13_spill] sm:$0xff] %v14024_v21  ;;  %v14037_v60 = vrot.slane %v4250_v58, 5  ;;  %v14044_v49 = vld [vmem:[#allocation3 + $0x10] sm:$0xe]  ;;  %v4088_v57 = vshrl.u32 %v14013_v27, 16  ;;  %v4160_v28 = vsel %vm13258_vm12, %v4086_v18, %v4159_v1  ;;  %v4091_v58 = vshll.u32 %v14013_v27, 16 }
 0x2eb   : > { %v14042_v29 = vrot.slane %v4476_v8, 4  ;;  %15744 = vst [vmem:[#allocation15_spill] sm:$0xff] %v14044_v49  ;;  %v4686_v38 = vld [vmem:[#allocation3 + $0x10] sm:$0xf]  ;;  %v14050_v23 = vld [vmem:[#allocation3 + $0x14] sm:$0x1] }
 0x2ec   : > { %v4703_v25 = vshrl.u32 %v4686_v38, 16  ;;  %v4706_v14 = vshll.u32 %v4686_v38, 16  ;;  %v4208_v51 = vld [vmem:[#allocation3 + $0x18] sm:$0xf]  ;;  %v4165_v54 = vld [vmem:[#allocation3 + $0x2c] sm:$0x1] }
 0x2ed   : > { %v14054_v30 = vrot.slane %v4479_v24, 5  ;;  %v4209_v16 = vld [vmem:[#allocation3 + $0x1c] sm:$0x1]  ;;  %v4261_v31 = vshrl.u32 %v4208_v51, 16  ;;  %v4264_v35 = vshll.u32 %v4208_v51, 16  ;;  %v4090_v32 = vrot.slane %v4088_v57, 7 }
 0x2ee   : > { %4161 = vst [vmem:[#allocation3 + $0x24] sm:$0x1] %v4160_v28  ;;  %v4162_v46 = vld [vmem:[#allocation3 + $0x28] sm:$0xf]  ;;  %v14057_v61 = vrot.slane %v4703_v25, 4  ;;  %v14061_v50 = vrot.slane %v4706_v14, 5  ;;  %v11183_v51 = vadd.f32 %v11182_v15, %v11181_v44  ;;  %v11221_v14 = vpop.f32.mrf.mxu1 }
 0x2ef   : > { %v4352_v45 = vld [vmem:[#allocation3 + $0x18] sm:$0xe]  ;;  %v4270_v4 = vshll.u32 %v4209_v16, 16  ;;  %v4353_v1 = vld [vmem:[#allocation3 + $0x1c] sm:$0x1]  ;;  %v4094_v53 = vrot.slane %v4090_v32, 4  ;;  %v4093_v57 = vor.u32 %v4091_v58, %v4090_v32  ;;  %v3746_v32 = vadd.f32 %v11143_v33, %v13987_v40 }
 0x2f0   : > { %v10412_v63 = vrot.slane %v4352_v45, 9  ;;  %v14063_v8 = vrot.slane %v4261_v31, 4  ;;  %v4395_v24 = vrot.slane %v4353_v1, 5  ;;  %v4449_v18 = vld [vmem:[#allocation3 + $0x18] sm:$0xf]  ;;  %v14065_v25 = vrot.slane %v4264_v35, 5 }
 0x2f1   : > { %v4450_v38 = vld [vmem:[#allocation3 + $0x1c] sm:$0x1]  ;;  %v4490_v28 = vshrl.u32 %v4449_v18, 16  ;;  %v4493_v26 = vshll.u32 %v4449_v18, 16  ;;  %v14067_v41 = vld [vmem:[#allocation3 + $0x18] sm:$0xe]  ;;  %v4166_v27 = vsel %vm13258_vm12, %v4094_v53, %v4165_v54  ;;  %v4163_v31 = vsel %vm13961_vm2, %v4093_v57, %v4162_v46 }
 0x2f2   : > { %v4499_v16 = vshll.u32 %v4450_v38, 16  ;;  %v4688_v45 = vld [vmem:[#allocation3 + $0x18] sm:$0xf]  ;;  %4167 = vst [vmem:[#allocation3 + $0x2c] sm:$0x1] %v4166_v27  ;;  %v3884_v1 = vmax.f32 %v3868_v48, 0.0  ;;  %v4396_v44 = vsel %vm13682_vm0, %v10412_v63, %v4395_v24  ;;  %v3743_v35 = vadd.f32 %v13999_v2, %v13984_v59  ;;  %v11222_v2 = vpop.f32.mrf.mxu1 }
 0x2f3   : > { %v14078_v15 = vrot.slane %v4270_v4, 5  ;;  %v4594_v58 = vld [vmem:[#allocation3 + $0x1c] sm:$0x1]  ;;  %v10419_v54 = vrot.slane %v14067_v41, 9  ;;  %4164 = vst [vmem:[#allocation3 + $0x28] sm:$0xf] %v4163_v31  ;;  %v3811_v31 = vadd.f32 %v11183_v51, %v3746_v32  ;;  %v11223_v47 = vadd.f32 %v11222_v2, %v11221_v14 }
 0x2f4   : > { %v4689_v53 = vld [vmem:[#allocation3 + $0x1c] sm:$0x1]  ;;  %4424 = vst [vmem:[#allocation4 + $0x74] sm:$0xf] %v4396_v44  ;;  %v4717_v18 = vshrl.u32 %v4688_v45, 16  ;;  %v4720_v46 = vshll.u32 %v4688_v45, 16  ;;  %v14081_v57 = vpack.c.bf16 %v3884_v1, %v3884_v1  ;;  %v3808_v45 = vadd.f32 %v14047_v0, %v3743_v35 }
 0x2f5   : > { %v4726_v38 = vshll.u32 %v4689_v53, 16  ;;  %v4210_v48 = vld [vmem:[#allocation3 + $0x20] sm:$0xf]  ;;  %v14083_v63 = vrot.slane %v4490_v28, 4  ;;  %v14085_v24 = vrot.slane %v4493_v26, 5  ;;  %v14087_v33 = vrot.slane %v4499_v16, 5 }
 0x2f6   : > { %v4275_v59 = vshrl.u32 %v4210_v48, 16  ;;  %v4278_v40 = vshll.u32 %v4210_v48, 16  ;;  %v4631_v4 = vrot.slane %v4594_v58, 5  ;;  %v14089_v41 = vld [vmem:[#allocation3 + $0x24] sm:$0x1]  ;;  %v14094_v44 = vrot.slane %v4717_v18, 4 }
 0x2f7   : > { %15745 = vst [vmem:[#allocation16_spill] sm:$0xff] %v14087_v33  ;;  %v14091_v27 = vld [vmem:[#allocation3 + $0x20] sm:$0xe]  ;;  %v14096_v1 = vrot.slane %v4720_v46, 5  ;;  %v14098_v28 = vrot.slane %v4726_v38, 5  ;;  %v4096_v53 = vshrl.u32 %v14081_v57, 16  ;;  %v3873_v56 = vadd.f32 %v11220_v11, %v3808_v45 }
 0x2f8   : > { %v4451_v26 = vld [vmem:[#allocation3 + $0x20] sm:$0xf]  ;;  %v14101_v48 = vld [vmem:[#allocation3 + $0x24] sm:$0x1]  ;;  %v14106_v0 = vrot.slane %v4275_v59, 4  ;;  %v14108_v51 = vrot.slane %v4278_v40, 5 }
 0x2f9   : > { %15746 = vst [vmem:[#allocation17_spill] sm:$0xff] %v14101_v48  ;;  %v4504_v16 = vshrl.u32 %v4451_v26, 16  ;;  %v4507_v58 = vshll.u32 %v4451_v26, 16  ;;  %v14103_v42 = vld [vmem:[#allocation3 + $0x20] sm:$0xe]  ;;  %v4098_v14 = vrot.slane %v4096_v53, 7  ;;  %v3876_v48 = vadd.f32 %v11223_v47, %v3811_v31 }
 0x2fa   : > { %15747 = vst [vmem:[#allocation18_spill] sm:$0xff] %v14103_v42  ;;  %v4690_v18 = vld [vmem:[#allocation3 + $0x20] sm:$0xf]  ;;  %v14116_v3 = vld [vmem:[#allocation3 + $0x24] sm:$0x1]  ;;  %v15749_v59 = vrot.slane %v14005_v20, 5 }
 0x2fb   : > { %v14112_v46 = vrot.slane %v4504_v16, 4  ;;  %15748 = vst [vmem:[#allocation19_spill] sm:$0xff] %v14116_v3  ;;  %v4731_v13 = vshrl.u32 %v4690_v18, 16  ;;  %v14118_v17 = vrot.slane %v4507_v58, 5  ;;  %v4734_v7 = vshll.u32 %v4690_v18, 16 }
 0x2fc   : > { %v15750_v40 = vrot.slane %v14001_v52, 9  ;;  %v4212_v32 = vld [vmem:[#allocation3 + $0x28] sm:$0xf]  ;;  %v4213_v26 = vld [vmem:[#allocation3 + $0x2c] sm:$0x1]  ;;  %v4632_v58 = vsel %vm13682_vm0, %v10419_v54, %v4631_v4  ;;  %v4099_v52 = vshll.u32 %v14081_v57, 16 }
 0x2fd   : > { %v14126_v16 = vrot.slane %v4731_v13, 4  ;;  %v4171_v35 = vld [vmem:[#allocation3 + $0x34] sm:$0x1]  ;;  %v4289_v53 = vshrl.u32 %v4212_v32, 16  ;;  %v4292_v18 = vshll.u32 %v4212_v32, 16  ;;  %v4298_v20 = vshll.u32 %v4213_v26, 16 }
 0x2fe   : > { %v4624_v2 = vsel %vm13682_vm0, %v15750_v40, %v15749_v59  ;;  %v4356_v42 = vld [vmem:[#allocation3 + $0x28] sm:$0xe]  ;;  %4663 = vst [vmem:[#allocation4 + $0x5c] sm:$0xf] %v4632_v58  ;;  %v4357_v59 = vld [vmem:[#allocation3 + $0x2c] sm:$0x1]  ;;  %v4101_v58 = vor.u32 %v4099_v52, %v4098_v14 }
 0x2ff   : > { %4661 = vst [vmem:[#allocation4 + $0x14] sm:$0xf] %v4624_v2  ;;  %v10414_v13 = vrot.slane %v4356_v42, 9  ;;  %v4453_v40 = vld [vmem:[#allocation3 + $0x28] sm:$0xf]  ;;  %v4102_v33 = vrot.slane %v4098_v14, 4 }
 0x300   : > { %v4168_v38 = vld [vmem:[#allocation3 + $0x30] sm:$0xf]  ;;  %v14132_v49 = vrot.slane %v4734_v7, 5  ;;  %v14134_v11 = vrot.slane %v4289_v53, 4  ;;  %v14136_v45 = vrot.slane %v4292_v18, 5  ;;  %v4403_v54 = vrot.slane %v4357_v59, 5 }
 0x301   : > { %v4454_v4 = vld [vmem:[#allocation3 + $0x2c] sm:$0x1]  ;;  %v14138_v32 = vrot.slane %v4298_v20, 5  ;;  %v4518_v26 = vshrl.u32 %v4453_v40, 16  ;;  %v4521_v2 = vshll.u32 %v4453_v40, 16  ;;  %v4172_v3 = vsel %vm13258_vm12, %v4102_v33, %v4171_v35 }
 0x302   : > { %v4597_v57 = vld [vmem:[#allocation3 + $0x28] sm:$0xe]  ;;  %v4527_v21 = vshll.u32 %v4454_v4, 16  ;;  %v3885_v47 = vmax.f32 %v3873_v56, 0.0  ;;  %v4404_v31 = vsel %vm13682_vm0, %v10414_v13, %v4403_v54  ;;  %v4351_v7 = vld [vmem:[#allocation3 + $0x14] sm:$0x1]  ;;  %v4239_v40 = vor.u32 %v14007_v36, %v14003_v43 }
 0x303   : > { %v4692_v42 = vld [vmem:[#allocation3 + $0x28] sm:$0xf]  ;;  %v14144_v53 = vrot.slane %v4518_v26, 4  ;;  %v4598_v18 = vld [vmem:[#allocation3 + $0x2c] sm:$0x1]  ;;  %v10421_v59 = vrot.slane %v4597_v57, 9  ;;  %v4169_v56 = vsel %vm13961_vm2, %v4101_v58, %v4168_v38 }
 0x304   : > { %v4693_v20 = vld [vmem:[#allocation3 + $0x2c] sm:$0x1]  ;;  %4173 = vst [vmem:[#allocation3 + $0x34] sm:$0x1] %v4172_v3  ;;  %4426 = vst [vmem:[#allocation4 + $0xbc] sm:$0xf] %v4404_v31  ;;  %v11026_v54 = vpack.c.bf16 %v3885_v47, %v3885_v47  ;;  %v4253_v3 = vor.u32 %v14037_v60, %v14035_v55 }
 0x305   : > { %v14148_v14 = vrot.slane %v4521_v2, 5  ;;  %v4745_v52 = vshrl.u32 %v4692_v42, 16  ;;  %v4748_v4 = vshll.u32 %v4692_v42, 16  ;;  %v4836_v33 = vld [vmem:[#allocation3 + $0x28] sm:$0xe]  ;;  %v4754_v35 = vshll.u32 %v4693_v20, 16 }
 0x306   : > { %v4837_v13 = vld [vmem:[#allocation3 + $0x2c] sm:$0x1]  ;;  %4170 = vst [vmem:[#allocation3 + $0x30] sm:$0xf] %v4169_v56  ;;  %v3886_v26 = vmax.f32 %v3876_v48, 0.0  ;;  %v14154_v22 = vrot.slane %v4527_v21, 5 }
 0x307   : > { %15751 = vst [vmem:[#allocation20_spill] sm:$0xff] %v14148_v14  ;;  %v4429_v57 = vld [vmem:[#allocation3 + $0x8] sm:$0xf]  ;;  %v4639_v43 = vrot.slane %v4598_v18, 5  ;;  %v10428_v36 = vrot.slane %v4836_v33, 9  ;;  %v4876_v2 = vrot.slane %v4837_v13, 5 }
 0x308   : > { %15752 = vst [vmem:[#allocation21_spill] sm:$0xff] %v14154_v22  ;;  %v4430_v31 = vld [vmem:[#allocation3 + $0x10] sm:$0xf]  ;;  %4437 = vst [vmem:[#allocation4 + $0xc] sm:$0xf] %v4429_v57  ;;  %v14156_v42 = vrot.slane %v4745_v52, 4  ;;  %v14158_v38 = vpack.c.bf16 %v3886_v26, %v3886_v26 }
 0x309   : > { %v4104_v14 = vshrl.u32 %v11026_v54, 16  ;;  %4438 = vst [vmem:[#allocation4 + $0x30] sm:$0xf] %v4430_v31  ;;  %v4187_v58 = vld [vmem:[#allocation3 + $0x8] sm:$0xf]  ;;  %v4240_v47 = vrot.slane %v4239_v40, 4 }
 0x30a   : > { %v14160_v48 = vrot.slane %v4748_v4, 5  ;;  %4195 = vst [vmem:[#allocation4 + $0x24] sm:$0xf] %v4187_v58  ;;  %v4391_v20 = vrot.slane %v4351_v7, 5  ;;  %v4431_v55 = vld [vmem:[#allocation3 + $0x18] sm:$0xf] }
 0x30b   : > { %v4432_v21 = vld [vmem:[#allocation3 + $0x20] sm:$0xf]  ;;  %v14162_v60 = vrot.slane %v4754_v35, 5  ;;  %v4106_v18 = vrot.slane %v4104_v14, 7  ;;  %v4107_v33 = vshll.u32 %v11026_v54, 16  ;;  %v4245_v52 = vsel %vm12677_vm7, %v4240_v47, %v14009_v37 }
 0x30c   : > { %4439 = vst [vmem:[#allocation4 + $0x54] sm:$0xf] %v4431_v55  ;;  %4440 = vst [vmem:[#allocation4 + $0x78] sm:$0xf] %v4432_v21  ;;  %v4188_v56 = vld [vmem:[#allocation3 + $0x10] sm:$0xf]  ;;  %v4640_v14 = vsel %vm13682_vm0, %v10421_v59, %v4639_v43  ;;  %v4877_v37 = vsel %vm13682_vm0, %v10428_v36, %v4876_v2  ;;  %v4267_v36 = vor.u32 %v14065_v25, %v14063_v8 }
 0x30d   : > { %v14167_v13 = vld [vmem:[#allocation3 + $0x34] sm:$0x1]  ;;  %4339 = vst [vmem:[#allocation4 + $0x28] sm:$0xf] %v4245_v52  ;;  %v15753_v40 = vrot.slane %v14020_v5, 9  ;;  %v14173_v4 = vrot.slane %v4253_v3, 4  ;;  %v4109_v43 = vor.u32 %v4107_v33, %v4106_v18 }
 0x30e   : > { %4196 = vst [vmem:[#allocation4 + $0x48] sm:$0xf] %v4188_v56  ;;  %v14179_v35 = vld [vmem:[#allocation3 + $0x34] sm:$0x1]  ;;  %v4174_v26 = vld [vmem:[#allocation3 + $0x38] sm:$0xf] }
 0x30f   : > { %v4392_v7 = vsel %vm13682_vm0, %v15753_v40, %v4391_v20  ;;  %15754 = vst [vmem:[#allocation22_spill] sm:$0xff] %v14179_v35  ;;  %v14181_v54 = vld [vmem:[#allocation3 + $0x34] sm:$0x1]  ;;  %v4177_v57 = vld [vmem:[#allocation3 + $0x3c] sm:$0x1]  ;;  %v4112_v5 = vshrl.u32 %v14158_v38, 16  ;;  %v4175_v25 = vsel %vm13961_vm2, %v4109_v43, %v4174_v26  ;;  %v4723_v43 = vor.u32 %v14096_v1, %v14094_v44 }
 0x310   : > { %15755 = vst [vmem:[#allocation23_spill] sm:$0xff] %v14181_v54  ;;  %v4115_v31 = vshll.u32 %v14158_v38, 16  ;;  %4423 = vst [vmem:[#allocation4 + $0x50] sm:$0xf] %v4392_v7  ;;  %v4214_v3 = vld [vmem:[#allocation3 + $0x30] sm:$0xf] }
 0x311   : > { %4665 = vst [vmem:[#allocation4 + $0xa4] sm:$0xf] %v4640_v14  ;;  %4905 = vst [vmem:[#allocation4 + $0x8c] sm:$0xf] %v4877_v37  ;;  %v14185_v58 = vld [vmem:[#allocation3 + $0x30] sm:$0xe] }
 0x312   : > { %v14187_v59 = vld [vmem:[#allocation3 + $0x30] sm:$0xf]  ;;  %v4303_v2 = vshrl.u32 %v4214_v3, 16  ;;  %v4306_v47 = vshll.u32 %v4214_v3, 16  ;;  %v4110_v40 = vrot.slane %v4106_v18, 4  ;;  %v12082_v33 = vld [vmem:[%s15675_s5 + $0x1b8] sm:$0xff]   ;;  %v4281_v3 = vor.u32 %v14108_v51, %v14106_v0 }
 0x313   : > { %v4532_v55 = vshrl.u32 %v14187_v59, 16  ;;  %v14193_v21 = vld [vmem:[#allocation3 + $0x30] sm:$0xe]  ;;  %v14201_v8 = vld [vmem:[#allocation3 + $0x24] sm:$0x1]  ;;  %v12085_v0 = vld [vmem:[%s15675_s5 + $0x138] sm:$0xff]  }
 0x314   : > { %15756 = vst [vmem:[#allocation24_spill] sm:$0xff] %v14193_v21  ;;  %v14204_v7 = vld [vmem:[#allocation3 + $0x30] sm:$0xf]  ;;  %v14214_v56 = vrot.slane %v4303_v2, 4  ;;  %v14216_v20 = vrot.slane %v4306_v47, 5  ;;  %v4178_v14 = vsel %vm13258_vm12, %v4110_v40, %v4177_v57  ;;  %v4114_v47 = vrot.slane %v4112_v5, 7 }
 0x315   : > { %v12084_v37 = vld [vmem:[%s15675_s5 + $0x1f0] sm:$0xff]   ;;  %v4180_v52 = vld [vmem:[#allocation3 + $0x40] sm:$0xf]  ;;  %v4183_v38 = vld [vmem:[#allocation3 + $0x44] sm:$0x1]  ;;  %v14227_v2 = vrot.slane %v4532_v55, 4  ;;  %v4295_v57 = vor.u32 %v14136_v45, %v14134_v11 }
 0x316   : > { %v12076_v21 = vld [vmem:[#allocation4 + $0xc] ss:$36 sps:$4 sm:$0xff]   ;;  %v14225_v51 = vld [vmem:[#allocation3 + $0x34] sm:$0x1]  ;;  %4176 = vst [vmem:[#allocation3 + $0x38] sm:$0xf] %v4175_v25  ;;  %v4117_v44 = vor.u32 %v4115_v31, %v4114_v47 }
 0x317   : > { %v12079_v22 = vld [vmem:[#allocation4 + $0x8] ss:$36 sps:$4 sm:$0xff]   ;;  %4179 = vst [vmem:[#allocation3 + $0x3c] sm:$0x1] %v4178_v14  ;;  %5670 = vmatprep.mubr.bf16.mxu1 %v12076_v21  ;;  %v12086_v5 = vld [vmem:[%s15675_s5 + $0x1b0] sm:$0xff]   ;;  %v4118_v1 = vrot.slane %v4114_v47, 4 }
 0x318   : > { %v4915_v18 = vld [vmem:[#allocation4 + $0x24] sm:$0xff]  ;;  %v12087_v25 = vld [vmem:[#allocation4 + $0x54] ss:$36 sps:$4 sm:$0xff]   ;;  %5671 = vmatmul.mubr.bf16.vlgmr.msra.gmra.mxu1 %v12079_v22  ;;  %v15757_v21 = vshll.u32 %v14011_v10, 16  ;;  %v4268_v14 = vrot.slane %v4267_v36, 4  ;;  %v4399_v31 = vrot.slane %v14201_v8, 5  ;;  %v4181_v40 = vsel %vm13961_vm2, %v4117_v44, %v4180_v52 }
 0x319   : > { %v4189_v26 = vld [vmem:[#allocation3 + $0x18] sm:$0xf]  ;;  %v10435_v54 = vcombine.high %v13442_v6, %v4915_v18  ;;  %v10434_v55 = vcombine.low %v13442_v6, %v4915_v18  ;;  %v12090_v11 = vld [vmem:[%s15675_s5 + $0x170] sm:$0xff]   ;;  %v12091_v45 = vld [vmem:[%s15675_s5 + $0x1e8] sm:$0xff]   ;;  %11345 = vmatpush3.bf16.msra.mxu1 %v12082_v33  ;;  %v4184_v10 = vsel %vm13258_vm12, %v4118_v1, %v4183_v38  ;;  %v15758_v52 = vshll.u32 %v14089_v41, 16  ;;  %5678 = vmatprep.mubr.bf16.mxu1 %v12087_v25 }
 0x31a   : > { %4197 = vst [vmem:[#allocation4 + $0x6c] sm:$0xf] %v4189_v26  ;;  %v4258_v6 = vrot.slane %v15757_v21, 5  ;;  %v4433_v18 = vld [vmem:[#allocation3 + $0x28] sm:$0xf]  ;;  %v14251_v35 = vld [vmem:[%s15675_s5 + $0x130] sm:$0xff]   ;;  %11346 = vmatprep.subr.bf16.mxu1 %v12084_v37 }
 0x31b   : > { %5605 = vmatprep.mubr.bf16.mxu0 %v10435_v54  ;;  %v4434_v47 = vld [vmem:[#allocation3 + $0x30] sm:$0xf]  ;;  %4441 = vst [vmem:[#allocation4 + $0x9c] sm:$0xf] %v4433_v18  ;;  %v4190_v22 = vld [vmem:[#allocation3 + $0x20] sm:$0xf] }
 0x31c   : > { %v4282_v26 = vrot.slane %v4281_v3, 4  ;;  %5606 = vmatmul.mubr.bf16.vlgmr.msra.gmra.mxu0 %v10434_v55  ;;  %v14258_v54 = vld [vmem:[#allocation4 + $0x50] ss:$36 sps:$4 sm:$0xff]   ;;  %v4259_v36 = vsel %vm12677_vm7, %v14173_v4, %v4258_v6  ;;  %v12096_v33 = vld [vmem:[%s15675_s5 + $0x168] sm:$0xff]   ;;  %4442 = vst [vmem:[#allocation4 + $0xc0] sm:$0xf] %v4434_v47  ;;  %v4273_v4 = vsel %vm12677_vm7, %v4268_v14, %v14078_v15 }
 0x31d   : > { %v4191_v8 = vld [vmem:[#allocation3 + $0x28] sm:$0xf]  ;;  %4198 = vst [vmem:[#allocation4 + $0x90] sm:$0xf] %v4190_v22  ;;  %v4286_v3 = vrot.slane %v15758_v52, 5  ;;  %11305 = vmatpush3.bf16.msra.mxu0 %v12085_v0  ;;  %v15759_v37 = vrot.slane %v14091_v27, 9  ;;  %v15760_v27 = vor.u32 %v14061_v50, %v14057_v61  ;;  %11347 = vmatpush3.bf16.msra.mxu1 %v12086_v5 }
 0x31e   : > { %v4670_v44 = vld [vmem:[#allocation3 + $0x10] sm:$0xf]  ;;  %4182 = vst [vmem:[#allocation3 + $0x40] sm:$0xf] %v4181_v40  ;;  %4185 = vst [vmem:[#allocation3 + $0x44] sm:$0x1] %v4184_v10  ;;  %11306 = vmatprep.subr.bf16.mxu0 %v12090_v11  ;;  %11348 = vmatprep.subr.bf16.mxu1 %v12091_v45 }
 0x31f   : > { %v12093_v38 = vld [vmem:[%s15675_s5 + $0x1a8] sm:$0xff]   ;;  %4340 = vst [vmem:[#allocation4 + $0x4c] sm:$0xf] %v4259_v36  ;;  %v4400_v41 = vsel %vm13682_vm0, %v15759_v37, %v4399_v31  ;;  %4199 = vst [vmem:[#allocation4 + $0xb4] sm:$0xf] %v4191_v8  ;;  %v4296_v55 = vrot.slane %v4295_v57, 4  ;;  %v4287_v15 = vsel %vm12677_vm7, %v4282_v26, %v4286_v3 }
 0x320   : > { %v4407_v40 = vrot.slane %v14225_v51, 5  ;;  %v4671_v0 = vld [vmem:[#allocation3 + $0x18] sm:$0xf]  ;;  %4678 = vst [vmem:[#allocation4 + $0x18] sm:$0xf] %v4670_v44  ;;  %v12097_v1 = vld [vmem:[%s15675_s5 + $0x1e0] sm:$0xff]   ;;  %5679 = vmatmul.mubr.bf16.gmra.mxu1 %v14258_v54 }
 0x321   : > { %v4192_v25 = vld [vmem:[#allocation3 + $0x30] sm:$0xf]  ;;  %4341 = vst [vmem:[#allocation4 + $0x70] sm:$0xf] %v4273_v4  ;;  %4425 = vst [vmem:[#allocation4 + $0x98] sm:$0xf] %v4400_v41  ;;  %v4301_v22 = vsel %vm12677_vm7, %v4296_v55, %v14138_v32  ;;  %v4309_v32 = vor.u32 %v14216_v20, %v14214_v56  ;;  %11307 = vmatpush3.bf16.msra.mxu0 %v14251_v35  ;;  %11349 = vmatpush3.bf16.msra.mxu1 %v12093_v38 }
 0x322   : > { %4679 = vst [vmem:[#allocation4 + $0x3c] sm:$0xf] %v4671_v0  ;;  %v4710_v57 = vrot.slane %v15760_v27, 4  ;;  %v15761_v51 = vshll.u32 %v14050_v23, 16  ;;  %v4724_v6 = vrot.slane %v4723_v43, 4  ;;  %v12099_v47 = vld [vmem:[%s15675_s5 + $0x128] sm:$0xff]   ;;  %11308 = vmatprep.subr.bf16.mxu0 %v12096_v33  ;;  %11350 = vmatprep.subr.bf16.mxu1 %v12097_v1 }
 0x323   : > { %4200 = vst [vmem:[#allocation4 + $0xd8] sm:$0xf] %v4192_v25  ;;  %v4672_v11 = vld [vmem:[#allocation3 + $0x20] sm:$0xf]  ;;  %v4216_v14 = vld [vmem:[#allocation3 + $0x38] sm:$0xf] }
 0x324   : > { %v4714_v21 = vrot.slane %v15761_v51, 5  ;;  %v4217_v18 = vld [vmem:[#allocation3 + $0x3c] sm:$0x1]  ;;  %v4360_v31 = vld [vmem:[#allocation3 + $0x38] sm:$0xe]  ;;  %v15762_v61 = vrot.slane %v14185_v58, 9  ;;  %v4729_v20 = vsel %vm12677_vm7, %v4724_v6, %v14098_v28 }
 0x325   : > { %4342 = vst [vmem:[#allocation4 + $0x94] sm:$0xf] %v4287_v15  ;;  %4680 = vst [vmem:[#allocation4 + $0x60] sm:$0xf] %v4672_v11  ;;  %v4317_v50 = vshrl.u32 %v4216_v14, 16  ;;  %v4320_v43 = vshll.u32 %v4216_v14, 16  ;;  %11309 = vmatpush3.bf16.msra.mxu0 %v12099_v47 }
 0x326   : > { %v4408_v23 = vsel %vm13682_vm0, %v15762_v61, %v4407_v40  ;;  %v4361_v26 = vld [vmem:[#allocation3 + $0x3c] sm:$0x1]  ;;  %v10416_v10 = vrot.slane %v4360_v31, 9  ;;  %v12104_v5 = vld [vmem:[%s15675_s5 + $0x160] sm:$0xff]   ;;  %4343 = vst [vmem:[#allocation4 + $0xb8] sm:$0xf] %v4301_v22  ;;  %v4715_v44 = vsel %vm12677_vm7, %v4710_v57, %v4714_v21 }
 0x327   : > { %4427 = vst [vmem:[#allocation4 + $0xe0] sm:$0xf] %v4408_v23  ;;  %v15763_v58 = vshll.u32 %v14187_v59, 16  ;;  %v4411_v8 = vrot.slane %v4361_v26, 5  ;;  %v4457_v52 = vld [vmem:[#allocation3 + $0x38] sm:$0xf]  ;;  %11310 = vmatprep.subr.bf16.mxu0 %v12104_v5 }
 0x328   : > { %v4458_v3 = vld [vmem:[#allocation3 + $0x3c] sm:$0x1]  ;;  %v12100_v45 = vld [vmem:[%s15675_s5 + $0x1a0] sm:$0xff]   ;;  %v15764_v59 = vshrl.u32 %v14204_v7, 16  ;;  %v15765_v4 = vshll.u32 %v14204_v7, 16  ;;  %v4326_v35 = vshll.u32 %v4217_v18, 16 }
 0x329   : > { %v14306_v36 = vrot.slane %v15763_v58, 5  ;;  %v4546_v41 = vshrl.u32 %v4457_v52, 16  ;;  %v4601_v55 = vld [vmem:[#allocation3 + $0x38] sm:$0xe]  ;;  %4822 = vst [vmem:[#allocation4 + $0x1c] sm:$0xf] %v4715_v44  ;;  %v4412_v27 = vsel %vm13682_vm0, %v10416_v10, %v4411_v8  ;;  %11351 = vmatpush3.bf16.msra.mxu1 %v12100_v45 }
 0x32a   : > { %v14319_v56 = vrot.slane %v15764_v59, 4  ;;  %v14323_v37 = vrot.slane %v15765_v4, 5  ;;  %v12105_v40 = vld [vmem:[%s15675_s5 + $0x1d8] sm:$0xff]   ;;  %4823 = vst [vmem:[#allocation4 + $0x40] sm:$0xf] %v4729_v20  ;;  %v4549_v28 = vshll.u32 %v4457_v52, 16 }
 0x32b   : > { %v4555_v0 = vshll.u32 %v4458_v3, 16  ;;  %v4602_v25 = vld [vmem:[#allocation3 + $0x3c] sm:$0x1]  ;;  %v10423_v15 = vrot.slane %v4601_v55, 9  ;;  %v12106_v7 = vld [vmem:[%s15675_s5 + $0x120] sm:$0xff]   ;;  %v14334_v54 = vrot.slane %v4317_v50, 4  ;;  %11352 = vmatprep.subr.bf16.mxu1 %v12105_v40  ;;  %v4737_v55 = vor.u32 %v14132_v49, %v14126_v16 }
 0x32c   : > { %v14336_v33 = vrot.slane %v4320_v43, 5  ;;  %v4647_v57 = vrot.slane %v4602_v25, 5  ;;  %v4696_v51 = vld [vmem:[#allocation3 + $0x38] sm:$0xf]  ;;  %4428 = vst [vmem:[#allocation4 + $0x104] sm:$0xf] %v4412_v27  ;;  %11311 = vmatpush3.bf16.msra.mxu0 %v12106_v7  ;;  %v4496_v40 = vor.u32 %v14085_v24, %v14083_v63 }
 0x32d   : > { %v14338_v21 = vrot.slane %v4309_v32, 4  ;;  %v4697_v6 = vld [vmem:[#allocation3 + $0x3c] sm:$0x1]  ;;  %v4773_v11 = vshrl.u32 %v4696_v51, 16  ;;  %v4776_v38 = vshll.u32 %v4696_v51, 16  ;;  %v14343_v31 = vrot.slane %v4326_v35, 5 }
 0x32e   : > { %v4459_v14 = vld [vmem:[#allocation3 + $0x40] sm:$0xf]  ;;  %v12107_v18 = vld [vmem:[%s15675_s5 + $0x198] sm:$0xff]   ;;  %v12111_v23 = vld [vmem:[%s15675_s5 + $0x1d0] sm:$0xff]   ;;  %v4648_v47 = vsel %vm13682_vm0, %v10423_v15, %v4647_v57  ;;  %v14353_v50 = vrot.slane %v4546_v41, 4  ;;  %v14355_v43 = vrot.slane %v4549_v28, 5  ;;  %v4468_v32 = vor.u32 %v14022_v9, %v14017_v39 }
 0x32f   : > { %v4560_v22 = vshrl.u32 %v4459_v14, 16  ;;  %v4563_v61 = vshll.u32 %v4459_v14, 16  ;;  %v12110_v1 = vld [vmem:[%s15675_s5 + $0x158] sm:$0xff]   ;;  %v14357_v26 = vrot.slane %v4555_v0, 5  ;;  %v14359_v10 = vld [vmem:[#allocation3 + $0x44] sm:$0x1]  ;;  %v4482_v41 = vor.u32 %v14054_v30, %v14042_v29  ;;  %11353 = vmatpush3.bf16.msra.mxu1 %v12107_v18 }
 0x330   : > { %v12113_v5 = vld [vmem:[%s15675_s5 + $0x118] sm:$0xff]   ;;  %4667 = vst [vmem:[#allocation4 + $0xec] sm:$0xf] %v4648_v47  ;;  %v14366_v58 = vrot.slane %v4773_v11, 4  ;;  %v14368_v8 = vrot.slane %v4776_v38, 5  ;;  %v4782_v52 = vshll.u32 %v4697_v6, 16  ;;  %v4510_v28 = vor.u32 %v14118_v17, %v14112_v46  ;;  %11312 = vmatprep.subr.bf16.mxu0 %v12110_v1  ;;  %11354 = vmatprep.subr.bf16.mxu1 %v12111_v23 }
 0x331   : > { %v14370_v3 = vrot.slane %v4560_v22, 4  ;;  %v14372_v44 = vld [vmem:[#allocation3 + $0x40] sm:$0xe]  ;;  %v14374_v45 = vld [vmem:[#allocation3 + $0x44] sm:$0x1]  ;;  %v12114_v4 = vld [vmem:[%s15675_s5 + $0x190] sm:$0xff]   ;;  %v4323_v49 = vor.u32 %v14336_v33, %v14334_v54  ;;  %v4751_v11 = vor.u32 %v14160_v48, %v14156_v42  ;;  %v4538_v54 = vor.u32 %v14306_v36, %v14227_v2  ;;  %11313 = vmatpush3.bf16.msra.mxu0 %v12113_v5 }
 0x332   : > { %v4698_v20 = vld [vmem:[#allocation3 + $0x40] sm:$0xf]  ;;  %v12118_v35 = vld [vmem:[%s15675_s5 + $0x150] sm:$0xff]   ;;  %v14392_v25 = vrot.slane %v4563_v61, 5  ;;  %v12098_v27 = vld [vmem:[#allocation4 + $0x48] ss:$36 sps:$4 sm:$0xff]   ;;  %v4765_v42 = vor.u32 %v14323_v37, %v14319_v56 }
 0x333   : > { %v12094_v59 = vld [vmem:[#allocation4 + $0x4c] ss:$36 sps:$4 sm:$0xff]   ;;  %v14390_v0 = vld [vmem:[#allocation3 + $0x14] sm:$0x1]  ;;  %v4787_v15 = vshrl.u32 %v4698_v20, 16  ;;  %v4790_v7 = vshll.u32 %v4698_v20, 16  ;;  %11355 = vmatpush3.bf16.msra.mxu1 %v12114_v4  ;;  %11314 = vmatprep.subr.bf16.mxu0 %v12118_v35 }
 0x334   : > { %v12119_v29 = vld [vmem:[%s15675_s5 + $0x1c8] sm:$0xff]   ;;  %5613 = vmatprep.mubr.bf16.mxu0 %v12094_v59  ;;  %v12120_v57 = vld [vmem:[%s15675_s5 + $0x110] sm:$0xff]   ;;  %v15766_v51 = vshll.u32 %v14167_v13, 16  ;;  %v4569_v33 = vshll.u32 %v14359_v10, 16  ;;  %v14420_v48 = vrot.slane %v4782_v52, 5  ;;  %v4796_v52 = vshll.u32 %v14374_v45, 16 }
 0x335   : > { %v12101_v30 = vld [vmem:[#allocation4 + $0x9c] ss:$36 sps:$4 sm:$0xff]   ;;  %v14411_v22 = vrot.slane %v4787_v15, 4  ;;  %v14413_v18 = vrot.slane %v4790_v7, 5  ;;  %5614 = vmatmul.mubr.bf16.gmra.mxu0 %v12098_v27  ;;  %v12108_v61 = vld [vmem:[#allocation4 + $0x94] ss:$36 sps:$4 sm:$0xff]   ;;  %v4552_v15 = vor.u32 %v14355_v43, %v14353_v50  ;;  %11356 = vmatprep.subr.bf16.mxu1 %v12119_v29 }
 0x336   : > { %v12103_v16 = vld [vmem:[#allocation4 + $0x98] ss:$36 sps:$4 sm:$0xff]   ;;  %v4314_v6 = vrot.slane %v15766_v51, 5  ;;  %v15767_v38 = vld [vmem:[#allocation20_spill] sm:$0xff]  ;;  %5686 = vmatprep.mubr.bf16.mxu1 %v12101_v30  ;;  %v4435_v47 = vld [vmem:[#allocation3 + $0x38] sm:$0xf]  ;;  %5621 = vmatprep.mubr.bf16.mxu0 %v12108_v61  ;;  %v4566_v51 = vor.u32 %v14392_v25, %v14370_v3 }
 0x337   : > { %v4524_v14 = vor.u32 %v15767_v38, %v14144_v53  ;;  %v12126_v13 = vld [vmem:[%s15675_s5 + $0x148] sm:$0xff]   ;;  %v4436_v20 = vld [vmem:[#allocation3 + $0x40] sm:$0xf]  ;;  %v14431_v7 = vld [vmem:[#allocation3 + $0x24] sm:$0x1]  ;;  %5687 = vmatmul.mubr.bf16.gmra.mxu1 %v12103_v16  ;;  %v4324_v27 = vrot.slane %v4323_v49, 4  ;;  %v4793_v9 = vor.u32 %v14413_v18, %v14411_v22  ;;  %11315 = vmatpush3.bf16.msra.mxu0 %v12120_v57 }
 0x338   : > { %v12121_v59 = vld [vmem:[%s15675_s5 + $0x188] sm:$0xff]   ;;  %v4315_v23 = vsel %vm12677_vm7, %v14338_v21, %v4314_v6  ;;  %4443 = vst [vmem:[#allocation4 + $0xe4] sm:$0xf] %v4435_v47  ;;  %4444 = vst [vmem:[#allocation4 + $0x108] sm:$0xf] %v4436_v20  ;;  %v12127_v30 = vld [vmem:[%s15675_s5 + $0x1c0] sm:$0xff]   ;;  %v4779_v21 = vor.u32 %v14368_v8, %v14366_v58  ;;  %11316 = vmatprep.subr.bf16.mxu0 %v12126_v13 }
 0x339   : > { %v4193_v5 = vld [vmem:[#allocation3 + $0x38] sm:$0xf]  ;;  %4344 = vst [vmem:[#allocation4 + $0xdc] sm:$0xf] %v4315_v23  ;;  %v4469_v16 = vrot.slane %v4468_v32, 4  ;;  %v4483_v6 = vrot.slane %v4482_v41, 4  ;;  %v4329_v58 = vsel %vm12677_vm7, %v4324_v27, %v14343_v31  ;;  %11357 = vmatpush3.bf16.msra.mxu1 %v12121_v59 }
 0x33a   : > { %4201 = vst [vmem:[#allocation4 + $0xfc] sm:$0xf] %v4193_v5  ;;  %v15768_v49 = vld [vmem:[#allocation14_spill] sm:$0xff]  ;;  %v4627_v20 = vrot.slane %v14390_v0, 5  ;;  %v4673_v23 = vld [vmem:[#allocation3 + $0x28] sm:$0xf]  ;;  %11358 = vmatprep.subr.bf16.mxu1 %v12127_v30 }
 0x33b   : > { %v15769_v61 = vshll.u32 %v15768_v49, 16  ;;  %4681 = vst [vmem:[#allocation4 + $0x84] sm:$0xf] %v4673_v23  ;;  %v4738_v8 = vrot.slane %v4737_v55, 4  ;;  %v15770_v4 = vld [vmem:[#allocation19_spill] sm:$0xff]  ;;  %v12130_v31 = vld [vmem:[%s15675_s5 + $0x180] sm:$0xff]  }
 0x33c   : > { %v15771_v35 = vshll.u32 %v15770_v4, 16  ;;  %v4674_v1 = vld [vmem:[#allocation3 + $0x30] sm:$0xf]  ;;  %v4675_v39 = vld [vmem:[#allocation3 + $0x38] sm:$0xf]  ;;  %v12129_v32 = vld [vmem:[%s15675_s5 + $0x108] sm:$0xff]  }
 0x33d   : > { %v4487_v47 = vrot.slane %v15769_v61, 5  ;;  %4345 = vst [vmem:[#allocation4 + $0x100] sm:$0xf] %v4329_v58  ;;  %v15772_v41 = vld [vmem:[#allocation13_spill] sm:$0xff]  ;;  %v15773_v29 = vld [vmem:[#allocation15_spill] sm:$0xff]  ;;  %v4752_v22 = vrot.slane %v4751_v11, 4  ;;  %11317 = vmatpush3.bf16.msra.mxu0 %v12129_v32  ;;  %11359 = vmatpush3.bf16.msra.mxu1 %v12130_v31 }
 0x33e   : > { %v4742_v5 = vrot.slane %v15771_v35, 5  ;;  %v4474_v55 = vsel %vm12677_vm7, %v4469_v16, %v15772_v41  ;;  %v15774_v27 = vrot.slane %v15773_v29, 9  ;;  %4682 = vst [vmem:[#allocation4 + $0xa8] sm:$0xf] %v4674_v1  ;;  %4683 = vst [vmem:[#allocation4 + $0xcc] sm:$0xf] %v4675_v39 }
 0x33f   : > { %v4488_v0 = vsel %vm12677_vm7, %v4483_v6, %v4487_v47  ;;  %v4676_v18 = vld [vmem:[#allocation3 + $0x40] sm:$0xf]  ;;  %4581 = vst [vmem:[#allocation4 + $0x10] sm:$0xf] %v4474_v55  ;;  %v4497_v61 = vrot.slane %v4496_v40, 4  ;;  %v4511_v11 = vrot.slane %v4510_v28, 4  ;;  %v4757_v58 = vsel %vm12677_vm7, %v4752_v22, %v14162_v60 }
 0x340   : > { %v4628_v57 = vsel %vm13682_vm0, %v15774_v27, %v4627_v20  ;;  %v12112_v49 = vld [vmem:[#allocation4 + $0x90] ss:$36 sps:$4 sm:$0xff]   ;;  %4582 = vst [vmem:[#allocation4 + $0x34] sm:$0xf] %v4488_v0  ;;  %v4743_v6 = vsel %vm12677_vm7, %v4738_v8, %v4742_v5  ;;  %v15775_v1 = vld [vmem:[#allocation17_spill] sm:$0xff]  ;;  %v4635_v63 = vrot.slane %v14431_v7, 5 }
 0x341   : > { %4662 = vst [vmem:[#allocation4 + $0x38] sm:$0xf] %v4628_v57  ;;  %v12133_v16 = vld [vmem:[%s15675_s5 + $0x140] sm:$0xff]   ;;  %v15776_v13 = vshll.u32 %v15775_v1, 16  ;;  %4684 = vst [vmem:[#allocation4 + $0xf0] sm:$0xf] %v4676_v18  ;;  %5622 = vmatmul.mubr.bf16.gmra.mxu0 %v12112_v49 }
 0x342   : > { %v4600_v20 = vld [vmem:[#allocation3 + $0x34] sm:$0x1]  ;;  %v12134_v23 = vld [vmem:[%s15675_s5 + $0x100] sm:$0xff]   ;;  %4824 = vst [vmem:[#allocation4 + $0x64] sm:$0xf] %v4743_v6  ;;  %v4766_v24 = vrot.slane %v4765_v42, 4  ;;  %11318 = vmatprep.subr.bf16.mxu0 %v12133_v16 }
 0x343   : > { %v4515_v47 = vrot.slane %v15776_v13, 5  ;;  %v15777_v46 = vld [vmem:[#allocation23_spill] sm:$0xff]  ;;  %v14494_v28 = vld [vmem:[#allocation3 + $0x44] sm:$0x1]  ;;  %4825 = vst [vmem:[#allocation4 + $0x88] sm:$0xf] %v4757_v58  ;;  %11319 = vmatpush3.bf16.msra.mxu0 %v12134_v23 }
 0x344   : > { %v15778_v17 = vshll.u32 %v15777_v46, 16  ;;  %v15779_v59 = vld [vmem:[#allocation16_spill] sm:$0xff]  ;;  %v4780_v7 = vrot.slane %v4779_v21, 4  ;;  %v4525_v56 = vrot.slane %v4524_v14, 4  ;;  %v15780_v30 = vld [vmem:[#allocation18_spill] sm:$0xff]  ;;  %v4539_v53 = vrot.slane %v4538_v54, 4 }
 0x345   : > { %v4502_v8 = vsel %vm12677_vm7, %v4497_v61, %v15779_v59  ;;  %v4516_v60 = vsel %vm12677_vm7, %v4511_v11, %v4515_v47  ;;  %v14504_v37 = vld [vmem:[#allocation3 + $0x10] sm:$0xe]  ;;  %v12115_v42 = vld [vmem:[#allocation4 + $0xe4] ss:$36 sps:$4 sm:$0xff]   ;;  %v15781_v35 = vrot.slane %v15780_v30, 9  ;;  %v15782_v38 = vld [vmem:[#allocation22_spill] sm:$0xff] }
 0x346   : > { %v4770_v40 = vrot.slane %v15778_v17, 5  ;;  %v12122_v4 = vld [vmem:[#allocation4 + $0x1c] ss:$36 sps:$4 sm:$0xff]   ;;  %4583 = vst [vmem:[#allocation4 + $0x58] sm:$0xf] %v4502_v8  ;;  %v15783_v14 = vshll.u32 %v15782_v38, 16  ;;  %v4785_v2 = vsel %vm12677_vm7, %v4780_v7, %v14420_v48  ;;  %5694 = vmatprep.mubr.bf16.mxu1 %v12115_v42 }
 0x347   : > { %4584 = vst [vmem:[#allocation4 + $0x7c] sm:$0xf] %v4516_v60  ;;  %v4636_v5 = vsel %vm13682_vm0, %v15781_v35, %v4635_v63  ;;  %v4831_v41 = vld [vmem:[#allocation3 + $0x14] sm:$0x1]  ;;  %v4832_v55 = vld [vmem:[#allocation3 + $0x18] sm:$0xe] }
 0x348   : > { %v4771_v39 = vsel %vm12677_vm7, %v4766_v24, %v4770_v40  ;;  %v4543_v21 = vrot.slane %v15783_v14, 5  ;;  %v4833_v32 = vld [vmem:[#allocation3 + $0x1c] sm:$0x1]  ;;  %v4834_v0 = vld [vmem:[#allocation3 + $0x20] sm:$0xe]  ;;  %v4643_v22 = vrot.slane %v4600_v20, 5 }
 0x349   : > { %v4835_v29 = vld [vmem:[#allocation3 + $0x24] sm:$0x1]  ;;  %v12117_v27 = vld [vmem:[#allocation4 + $0xe0] ss:$36 sps:$4 sm:$0xff]   ;;  %v14520_v57 = vld [vmem:[%s15675_s5 + $0x238] sm:$0xff]   ;;  %v4794_v18 = vrot.slane %v4793_v9, 4 }
 0x34a   : > { %4664 = vst [vmem:[#allocation4 + $0x80] sm:$0xf] %v4636_v5  ;;  %4826 = vst [vmem:[#allocation4 + $0xac] sm:$0xf] %v4771_v39  ;;  %v15784_v36 = vld [vmem:[#allocation21_spill] sm:$0xff]  ;;  %v4544_v49 = vsel %vm12677_vm7, %v4539_v53, %v4543_v21  ;;  %v4798_v16 = vrot.slane %v4796_v52, 5  ;;  %5695 = vmatmul.mubr.bf16.gmra.mxu1 %v12117_v27  ;;  %11790 = vmatprep.subr.bf16.mxu0 %v14520_v57 }
 0x34b   : > { %v4530_v54 = vsel %vm12677_vm7, %v4525_v56, %v15784_v36  ;;  %4827 = vst [vmem:[#allocation4 + $0xd0] sm:$0xf] %v4785_v2  ;;  %v4553_v48 = vrot.slane %v4552_v15, 4  ;;  %v4567_v6 = vrot.slane %v4566_v51, 4  ;;  %v4838_v61 = vld [vmem:[#allocation3 + $0x30] sm:$0xe]  ;;  %5800 = vmatprep.mubr.bf16.mxu1 %v12122_v4 }
 0x34c   : > { %4585 = vst [vmem:[#allocation4 + $0xa0] sm:$0xf] %v4530_v54  ;;  %v12124_v9 = vld [vmem:[#allocation4 + $0xdc] ss:$36 sps:$4 sm:$0xff]   ;;  %4586 = vst [vmem:[#allocation4 + $0xc4] sm:$0xf] %v4544_v49  ;;  %v4799_v50 = vsel %vm12677_vm7, %v4794_v18, %v4798_v16 }
 0x34d   : > { %v12128_v31 = vld [vmem:[#allocation4 + $0xd8] ss:$36 sps:$4 sm:$0xff]   ;;  %v15785_v11 = vld [vmem:[#allocation24_spill] sm:$0xff]  ;;  %v4571_v45 = vrot.slane %v4569_v33, 5  ;;  %v4558_v43 = vsel %vm12677_vm7, %v4553_v48, %v14357_v26  ;;  %v4651_v3 = vrot.slane %v14494_v28, 5  ;;  %v10425_v25 = vrot.slane %v14504_v37, 9  ;;  %5629 = vmatprep.mubr.bf16.mxu0 %v12124_v9 }
 0x34e   : > { %v15786_v1 = vrot.slane %v15785_v11, 9  ;;  %4828 = vst [vmem:[#allocation4 + $0xf4] sm:$0xf] %v4799_v50  ;;  %4587 = vst [vmem:[#allocation4 + $0xe8] sm:$0xf] %v4558_v43  ;;  %v4864_v33 = vrot.slane %v4831_v41, 5  ;;  %5630 = vmatmul.mubr.bf16.gmra.mxu0 %v12128_v31 }
 0x34f   : > { %v4572_v10 = vsel %vm12677_vm7, %v4567_v6, %v4571_v45  ;;  %v10426_v15 = vrot.slane %v4832_v55, 9  ;;  %v4868_v52 = vrot.slane %v4833_v32, 5  ;;  %v4918_v51 = vld [vmem:[#allocation4 + $0x3c] sm:$0xff]  ;;  %v12131_v47 = vld [vmem:[#allocation4 + $0x14] ss:$36 sps:$4 sm:$0xff]   ;;  %v15787_v26 = vrot.slane %v14372_v44, 9 }
 0x350   : > { %v4644_v13 = vsel %vm13682_vm0, %v15786_v1, %v4643_v22  ;;  %4588 = vst [vmem:[#allocation4 + $0x10c] sm:$0xf] %v4572_v10  ;;  %v10427_v23 = vrot.slane %v4834_v0, 9  ;;  %v4872_v58 = vrot.slane %v4835_v29, 5  ;;  %v10429_v63 = vrot.slane %v4838_v61, 9  ;;  %v4913_v28 = vld [vmem:[#allocation4 + $0x18] sm:$0xff]  ;;  %5735 = vmatprep.mubr.bf16.mxu0 %v12131_v47 }
 0x351   : > { %4666 = vst [vmem:[#allocation4 + $0xc8] sm:$0xf] %v4644_v13  ;;  %v4652_v20 = vsel %vm13682_vm0, %v15787_v26, %v4651_v3  ;;  %v4865_v24 = vsel %vm13682_vm0, %v10425_v25, %v4864_v33  ;;  %v4869_v46 = vsel %vm13682_vm0, %v10426_v15, %v4868_v52  ;;  %v4839_v17 = vld [vmem:[#allocation3 + $0x34] sm:$0x1]  ;;  %v4840_v40 = vld [vmem:[#allocation3 + $0x38] sm:$0xe]  ;;  %v10440_v8 = vcombine.low %v4913_v28, %v4918_v51 }
 0x352   : > { %4668 = vst [vmem:[#allocation4 + $0x110] sm:$0xf] %v4652_v20  ;;  %4902 = vst [vmem:[#allocation4 + $0x20] sm:$0xf] %v4865_v24  ;;  %v4873_v44 = vsel %vm13682_vm0, %v10427_v23, %v4872_v58  ;;  %v4880_v59 = vrot.slane %v4839_v17, 5  ;;  %v10430_v7 = vrot.slane %v4840_v40, 9 }
 0x353   : > { %4903 = vst [vmem:[#allocation4 + $0x44] sm:$0xf] %v4869_v46  ;;  %v12135_v60 = vld [vmem:[#allocation4 + $0x64] ss:$36 sps:$4 sm:$0xff]   ;;  %4904 = vst [vmem:[#allocation4 + $0x68] sm:$0xf] %v4873_v44  ;;  %5801 = vmatmul.mubr.bf16.vlgmr.msra.gmra.mxu1 %v10440_v8 }
 0x354   : > { %v4841_v56 = vld [vmem:[#allocation3 + $0x3c] sm:$0x1]  ;;  %v4881_v37 = vsel %vm13682_vm0, %v10429_v63, %v4880_v59  ;;  %v4842_v42 = vld [vmem:[#allocation3 + $0x40] sm:$0xe]  ;;  %5808 = vmatprep.mubr.bf16.mxu1 %v12135_v60  ;;  %v12141_v30 = vld [vmem:[%s15675_s5 + $0x230] sm:$0xff]  }
 0x355   : > { %v4884_v4 = vrot.slane %v4841_v56, 5  ;;  %4906 = vst [vmem:[#allocation4 + $0xb0] sm:$0xf] %v4881_v37  ;;  %v4843_v35 = vld [vmem:[#allocation3 + $0x44] sm:$0x1]  ;;  %v10431_v5 = vrot.slane %v4842_v42, 9 }
 0x356   : > { %v4928_v39 = vld [vmem:[#allocation4 + $0x84] sm:$0xff]  ;;  %v12138_v53 = vld [vmem:[#allocation4 + $0x10] ss:$36 sps:$4 sm:$0xff]   ;;  %v4888_v14 = vrot.slane %v4843_v35, 5  ;;  %v12139_v21 = vld [vmem:[#allocation4 + $0x5c] ss:$36 sps:$4 sm:$0xff]  }
 0x357   : > { %v4885_v38 = vsel %vm13682_vm0, %v10430_v7, %v4884_v4  ;;  %v6856_v41 = vld [vmem:[#allocation3 + $0x48] sm:$0xe]  ;;  %5736 = vmatmul.mubr.bf16.vlgmr.msra.gmra.mxu0 %v12138_v53  ;;  %v4923_v32 = vld [vmem:[#allocation4 + $0x60] sm:$0xff]  ;;  %v6857_v0 = vld [vmem:[#allocation3 + $0x4c] sm:$0x1] }
 0x358   : > { %4907 = vst [vmem:[#allocation4 + $0xd4] sm:$0xf] %v4885_v38  ;;  %v4889_v55 = vsel %vm13682_vm0, %v10431_v5, %v4888_v14  ;;  %11791 = vmatpush3.bf16.msra.mxu0 %v14520_v57  ;;  %5743 = vmatprep.mubr.bf16.mxu0 %v12139_v21  ;;  %v10449_v29 = vcombine.low %v4923_v32, %v4928_v39  ;;  %v12144_v27 = vld [vmem:[%s15675_s5 + $0x228] sm:$0xff]   ;;  %v10573_v2 = vrot.slane %v6856_v41, 9  ;;  %v6904_v36 = vrot.slane %v6857_v0, 5  ;;  %v12148_v57 = vld [vmem:[%s15675_s5 + $0x220] sm:$0xff]  }
 0x359   : > { %4908 = vst [vmem:[#allocation4 + $0xf8] sm:$0xf] %v4889_v55  ;;  %11792 = vmatprep.subr.bf16.mxu0 %v12141_v30  ;;  %v12142_v54 = vld [vmem:[#allocation4 + $0xac] ss:$36 sps:$4 sm:$0xff]   ;;  %v12145_v22 = vld [vmem:[#allocation4 + $0x58] ss:$36 sps:$4 sm:$0xff]  }
 0x35a   : > { %v6905_v18 = vsel %vm13682_vm0, %v10573_v2, %v6904_v36  ;;  %v4938_v49 = vld [vmem:[#allocation4 + $0xcc] sm:$0xff]  ;;  %v12146_v16 = vld [vmem:[#allocation4 + $0xa4] ss:$36 sps:$4 sm:$0xff]   ;;  %v15788_v11 = vld [vmem:[#allocation11_spill] sm:$0xff] }
 0x35b   : > { %5809 = vmatmul.mubr.bf16.gmra.mxu1 %v10449_v29  ;;  %v4943_v48 = vld [vmem:[#allocation4 + $0xf0] sm:$0xff]  ;;  %v4933_v61 = vld [vmem:[#allocation4 + $0xa8] sm:$0xff]  ;;  %v12150_v13 = vld [vmem:[#allocation4 + $0xa0] ss:$36 sps:$4 sm:$0xff]  }
 0x35c   : > { %5816 = vmatprep.mubr.bf16.mxu1 %v12142_v54  ;;  %11793 = vmatpush3.bf16.msra.mxu0 %v12141_v30  ;;  %v10458_v9 = vcombine.low %v4933_v61, %v4938_v49  ;;  %v12149_v31 = vld [vmem:[%s15675_s5 + $0x218] sm:$0xff]   ;;  %v10468_v1 = vcombine.high %v4943_v48, %v15788_v11  ;;  %v12153_v45 = vld [vmem:[%s15675_s5 + $0x210] sm:$0xff]   ;;  %v10467_v43 = vcombine.low %v4943_v48, %v15788_v11  ;;  %v12154_v3 = vld [vmem:[%s15675_s5 + $0x208] sm:$0xff]  }
 0x35d   : > { %11794 = vmatprep.subr.bf16.mxu0 %v12144_v27  ;;  %v12151_v50 = vld [vmem:[#allocation4 + $0xec] ss:$36 sps:$4 sm:$0xff]   ;;  %v12156_v33 = vld [vmem:[#allocation4 + $0x20] ss:$36 sps:$4 sm:$0xff]   ;;  %v12168_v24 = vld [vmem:[%s15677_s7 + $0xe8] sm:$0xff]  }
 0x35e   : > { %v12155_v25 = vld [vmem:[#allocation4 + $0xe8] ss:$36 sps:$4 sm:$0xff]   ;;  %v12157_v10 = vld [vmem:[%s15675_s5 + $0x200] sm:$0xff]   ;;  %v12164_v20 = vld [vmem:[%s15677_s7 + $0xf0] sm:$0xff]  }
 0x35f   : > { %5744 = vmatmul.mubr.bf16.gmra.mxu0 %v12145_v22  ;;  %v12158_v15 = vld [vmem:[#allocation4 + $0x68] ss:$36 sps:$4 sm:$0xff]   ;;  %v12159_v52 = vld [vmem:[#allocation4 + $0xb0] ss:$36 sps:$4 sm:$0xff]   ;;  %v12166_v58 = vld [vmem:[%s15677_s7 + $0xb0] sm:$0xff]  }
 0x360   : > { %v12160_v6 = vld [vmem:[#allocation4 + $0xf8] ss:$36 sps:$4 sm:$0xff]   ;;  %11795 = vmatpush3.bf16.msra.mxu0 %v12144_v27  ;;  %5751 = vmatprep.mubr.bf16.mxu0 %v12146_v16  ;;  %v12161_v51 = vld [vmem:[%s15677_s7 + $0xf8] sm:$0xff]   ;;  %v12167_v63 = vld [vmem:[%s15677_s7 + $0x70] sm:$0xff]  }
 0x361   : > { %6921 = vst [vmem:[#allocation4 + $0x11c] sm:$0xf] %v6905_v18  ;;  %11796 = vmatprep.subr.bf16.mxu0 %v12148_v57  ;;  %v12162_v47 = vld [vmem:[%s15677_s7 + $0xb8] sm:$0xff]   ;;  %v12169_v46 = vld [vmem:[%s15677_s7 + $0x30] sm:$0xff]   ;;  %v12170_v17 = vld [vmem:[%s15677_s7 + $0xa8] sm:$0xff]  }
 0x362   : > { %v12163_v26 = vld [vmem:[%s15677_s7 + $0x78] sm:$0xff]   ;;  %v12171_v40 = vld [vmem:[%s15677_s7 + $0x68] sm:$0xff]   ;;  %v12172_v28 = vld [vmem:[%s15677_s7 + $0xe0] sm:$0xff]  }
 0x363   : > { %5817 = vmatmul.mubr.bf16.gmra.mxu1 %v10458_v9  ;;  %11396 = vmatprep.subr.bf16.mxu1 %v12163_v26  ;;  %v12165_v23 = vld [vmem:[%s15677_s7 + $0x38] sm:$0xff]   ;;  %v12173_v44 = vld [vmem:[%s15677_s7 + $0x28] sm:$0xff]   ;;  %v12174_v59 = vld [vmem:[%s15677_s7 + $0xa0] sm:$0xff]  }
 0x364   : > { %5824 = vmatprep.mubr.bf16.mxu1 %v10468_v1  ;;  %11797 = vmatpush3.bf16.msra.mxu0 %v12148_v57  ;;  %v12175_v8 = vld [vmem:[%s15677_s7 + $0x60] sm:$0xff]   ;;  %v12176_v60 = vld [vmem:[%s15677_s7 + $0xd8] sm:$0xff]   ;;  %v12180_v30 = vld [vmem:[%s15677_s7 + $0xd0] sm:$0xff]  }
 0x365   : > { %11798 = vmatprep.subr.bf16.mxu0 %v12149_v31  ;;  %11397 = vmatpush3.bf16.msra.mxu1 %v12165_v23  ;;  %v12177_v7 = vld [vmem:[%s15677_s7 + $0x20] sm:$0xff]   ;;  %v12178_v56 = vld [vmem:[%s15677_s7 + $0x98] sm:$0xff]   ;;  %v12182_v21 = vld [vmem:[%s15677_s7 + $0x90] sm:$0xff]  }
 0x366   : > { %11398 = vmatprep.subr.bf16.mxu1 %v12167_v63  ;;  %v6362_v37 = vld [vmem:[#allocation3] sm:$0xe]  ;;  %v6363_v42 = vld [vmem:[#allocation3 + $0x4] sm:$0x1]  ;;  %v12179_v4 = vld [vmem:[%s15677_s7 + $0x58] sm:$0xff]  }
 0x367   : > { %5752 = vmatmul.mubr.bf16.gmra.mxu0 %v12150_v13  ;;  %v10550_v35 = vrot.slane %v6362_v37, 9  ;;  %v6396_v5 = vrot.slane %v6363_v42, 5  ;;  %v6218_v53 = vld [vmem:[#allocation3] sm:$0xf]  ;;  %v6219_v38 = vld [vmem:[#allocation3 + $0x4] sm:$0x1] }
 0x368   : > { %11799 = vmatpush3.bf16.msra.mxu0 %v12149_v31  ;;  %5759 = vmatprep.mubr.bf16.mxu0 %v12151_v50  ;;  %v12181_v14 = vld [vmem:[%s15677_s7 + $0x18] sm:$0xff]   ;;  %v6235_v41 = vshrl.u32 %v6218_v53, 16  ;;  %v6238_v55 = vshll.u32 %v6218_v53, 16  ;;  %v6244_v32 = vshll.u32 %v6219_v38, 16  ;;  %v12183_v0 = vld [vmem:[%s15677_s7 + $0x50] sm:$0xff]   ;;  %v12184_v29 = vld [vmem:[%s15677_s7 + $0xc8] sm:$0xff]  }
 0x369   : > { %11800 = vmatprep.subr.bf16.mxu0 %v12153_v45  ;;  %11399 = vmatpush3.bf16.msra.mxu1 %v12169_v46  ;;  %v6397_v39 = vsel %vm13682_vm0, %v10550_v35, %v6396_v5  ;;  %v12185_v36 = vld [vmem:[%s15677_s7 + $0x10] sm:$0xff]   ;;  %v12186_v54 = vld [vmem:[%s15677_s7 + $0x88] sm:$0xff]   ;;  %v12188_v49 = vld [vmem:[%s15677_s7 + $0xc0] sm:$0xff]  }
 0x36a   : > { %11400 = vmatprep.subr.bf16.mxu1 %v12171_v40  ;;  %6434 = vst [vmem:[#allocation4 + $0x8] sm:$0xf] %v6397_v39  ;;  %v6237_v27 = vrot.slane %v6235_v41, 4  ;;  %v6240_v2 = vrot.slane %v6238_v55, 5  ;;  %v6246_v57 = vrot.slane %v6244_v32, 5  ;;  %v12187_v18 = vld [vmem:[%s15677_s7 + $0x48] sm:$0xff]  }
 0x36b   : > { %5825 = vmatmul.mubr.bf16.gmra.mxu1 %v10467_v43  ;;  %v12189_v48 = vld [vmem:[%s15677_s7 + $0x8] sm:$0xff]   ;;  %v12193_v9 = vld [vmem:[%s15677_s7 + $0x40] sm:$0xff]   ;;  %v12194_v31 = vld [vmem:[%s15677_s7 + $0x1f8] sm:$0xff]  }
 0x36c   : > { %11801 = vmatpush3.bf16.msra.mxu0 %v12153_v45  ;;  %v6241_v22 = vor.u32 %v6240_v2, %v6237_v27  ;;  %v12195_v1 = vld [vmem:[%s15677_s7] sm:$0xff]   ;;  %v12201_v50 = vld [vmem:[%s15677_s7 + $0x178] sm:$0xff]   ;;  %v6689_v27 = vld [vmem:[#allocation3 + $0x48] sm:$0xf] }
 0x36d   : > { %11802 = vmatprep.subr.bf16.mxu0 %v12154_v3  ;;  %11401 = vmatpush3.bf16.msra.mxu1 %v12173_v44  ;;  %6697 = vst [vmem:[#allocation4 + $0x114] sm:$0xf] %v6689_v27 }
 0x36e   : > { %11402 = vmatprep.subr.bf16.mxu1 %v12175_v8  ;;  %v6242_v16 = vrot.slane %v6241_v22, 4 }
 0x36f   : > { %5760 = vmatmul.mubr.bf16.gmra.mxu0 %v12155_v25 }
 0x370   : > { %11803 = vmatpush3.bf16.msra.mxu0 %v12154_v3  ;;  %11806 = vmatprep.mubr.bf16.mxu0 %v12156_v33  ;;  %v6247_v61 = vsel %vm12677_vm7, %v6242_v16, %v6246_v57 }
 0x371   : > { %11804 = vmatprep.subr.bf16.mxu0 %v12157_v10  ;;  %11403 = vmatpush3.bf16.msra.mxu1 %v12177_v7  ;;  %6354 = vst [vmem:[#allocation4 + $0x4] sm:$0xf] %v6247_v61 }
 0x372   : > { %11404 = vmatprep.subr.bf16.mxu1 %v12179_v4 }
 0x374   : > { %11805 = vmatpush3.bf16.msra.mxu0 %v12157_v10 }
 0x375   : > { %11436 = vmatprep.subr.bf16.mxu0 %v12161_v51  ;;  %11405 = vmatpush3.bf16.msra.mxu1 %v12181_v14 }
 0x376   : > { %11406 = vmatprep.subr.bf16.mxu1 %v12183_v0 }
 0x377   : > { %11807 = vmatmul.mubr.bf16.vlgmr.msra.gmra.mxu0 %v12158_v15 }
 0x378   : > { %11810 = vmatprep.mubr.bf16.mxu0 %v12159_v52  ;;  %11437 = vmatpush3.bf16.msra.mxu0 %v12162_v47 }
 0x379   : > { %11438 = vmatprep.subr.bf16.mxu0 %v12164_v20  ;;  %11407 = vmatpush3.bf16.msra.mxu1 %v12185_v36 }
 0x37a   : > { %11408 = vmatprep.subr.bf16.mxu1 %v12187_v18 }
 0x37c   : > { %11439 = vmatpush3.bf16.msra.mxu0 %v12166_v58 }
 0x37d   : > { %11440 = vmatprep.subr.bf16.mxu0 %v12168_v24  ;;  %11409 = vmatpush3.bf16.msra.mxu1 %v12189_v48 }
 0x37e   : > { %11410 = vmatprep.subr.bf16.mxu1 %v12193_v9 }
 0x37f   : > { %11811 = vmatmul.mubr.bf16.gmra.mxu0 %v12160_v6  ;;  %v12190_v6 = vld [vmem:[%s15677_s7 + $0x80] sm:$0xff]  }
 0x380   : > { %11441 = vmatpush3.bf16.msra.mxu0 %v12170_v17 }
 0x381   : > { %11442 = vmatprep.subr.bf16.mxu0 %v12172_v28  ;;  %11411 = vmatpush3.bf16.msra.mxu1 %v12195_v1 }
 0x382   : > { %11476 = vmatprep.subr.bf16.mxu1 %v12201_v50 }
 0x384   : > { %11443 = vmatpush3.bf16.msra.mxu0 %v12174_v59 }
 0x385   : > { %11444 = vmatprep.subr.bf16.mxu0 %v12176_v60 }
 0x388   : > { %11445 = vmatpush3.bf16.msra.mxu0 %v12178_v56 }
 0x389   : > { %11446 = vmatprep.subr.bf16.mxu0 %v12180_v30 }
 0x38c   : > { %11447 = vmatpush3.bf16.msra.mxu0 %v12182_v21 }
 0x38d   : > { %11448 = vmatprep.subr.bf16.mxu0 %v12184_v29 }
 0x390   : > { %11449 = vmatpush3.bf16.msra.mxu0 %v12186_v54  ;;  %v8338_v54 = vld [vmem:[#allocation3] sm:$0xf] }
 0x391   : > { %11450 = vmatprep.subr.bf16.mxu0 %v12188_v49  ;;  %v8355_v16 = vshrl.u32 %v8338_v54, 16  ;;  %v8358_v48 = vshll.u32 %v8338_v54, 16 }
 0x393   : > { %v8357_v50 = vrot.slane %v8355_v16, 4  ;;  %v8360_v27 = vrot.slane %v8358_v48, 5 }
 0x394   : > { %11451 = vmatpush3.bf16.msra.mxu0 %v12190_v6 }
 0x395   : > { %11516 = vmatprep.subr.bf16.mxu0 %v12194_v31  ;;  %v8339_v31 = vld [vmem:[#allocation3 + $0x4] sm:$0x1]  ;;  %v8361_v16 = vor.u32 %v8360_v27, %v8357_v50 }
 0x3d8   : > { %v14696_v11 = vpop.f32.mrf.mxu1 }
 0x3da   : > { %v14701_v13 = vpop.f32.mrf.mxu1 }
 0x3dc   : > { %v14703_v45 = vpop.f32.mrf.mxu0  ;;  %v14708_v43 = vpop.f32.mrf.mxu1 }
 0x3de   : > { %v14710_v3 = vpop.f32.mrf.mxu1  ;;  %v11241_v25 = vpop.f32.mrf.mxu0 }
 0x3df   : > { %v11242_v12 = vadd.f32 %v11241_v25, %v14703_v45 }
 0x3e0   : > { %v14712_v10 = vpop.f32.mrf.mxu1  ;;  %v11243_v33 = vpop.f32.mrf.mxu0 }
 0x3e1   : > { %v5608_v48 = vadd.f32 %v11242_v12, %v10433_v62 }
 0x3e2   : > { %v14714_v15 = vpop.f32.mrf.mxu1  ;;  %v11244_v51 = vpop.f32.mrf.mxu0 }
 0x3e3   : > { %v11245_v19 = vadd.f32 %v11244_v51, %v11243_v33  ;;  %v11288_v45 = vadd.f32 %v14714_v15, %v14712_v10  ;;  %v11285_v10 = vadd.f32 %v14710_v3, %v14708_v43 }
 0x3e4   : > { %v14716_v52 = vpop.f32.mrf.mxu1 }
 0x3e5   : > { %v5611_v33 = vadd.f32 %v11245_v19, %v10433_v62 }
 0x3e6   : > { %v14718_v47 = vpop.f32.mrf.mxu1 }
 0x3e7   : > { %v5676_v3 = vadd.f32 %v11285_v10, %v5611_v33 }
 0x3f5   : > { %v11246_v26 = vpop.f32.mrf.mxu0 }
 0x3f7   : > { %v11247_v20 = vpop.f32.mrf.mxu0  ;;  %v14720_v23 = vpop.f32.mrf.mxu1 }
 0x3f8   : > { %v11248_v61 = vadd.f32 %v11247_v20, %v11246_v26  ;;  %v14780_v20 = vld [vmem:[#allocation3 + $0x4] sm:$0x1] }
 0x3f9   : > { %v11249_v58 = vpop.f32.mrf.mxu0  ;;  %v14722_v63 = vpop.f32.mrf.mxu1 }
 0x3fa   : > { %v5616_v54 = vadd.f32 %v11248_v61, %v10433_v62 }
 0x3fb   : > { %v11250_v24 = vpop.f32.mrf.mxu0  ;;  %v14724_v46 = vpop.f32.mrf.mxu1 }
 0x3fc   : > { %v5681_v50 = vadd.f32 %v11288_v45, %v5616_v54 }
 0x3fd   : > { %v14726_v40 = vpop.f32.mrf.mxu1 }
 0x401   : > { %v11252_v17 = vpop.f32.mrf.mxu0 }
 0x403   : > { %v11253_v28 = vpop.f32.mrf.mxu0 }
 0x404   : > { %v11254_v51 = vadd.f32 %v11253_v28, %v11252_v17  ;;  %v14795_v28 = vrot.slane %v8361_v16, 4 }
 0x405   : > { %v14730_v59 = vpop.f32.mrf.mxu0 }
 0x407   : > { %v14734_v60 = vpop.f32.mrf.mxu0 }
 0x408   : > { %v11257_v15 = vadd.f32 %v14734_v60, %v14730_v59  ;;  %v11297_v60 = vadd.f32 %v14726_v40, %v14724_v46 }
 0x40a   : > { %v14728_v44 = vpop.f32.mrf.mxu1 }
 0x40c   : > { %v14732_v8 = vpop.f32.mrf.mxu1 }
 0x40e   : > { %v14736_v7 = vpop.f32.mrf.mxu1  ;;  %v14738_v56 = vpop.f32.mrf.mxu0 }
 0x410   : > { %v14740_v37 = vpop.f32.mrf.mxu1  ;;  %v11259_v42 = vpop.f32.mrf.mxu0 }
 0x411   : > { %v11260_v19 = vadd.f32 %v11259_v42, %v14738_v56 }
 0x412   : > { %v14744_v30 = vpop.f32.mrf.mxu0 }
 0x413   : > { %v14742_v4 = vpop.f32.mrf.mxu1 }
 0x414   : > { %v14748_v5 = vpop.f32.mrf.mxu0 }
 0x415   : > { %v14746_v35 = vpop.f32.mrf.mxu1  ;;  %v11263_v43 = vadd.f32 %v14748_v5, %v14744_v30 }
 0x416   : > { %v11362_v5 = vadd.f32 %v14746_v35, %v14742_v4 }
 0x417   : > { %v14750_v39 = vpop.f32.mrf.mxu1  ;;  %v11320_v53 = vpop.f32.mrf.mxu0 }
 0x418   : > { %15789 = vst [vmem:[#allocation20_spill] sm:$0xff] %v14750_v39 }
 0x419   : > { %v14752_v38 = vpop.f32.mrf.mxu1  ;;  %v11321_v14 = vpop.f32.mrf.mxu0 }
 0x41a   : > { %15790 = vst [vmem:[#allocation14_spill] sm:$0xff] %v14752_v38  ;;  %v11251_v38 = vadd.f32 %v11250_v24, %v11249_v58  ;;  %v11282_v58 = vadd.f32 %v14701_v13, %v14696_v11 }
 0x41b   : > { %v14754_v21 = vpop.f32.mrf.mxu1  ;;  %v14756_v41 = vpop.f32.mrf.mxu0 }
 0x41c   : > { %v5619_v24 = vadd.f32 %v11251_v38, %v10433_v62  ;;  %v5624_v38 = vadd.f32 %v11254_v51, %v10433_v62 }
 0x41d   : > { %v14758_v55 = vpop.f32.mrf.mxu1  ;;  %v14760_v32 = vpop.f32.mrf.mxu0 }
 0x41e   : > { %v11368_v42 = vadd.f32 %v14758_v55, %v14754_v21 }
 0x41f   : > { %v14762_v0 = vpop.f32.mrf.mxu1  ;;  %v11326_v29 = vpop.f32.mrf.mxu0  ;;  %v15799_v45 = vld [vmem:[#allocation20_spill] sm:$0xff] }
 0x421   : > { %v14764_v2 = vpop.f32.mrf.mxu1  ;;  %v11327_v36 = vpop.f32.mrf.mxu0 }
 0x422   : > { %15791 = vst [vmem:[#allocation19_spill] sm:$0xff] %v14764_v2  ;;  %v11328_v25 = vadd.f32 %v11327_v36, %v11326_v29  ;;  %v11291_v29 = vadd.f32 %v14718_v47, %v14716_v52  ;;  %v5673_v36 = vadd.f32 %v11282_v58, %v5608_v48 }
 0x423   : > { %v14766_v22 = vpop.f32.mrf.mxu1  ;;  %v11329_v57 = vpop.f32.mrf.mxu0 }
 0x424   : > { %15792 = vst [vmem:[#allocation13_spill] sm:$0xff] %v14766_v22  ;;  %v8364_v22 = vshll.u32 %v8339_v31, 16  ;;  %v8516_v31 = vrot.slane %v14780_v20, 5  ;;  %v5746_v11 = vadd.f32 %v11328_v25, %v5681_v50  ;;  %v5684_v52 = vadd.f32 %v11291_v29, %v5619_v24  ;;  %v12202_v20 = vld [vmem:[%s15677_s7 + $0x1f0] sm:$0xff]  }
 0x425   : > { %v14768_v18 = vpop.f32.mrf.mxu1  ;;  %v11330_v49 = vpop.f32.mrf.mxu0 }
 0x426   : > { %15793 = vst [vmem:[#allocation15_spill] sm:$0xff] %v14768_v18  ;;  %v14776_v18 = vld [vmem:[#allocation3] sm:$0xe]  ;;  %v14786_v61 = vrot.slane %v8364_v22, 5  ;;  %v11331_v13 = vadd.f32 %v11330_v49, %v11329_v57  ;;  %v5627_v22 = vadd.f32 %v11257_v15, %v10433_v62  ;;  %v5811_v40 = vadd.f32 %v11368_v42, %v5746_v11 }
 0x427   : > { %v11332_v6 = vpop.f32.mrf.mxu0  ;;  %v14770_v9 = vpop.f32.mrf.mxu1  ;;  %v10840_v39 = vrot.slane %v14776_v18, 9  ;;  %v5635_v49 = vadd.f32 %v11263_v43, %v10433_v62 }
 0x428   : > { %15794 = vst [vmem:[#allocation17_spill] sm:$0xff] %v14770_v9  ;;  %v5749_v57 = vadd.f32 %v11331_v13, %v5684_v52  ;;  %v5692_v4 = vadd.f32 %v11297_v60, %v5627_v22 }
 0x429   : > { %v11333_v1 = vpop.f32.mrf.mxu0  ;;  %v14778_v26 = vpop.f32.mrf.mxu1 }
 0x42a   : > { %15795 = vst [vmem:[#allocation23_spill] sm:$0xff] %v14778_v26  ;;  %v11322_v26 = vadd.f32 %v11321_v14, %v11320_v53  ;;  %v11294_v53 = vadd.f32 %v14722_v63, %v14720_v23  ;;  %v11300_v14 = vadd.f32 %v14732_v8, %v14728_v44  ;;  %v5632_v23 = vadd.f32 %v11260_v19, %v10433_v62  ;;  %v15796_v8 = vld [vmem:[#allocation19_spill] sm:$0xff] }
 0x42b   : > { %v11335_v34 = vpop.f32.mrf.mxu0  ;;  %v11378_v12 = vpop.f32.mrf.mxu1  ;;  %v11325_v63 = vadd.f32 %v14760_v32, %v14756_v41  ;;  %v11334_v46 = vadd.f32 %v11333_v1, %v11332_v6  ;;  %v11303_v44 = vadd.f32 %v14740_v37, %v14736_v7  ;;  %v15800_v7 = vld [vmem:[#allocation14_spill] sm:$0xff]  ;;  %v15801_v58 = vld [vmem:[#allocation13_spill] sm:$0xff] }
 0x42c   : > { %v5738_v56 = vadd.f32 %v11322_v26, %v5673_v36  ;;  %v5689_v27 = vadd.f32 %v11294_v53, %v5624_v38  ;;  %v11371_v26 = vadd.f32 %v15796_v8, %v14762_v0  ;;  %v5697_v35 = vadd.f32 %v11300_v14, %v5632_v23  ;;  %v6169_v8 = vld [vmem:[#allocation3 + $0x1c] sm:$0x1] }
 0x42d   : > { %v11336_v9 = vpop.f32.mrf.mxu0  ;;  %v11379_v47 = vpop.f32.mrf.mxu1  ;;  %v5741_v48 = vadd.f32 %v11325_v63, %v5676_v3  ;;  %v11365_v37 = vadd.f32 %v15800_v7, %v15799_v45  ;;  %v5700_v33 = vadd.f32 %v11303_v44, %v5635_v49  ;;  %v15802_v24 = vld [vmem:[#allocation15_spill] sm:$0xff]  ;;  %v6166_v44 = vld [vmem:[#allocation3 + $0x18] sm:$0xf] }
 0x42e   : > { %v11337_v21 = vadd.f32 %v11336_v9, %v11335_v34  ;;  %v5803_v32 = vadd.f32 %v11362_v5, %v5738_v56  ;;  %v5754_v62 = vadd.f32 %v11334_v46, %v5689_v27  ;;  %v5814_v9 = vadd.f32 %v11371_v26, %v5749_v57  ;;  %v6154_v45 = vld [vmem:[#allocation3 + $0x8] sm:$0xf]  ;;  %v6157_v7 = vld [vmem:[#allocation3 + $0xc] sm:$0x1] }
 0x42f   : > { %v11338_v2 = vpop.f32.mrf.mxu0  ;;  %v11381_v16 = vpop.f32.mrf.mxu1  ;;  %v11374_v50 = vadd.f32 %v15802_v24, %v15801_v58  ;;  %v15804_v29 = vld [vmem:[#allocation17_spill] sm:$0xff]  ;;  %v11380_v13 = vadd.f32 %v11379_v47, %v11378_v12  ;;  %v5806_v38 = vadd.f32 %v11365_v37, %v5741_v48  ;;  %v14844_v58 = vld [vmem:[#allocation3 + $0x48] sm:$0xf] }
 0x430   : > { %v5757_v25 = vadd.f32 %v11337_v21, %v5692_v4 }
 0x431   : > { %v11339_v17 = vpop.f32.mrf.mxu0  ;;  %v11382_v10 = vpop.f32.mrf.mxu1  ;;  %v15805_v36 = vld [vmem:[#allocation23_spill] sm:$0xff]  ;;  %v5819_v56 = vadd.f32 %v11374_v50, %v5754_v62 }
 0x432   : > { %v11340_v55 = vadd.f32 %v11339_v17, %v11338_v2  ;;  %v11377_v11 = vadd.f32 %v15805_v36, %v15804_v29  ;;  %v11383_v42 = vadd.f32 %v11382_v10, %v11381_v16 }
 0x433   : > { %v11341_v59 = vpop.f32.mrf.mxu0 }
 0x434   : > { %v5762_v0 = vadd.f32 %v11340_v55, %v5697_v35  ;;  %v5822_v23 = vadd.f32 %v11377_v11, %v5757_v25 }
 0x435   : > { %v11342_v30 = vpop.f32.mrf.mxu0 }
 0x436   : > { %v11343_v6 = vadd.f32 %v11342_v30, %v11341_v59  ;;  %v5827_v14 = vadd.f32 %v11380_v13, %v5762_v0  ;;  %v6172_v13 = vld [vmem:[#allocation3 + $0x20] sm:$0xf] }
 0x437   : > { %v11808_v54 = vpop.f32.mrf.mxu0 }
 0x438   : > { %v14817_v41 = vadd.f32 %v11808_v54, %v5811_v40  ;;  %v5765_v53 = vadd.f32 %v11343_v6, %v5700_v33 }
 0x439   : > { %v5867_v1 = vpop.f32.mrf.mxu0 }
 0x43a   : > { %15797 = vst [vmem:[#allocation16_spill] sm:$0xff] %v14817_v41  ;;  %v5900_v34 = vmax.f32 %v14817_v41, 0.0  ;;  %v14820_v2 = vadd.f32 %v5867_v1, %v5803_v32  ;;  %v5830_v49 = vadd.f32 %v11383_v42, %v5765_v53  ;;  %v6175_v53 = vld [vmem:[#allocation3 + $0x24] sm:$0x1] }
 0x43b   : > { %v11809_v51 = vpop.f32.mrf.mxu0 }
 0x43c   : > { %15798 = vst [vmem:[#allocation18_spill] sm:$0xff] %v14820_v2  ;;  %v11030_v15 = vpack.c.bf16 %v5900_v34, %v5900_v34  ;;  %v5898_v19 = vmax.f32 %v14820_v2, 0.0  ;;  %v14827_v17 = vadd.f32 %v11809_v51, %v5814_v9 }
 0x43d   : > { %v5870_v43 = vpop.f32.mrf.mxu0 }
 0x43e   : > { %15803 = vst [vmem:[#allocation22_spill] sm:$0xff] %v14827_v17  ;;  %v6091_v3 = vshrl.u32 %v11030_v15, 16  ;;  %v11028_v59 = vpack.c.bf16 %v5898_v19, %v5898_v19  ;;  %v5901_v60 = vmax.f32 %v14827_v17, 0.0  ;;  %v14832_v52 = vadd.f32 %v5870_v43, %v5806_v38 }
 0x43f   : > { %v11812_v22 = vpop.f32.mrf.mxu0  ;;  %v6094_v30 = vshll.u32 %v11030_v15, 16 }
 0x440   : > { %15806 = vst [vmem:[#allocation21_spill] sm:$0xff] %v14832_v52  ;;  %v6093_v63 = vrot.slane %v6091_v3, 7  ;;  %v6075_v5 = vshrl.u32 %v11028_v59, 16  ;;  %v11031_v57 = vpack.c.bf16 %v5901_v60, %v5901_v60  ;;  %v6078_v46 = vshll.u32 %v11028_v59, 16 }
 0x441   : > { %v5899_v12 = vmax.f32 %v14832_v52, 0.0  ;;  %v14835_v47 = vadd.f32 %v11812_v22, %v5827_v14  ;;  %v5883_v40 = vpop.f32.mrf.mxu0  ;;  %v8933_v59 = vshrl.u32 %v14844_v58, 16  ;;  %v6160_v22 = vld [vmem:[#allocation3 + $0x10] sm:$0xf] }
 0x442   : > { %v6096_v27 = vor.u32 %v6094_v30, %v6093_v63  ;;  %v6097_v21 = vrot.slane %v6093_v63, 4  ;;  %v6077_v55 = vrot.slane %v6075_v5, 7  ;;  %v6099_v54 = vshrl.u32 %v11031_v57, 16  ;;  %v6163_v63 = vld [vmem:[#allocation3 + $0x14] sm:$0x1] }
 0x443   : > { %15807 = vst [vmem:[#allocation24_spill] sm:$0xff] %v14835_v47  ;;  %v6102_v26 = vshll.u32 %v11031_v57, 16  ;;  %v11029_v16 = vpack.c.bf16 %v5899_v12, %v5899_v12  ;;  %v5904_v32 = vmax.f32 %v14835_v47, 0.0  ;;  %v14838_v48 = vadd.f32 %v5883_v40, %v5819_v56  ;;  %v11813_v4 = vpop.f32.mrf.mxu0  ;;  %v6190_v40 = vld [vmem:[#allocation3 + $0x38] sm:$0xf] }
 0x444   : > { %v6167_v6 = vsel %vm13961_vm2, %v6096_v27, %v6166_v44  ;;  %v6170_v62 = vsel %vm13258_vm12, %v6097_v21, %v6169_v8  ;;  %v6080_v34 = vor.u32 %v6078_v46, %v6077_v55  ;;  %v6081_v9 = vrot.slane %v6077_v55, 4 }
 0x445   : > { %15808 = vst [vmem:[#allocation11_spill] sm:$0xff] %v14838_v48  ;;  %6168 = vst [vmem:[#allocation3 + $0x18] sm:$0xf] %v6167_v6  ;;  %v6101_v37 = vrot.slane %v6099_v54, 7  ;;  %v6083_v25 = vshrl.u32 %v11029_v16, 16  ;;  %v6086_v0 = vshll.u32 %v11029_v16, 16  ;;  %v11034_v33 = vpack.c.bf16 %v5904_v32, %v5904_v32  ;;  %v5886_v51 = vpop.f32.mrf.mxu0 }
 0x446   : > { %6171 = vst [vmem:[#allocation3 + $0x1c] sm:$0x1] %v6170_v62  ;;  %v6155_v24 = vsel %vm13961_vm2, %v6080_v34, %v6154_v45  ;;  %v6158_v50 = vsel %vm13258_vm12, %v6081_v9, %v6157_v7  ;;  %v5902_v10 = vmax.f32 %v14838_v48, 0.0  ;;  %v14851_v15 = vadd.f32 %v11813_v4, %v5830_v49  ;;  %v6193_v49 = vld [vmem:[#allocation3 + $0x3c] sm:$0x1] }
 0x447   : > { %6156 = vst [vmem:[#allocation3 + $0x8] sm:$0xf] %v6155_v24  ;;  %6159 = vst [vmem:[#allocation3 + $0xc] sm:$0x1] %v6158_v50  ;;  %v6104_v19 = vor.u32 %v6102_v26, %v6101_v37  ;;  %v6105_v29 = vrot.slane %v6101_v37, 4  ;;  %v6085_v36 = vrot.slane %v6083_v25, 7  ;;  %v14854_v3 = vadd.f32 %v5886_v51, %v5822_v23 }
 0x448   : > { %15811 = vst [vmem:[#allocation19_spill] sm:$0xff] %v14851_v15  ;;  %v6123_v11 = vshrl.u32 %v11034_v33, 16  ;;  %v11032_v38 = vpack.c.bf16 %v5902_v10, %v5902_v10  ;;  %v5905_v43 = vmax.f32 %v14851_v15, 0.0  ;;  %v6126_v5 = vshll.u32 %v11034_v33, 16  ;;  %v6178_v16 = vld [vmem:[#allocation3 + $0x28] sm:$0xf] }
 0x449   : > { %15812 = vst [vmem:[#allocation20_spill] sm:$0xff] %v14854_v3  ;;  %v6173_v60 = vsel %vm13961_vm2, %v6104_v19, %v6172_v13  ;;  %v6176_v56 = vsel %vm13258_vm12, %v6105_v29, %v6175_v53  ;;  %v6088_v42 = vor.u32 %v6086_v0, %v6085_v36  ;;  %v6089_v14 = vrot.slane %v6085_v36, 4  ;;  %v6181_v32 = vld [vmem:[#allocation3 + $0x2c] sm:$0x1]  ;;  %v6199_v13 = vld [vmem:[#allocation3 + $0x44] sm:$0x1] }
 0x44a   : > { %6174 = vst [vmem:[#allocation3 + $0x20] sm:$0xf] %v6173_v60  ;;  %6177 = vst [vmem:[#allocation3 + $0x24] sm:$0x1] %v6176_v56  ;;  %v6125_v30 = vrot.slane %v6123_v11, 7  ;;  %v6107_v57 = vshrl.u32 %v11032_v38, 16  ;;  %v11035_v46 = vpack.c.bf16 %v5905_v43, %v5905_v43 }
 0x44b   : > { %v6161_v23 = vsel %vm13961_vm2, %v6088_v42, %v6160_v22  ;;  %v6164_v12 = vsel %vm13258_vm12, %v6089_v14, %v6163_v63  ;;  %v6110_v27 = vshll.u32 %v11032_v38, 16  ;;  %v5903_v21 = vmax.f32 %v14854_v3, 0.0  ;;  %v6196_v11 = vld [vmem:[#allocation3 + $0x40] sm:$0xf] }
 0x44c   : > { %6162 = vst [vmem:[#allocation3 + $0x10] sm:$0xf] %v6161_v23  ;;  %6165 = vst [vmem:[#allocation3 + $0x14] sm:$0x1] %v6164_v12  ;;  %v6128_v55 = vor.u32 %v6126_v5, %v6125_v30  ;;  %v6129_v54 = vrot.slane %v6125_v30, 4  ;;  %v6109_v44 = vrot.slane %v6107_v57, 7 }
 0x44d   : > { %v6131_v8 = vshrl.u32 %v11035_v46, 16  ;;  %v6368_v26 = vld [vmem:[#allocation3 + $0x18] sm:$0xe]  ;;  %v6134_v4 = vshll.u32 %v11035_v46, 16  ;;  %v11033_v6 = vpack.c.bf16 %v5903_v21, %v5903_v21  ;;  %v6369_v62 = vld [vmem:[#allocation3 + $0x1c] sm:$0x1] }
 0x44e   : > { %v10553_v34 = vrot.slane %v6368_v26, 9  ;;  %v6444_v9 = vld [vmem:[#allocation3 + $0x18] sm:$0xf]  ;;  %v6191_v45 = vsel %vm13961_vm2, %v6128_v55, %v6190_v40  ;;  %v6194_v7 = vsel %vm13258_vm12, %v6129_v54, %v6193_v49  ;;  %v6112_v37 = vor.u32 %v6110_v27, %v6109_v44  ;;  %v6364_v0 = vld [vmem:[#allocation3 + $0x8] sm:$0xe] }
 0x44f   : > { %v6113_v25 = vrot.slane %v6109_v44, 4  ;;  %v6365_v33 = vld [vmem:[#allocation3 + $0xc] sm:$0x1]  ;;  %6452 = vst [vmem:[#allocation4 + $0x54] sm:$0xf] %v6444_v9  ;;  %v6133_v51 = vrot.slane %v6131_v8, 7 }
 0x450   : > { %6192 = vst [vmem:[#allocation3 + $0x38] sm:$0xf] %v6191_v45  ;;  %6195 = vst [vmem:[#allocation3 + $0x3c] sm:$0x1] %v6194_v7  ;;  %v6115_v24 = vshrl.u32 %v11033_v6, 16  ;;  %v6118_v50 = vshll.u32 %v11033_v6, 16  ;;  %v6179_v29 = vsel %vm13961_vm2, %v6112_v37, %v6178_v16 }
 0x451   : > { %v10551_v10 = vrot.slane %v6364_v0, 9  ;;  %v6442_v19 = vld [vmem:[#allocation3 + $0x8] sm:$0xf]  ;;  %v6182_v36 = vsel %vm13258_vm12, %v6113_v25, %v6181_v32  ;;  %v6400_v53 = vrot.slane %v6365_v33, 5  ;;  %v6408_v38 = vrot.slane %v6369_v62, 5 }
 0x452   : > { %6450 = vst [vmem:[#allocation4 + $0xc] sm:$0xf] %v6442_v19  ;;  %v6203_v43 = vld [vmem:[#allocation3 + $0x8] sm:$0xf]  ;;  %6180 = vst [vmem:[#allocation3 + $0x28] sm:$0xf] %v6179_v29  ;;  %v6136_v56 = vor.u32 %v6134_v4, %v6133_v51 }
 0x453   : > { %v6220_v60 = vld [vmem:[#allocation3 + $0x8] sm:$0xf]  ;;  %6183 = vst [vmem:[#allocation3 + $0x2c] sm:$0x1] %v6182_v36  ;;  %v6137_v42 = vrot.slane %v6133_v51, 4  ;;  %v6117_v14 = vrot.slane %v6115_v24, 7  ;;  %v6401_v46 = vsel %vm13682_vm0, %v10551_v10, %v6400_v53  ;;  %v6409_v23 = vsel %vm13682_vm0, %v10553_v34, %v6408_v38 }
 0x454   : > { %v6445_v22 = vld [vmem:[#allocation3 + $0x20] sm:$0xf]  ;;  %6211 = vst [vmem:[#allocation4 + $0x24] sm:$0xf] %v6203_v43  ;;  %v6221_v63 = vld [vmem:[#allocation3 + $0xc] sm:$0x1]  ;;  %v6197_v21 = vsel %vm13961_vm2, %v6136_v56, %v6196_v11  ;;  %v8517_v56 = vsel %vm13682_vm0, %v10840_v39, %v8516_v31 }
 0x455   : > { %v6184_v30 = vld [vmem:[#allocation3 + $0x30] sm:$0xf]  ;;  %v6187_v5 = vld [vmem:[#allocation3 + $0x34] sm:$0x1]  ;;  %6453 = vst [vmem:[#allocation4 + $0x78] sm:$0xf] %v6445_v22  ;;  %v6200_v55 = vsel %vm13258_vm12, %v6137_v42, %v6199_v13  ;;  %v6120_v54 = vor.u32 %v6118_v50, %v6117_v14 }
 0x456   : > { %v6249_v12 = vshrl.u32 %v6220_v60, 16  ;;  %v6252_v40 = vshll.u32 %v6220_v60, 16  ;;  %v6205_v49 = vld [vmem:[#allocation3 + $0x18] sm:$0xf]  ;;  %v6121_v44 = vrot.slane %v6117_v14, 4  ;;  %v6258_v62 = vshll.u32 %v6221_v63, 16 }
 0x457   : > { %v6224_v27 = vld [vmem:[#allocation3 + $0x18] sm:$0xf]  ;;  %6435 = vst [vmem:[#allocation4 + $0x2c] sm:$0xf] %v6401_v46  ;;  %v6443_v8 = vld [vmem:[#allocation3 + $0x10] sm:$0xf]  ;;  %v6185_v34 = vsel %vm13961_vm2, %v6120_v54, %v6184_v30 }
 0x458   : > { %v6366_v26 = vld [vmem:[#allocation3 + $0x10] sm:$0xe]  ;;  %6437 = vst [vmem:[#allocation4 + $0x74] sm:$0xf] %v6409_v23  ;;  %6213 = vst [vmem:[#allocation4 + $0x6c] sm:$0xf] %v6205_v49  ;;  %v6188_v9 = vsel %vm13258_vm12, %v6121_v44, %v6187_v5 }
 0x459   : > { %6198 = vst [vmem:[#allocation3 + $0x40] sm:$0xf] %v6197_v21  ;;  %6201 = vst [vmem:[#allocation3 + $0x44] sm:$0x1] %v6200_v55  ;;  %v6367_v16 = vld [vmem:[#allocation3 + $0x14] sm:$0x1] }
 0x45a   : > { %6451 = vst [vmem:[#allocation4 + $0x30] sm:$0xf] %v6443_v8  ;;  %v10552_v32 = vrot.slane %v6366_v26, 9  ;;  %v6251_v4 = vrot.slane %v6249_v12, 4  ;;  %v6254_v6 = vrot.slane %v6252_v40, 5  ;;  %v6404_v45 = vrot.slane %v6367_v16, 5 }
 0x45b   : > { %v6204_v7 = vld [vmem:[#allocation3 + $0x10] sm:$0xf]  ;;  %v6277_v25 = vshrl.u32 %v6224_v27, 16  ;;  %6186 = vst [vmem:[#allocation3 + $0x30] sm:$0xf] %v6185_v34  ;;  %v6260_v33 = vrot.slane %v6258_v62, 5 }
 0x45c   : > { %v6222_v37 = vld [vmem:[#allocation3 + $0x10] sm:$0xf]  ;;  %6189 = vst [vmem:[#allocation3 + $0x34] sm:$0x1] %v6188_v9  ;;  %v6255_v0 = vor.u32 %v6254_v6, %v6251_v4  ;;  %6212 = vst [vmem:[#allocation4 + $0x48] sm:$0xf] %v6204_v7  ;;  %v6405_v10 = vsel %vm13682_vm0, %v10552_v32, %v6404_v45 }
 0x45d   : > { %v6223_v51 = vld [vmem:[#allocation3 + $0x14] sm:$0x1]  ;;  %v6225_v24 = vld [vmem:[#allocation3 + $0x1c] sm:$0x1]  ;;  %v6263_v50 = vshrl.u32 %v6222_v37, 16  ;;  %v6266_v19 = vshll.u32 %v6222_v37, 16 }
 0x45e   : > { %v6272_v29 = vshll.u32 %v6223_v51, 16  ;;  %v6279_v36 = vrot.slane %v6277_v25, 4  ;;  %v6370_v11 = vld [vmem:[#allocation3 + $0x20] sm:$0xe]  ;;  %6436 = vst [vmem:[#allocation4 + $0x50] sm:$0xf] %v6405_v10 }
 0x45f   : > { %v6256_v13 = vrot.slane %v6255_v0, 4  ;;  %v6265_v53 = vrot.slane %v6263_v50, 4  ;;  %v6280_v38 = vshll.u32 %v6224_v27, 16  ;;  %v6286_v43 = vshll.u32 %v6225_v24, 16  ;;  %v6371_v60 = vld [vmem:[#allocation3 + $0x24] sm:$0x1] }
 0x460   : > { %v12196_v42 = vld [vmem:[%s15677_s7 + $0x1b8] sm:$0xff]   ;;  %v6268_v14 = vrot.slane %v6266_v19, 5  ;;  %v6274_v22 = vrot.slane %v6272_v29, 5  ;;  %v6372_v63 = vld [vmem:[#allocation3 + $0x28] sm:$0xe]  ;;  %v10554_v40 = vrot.slane %v6370_v11, 9 }
 0x461   : > { %v6373_v30 = vld [vmem:[#allocation3 + $0x2c] sm:$0x1]  ;;  %v6923_v5 = vld [vmem:[#allocation4 + $0x8] sm:$0xff]  ;;  %v6261_v23 = vsel %vm12677_vm7, %v6256_v13, %v6260_v33  ;;  %v6282_v18 = vrot.slane %v6280_v38, 5  ;;  %v6288_v12 = vrot.slane %v6286_v43, 5  ;;  %v6412_v21 = vrot.slane %v6371_v60, 5 }
 0x462   : > { %v6446_v39 = vld [vmem:[#allocation3 + $0x28] sm:$0xf]  ;;  %v6928_v31 = vld [vmem:[#allocation4 + $0x2c] sm:$0xff]  ;;  %6355 = vst [vmem:[#allocation4 + $0x28] sm:$0xf] %v6261_v23  ;;  %v6269_v27 = vor.u32 %v6268_v14, %v6265_v53  ;;  %v10555_v55 = vrot.slane %v6372_v63, 9  ;;  %v8367_v13 = vsel %vm12677_vm7, %v14795_v28, %v14786_v61 }
 0x463   : > { %v12191_v49 = vld [vmem:[#allocation4 + $0xc] ss:$36 sps:$4 sm:$0xff]   ;;  %v6416_v54 = vrot.slane %v6373_v30, 5  ;;  %6454 = vst [vmem:[#allocation4 + $0x9c] sm:$0xf] %v6446_v39  ;;  %v10576_v44 = vcombine.low %v6923_v5, %v6928_v31  ;;  %v6283_v8 = vor.u32 %v6282_v18, %v6279_v36  ;;  %v12204_v4 = vld [vmem:[%s15677_s7 + $0x1b0] sm:$0xff]   ;;  %v6413_v62 = vsel %vm13682_vm0, %v10554_v40, %v6412_v21 }
 0x464   : > { %8554 = vst [vmem:[#allocation4 + $0x8] sm:$0xf] %v8517_v56  ;;  %v6206_v26 = vld [vmem:[#allocation3 + $0x20] sm:$0xf]  ;;  %v6207_v16 = vld [vmem:[#allocation3 + $0x28] sm:$0xf]  ;;  %7675 = vmatprep.mubr.bf16.mxu0 %v12191_v49 }
 0x465   : > { %v6226_v32 = vld [vmem:[#allocation3 + $0x20] sm:$0xf]  ;;  %v6270_v6 = vrot.slane %v6269_v27, 4  ;;  %v6417_v34 = vsel %vm13682_vm0, %v10555_v55, %v6416_v54  ;;  %v6447_v9 = vld [vmem:[#allocation3 + $0x30] sm:$0xf]  ;;  %7676 = vmatmul.mubr.bf16.vlgmr.msra.gmra.mxu0 %v10576_v44  ;;  %v6284_v25 = vrot.slane %v6283_v8, 4 }
 0x466   : > { %6214 = vst [vmem:[#allocation4 + $0x90] sm:$0xf] %v6206_v26  ;;  %6215 = vst [vmem:[#allocation4 + $0xb4] sm:$0xf] %v6207_v16  ;;  %v6227_v45 = vld [vmem:[#allocation3 + $0x24] sm:$0x1]  ;;  %11517 = vmatpush3.bf16.msra.mxu0 %v12196_v42 }
 0x467   : > { %v6291_v7 = vshrl.u32 %v6226_v32, 16  ;;  %v8322_v37 = vld [vmem:[#allocation3] sm:$0xf]  ;;  %v12208_v0 = vld [vmem:[%s15677_s7 + $0x1e8] sm:$0xff]   ;;  %6438 = vst [vmem:[#allocation4 + $0x98] sm:$0xf] %v6413_v62  ;;  %v6275_v19 = vsel %vm12677_vm7, %v6270_v6, %v6274_v22  ;;  %11518 = vmatprep.subr.bf16.mxu0 %v12202_v20  ;;  %v6289_v38 = vsel %vm12677_vm7, %v6284_v25, %v6288_v12 }
 0x468   : > { %6439 = vst [vmem:[#allocation4 + $0xbc] sm:$0xf] %v6417_v34  ;;  %6455 = vst [vmem:[#allocation4 + $0xc0] sm:$0xf] %v6447_v9  ;;  %v6228_v33 = vld [vmem:[#allocation3 + $0x28] sm:$0xf] }
 0x469   : > { %v14912_v51 = vld [vmem:[#allocation3 + $0x2c] sm:$0x1]  ;;  %v6294_v24 = vshll.u32 %v6226_v32, 16  ;;  %v12197_v50 = vld [vmem:[#allocation4 + $0x54] ss:$36 sps:$4 sm:$0xff]   ;;  %v6922_v10 = vld [vmem:[#allocation4] sm:$0xff] }
 0x46a   : > { %v6293_v29 = vrot.slane %v6291_v7, 4  ;;  %v6300_v36 = vshll.u32 %v6227_v45, 16  ;;  %v6305_v11 = vshrl.u32 %v6228_v33, 16  ;;  %v12203_v53 = vld [vmem:[%s15677_s7 + $0x138] sm:$0xff]   ;;  %6356 = vst [vmem:[#allocation4 + $0x4c] sm:$0xf] %v6275_v19  ;;  %7683 = vmatprep.mubr.bf16.mxu0 %v12197_v50  ;;  %11519 = vmatpush3.bf16.msra.mxu0 %v12204_v4 }
 0x46b   : > { %v6296_v43 = vrot.slane %v6294_v24, 5  ;;  %v6308_v60 = vshll.u32 %v6228_v33, 16  ;;  %v6374_v56 = vld [vmem:[#allocation3 + $0x30] sm:$0xe]  ;;  %v6375_v42 = vld [vmem:[#allocation3 + $0x34] sm:$0x1]  ;;  %11520 = vmatprep.subr.bf16.mxu0 %v12208_v0 }
 0x46c   : > { %v6933_v14 = vld [vmem:[#allocation4 + $0x50] sm:$0xff]  ;;  %6357 = vst [vmem:[#allocation4 + $0x70] sm:$0xf] %v6289_v38  ;;  %v12207_v61 = vld [vmem:[%s15677_s7 + $0x170] sm:$0xff]   ;;  %v6307_v28 = vrot.slane %v6305_v11, 4  ;;  %v6314_v22 = vshll.u32 %v14912_v51, 16 }
 0x46d   : > { %v6376_v63 = vld [vmem:[#allocation3 + $0x38] sm:$0xe]  ;;  %v10556_v30 = vrot.slane %v6374_v56, 9  ;;  %v12212_v20 = vld [vmem:[%s15677_s7 + $0x1a8] sm:$0xff]   ;;  %v6297_v18 = vor.u32 %v6296_v43, %v6293_v29  ;;  %v6310_v12 = vrot.slane %v6308_v60, 5  ;;  %v6302_v49 = vrot.slane %v6300_v36, 5 }
 0x46e   : > { %v6927_v5 = vld [vmem:[#allocation4 + $0x24] sm:$0xff]  ;;  %v6377_v40 = vld [vmem:[#allocation3 + $0x3c] sm:$0x1]  ;;  %v6938_v39 = vld [vmem:[#allocation4 + $0x74] sm:$0xff]  ;;  %8330 = vst [vmem:[#allocation4] sm:$0xf] %v8322_v37  ;;  %11521 = vmatpush3.bf16.msra.mxu0 %v12212_v20 }
 0x46f   : > { %v12199_v23 = vld [vmem:[#allocation4 + $0x4] ss:$36 sps:$4 sm:$0xff]   ;;  %v10574_v31 = vcombine.low %v6922_v10, %v6927_v5  ;;  %v6420_v27 = vrot.slane %v6375_v42, 5  ;;  %v10557_v21 = vrot.slane %v6376_v63, 9  ;;  %v10585_v54 = vcombine.low %v6933_v14, %v6938_v39  ;;  %v6449_v32 = vld [vmem:[#allocation3 + $0x40] sm:$0xf] }
 0x470   : > { %8474 = vst [vmem:[#allocation4 + $0x4] sm:$0xf] %v8367_v13  ;;  %v6448_v55 = vld [vmem:[#allocation3 + $0x38] sm:$0xf]  ;;  %7610 = vmatprep.mubr.bf16.mxu1 %v12199_v23  ;;  %v12211_v44 = vld [vmem:[%s15677_s7 + $0x130] sm:$0xff]   ;;  %v6298_v8 = vrot.slane %v6297_v18, 4  ;;  %v6311_v26 = vor.u32 %v6310_v12, %v6307_v28 }
 0x471   : > { %v6424_v16 = vrot.slane %v6377_v40, 5  ;;  %6456 = vst [vmem:[#allocation4 + $0xe4] sm:$0xf] %v6448_v55  ;;  %v6208_v6 = vld [vmem:[#allocation3 + $0x30] sm:$0xf]  ;;  %7611 = vmatmul.mubr.bf16.vlgmr.msra.gmra.mxu1 %v10574_v31  ;;  %v12213_v4 = vld [vmem:[%s15677_s7 + $0x168] sm:$0xff]   ;;  %v6421_v9 = vsel %vm13682_vm0, %v10556_v30, %v6420_v27  ;;  %7684 = vmatmul.mubr.bf16.gmra.mxu0 %v10585_v54 }
 0x472   : > { %v12209_v62 = vld [vmem:[#allocation4 + $0x9c] ss:$36 sps:$4 sm:$0xff]   ;;  %v12214_v34 = vld [vmem:[%s15677_s7 + $0x1e0] sm:$0xff]   ;;  %6457 = vst [vmem:[#allocation4 + $0x108] sm:$0xf] %v6449_v32  ;;  %v8936_v7 = vshll.u32 %v14844_v58, 16  ;;  %11477 = vmatpush3.bf16.msra.mxu1 %v12203_v53  ;;  %v6303_v25 = vsel %vm12677_vm7, %v6298_v8, %v6302_v49 }
 0x473   : > { %6216 = vst [vmem:[#allocation4 + $0xd8] sm:$0xf] %v6208_v6  ;;  %v14943_v45 = vld [vmem:[#allocation3 + $0x4c] sm:$0x1]  ;;  %v12217_v37 = vld [vmem:[%s15677_s7 + $0x1a0] sm:$0xff]   ;;  %v6312_v0 = vrot.slane %v6311_v26, 4  ;;  %v6425_v51 = vsel %vm13682_vm0, %v10557_v21, %v6424_v16  ;;  %11478 = vmatprep.subr.bf16.mxu1 %v12207_v61  ;;  %7691 = vmatprep.mubr.bf16.mxu0 %v12209_v62 }
 0x474   : > { %v6316_v33 = vrot.slane %v6314_v22, 5  ;;  %6440 = vst [vmem:[#allocation4 + $0xe0] sm:$0xf] %v6421_v9  ;;  %v6209_v24 = vld [vmem:[#allocation3 + $0x38] sm:$0xf]  ;;  %v12216_v13 = vld [vmem:[%s15677_s7 + $0x128] sm:$0xff]   ;;  %11522 = vmatprep.subr.bf16.mxu0 %v12214_v34 }
 0x475   : > { %v6230_v50 = vld [vmem:[#allocation3 + $0x30] sm:$0xf]  ;;  %6358 = vst [vmem:[#allocation4 + $0x94] sm:$0xf] %v6303_v25  ;;  %v12221_v10 = vld [vmem:[%s15677_s7 + $0x1d8] sm:$0xff]   ;;  %v14963_v43 = vrot.slane %v8933_v59, 4  ;;  %11523 = vmatpush3.bf16.msra.mxu0 %v12217_v37 }
 0x476   : > { %6441 = vst [vmem:[#allocation4 + $0x104] sm:$0xf] %v6425_v51  ;;  %6217 = vst [vmem:[#allocation4 + $0xfc] sm:$0xf] %v6209_v24  ;;  %v6231_v19 = vld [vmem:[#allocation3 + $0x34] sm:$0x1]  ;;  %v6317_v53 = vsel %vm12677_vm7, %v6312_v0, %v6316_v33  ;;  %11479 = vmatpush3.bf16.msra.mxu1 %v12211_v44  ;;  %11524 = vmatprep.subr.bf16.mxu0 %v12221_v10 }
 0x477   : > { %v6232_v29 = vld [vmem:[#allocation3 + $0x38] sm:$0xf]  ;;  %v6319_v36 = vshrl.u32 %v6230_v50, 16  ;;  %v12205_v11 = vld [vmem:[#allocation4 + $0x4c] ss:$36 sps:$4 sm:$0xff]   ;;  %v6322_v38 = vshll.u32 %v6230_v50, 16  ;;  %11480 = vmatprep.subr.bf16.mxu1 %v12213_v4 }
 0x478   : > { %v8942_v60 = vshll.u32 %v14943_v45, 16  ;;  %v6943_v56 = vld [vmem:[#allocation4 + $0x98] sm:$0xff]  ;;  %v12215_v14 = vld [vmem:[#allocation4 + $0x48] ss:$36 sps:$4 sm:$0xff]   ;;  %6359 = vst [vmem:[#allocation4 + $0xb8] sm:$0xf] %v6317_v53  ;;  %7618 = vmatprep.mubr.bf16.mxu1 %v12205_v11 }
 0x479   : > { %v6948_v42 = vld [vmem:[#allocation4 + $0xbc] sm:$0xff]  ;;  %v12220_v61 = vld [vmem:[%s15677_s7 + $0x160] sm:$0xff]   ;;  %v6233_v28 = vld [vmem:[#allocation3 + $0x3c] sm:$0x1]  ;;  %v6321_v22 = vrot.slane %v6319_v36, 4  ;;  %v6333_v63 = vshrl.u32 %v6232_v29, 16  ;;  %7619 = vmatmul.mubr.bf16.gmra.mxu1 %v12215_v14 }
 0x47a   : > { %v6336_v30 = vshll.u32 %v6232_v29, 16  ;;  %v12225_v58 = vld [vmem:[%s15677_s7 + $0x198] sm:$0xff]   ;;  %v6324_v59 = vrot.slane %v6322_v38, 5  ;;  %v6328_v5 = vshll.u32 %v6231_v19, 16  ;;  %v6682_v23 = vld [vmem:[#allocation3 + $0x10] sm:$0xf]  ;;  %v10594_v49 = vcombine.low %v6943_v56, %v6948_v42  ;;  %11481 = vmatpush3.bf16.msra.mxu1 %v12216_v13 }
 0x47b   : > { %v6683_v20 = vld [vmem:[#allocation3 + $0x18] sm:$0xf]  ;;  %v12227_v18 = vld [vmem:[%s15677_s7 + $0x1d0] sm:$0xff]   ;;  %v6335_v12 = vrot.slane %v6333_v63, 4  ;;  %v6342_v39 = vshll.u32 %v6233_v28, 16  ;;  %v12224_v27 = vld [vmem:[%s15677_s7 + $0x120] sm:$0xff]   ;;  %11482 = vmatprep.subr.bf16.mxu1 %v12220_v61  ;;  %11525 = vmatpush3.bf16.msra.mxu0 %v12225_v58 }
 0x47c   : > { %v6338_v40 = vrot.slane %v6336_v30, 5  ;;  %6690 = vst [vmem:[#allocation4 + $0x18] sm:$0xf] %v6682_v23  ;;  %6691 = vst [vmem:[#allocation4 + $0x3c] sm:$0xf] %v6683_v20  ;;  %v6325_v21 = vor.u32 %v6324_v59, %v6321_v22  ;;  %v14978_v8 = vrot.slane %v8936_v7, 5  ;;  %7692 = vmatmul.mubr.bf16.gmra.mxu0 %v10594_v49  ;;  %11526 = vmatprep.subr.bf16.mxu0 %v12227_v18 }
 0x47d   : > { %v6698_v31 = vld [vmem:[#allocation3 + $0x10] sm:$0xf]  ;;  %v6699_v55 = vld [vmem:[#allocation3 + $0x14] sm:$0x1]  ;;  %v6700_v54 = vld [vmem:[#allocation3 + $0x18] sm:$0xf] }
 0x47e   : > { %v6715_v44 = vshrl.u32 %v6698_v31, 16  ;;  %v14980_v26 = vld [vmem:[#allocation4 + $0xe0] sm:$0xff]  ;;  %v12226_v16 = vld [vmem:[%s15677_s7 + $0x158] sm:$0xff]   ;;  %v6339_v32 = vor.u32 %v6338_v40, %v6335_v12  ;;  %v6718_v62 = vshll.u32 %v6698_v31, 16  ;;  %v6724_v4 = vshll.u32 %v6699_v55, 16  ;;  %v12234_v13 = vld [vmem:[%s15677_s7 + $0x1c8] sm:$0xff]   ;;  %11483 = vmatpush3.bf16.msra.mxu1 %v12224_v27 }
 0x47f   : > { %v6701_v6 = vld [vmem:[#allocation3 + $0x1c] sm:$0x1]  ;;  %v6729_v34 = vshrl.u32 %v6700_v54, 16  ;;  %v12222_v9 = vld [vmem:[#allocation4 + $0xe4] ss:$36 sps:$4 sm:$0xff]   ;;  %v6326_v37 = vrot.slane %v6325_v21, 4  ;;  %11484 = vmatprep.subr.bf16.mxu1 %v12226_v16 }
 0x480   : > { %v12230_v7 = vld [vmem:[%s15677_s7 + $0x190] sm:$0xff]   ;;  %v6330_v25 = vrot.slane %v6328_v5, 5  ;;  %v6717_v0 = vrot.slane %v6715_v44, 4  ;;  %v6340_v51 = vrot.slane %v6339_v32, 4  ;;  %v6344_v24 = vrot.slane %v6342_v39, 5  ;;  %7699 = vmatprep.mubr.bf16.mxu0 %v12222_v9  ;;  %v12229_v29 = vld [vmem:[%s15677_s7 + $0x118] sm:$0xff]  }
 0x481   : > { %v6958_v33 = vld [vmem:[#allocation4 + $0x104] sm:$0xff]  ;;  %v6720_v50 = vrot.slane %v6718_v62, 5  ;;  %v6458_v10 = vld [vmem:[#allocation3 + $0x8] sm:$0xf]  ;;  %v6726_v53 = vrot.slane %v6724_v4, 5  ;;  %v6731_v38 = vrot.slane %v6729_v34, 4  ;;  %11527 = vmatpush3.bf16.msra.mxu0 %v12230_v7 }
 0x482   : > { %v12218_v19 = vld [vmem:[#allocation4 + $0x94] ss:$36 sps:$4 sm:$0xff]   ;;  %v6331_v36 = vsel %vm12677_vm7, %v6326_v37, %v6330_v25  ;;  %v10603_v11 = vcombine.low %v14980_v26, %v6958_v33  ;;  %v6345_v42 = vsel %vm12677_vm7, %v6340_v51, %v6344_v24  ;;  %v12233_v14 = vld [vmem:[%s15677_s7 + $0x150] sm:$0xff]   ;;  %v6732_v28 = vshll.u32 %v6700_v54, 16  ;;  %v6459_v63 = vld [vmem:[#allocation3 + $0xc] sm:$0x1]  ;;  %11528 = vmatprep.subr.bf16.mxu0 %v12234_v13  ;;  %11485 = vmatpush3.bf16.msra.mxu1 %v12229_v29 }
 0x483   : > { %v12228_v56 = vld [vmem:[#allocation4 + $0x90] ss:$36 sps:$4 sm:$0xff]   ;;  %6360 = vst [vmem:[#allocation4 + $0xdc] sm:$0xf] %v6331_v36  ;;  %v6721_v61 = vor.u32 %v6720_v50, %v6717_v0  ;;  %v6738_v22 = vshll.u32 %v6701_v6, 16  ;;  %7626 = vmatprep.mubr.bf16.mxu1 %v12218_v19  ;;  %v12236_v58 = vld [vmem:[%s15677_s7 + $0x188] sm:$0xff]   ;;  %11486 = vmatprep.subr.bf16.mxu1 %v12233_v14 }
 0x484   : > { %v6460_v30 = vld [vmem:[#allocation3 + $0x10] sm:$0xf]  ;;  %6361 = vst [vmem:[#allocation4 + $0x100] sm:$0xf] %v6345_v42  ;;  %v6461_v59 = vld [vmem:[#allocation3 + $0x14] sm:$0x1]  ;;  %7627 = vmatmul.mubr.bf16.gmra.mxu1 %v12228_v56  ;;  %7700 = vmatmul.mubr.bf16.gmra.mxu0 %v10603_v11 }
 0x485   : > { %v6475_v5 = vshrl.u32 %v6458_v10, 16  ;;  %v6478_v23 = vshll.u32 %v6458_v10, 16  ;;  %v6484_v20 = vshll.u32 %v6459_v63, 16  ;;  %v6489_v18 = vshrl.u32 %v6460_v30, 16  ;;  %v12240_v31 = vld [vmem:[%s15677_s7 + $0x1c0] sm:$0xff]   ;;  %v12235_v21 = vld [vmem:[%s15677_s7 + $0x110] sm:$0xff]   ;;  %11529 = vmatpush3.bf16.msra.mxu0 %v12236_v58 }
 0x486   : > { %v6722_v12 = vrot.slane %v6721_v61, 4  ;;  %v6734_v40 = vrot.slane %v6732_v28, 5  ;;  %v6740_v39 = vrot.slane %v6738_v22, 5  ;;  %v6492_v49 = vshll.u32 %v6460_v30, 16  ;;  %v6602_v27 = vld [vmem:[#allocation3 + $0x8] sm:$0xe]  ;;  %11530 = vmatprep.subr.bf16.mxu0 %v12240_v31  ;;  %11487 = vmatpush3.bf16.msra.mxu1 %v12235_v21 }
 0x487   : > { %v6477_v55 = vrot.slane %v6475_v5, 4  ;;  %v6480_v54 = vrot.slane %v6478_v23, 5  ;;  %v6486_v44 = vrot.slane %v6484_v20, 5  ;;  %v6491_v26 = vrot.slane %v6489_v18, 4  ;;  %v6603_v32 = vld [vmem:[#allocation3 + $0xc] sm:$0x1] }
 0x488   : > { %v6727_v16 = vsel %vm12677_vm7, %v6722_v12, %v6726_v53  ;;  %v6735_v6 = vor.u32 %v6734_v40, %v6731_v38  ;;  %v6494_v62 = vrot.slane %v6492_v49, 5  ;;  %v6498_v4 = vshll.u32 %v6461_v59, 16  ;;  %v6604_v34 = vld [vmem:[#allocation3 + $0x10] sm:$0xe]  ;;  %v6605_v9 = vld [vmem:[#allocation3 + $0x14] sm:$0x1] }
 0x489   : > { %6834 = vst [vmem:[#allocation4 + $0x1c] sm:$0xf] %v6727_v16  ;;  %v12239_v7 = vld [vmem:[%s15677_s7 + $0x148] sm:$0xff]   ;;  %v6481_v37 = vor.u32 %v6480_v54, %v6477_v55  ;;  %v10558_v25 = vrot.slane %v6602_v27, 9  ;;  %v6636_v0 = vrot.slane %v6603_v32, 5  ;;  %v10559_v33 = vrot.slane %v6604_v34, 9 }
 0x48a   : > { %v6684_v51 = vld [vmem:[#allocation3 + $0x20] sm:$0xf]  ;;  %v6736_v24 = vrot.slane %v6735_v6, 4  ;;  %v6495_v10 = vor.u32 %v6494_v62, %v6491_v26  ;;  %v6500_v19 = vrot.slane %v6498_v4, 5  ;;  %v6640_v29 = vrot.slane %v6605_v9, 5  ;;  %v12242_v11 = vld [vmem:[%s15677_s7 + $0x108] sm:$0xff]   ;;  %11488 = vmatprep.subr.bf16.mxu1 %v12239_v7 }
 0x48b   : > { %v12243_v50 = vld [vmem:[%s15677_s7 + $0x180] sm:$0xff]   ;;  %v6685_v36 = vld [vmem:[#allocation3 + $0x28] sm:$0xf]  ;;  %6692 = vst [vmem:[#allocation4 + $0x60] sm:$0xf] %v6684_v51  ;;  %v6482_v13 = vrot.slane %v6481_v37, 4  ;;  %v6637_v53 = vsel %vm13682_vm0, %v10558_v25, %v6636_v0  ;;  %v8939_v63 = vor.u32 %v14978_v8, %v14963_v43  ;;  %11489 = vmatpush3.bf16.msra.mxu1 %v12242_v11 }
 0x48c   : > { %6693 = vst [vmem:[#allocation4 + $0x84] sm:$0xf] %v6685_v36  ;;  %v6702_v38 = vld [vmem:[#allocation3 + $0x20] sm:$0xf]  ;;  %v6703_v56 = vld [vmem:[#allocation3 + $0x24] sm:$0x1]  ;;  %v6741_v14 = vsel %vm12677_vm7, %v6736_v24, %v6740_v39  ;;  %v6641_v22 = vsel %vm13682_vm0, %v10559_v33, %v6640_v29  ;;  %11531 = vmatpush3.bf16.msra.mxu0 %v12243_v50 }
 0x48d   : > { %v12231_v42 = vld [vmem:[#allocation4 + $0xdc] ss:$36 sps:$4 sm:$0xff]   ;;  %v6496_v28 = vrot.slane %v6495_v10, 4  ;;  %6674 = vst [vmem:[#allocation4 + $0x14] sm:$0xf] %v6637_v53  ;;  %v6487_v30 = vsel %vm12677_vm7, %v6482_v13, %v6486_v44  ;;  %v6743_v5 = vshrl.u32 %v6702_v38, 16 }
 0x48e   : > { %v12241_v61 = vld [vmem:[#allocation4 + $0xd8] ss:$36 sps:$4 sm:$0xff]   ;;  %6835 = vst [vmem:[#allocation4 + $0x40] sm:$0xf] %v6741_v14  ;;  %6675 = vst [vmem:[#allocation4 + $0x38] sm:$0xf] %v6641_v22  ;;  %7634 = vmatprep.mubr.bf16.mxu1 %v12231_v42 }
 0x48f   : > { %v6704_v58 = vld [vmem:[#allocation3 + $0x28] sm:$0xf]  ;;  %v6705_v59 = vld [vmem:[#allocation3 + $0x2c] sm:$0x1]  ;;  %v6746_v23 = vshll.u32 %v6702_v38, 16  ;;  %v6501_v20 = vsel %vm12677_vm7, %v6496_v28, %v6500_v19  ;;  %v12246_v43 = vld [vmem:[%s15677_s7 + $0x140] sm:$0xff]   ;;  %7635 = vmatmul.mubr.bf16.gmra.mxu1 %v12241_v61 }
 0x490   : > { %6594 = vst [vmem:[#allocation4 + $0x10] sm:$0xf] %v6487_v30  ;;  %v6752_v8 = vshll.u32 %v6703_v56, 16  ;;  %v6757_v18 = vshrl.u32 %v6704_v58, 16  ;;  %v6760_v12 = vshll.u32 %v6704_v58, 16  ;;  %v12247_v39 = vld [vmem:[%s15677_s7 + $0x100] sm:$0xff]   ;;  %11490 = vmatprep.subr.bf16.mxu1 %v12246_v43 }
 0x491   : > { %v6462_v40 = vld [vmem:[#allocation3 + $0x18] sm:$0xf]  ;;  %6595 = vst [vmem:[#allocation4 + $0x34] sm:$0xf] %v6501_v20  ;;  %v6745_v31 = vrot.slane %v6743_v5, 4  ;;  %v6748_v49 = vrot.slane %v6746_v23, 5  ;;  %11491 = vmatpush3.bf16.msra.mxu1 %v12247_v39 }
 0x492   : > { %v6766_v27 = vshll.u32 %v6705_v59, 16  ;;  %v6463_v21 = vld [vmem:[#allocation3 + $0x1c] sm:$0x1]  ;;  %v6503_v55 = vshrl.u32 %v6462_v40, 16  ;;  %v6759_v54 = vrot.slane %v6757_v18, 4  ;;  %v6762_v44 = vrot.slane %v6760_v12, 5 }
 0x493   : > { %v6464_v26 = vld [vmem:[#allocation3 + $0x20] sm:$0xf]  ;;  %v15040_v32 = vrot.slane %v8939_v63, 4  ;;  %v15044_v16 = vrot.slane %v8942_v60, 5  ;;  %v6749_v6 = vor.u32 %v6748_v49, %v6745_v31  ;;  %v6754_v62 = vrot.slane %v6752_v8, 5  ;;  %v12250_v4 = vld [vmem:[%s15677_s7 + $0x238] sm:$0xff]  }
 0x494   : > { %v6465_v34 = vld [vmem:[#allocation3 + $0x24] sm:$0x1]  ;;  %v6505_v9 = vrot.slane %v6503_v55, 4  ;;  %v6506_v7 = vshll.u32 %v6462_v40, 16  ;;  %v6925_v37 = vld [vmem:[#allocation4 + $0x18] sm:$0xff]  ;;  %v6763_v25 = vor.u32 %v6762_v44, %v6759_v54  ;;  %v6512_v0 = vshll.u32 %v6463_v21, 16  ;;  %11814 = vmatprep.subr.bf16.mxu1 %v12250_v4 }
 0x495   : > { %v6517_v33 = vshrl.u32 %v6464_v26, 16  ;;  %v6520_v51 = vshll.u32 %v6464_v26, 16  ;;  %v6606_v24 = vld [vmem:[#allocation3 + $0x18] sm:$0xe]  ;;  %v6750_v45 = vrot.slane %v6749_v6, 4  ;;  %v6768_v60 = vrot.slane %v6766_v27, 5 }
 0x496   : > { %v6508_v50 = vrot.slane %v6506_v7, 5  ;;  %v6526_v10 = vshll.u32 %v6465_v34, 16  ;;  %v6607_v19 = vld [vmem:[#allocation3 + $0x1c] sm:$0x1]  ;;  %v6930_v29 = vld [vmem:[#allocation4 + $0x3c] sm:$0xff]  ;;  %v6764_v11 = vrot.slane %v6763_v25, 4 }
 0x497   : > { %v12237_v36 = vld [vmem:[#allocation4 + $0x1c] ss:$36 sps:$4 sm:$0xff]   ;;  %v6519_v13 = vrot.slane %v6517_v33, 4  ;;  %v10560_v53 = vrot.slane %v6606_v24, 9  ;;  %v10580_v38 = vcombine.low %v6925_v37, %v6930_v29  ;;  %v6755_v56 = vsel %vm12677_vm7, %v6750_v45, %v6754_v62  ;;  %v6608_v61 = vld [vmem:[#allocation3 + $0x20] sm:$0xe] }
 0x498   : > { %v6509_v42 = vor.u32 %v6508_v50, %v6505_v9  ;;  %v6522_v14 = vrot.slane %v6520_v51, 5  ;;  %v6609_v28 = vld [vmem:[#allocation3 + $0x24] sm:$0x1]  ;;  %7805 = vmatprep.mubr.bf16.mxu0 %v12237_v36  ;;  %v6769_v63 = vsel %vm12677_vm7, %v6764_v11, %v6768_v60  ;;  %6836 = vst [vmem:[#allocation4 + $0x64] sm:$0xf] %v6755_v56  ;;  %v6514_v58 = vrot.slane %v6512_v0, 5 }
 0x499   : > { %v12244_v22 = vld [vmem:[#allocation4 + $0x14] ss:$36 sps:$4 sm:$0xff]   ;;  %7806 = vmatmul.mubr.bf16.vlgmr.msra.gmra.mxu0 %v10580_v38  ;;  %6837 = vst [vmem:[#allocation4 + $0x88] sm:$0xf] %v6769_v63  ;;  %v6644_v23 = vrot.slane %v6607_v19, 5  ;;  %v10561_v20 = vrot.slane %v6608_v61, 9 }
 0x49a   : > { %v12251_v30 = vld [vmem:[#allocation4 + $0x10] ss:$36 sps:$4 sm:$0xff]   ;;  %v6510_v59 = vrot.slane %v6509_v42, 4  ;;  %v6523_v5 = vor.u32 %v6522_v14, %v6519_v13  ;;  %v12254_v43 = vld [vmem:[%s15677_s7 + $0x230] sm:$0xff]   ;;  %7740 = vmatprep.mubr.bf16.mxu1 %v12244_v22  ;;  %v6528_v18 = vrot.slane %v6526_v10, 5  ;;  %v6648_v12 = vrot.slane %v6609_v28, 5 }
 0x49b   : > { %v6686_v8 = vld [vmem:[#allocation3 + $0x30] sm:$0xf]  ;;  %v6687_v40 = vld [vmem:[#allocation3 + $0x38] sm:$0xf]  ;;  %7741 = vmatmul.mubr.bf16.vlgmr.msra.gmra.mxu1 %v12251_v30  ;;  %v6645_v27 = vsel %vm13682_vm0, %v10560_v53, %v6644_v23  ;;  %v6707_v21 = vld [vmem:[#allocation3 + $0x34] sm:$0x1] }
 0x49c   : > { %6694 = vst [vmem:[#allocation4 + $0xa8] sm:$0xf] %v6686_v8  ;;  %v6706_v39 = vld [vmem:[#allocation3 + $0x30] sm:$0xf]  ;;  %v6515_v31 = vsel %vm12677_vm7, %v6510_v59, %v6514_v58  ;;  %v6524_v49 = vrot.slane %v6523_v5, 4  ;;  %11815 = vmatpush3.bf16.msra.mxu1 %v12250_v4  ;;  %v6649_v44 = vsel %vm13682_vm0, %v10561_v20, %v6648_v12  ;;  %v6780_v62 = vshll.u32 %v6707_v21, 16 }
 0x49d   : > { %6695 = vst [vmem:[#allocation4 + $0xcc] sm:$0xf] %v6687_v40  ;;  %v6708_v55 = vld [vmem:[#allocation3 + $0x38] sm:$0xf]  ;;  %v6771_v54 = vshrl.u32 %v6706_v39, 16  ;;  %v6774_v6 = vshll.u32 %v6706_v39, 16  ;;  %11816 = vmatprep.subr.bf16.mxu1 %v12254_v43 }
 0x49e   : > { %6596 = vst [vmem:[#allocation4 + $0x58] sm:$0xf] %v6515_v31  ;;  %6676 = vst [vmem:[#allocation4 + $0x5c] sm:$0xf] %v6645_v27  ;;  %v6709_v26 = vld [vmem:[#allocation3 + $0x3c] sm:$0x1]  ;;  %v6529_v9 = vsel %vm12677_vm7, %v6524_v49, %v6528_v18 }
 0x49f   : > { %v6785_v34 = vshrl.u32 %v6708_v55, 16  ;;  %6677 = vst [vmem:[#allocation4 + $0x80] sm:$0xf] %v6649_v44  ;;  %v6773_v7 = vrot.slane %v6771_v54, 4  ;;  %v6788_v37 = vshll.u32 %v6708_v55, 16  ;;  %v6794_v25 = vshll.u32 %v6709_v26, 16 }
 0x4a0   : > { %v12257_v4 = vld [vmem:[%s15677_s7 + $0x228] sm:$0xff]   ;;  %6597 = vst [vmem:[#allocation4 + $0x7c] sm:$0xf] %v6529_v9  ;;  %v6776_v33 = vrot.slane %v6774_v6, 5  ;;  %v6782_v51 = vrot.slane %v6780_v62, 5  ;;  %v6935_v50 = vld [vmem:[#allocation4 + $0x60] sm:$0xff]  ;;  %11817 = vmatpush3.bf16.msra.mxu1 %v12254_v43 }
 0x4a1   : > { %v6466_v0 = vld [vmem:[#allocation3 + $0x28] sm:$0xf]  ;;  %v6787_v24 = vrot.slane %v6785_v34, 4  ;;  %v6467_v45 = vld [vmem:[#allocation3 + $0x2c] sm:$0x1]  ;;  %v6790_v10 = vrot.slane %v6788_v37, 5  ;;  %11818 = vmatprep.subr.bf16.mxu1 %v12257_v4 }
 0x4a2   : > { %v6531_v60 = vshrl.u32 %v6466_v0, 16  ;;  %v6796_v19 = vrot.slane %v6794_v25, 5  ;;  %v6468_v29 = vld [vmem:[#allocation3 + $0x30] sm:$0xf]  ;;  %v6534_v36 = vshll.u32 %v6466_v0, 16  ;;  %v15070_v11 = vld [vmem:[%s15677_s7 + $0x220] sm:$0xff]   ;;  %v6777_v38 = vor.u32 %v6776_v33, %v6773_v7 }
 0x4a3   : > { %v6940_v13 = vld [vmem:[#allocation4 + $0x84] sm:$0xff]  ;;  %v6791_v61 = vor.u32 %v6790_v10, %v6787_v24  ;;  %v6540_v22 = vshll.u32 %v6467_v45, 16  ;;  %v6610_v63 = vld [vmem:[#allocation3 + $0x28] sm:$0xe]  ;;  %v6611_v30 = vld [vmem:[#allocation3 + $0x2c] sm:$0x1] }
 0x4a4   : > { %v12248_v53 = vld [vmem:[#allocation4 + $0x64] ss:$36 sps:$4 sm:$0xff]   ;;  %v6533_v42 = vrot.slane %v6531_v60, 4  ;;  %v10589_v14 = vcombine.low %v6935_v50, %v6940_v13  ;;  %v6536_v28 = vrot.slane %v6534_v36, 5  ;;  %v6778_v58 = vrot.slane %v6777_v38, 4  ;;  %11819 = vmatpush3.bf16.msra.mxu1 %v12257_v4 }
 0x4a5   : > { %v6469_v56 = vld [vmem:[#allocation3 + $0x34] sm:$0x1]  ;;  %7813 = vmatprep.mubr.bf16.mxu0 %v12248_v53  ;;  %v6545_v59 = vshrl.u32 %v6468_v29, 16  ;;  %v6548_v5 = vshll.u32 %v6468_v29, 16  ;;  %v6612_v20 = vld [vmem:[#allocation3 + $0x30] sm:$0xe]  ;;  %11820 = vmatprep.subr.bf16.mxu1 %v15070_v11 }
 0x4a6   : > { %v6554_v23 = vshll.u32 %v6469_v56, 16  ;;  %7814 = vmatmul.mubr.bf16.gmra.mxu0 %v10589_v14  ;;  %v6792_v8 = vrot.slane %v6791_v61, 4  ;;  %v6537_v18 = vor.u32 %v6536_v28, %v6533_v42  ;;  %v6542_v12 = vrot.slane %v6540_v22, 5  ;;  %v6613_v43 = vld [vmem:[#allocation3 + $0x34] sm:$0x1]  ;;  %v12264_v37 = vld [vmem:[%s15677_s7 + $0x218] sm:$0xff]  }
 0x4a7   : > { %v10562_v40 = vrot.slane %v6610_v63, 9  ;;  %v6783_v39 = vsel %vm12677_vm7, %v6778_v58, %v6782_v51  ;;  %v6547_v31 = vrot.slane %v6545_v59, 4  ;;  %v6550_v49 = vrot.slane %v6548_v5, 5  ;;  %v6688_v21 = vld [vmem:[#allocation3 + $0x40] sm:$0xf]  ;;  %v12268_v22 = vld [vmem:[%s15677_s7 + $0x210] sm:$0xff]  }
 0x4a8   : > { %v6556_v27 = vrot.slane %v6554_v23, 5  ;;  %v12252_v55 = vld [vmem:[#allocation4 + $0x5c] ss:$36 sps:$4 sm:$0xff]   ;;  %v6797_v54 = vsel %vm12677_vm7, %v6792_v8, %v6796_v19  ;;  %6838 = vst [vmem:[#allocation4 + $0xac] sm:$0xf] %v6783_v39  ;;  %v6538_v26 = vrot.slane %v6537_v18, 4  ;;  %11821 = vmatpush3.bf16.msra.mxu1 %v15070_v11 }
 0x4a9   : > { %v12258_v44 = vld [vmem:[#allocation4 + $0x58] ss:$36 sps:$4 sm:$0xff]   ;;  %6696 = vst [vmem:[#allocation4 + $0xf0] sm:$0xf] %v6688_v21  ;;  %6839 = vst [vmem:[#allocation4 + $0xd0] sm:$0xf] %v6797_v54  ;;  %v6551_v6 = vor.u32 %v6550_v49, %v6547_v31  ;;  %7748 = vmatprep.mubr.bf16.mxu1 %v12252_v55  ;;  %11822 = vmatprep.subr.bf16.mxu1 %v12264_v37 }
 0x4aa   : > { %v6652_v62 = vrot.slane %v6611_v30, 5  ;;  %v10563_v34 = vrot.slane %v6612_v20, 9  ;;  %v6656_v9 = vrot.slane %v6613_v43, 5  ;;  %v6710_v7 = vld [vmem:[#allocation3 + $0x40] sm:$0xf]  ;;  %v6543_v25 = vsel %vm12677_vm7, %v6538_v26, %v6542_v12  ;;  %7749 = vmatmul.mubr.bf16.gmra.mxu1 %v12258_v44  ;;  %v12269_v26 = vld [vmem:[%s15677_s7 + $0x208] sm:$0xff]  }
 0x4ab   : > { %v6711_v4 = vld [vmem:[#allocation3 + $0x44] sm:$0x1]  ;;  %v6799_v0 = vshrl.u32 %v6710_v7, 16  ;;  %v6802_v33 = vshll.u32 %v6710_v7, 16  ;;  %v6470_v51 = vld [vmem:[#allocation3 + $0x38] sm:$0xf] }
 0x4ac   : > { %v6552_v24 = vrot.slane %v6551_v6, 4  ;;  %6598 = vst [vmem:[#allocation4 + $0xa0] sm:$0xf] %v6543_v25  ;;  %v6653_v45 = vsel %vm13682_vm0, %v10562_v40, %v6652_v62  ;;  %v6657_v60 = vsel %vm13682_vm0, %v10563_v34, %v6656_v9  ;;  %v6808_v50 = vshll.u32 %v6711_v4, 16  ;;  %v6471_v10 = vld [vmem:[#allocation3 + $0x3c] sm:$0x1]  ;;  %11823 = vmatpush3.bf16.msra.mxu1 %v12264_v37 }
 0x4ad   : > { %v6472_v19 = vld [vmem:[#allocation3 + $0x40] sm:$0xf]  ;;  %6678 = vst [vmem:[#allocation4 + $0xa4] sm:$0xf] %v6653_v45  ;;  %6679 = vst [vmem:[#allocation4 + $0xc8] sm:$0xf] %v6657_v60  ;;  %11824 = vmatprep.subr.bf16.mxu1 %v12268_v22 }
 0x4ae   : > { %v6801_v29 = vrot.slane %v6799_v0, 4  ;;  %v6804_v36 = vrot.slane %v6802_v33, 5  ;;  %v6473_v13 = vld [vmem:[#allocation3 + $0x44] sm:$0x1]  ;;  %v6559_v53 = vshrl.u32 %v6470_v51, 16  ;;  %v6562_v38 = vshll.u32 %v6470_v51, 16 }
 0x4af   : > { %v6557_v56 = vsel %vm12677_vm7, %v6552_v24, %v6556_v27  ;;  %v6810_v42 = vrot.slane %v6808_v50, 5  ;;  %v6568_v14 = vshll.u32 %v6471_v10, 16  ;;  %v6573_v61 = vshrl.u32 %v6472_v19, 16  ;;  %v6614_v28 = vld [vmem:[#allocation3 + $0x38] sm:$0xe]  ;;  %v12272_v50 = vld [vmem:[%s15677_s7 + $0x200] sm:$0xff]  }
 0x4b0   : > { %6599 = vst [vmem:[#allocation4 + $0xc4] sm:$0xf] %v6557_v56  ;;  %v6805_v63 = vor.u32 %v6804_v36, %v6801_v29  ;;  %v6561_v30 = vrot.slane %v6559_v53, 4  ;;  %v6564_v58 = vrot.slane %v6562_v38, 5  ;;  %v6576_v11 = vshll.u32 %v6472_v19, 16  ;;  %v6945_v5 = vld [vmem:[#allocation4 + $0xa8] sm:$0xff]  ;;  %11825 = vmatpush3.bf16.msra.mxu1 %v12268_v22 }
 0x4b1   : > { %v6615_v59 = vld [vmem:[#allocation3 + $0x3c] sm:$0x1]  ;;  %v6570_v23 = vrot.slane %v6568_v14, 5  ;;  %v6575_v20 = vrot.slane %v6573_v61, 4  ;;  %v6582_v8 = vshll.u32 %v6473_v13, 16  ;;  %v10564_v49 = vrot.slane %v6614_v28, 9  ;;  %11826 = vmatprep.subr.bf16.mxu1 %v12269_v26 }
 0x4b2   : > { %v6616_v18 = vld [vmem:[#allocation3 + $0x40] sm:$0xe]  ;;  %v6806_v40 = vrot.slane %v6805_v63, 4  ;;  %v6565_v39 = vor.u32 %v6564_v58, %v6561_v30  ;;  %v6578_v31 = vrot.slane %v6576_v11, 5  ;;  %v6617_v55 = vld [vmem:[#allocation3 + $0x44] sm:$0x1] }
 0x4b3   : > { %v6950_v12 = vld [vmem:[#allocation4 + $0xcc] sm:$0xff]  ;;  %v6584_v21 = vrot.slane %v6582_v8, 5  ;;  %v6660_v54 = vrot.slane %v6615_v59, 5  ;;  %v10565_v44 = vrot.slane %v6616_v18, 9  ;;  %v6664_v9 = vrot.slane %v6617_v55, 5  ;;  %v6960_v22 = vld [vmem:[#allocation4 + $0x114] sm:$0xff] }
 0x4b4   : > { %v12255_v43 = vld [vmem:[#allocation4 + $0xac] ss:$36 sps:$4 sm:$0xff]   ;;  %v10598_v27 = vcombine.low %v6945_v5, %v6950_v12  ;;  %v6811_v6 = vsel %vm12677_vm7, %v6806_v40, %v6810_v42  ;;  %v6566_v62 = vrot.slane %v6565_v39, 4  ;;  %v6579_v34 = vor.u32 %v6578_v31, %v6575_v20  ;;  %v6842_v7 = vld [vmem:[#allocation3 + $0x10] sm:$0xe]  ;;  %11827 = vmatpush3.bf16.msra.mxu1 %v12269_v26 }
 0x4b5   : > { %7821 = vmatprep.mubr.bf16.mxu0 %v12255_v43  ;;  %v6843_v37 = vld [vmem:[#allocation3 + $0x14] sm:$0x1]  ;;  %6840 = vst [vmem:[#allocation4 + $0xf4] sm:$0xf] %v6811_v6  ;;  %v6661_v25 = vsel %vm13682_vm0, %v10564_v49, %v6660_v54  ;;  %v6844_v4 = vld [vmem:[#allocation3 + $0x18] sm:$0xe]  ;;  %v6665_v45 = vsel %vm13682_vm0, %v10565_v44, %v6664_v9  ;;  %v8945_v59 = vsel %vm12677_vm7, %v15040_v32, %v15044_v16 }
 0x4b6   : > { %7822 = vmatmul.mubr.bf16.gmra.mxu0 %v10598_v27  ;;  %v6845_v0 = vld [vmem:[#allocation3 + $0x1c] sm:$0x1]  ;;  %v10566_v33 = vrot.slane %v6842_v7, 9  ;;  %v6571_v51 = vsel %vm12677_vm7, %v6566_v62, %v6570_v23  ;;  %v6580_v24 = vrot.slane %v6579_v34, 4  ;;  %6680 = vst [vmem:[#allocation4 + $0xec] sm:$0xf] %v6661_v25  ;;  %11828 = vmatprep.subr.bf16.mxu1 %v12272_v50 }
 0x4b7   : > { %v6876_v60 = vrot.slane %v6843_v37, 5  ;;  %v6846_v10 = vld [vmem:[#allocation3 + $0x20] sm:$0xe]  ;;  %v6847_v19 = vld [vmem:[#allocation3 + $0x24] sm:$0x1]  ;;  %v10567_v13 = vrot.slane %v6844_v4, 9 }
 0x4b8   : > { %v12259_v29 = vld [vmem:[#allocation4 + $0xa4] ss:$36 sps:$4 sm:$0xff]   ;;  %6600 = vst [vmem:[#allocation4 + $0xe8] sm:$0xf] %v6571_v51  ;;  %6681 = vst [vmem:[#allocation4 + $0x110] sm:$0xf] %v6665_v45  ;;  %v6585_v38 = vsel %vm12677_vm7, %v6580_v24, %v6584_v21  ;;  %11829 = vmatpush3.bf16.msra.mxu1 %v12272_v50 }
 0x4b9   : > { %v12265_v36 = vld [vmem:[#allocation4 + $0xa0] ss:$36 sps:$4 sm:$0xff]   ;;  %v8809_v53 = vld [vmem:[#allocation3 + $0x48] sm:$0xf]  ;;  %v6877_v56 = vsel %vm13682_vm0, %v10566_v33, %v6876_v60  ;;  %v6880_v42 = vrot.slane %v6845_v0, 5  ;;  %v10568_v28 = vrot.slane %v6846_v10, 9  ;;  %7756 = vmatprep.mubr.bf16.mxu1 %v12259_v29 }
 0x4ba   : > { %v6848_v14 = vld [vmem:[#allocation3 + $0x28] sm:$0xe]  ;;  %v6849_v61 = vld [vmem:[#allocation3 + $0x2c] sm:$0x1]  ;;  %6601 = vst [vmem:[#allocation4 + $0x10c] sm:$0xf] %v6585_v38  ;;  %7757 = vmatmul.mubr.bf16.gmra.mxu1 %v12265_v36 }
 0x4bb   : > { %6914 = vst [vmem:[#allocation4 + $0x20] sm:$0xf] %v6877_v56  ;;  %v6884_v63 = vrot.slane %v6847_v19, 5  ;;  %v10569_v30 = vrot.slane %v6848_v14, 9  ;;  %v6888_v58 = vrot.slane %v6849_v61, 5  ;;  %v6881_v5 = vsel %vm13682_vm0, %v10567_v13, %v6880_v42  ;;  %v12276_v45 = vld [vmem:[%s15678_s8 + $0x8] sm:$0xff]  }
 0x4bc   : > { %v6850_v11 = vld [vmem:[#allocation3 + $0x30] sm:$0xe]  ;;  %v6851_v23 = vld [vmem:[#allocation3 + $0x34] sm:$0x1]  ;;  %v6852_v20 = vld [vmem:[#allocation3 + $0x38] sm:$0xe]  ;;  %11838 = vmatprep.subr.bf16.mxu0 %v12276_v45 }
 0x4bd   : > { %v6853_v8 = vld [vmem:[#allocation3 + $0x3c] sm:$0x1]  ;;  %6915 = vst [vmem:[#allocation4 + $0x44] sm:$0xf] %v6881_v5  ;;  %v6885_v18 = vsel %vm13682_vm0, %v10568_v28, %v6884_v63  ;;  %v6889_v12 = vsel %vm13682_vm0, %v10569_v30, %v6888_v58  ;;  %v10570_v43 = vrot.slane %v6850_v11, 9  ;;  %v6892_v40 = vrot.slane %v6851_v23, 5  ;;  %11839 = vmatpush3.bf16.msra.mxu0 %v12276_v45 }
 0x4be   : > { %v6854_v39 = vld [vmem:[#allocation3 + $0x40] sm:$0xe]  ;;  %v6855_v31 = vld [vmem:[#allocation3 + $0x44] sm:$0x1]  ;;  %6916 = vst [vmem:[#allocation4 + $0x68] sm:$0xf] %v6885_v18 }
 0x4bf   : > { %v6955_v32 = vld [vmem:[#allocation4 + $0xf0] sm:$0xff]  ;;  %6917 = vst [vmem:[#allocation4 + $0x8c] sm:$0xf] %v6889_v12  ;;  %v10571_v49 = vrot.slane %v6852_v20, 9  ;;  %v6896_v27 = vrot.slane %v6853_v8, 5  ;;  %v10572_v21 = vrot.slane %v6854_v39, 9  ;;  %v6893_v54 = vsel %vm13682_vm0, %v10570_v43, %v6892_v40 }
 0x4c0   : > { %v12262_v16 = vld [vmem:[#allocation4 + $0xf4] ss:$36 sps:$4 sm:$0xff]   ;;  %8817 = vst [vmem:[#allocation4 + $0x114] sm:$0xf] %v8809_v53  ;;  %v10607_v55 = vcombine.low %v6955_v32, %v6960_v22  ;;  %v6900_v44 = vrot.slane %v6855_v31, 5 }
 0x4c1   : > { %8961 = vst [vmem:[#allocation4 + $0x118] sm:$0xf] %v8945_v59  ;;  %7829 = vmatprep.mubr.bf16.mxu0 %v12262_v16  ;;  %v6897_v26 = vsel %vm13682_vm0, %v10571_v49, %v6896_v27  ;;  %6918 = vst [vmem:[#allocation4 + $0xb0] sm:$0xf] %v6893_v54  ;;  %v8976_v6 = vld [vmem:[#allocation3 + $0x48] sm:$0xe] }
 0x4c2   : > { %v8977_v62 = vld [vmem:[#allocation3 + $0x4c] sm:$0x1]  ;;  %7830 = vmatmul.mubr.bf16.gmra.mxu0 %v10607_v55  ;;  %6919 = vst [vmem:[#allocation4 + $0xd4] sm:$0xf] %v6897_v26  ;;  %v6901_v34 = vsel %vm13682_vm0, %v10572_v21, %v6900_v44  ;;  %v12266_v9 = vld [vmem:[#allocation4 + $0xec] ss:$36 sps:$4 sm:$0xff]  }
 0x4c3   : > { %6920 = vst [vmem:[#allocation4 + $0xf8] sm:$0xf] %v6901_v34  ;;  %v12270_v7 = vld [vmem:[#allocation4 + $0xe8] ss:$36 sps:$4 sm:$0xff]   ;;  %v10863_v37 = vrot.slane %v8976_v6, 9  ;;  %v9024_v25 = vrot.slane %v8977_v62, 5  ;;  %7764 = vmatprep.mubr.bf16.mxu1 %v12266_v9 }
 0x4c4   : > { %v12271_v4 = vld [vmem:[#allocation4 + $0x20] ss:$36 sps:$4 sm:$0xff]   ;;  %7765 = vmatmul.mubr.bf16.gmra.mxu1 %v12270_v7  ;;  %v12277_v60 = vld [vmem:[%s15678_s8] sm:$0xff]  }
 0x4c5   : > { %11830 = vmatprep.mubr.bf16.mxu1 %v12271_v4  ;;  %v9025_v0 = vsel %vm13682_vm0, %v10863_v37, %v9024_v25  ;;  %11840 = vmatprep.subr.bf16.mxu0 %v12277_v60 }
 0x4c6   : > { %v12273_v51 = vld [vmem:[#allocation4 + $0x68] ss:$36 sps:$4 sm:$0xff]   ;;  %11841 = vmatpush3.bf16.msra.mxu0 %v12277_v60 }
 0x4c9   : > { %v12274_v24 = vld [vmem:[#allocation4 + $0xb0] ss:$36 sps:$4 sm:$0xff]  }
 0x4ca   : > { %v12275_v33 = vld [vmem:[#allocation4 + $0xf8] ss:$36 sps:$4 sm:$0xff]  }
 0x4cb   : > { %9041 = vst [vmem:[#allocation4 + $0x11c] sm:$0xf] %v9025_v0 }
 0x4cc   : > { %11831 = vmatmul.mubr.bf16.vlgmr.msra.gmra.mxu1 %v12273_v51 }
 0x4cd   : > { %11834 = vmatprep.mubr.bf16.mxu1 %v12274_v24 }
 0x4d4   : > { %11835 = vmatmul.mubr.bf16.gmra.mxu1 %v12275_v33 }
 0x525   : > { %v15134_v50 = vpop.f32.mrf.mxu0 }
 0x527   : > { %v11453_v10 = vpop.f32.mrf.mxu0 }
 0x528   : > { %v11454_v41 = vadd.f32 %v11453_v10, %v15134_v50 }
 0x529   : > { %v15136_v19 = vpop.f32.mrf.mxu0 }
 0x52b   : > { %v15138_v29 = vpop.f32.mrf.mxu0 }
 0x531   : > { %v11412_v36 = vpop.f32.mrf.mxu1  ;;  %v15140_v13 = vpop.f32.mrf.mxu0 }
 0x533   : > { %v11413_v53 = vpop.f32.mrf.mxu1  ;;  %v11459_v38 = vpop.f32.mrf.mxu0 }
 0x534   : > { %v11414_v35 = vadd.f32 %v11413_v53, %v11412_v36 }
 0x535   : > { %v11415_v56 = vpop.f32.mrf.mxu1  ;;  %v11461_v42 = vpop.f32.mrf.mxu0 }
 0x537   : > { %v11416_v14 = vpop.f32.mrf.mxu1  ;;  %v11462_v61 = vpop.f32.mrf.mxu0 }
 0x538   : > { %v11417_v47 = vadd.f32 %v11416_v14, %v11415_v56 }
 0x539   : > { %v11418_v28 = vpop.f32.mrf.mxu1 }
 0x53b   : > { %v11419_v63 = vpop.f32.mrf.mxu1 }
 0x53c   : > { %v15142_v22 = vpop.f32.mrf.mxu0  ;;  %v11420_v52 = vadd.f32 %v11419_v63, %v11418_v28 }
 0x53d   : > { %v11421_v58 = vpop.f32.mrf.mxu1 }
 0x53e   : > { %v15144_v30 = vpop.f32.mrf.mxu0 }
 0x53f   : > { %v11422_v59 = vpop.f32.mrf.mxu1  ;;  %v11466_v50 = vadd.f32 %v15144_v30, %v15142_v22 }
 0x540   : > { %v11467_v11 = vpop.f32.mrf.mxu0  ;;  %v11423_v48 = vadd.f32 %v11422_v59, %v11421_v58 }
 0x542   : > { %v11468_v5 = vpop.f32.mrf.mxu0 }
 0x543   : > { %v11469_v10 = vadd.f32 %v11468_v5, %v11467_v11 }
 0x544   : > { %v11424_v23 = vpop.f32.mrf.mxu1  ;;  %v11470_v20 = vpop.f32.mrf.mxu0 }
 0x546   : > { %v11425_v8 = vpop.f32.mrf.mxu1  ;;  %v11471_v18 = vpop.f32.mrf.mxu0 }
 0x547   : > { %v11426_v58 = vadd.f32 %v11425_v8, %v11424_v23  ;;  %v11472_v59 = vadd.f32 %v11471_v18, %v11470_v20 }
 0x548   : > { %v15146_v12 = vpop.f32.mrf.mxu1  ;;  %v15148_v40 = vpop.f32.mrf.mxu0 }
 0x549   : > { %15815 = vst [vmem:[#allocation14_spill] sm:$0xff] %v15146_v12  ;;  %15816 = vst [vmem:[#allocation13_spill] sm:$0xff] %v15148_v40  ;;  %v7678_v12 = vadd.f32 %v11454_v41, %v11414_v35  ;;  %v7694_v18 = vadd.f32 %v11466_v50, %v11426_v58 }
 0x54a   : > { %v11428_v43 = vpop.f32.mrf.mxu1  ;;  %v11474_v32 = vpop.f32.mrf.mxu0 }
 0x54f   : > { %v15150_v39 = vpop.f32.mrf.mxu1 }
 0x550   : > { %15817 = vst [vmem:[#allocation15_spill] sm:$0xff] %v15150_v39  ;;  %v11460_v39 = vadd.f32 %v11459_v38, %v15140_v13  ;;  %v15823_v38 = vld [vmem:[#allocation14_spill] sm:$0xff] }
 0x551   : > { %v15152_v31 = vpop.f32.mrf.mxu1 }
 0x552   : > { %15818 = vst [vmem:[#allocation17_spill] sm:$0xff] %v15152_v31  ;;  %v7686_v14 = vadd.f32 %v11460_v39, %v11420_v52 }
 0x553   : > { %v11433_v16 = vpop.f32.mrf.mxu1 }
 0x555   : > { %v11434_v49 = vpop.f32.mrf.mxu1 }
 0x559   : > { %v11532_v27 = vpop.f32.mrf.mxu0  ;;  %v15826_v39 = vld [vmem:[#allocation17_spill] sm:$0xff] }
 0x55b   : > { %v11533_v21 = vpop.f32.mrf.mxu0  ;;  %v11492_v55 = vpop.f32.mrf.mxu1 }
 0x55c   : > { %v11534_v41 = vadd.f32 %v11533_v21, %v11532_v27 }
 0x55d   : > { %v11535_v54 = vpop.f32.mrf.mxu0  ;;  %v11493_v44 = vpop.f32.mrf.mxu1 }
 0x55f   : > { %v11536_v26 = vpop.f32.mrf.mxu0  ;;  %v11495_v6 = vpop.f32.mrf.mxu1 }
 0x561   : > { %v11496_v34 = vpop.f32.mrf.mxu1 }
 0x562   : > { %v11497_v53 = vadd.f32 %v11496_v34, %v11495_v6  ;;  %v11537_v6 = vadd.f32 %v11536_v26, %v11535_v54 }
 0x566   : > { %v11538_v62 = vpop.f32.mrf.mxu0 }
 0x568   : > { %v11539_v9 = vpop.f32.mrf.mxu0 }
 0x569   : > { %v11540_v22 = vadd.f32 %v11539_v9, %v11538_v62 }
 0x56a   : > { %v11541_v7 = vpop.f32.mrf.mxu0  ;;  %v11498_v37 = vpop.f32.mrf.mxu1 }
 0x56c   : > { %v11499_v25 = vpop.f32.mrf.mxu1  ;;  %v11542_v4 = vpop.f32.mrf.mxu0 }
 0x56d   : > { %v11500_v40 = vadd.f32 %v11499_v25, %v11498_v37  ;;  %v11543_v35 = vadd.f32 %v11542_v4, %v11541_v7 }
 0x56e   : > { %v11501_v0 = vpop.f32.mrf.mxu1 }
 0x570   : > { %v11502_v51 = vpop.f32.mrf.mxu1 }
 0x571   : > { %v11503_v31 = vadd.f32 %v11502_v51, %v11501_v0 }
 0x576   : > { %v15154_v33 = vpop.f32.mrf.mxu0 }
 0x577   : > { %15819 = vst [vmem:[#allocation23_spill] sm:$0xff] %v15154_v33  ;;  %v11463_v33 = vadd.f32 %v11462_v61, %v11461_v42 }
 0x578   : > { %v15156_v24 = vpop.f32.mrf.mxu0 }
 0x579   : > { %15820 = vst [vmem:[#allocation25_spill] sm:$0xff] %v15156_v24  ;;  %v11494_v24 = vadd.f32 %v11493_v44, %v11492_v55  ;;  %v7689_v36 = vadd.f32 %v11463_v33, %v11423_v48  ;;  %v11429_v55 = vadd.f32 %v11428_v43, %v15823_v38 }
 0x57a   : > { %v11504_v45 = vpop.f32.mrf.mxu1  ;;  %v15158_v46 = vpop.f32.mrf.mxu0 }
 0x57b   : > { %15821 = vst [vmem:[#allocation26_spill] sm:$0xff] %v15158_v46  ;;  %v11457_v46 = vadd.f32 %v15138_v29, %v15136_v19  ;;  %v7743_v42 = vadd.f32 %v11494_v24, %v7678_v12  ;;  %v7754_v61 = vadd.f32 %v11503_v31, %v7689_v36  ;;  %v11435_v19 = vadd.f32 %v11434_v49, %v11433_v16 }
 0x57c   : > { %v11505_v60 = vpop.f32.mrf.mxu1  ;;  %v15160_v15 = vpop.f32.mrf.mxu0  ;;  %v7751_v29 = vadd.f32 %v11500_v40, %v7686_v14  ;;  %v7697_v26 = vadd.f32 %v11469_v10, %v11429_v55 }
 0x57d   : > { %15822 = vst [vmem:[#allocation27_spill] sm:$0xff] %v15160_v15  ;;  %v7681_v56 = vadd.f32 %v11457_v46, %v11417_v47  ;;  %v15824_v47 = vld [vmem:[#allocation13_spill] sm:$0xff]  ;;  %v15825_v46 = vld [vmem:[#allocation15_spill] sm:$0xff]  ;;  %v11506_v5 = vadd.f32 %v11505_v60, %v11504_v45  ;;  %v7808_v20 = vadd.f32 %v11534_v41, %v7743_v42  ;;  %v7819_v8 = vadd.f32 %v11543_v35, %v7754_v61 }
 0x57e   : > { %v11507_v57 = vpop.f32.mrf.mxu1  ;;  %v11475_v52 = vadd.f32 %v11474_v32, %v15824_v47  ;;  %v11432_v44 = vadd.f32 %v15826_v39, %v15825_v46  ;;  %v7816_v43 = vadd.f32 %v11540_v22, %v7751_v29  ;;  %v12278_v47 = vld [vmem:[%s15677_s7 + $0x338] sm:$0xff]   ;;  %v12281_v39 = vld [vmem:[%s15677_s7 + $0x330] sm:$0xff]  }
 0x57f   : > { %v7746_v48 = vadd.f32 %v11497_v53, %v7681_v56  ;;  %v7759_v62 = vadd.f32 %v11506_v5, %v7694_v18  ;;  %11614 = vmatprep.subr.bf16.mxu0 %v12278_v47  ;;  %v12280_v46 = vld [vmem:[%s15677_s7 + $0x2b8] sm:$0xff]   ;;  %v12284_v22 = vld [vmem:[%s15677_s7 + $0x2b0] sm:$0xff]   ;;  %v12287_v5 = vld [vmem:[%s15677_s7 + $0x2e8] sm:$0xff]  }
 0x580   : > { %v11508_v3 = vpop.f32.mrf.mxu1  ;;  %v7705_v12 = vadd.f32 %v11475_v52, %v11435_v19  ;;  %v7702_v21 = vadd.f32 %v11472_v59, %v11432_v44  ;;  %v15828_v25 = vld [vmem:[#allocation25_spill] sm:$0xff]  ;;  %11574 = vmatprep.subr.bf16.mxu1 %v12280_v46  ;;  %v12291_v18 = vld [vmem:[%s15677_s7 + $0x2e0] sm:$0xff]  }
 0x581   : > { %v11509_v16 = vadd.f32 %v11508_v3, %v11507_v57  ;;  %v7811_v32 = vadd.f32 %v11537_v6, %v7746_v48  ;;  %v12279_v52 = vld [vmem:[%s15677_s7 + $0x2f8] sm:$0xff]   ;;  %v12283_v6 = vld [vmem:[%s15677_s7 + $0x2f0] sm:$0xff]  }
 0x582   : > { %v15162_v17 = vpop.f32.mrf.mxu0  ;;  %v15829_v36 = vld [vmem:[#allocation26_spill] sm:$0xff]  ;;  %v12282_v44 = vld [vmem:[%s15677_s7 + $0x278] sm:$0xff]  }
 0x583   : > { %11575 = vmatpush3.bf16.msra.mxu1 %v12282_v44  ;;  %v8286_v46 = vld [vmem:[#allocation3 + $0x18] sm:$0xf] }
 0x584   : > { %v11510_v1 = vpop.f32.mrf.mxu1  ;;  %v11551_v28 = vpop.f32.mrf.mxu0  ;;  %v15830_v53 = vld [vmem:[#allocation27_spill] sm:$0xff]  ;;  %11576 = vmatprep.subr.bf16.mxu1 %v12284_v22 }
 0x585   : > { %v11552_v24 = vadd.f32 %v11551_v28, %v15162_v17  ;;  %v11549_v56 = vadd.f32 %v15830_v53, %v15829_v36  ;;  %v15835_v53 = vld [vmem:[#allocation22_spill] sm:$0xff] }
 0x586   : > { %v11511_v2 = vpop.f32.mrf.mxu1  ;;  %v11553_v30 = vpop.f32.mrf.mxu0 }
 0x587   : > { %v11512_v40 = vadd.f32 %v11511_v2, %v11510_v1  ;;  %v7762_v1 = vadd.f32 %v11509_v16, %v7697_v26  ;;  %v12296_v16 = vld [vmem:[%s15677_s7 + $0x298] sm:$0xff]   ;;  %v12304_v26 = vld [vmem:[%s15677_s7 + $0x288] sm:$0xff]  }
 0x588   : > { %v11513_v15 = vpop.f32.mrf.mxu1  ;;  %v11554_v34 = vpop.f32.mrf.mxu0 }
 0x589   : > { %v7767_v0 = vadd.f32 %v11512_v40, %v7702_v21  ;;  %v11555_v51 = vadd.f32 %v11554_v34, %v11553_v30  ;;  %v7827_v19 = vadd.f32 %v11549_v56, %v7762_v1  ;;  %v12285_v30 = vld [vmem:[%s15677_s7 + $0x328] sm:$0xff]   ;;  %v12293_v40 = vld [vmem:[%s15677_s7 + $0x318] sm:$0xff]   ;;  %v12300_v21 = vld [vmem:[%s15677_s7 + $0x290] sm:$0xff]  }
 0x58a   : > { %v11514_v63 = vpop.f32.mrf.mxu1  ;;  %v12301_v34 = vld [vmem:[%s15677_s7 + $0x308] sm:$0xff]  }
 0x58b   : > { %v11515_v23 = vadd.f32 %v11514_v63, %v11513_v15  ;;  %v15827_v15 = vld [vmem:[#allocation23_spill] sm:$0xff]  ;;  %v7832_v42 = vadd.f32 %v11552_v24, %v7767_v0  ;;  %v12321_v0 = vld [vmem:[%s15677_s7 + $0x3b8] sm:$0xff]  }
 0x58c   : > { %v11832_v13 = vpop.f32.mrf.mxu1  ;;  %v11546_v4 = vadd.f32 %v15828_v25, %v15827_v15  ;;  %v12311_v15 = vld [vmem:[%s15677_s7 + $0x280] sm:$0xff]   ;;  %v12312_v25 = vld [vmem:[%s15677_s7 + $0x438] sm:$0xff]  }
 0x58d   : > { %v7881_v7 = vadd.f32 %v11832_v13, %v7816_v43  ;;  %v7770_v9 = vadd.f32 %v11515_v23, %v7705_v12  ;;  %v12288_v23 = vld [vmem:[%s15677_s7 + $0x2a8] sm:$0xff]   ;;  %v12292_v12 = vld [vmem:[%s15677_s7 + $0x2a0] sm:$0xff]  }
 0x58e   : > { %v7872_v11 = vpop.f32.mrf.mxu1  ;;  %v7824_v63 = vadd.f32 %v11546_v4, %v7759_v62  ;;  %v12294_v43 = vld [vmem:[%s15677_s7 + $0x260] sm:$0xff]  }
 0x58f   : > { %v7873_v49 = vadd.f32 %v7872_v11, %v7808_v20  ;;  %v7905_v45 = vmax.f32 %v7881_v7, 0.0  ;;  %v7835_v50 = vadd.f32 %v11555_v51, %v7770_v9  ;;  %v12286_v11 = vld [vmem:[%s15677_s7 + $0x270] sm:$0xff]   ;;  %v12289_v20 = vld [vmem:[%s15677_s7 + $0x320] sm:$0xff]   ;;  %v12306_v9 = vld [vmem:[%s15677_s7 + $0x248] sm:$0xff]  }
 0x590   : > { %v11833_v31 = vpop.f32.mrf.mxu1  ;;  %11577 = vmatpush3.bf16.msra.mxu1 %v12286_v11  ;;  %v12302_v7 = vld [vmem:[%s15677_s7 + $0x250] sm:$0xff]   ;;  %v12305_v62 = vld [vmem:[%s15677_s7 + $0x300] sm:$0xff]  }
 0x591   : > { %v7884_v27 = vadd.f32 %v11833_v31, %v7819_v8  ;;  %v7903_v3 = vmax.f32 %v7873_v49, 0.0  ;;  %v12290_v8 = vld [vmem:[%s15677_s7 + $0x268] sm:$0xff]   ;;  %11578 = vmatprep.subr.bf16.mxu1 %v12288_v23  ;;  %v12295_v31 = vld [vmem:[%s15677_s7 + $0x2d8] sm:$0xff]   ;;  %v12297_v49 = vld [vmem:[%s15677_s7 + $0x310] sm:$0xff]  }
 0x592   : > { %v7875_v54 = vpop.f32.mrf.mxu1  ;;  %v12313_v4 = vld [vmem:[%s15677_s7 + $0x240] sm:$0xff]  }
 0x593   : > { %v7876_v37 = vadd.f32 %v7875_v54, %v7811_v32  ;;  %v7906_v33 = vmax.f32 %v7884_v27, 0.0  ;;  %v12298_v27 = vld [vmem:[%s15677_s7 + $0x258] sm:$0xff]   ;;  %v12299_v32 = vld [vmem:[%s15677_s7 + $0x2d0] sm:$0xff]   ;;  %v12303_v54 = vld [vmem:[%s15677_s7 + $0x2c8] sm:$0xff]  }
 0x594   : > { %v11836_v2 = vpop.f32.mrf.mxu1  ;;  %11579 = vmatpush3.bf16.msra.mxu1 %v12290_v8 }
 0x595   : > { %v7904_v57 = vmax.f32 %v7876_v37, 0.0  ;;  %v7912_v10 = vpack.c.bf16 %v7906_v33, %v7905_v45  ;;  %v7897_v29 = vadd.f32 %v11836_v2, %v7832_v42  ;;  %11580 = vmatprep.subr.bf16.mxu1 %v12292_v12  ;;  %v12307_v37 = vld [vmem:[%s15677_s7 + $0x2c0] sm:$0xff]   ;;  %v15831_v2 = vld [vmem:[#allocation16_spill] sm:$0xff]  ;;  %v15837_v42 = vld [vmem:[#allocation21_spill] sm:$0xff] }
 0x596   : > { %v7888_v60 = vpop.f32.mrf.mxu1 }
 0x597   : > { %v7911_v14 = vpack.c.bf16 %v7904_v57, %v7903_v3  ;;  %v7889_v58 = vadd.f32 %v7888_v60, %v7824_v63  ;;  %v7909_v41 = vmax.f32 %v7897_v29, 0.0  ;;  %v15833_v57 = vld [vmem:[#allocation18_spill] sm:$0xff] }
 0x598   : > { %v11837_v61 = vpop.f32.mrf.mxu1  ;;  %11581 = vmatpush3.bf16.msra.mxu1 %v12294_v43  ;;  %v8274_v43 = vld [vmem:[#allocation3 + $0x8] sm:$0xf] }
 0x599   : > { %v7900_v59 = vadd.f32 %v11837_v61, %v7835_v50  ;;  %11842 = vmatprep.mubr.msk.bf16.mxu0 %vm7931_vm3, %v7911_v14  ;;  %v7907_v38 = vmax.f32 %v7889_v58, 0.0  ;;  %11582 = vmatprep.subr.bf16.mxu1 %v12296_v16 }
 0x59a   : > { %v7891_v13 = vpop.f32.mrf.mxu1  ;;  %11843 = vmatmul.mubr.msk.bf16.vlgmr.msra.gmra.mxu0 %vm7931_vm3, %v7912_v10 }
 0x59b   : > { %v7892_v17 = vadd.f32 %v7891_v13, %v7827_v19  ;;  %v7910_v28 = vmax.f32 %v7900_v59, 0.0  ;;  %11615 = vmatpush3.bf16.msra.mxu0 %v12279_v52 }
 0x59c   : > { %11616 = vmatprep.subr.bf16.mxu0 %v12281_v39  ;;  %11583 = vmatpush3.bf16.msra.mxu1 %v12298_v27  ;;  %v8289_v39 = vld [vmem:[#allocation3 + $0x1c] sm:$0x1] }
 0x59d   : > { %v7908_v55 = vmax.f32 %v7892_v17, 0.0  ;;  %v7914_v35 = vpack.c.bf16 %v7910_v28, %v7909_v41  ;;  %11584 = vmatprep.subr.bf16.mxu1 %v12300_v21 }
 0x59f   : > { %v7913_v48 = vpack.c.bf16 %v7908_v55, %v7907_v38  ;;  %11617 = vmatpush3.bf16.msra.mxu0 %v12283_v6  ;;  %v15839_v38 = vld [vmem:[#allocation24_spill] sm:$0xff] }
 0x5a0   : > { %11618 = vmatprep.subr.bf16.mxu0 %v12285_v30  ;;  %11585 = vmatpush3.bf16.msra.mxu1 %v12302_v7  ;;  %v15841_v30 = vld [vmem:[#allocation11_spill] sm:$0xff] }
 0x5a1   : > { %11846 = vmatprep.mubr.msk.bf16.mxu0 %vm7931_vm3, %v7913_v48  ;;  %11586 = vmatprep.subr.bf16.mxu1 %v12304_v26  ;;  %v15845_v26 = vld [vmem:[#allocation19_spill] sm:$0xff] }
 0x5a2   : > { %11847 = vmatmul.mubr.msk.bf16.gmra.mxu0 %vm7931_vm3, %v7914_v35 }
 0x5a3   : > { %11619 = vmatpush3.bf16.msra.mxu0 %v12287_v5 }
 0x5a4   : > { %11620 = vmatprep.subr.bf16.mxu0 %v12289_v20  ;;  %11587 = vmatpush3.bf16.msra.mxu1 %v12306_v9 }
 0x5a5   : > { %11588 = vmatprep.subr.bf16.mxu1 %v12311_v15 }
 0x5a7   : > { %11621 = vmatpush3.bf16.msra.mxu0 %v12291_v18 }
 0x5a8   : > { %11622 = vmatprep.subr.bf16.mxu0 %v12293_v40  ;;  %11589 = vmatpush3.bf16.msra.mxu1 %v12313_v4  ;;  %v8292_v4 = vld [vmem:[#allocation3 + $0x20] sm:$0xf] }
 0x5a9   : > { %11654 = vmatprep.subr.bf16.mxu1 %v12321_v0  ;;  %v8295_v0 = vld [vmem:[#allocation3 + $0x24] sm:$0x1] }
 0x5ab   : > { %11623 = vmatpush3.bf16.msra.mxu0 %v12295_v31  ;;  %v8277_v31 = vld [vmem:[#allocation3 + $0xc] sm:$0x1] }
 0x5ac   : > { %11624 = vmatprep.subr.bf16.mxu0 %v12297_v49 }
 0x5af   : > { %11625 = vmatpush3.bf16.msra.mxu0 %v12299_v32 }
 0x5b0   : > { %11626 = vmatprep.subr.bf16.mxu0 %v12301_v34 }
 0x5b3   : > { %11627 = vmatpush3.bf16.msra.mxu0 %v12303_v54 }
 0x5b4   : > { %11628 = vmatprep.subr.bf16.mxu0 %v12305_v62 }
 0x5b7   : > { %11629 = vmatpush3.bf16.msra.mxu0 %v12307_v37 }
 0x5b8   : > { %11694 = vmatprep.subr.bf16.mxu0 %v12312_v25 }
 0x65a   : > { %v11844_v33 = vpop.f32.mrf.mxu0 }
 0x65b   : > { %v15286_v1 = vadd.f32 %v11844_v33, %v15831_v2 }
 0x65c   : > { %v7978_v51 = vpop.f32.mrf.mxu0 }
 0x65d   : > { %15832 = vst [vmem:[#allocation14_spill] sm:$0xff] %v15286_v1  ;;  %v8019_v3 = vmax.f32 %v15286_v1, 0.0  ;;  %v15290_v24 = vadd.f32 %v7978_v51, %v15833_v57  ;;  %v15847_v51 = vld [vmem:[#allocation20_spill] sm:$0xff] }
 0x65e   : > { %v11845_v45 = vpop.f32.mrf.mxu0 }
 0x65f   : > { %15834 = vst [vmem:[#allocation13_spill] sm:$0xff] %v15290_v24  ;;  %v11038_v60 = vpack.c.bf16 %v8019_v3, %v8019_v3  ;;  %v8017_v36 = vmax.f32 %v15290_v24, 0.0  ;;  %v15294_v56 = vadd.f32 %v11845_v45, %v15835_v53  ;;  %v8280_v53 = vld [vmem:[#allocation3 + $0x10] sm:$0xf] }
 0x660   : > { %v7981_v14 = vpop.f32.mrf.mxu0 }
 0x661   : > { %15836 = vst [vmem:[#allocation15_spill] sm:$0xff] %v15294_v56  ;;  %v8211_v63 = vshrl.u32 %v11038_v60, 16  ;;  %v11036_v50 = vpack.c.bf16 %v8017_v36, %v8017_v36  ;;  %v8020_v10 = vmax.f32 %v15294_v56, 0.0  ;;  %v15298_v61 = vadd.f32 %v7981_v14, %v15837_v42  ;;  %v8283_v14 = vld [vmem:[#allocation3 + $0x14] sm:$0x1] }
 0x662   : > { %v11848_v58 = vpop.f32.mrf.mxu0  ;;  %v8214_v19 = vshll.u32 %v11038_v60, 16 }
 0x663   : > { %15838 = vst [vmem:[#allocation17_spill] sm:$0xff] %v15298_v61  ;;  %v8213_v59 = vrot.slane %v8211_v63, 7  ;;  %v8195_v29 = vshrl.u32 %v11036_v50, 16  ;;  %v11039_v13 = vpack.c.bf16 %v8020_v10, %v8020_v10  ;;  %v8198_v17 = vshll.u32 %v11036_v50, 16 }
 0x664   : > { %v8018_v28 = vmax.f32 %v15298_v61, 0.0  ;;  %v15302_v55 = vadd.f32 %v11848_v58, %v15839_v38  ;;  %v7994_v41 = vpop.f32.mrf.mxu0 }
 0x665   : > { %v8216_v48 = vor.u32 %v8214_v19, %v8213_v59  ;;  %v8217_v35 = vrot.slane %v8213_v59, 4  ;;  %v8197_v47 = vrot.slane %v8195_v29, 7  ;;  %v8219_v52 = vshrl.u32 %v11039_v13, 16  ;;  %v8310_v19 = vld [vmem:[#allocation3 + $0x38] sm:$0xf] }
 0x666   : > { %15840 = vst [vmem:[#allocation23_spill] sm:$0xff] %v15302_v55  ;;  %v8222_v44 = vshll.u32 %v11039_v13, 16  ;;  %v11037_v6 = vpack.c.bf16 %v8018_v28, %v8018_v28  ;;  %v8023_v22 = vmax.f32 %v15302_v55, 0.0  ;;  %v15306_v11 = vadd.f32 %v7994_v41, %v15841_v30  ;;  %v11849_v5 = vpop.f32.mrf.mxu0  ;;  %v8313_v29 = vld [vmem:[#allocation3 + $0x3c] sm:$0x1] }
 0x667   : > { %v8287_v20 = vsel %vm13961_vm2, %v8216_v48, %v8286_v46  ;;  %v8290_v18 = vsel %vm13258_vm12, %v8217_v35, %v8289_v39  ;;  %v8200_v12 = vor.u32 %v8198_v17, %v8197_v47  ;;  %v8201_v40 = vrot.slane %v8197_v47, 4  ;;  %v8298_v47 = vld [vmem:[#allocation3 + $0x28] sm:$0xf] }
 0x668   : > { %15842 = vst [vmem:[#allocation25_spill] sm:$0xff] %v15306_v11  ;;  %8288 = vst [vmem:[#allocation3 + $0x18] sm:$0xf] %v8287_v20  ;;  %v8221_v16 = vrot.slane %v8219_v52, 7  ;;  %v8203_v49 = vshrl.u32 %v11037_v6, 16  ;;  %v8206_v27 = vshll.u32 %v11037_v6, 16  ;;  %v11042_v32 = vpack.c.bf16 %v8023_v22, %v8023_v22  ;;  %v7997_v21 = vpop.f32.mrf.mxu0 }
 0x669   : > { %8291 = vst [vmem:[#allocation3 + $0x1c] sm:$0x1] %v8290_v18  ;;  %v8275_v34 = vsel %vm13961_vm2, %v8200_v12, %v8274_v43  ;;  %v8278_v7 = vsel %vm13258_vm12, %v8201_v40, %v8277_v31  ;;  %v8021_v54 = vmax.f32 %v15306_v11, 0.0  ;;  %v15318_v62 = vadd.f32 %v11849_v5, %v15845_v26  ;;  %v8301_v52 = vld [vmem:[#allocation3 + $0x2c] sm:$0x1] }
 0x66a   : > { %8279 = vst [vmem:[#allocation3 + $0xc] sm:$0x1] %v8278_v7  ;;  %8276 = vst [vmem:[#allocation3 + $0x8] sm:$0xf] %v8275_v34  ;;  %v8224_v9 = vor.u32 %v8222_v44, %v8221_v16  ;;  %v8225_v37 = vrot.slane %v8221_v16, 4  ;;  %v8205_v15 = vrot.slane %v8203_v49, 7  ;;  %v15322_v3 = vadd.f32 %v7997_v21, %v15847_v51 }
 0x66b   : > { %15846 = vst [vmem:[#allocation26_spill] sm:$0xff] %v15318_v62  ;;  %v8243_v25 = vshrl.u32 %v11042_v32, 16  ;;  %v11040_v33 = vpack.c.bf16 %v8021_v54, %v8021_v54  ;;  %v8024_v2 = vmax.f32 %v15318_v62, 0.0  ;;  %v8246_v50 = vshll.u32 %v11042_v32, 16  ;;  %v8316_v34 = vld [vmem:[#allocation3 + $0x40] sm:$0xf] }
 0x66c   : > { %15848 = vst [vmem:[#allocation27_spill] sm:$0xff] %v15322_v3  ;;  %v8293_v57 = vsel %vm13961_vm2, %v8224_v9, %v8292_v4  ;;  %v8296_v45 = vsel %vm13258_vm12, %v8225_v37, %v8295_v0  ;;  %v8208_v60 = vor.u32 %v8206_v27, %v8205_v15  ;;  %v8209_v36 = vrot.slane %v8205_v15, 4  ;;  %v8319_v7 = vld [vmem:[#allocation3 + $0x44] sm:$0x1]  ;;  %v8307_v51 = vld [vmem:[#allocation3 + $0x34] sm:$0x1] }
 0x66d   : > { %8294 = vst [vmem:[#allocation3 + $0x20] sm:$0xf] %v8293_v57  ;;  %8297 = vst [vmem:[#allocation3 + $0x24] sm:$0x1] %v8296_v45  ;;  %v8245_v63 = vrot.slane %v8243_v25, 7  ;;  %v8227_v10 = vshrl.u32 %v11040_v33, 16  ;;  %v11043_v42 = vpack.c.bf16 %v8024_v2, %v8024_v2 }
 0x66e   : > { %v8281_v58 = vsel %vm13961_vm2, %v8208_v60, %v8280_v53  ;;  %v8284_v59 = vsel %vm13258_vm12, %v8209_v36, %v8283_v14  ;;  %v8230_v13 = vshll.u32 %v11040_v33, 16  ;;  %v8022_v17 = vmax.f32 %v15322_v3, 0.0  ;;  %v8304_v2 = vld [vmem:[#allocation3 + $0x30] sm:$0xf] }
 0x66f   : > { %8282 = vst [vmem:[#allocation3 + $0x10] sm:$0xf] %v8281_v58  ;;  %8285 = vst [vmem:[#allocation3 + $0x14] sm:$0x1] %v8284_v59  ;;  %v8248_v28 = vor.u32 %v8246_v50, %v8245_v63  ;;  %v8249_v38 = vrot.slane %v8245_v63, 4  ;;  %v8229_v41 = vrot.slane %v8227_v10, 7 }
 0x670   : > { %v8251_v48 = vshrl.u32 %v11043_v42, 16  ;;  %v8488_v35 = vld [vmem:[#allocation3 + $0x18] sm:$0xe]  ;;  %v8254_v46 = vshll.u32 %v11043_v42, 16  ;;  %v11041_v39 = vpack.c.bf16 %v8022_v17, %v8022_v17  ;;  %v8489_v44 = vld [vmem:[#allocation3 + $0x1c] sm:$0x1] }
 0x671   : > { %v10843_v6 = vrot.slane %v8488_v35, 9  ;;  %v8564_v22 = vld [vmem:[#allocation3 + $0x18] sm:$0xf]  ;;  %v8311_v30 = vsel %vm13961_vm2, %v8248_v28, %v8310_v19  ;;  %v8314_v5 = vsel %vm13258_vm12, %v8249_v38, %v8313_v29  ;;  %v8232_v20 = vor.u32 %v8230_v13, %v8229_v41  ;;  %v8484_v12 = vld [vmem:[#allocation3 + $0x8] sm:$0xe]  ;;  %v12403_v57 = vld [vmem:[%s15678_s8 + $0x10] sm:$0xff]  }
 0x672   : > { %v8233_v18 = vrot.slane %v8229_v41, 4  ;;  %v8485_v40 = vld [vmem:[#allocation3 + $0xc] sm:$0x1]  ;;  %8572 = vst [vmem:[#allocation4 + $0x54] sm:$0xf] %v8564_v22  ;;  %v8253_v43 = vrot.slane %v8251_v48, 7 }
 0x673   : > { %8312 = vst [vmem:[#allocation3 + $0x38] sm:$0xf] %v8311_v30  ;;  %8315 = vst [vmem:[#allocation3 + $0x3c] sm:$0x1] %v8314_v5  ;;  %v8235_v31 = vshrl.u32 %v11041_v39, 16  ;;  %v8238_v16 = vshll.u32 %v11041_v39, 16  ;;  %v8299_v32 = vsel %vm13961_vm2, %v8232_v20, %v8298_v47 }
 0x674   : > { %v10841_v49 = vrot.slane %v8484_v12, 9  ;;  %v8562_v27 = vld [vmem:[#allocation3 + $0x8] sm:$0xf]  ;;  %v8302_v21 = vsel %vm13258_vm12, %v8233_v18, %v8301_v52  ;;  %v8520_v54 = vrot.slane %v8485_v40, 5  ;;  %v8528_v26 = vrot.slane %v8489_v44, 5 }
 0x675   : > { %8570 = vst [vmem:[#allocation4 + $0xc] sm:$0xf] %v8562_v27  ;;  %v8323_v9 = vld [vmem:[#allocation3 + $0x8] sm:$0xf]  ;;  %8300 = vst [vmem:[#allocation3 + $0x28] sm:$0xf] %v8299_v32  ;;  %v8256_v15 = vor.u32 %v8254_v46, %v8253_v43 }
 0x676   : > { %v8340_v37 = vld [vmem:[#allocation3 + $0x8] sm:$0xf]  ;;  %8303 = vst [vmem:[#allocation3 + $0x2c] sm:$0x1] %v8302_v21  ;;  %v8257_v25 = vrot.slane %v8253_v43, 4  ;;  %v8237_v4 = vrot.slane %v8235_v31, 7  ;;  %v8521_v45 = vsel %vm13682_vm0, %v10841_v49, %v8520_v54  ;;  %v8529_v60 = vsel %vm13682_vm0, %v10843_v6, %v8528_v26 }
 0x677   : > { %v8565_v0 = vld [vmem:[#allocation3 + $0x20] sm:$0xf]  ;;  %8331 = vst [vmem:[#allocation4 + $0x24] sm:$0xf] %v8323_v9  ;;  %v8341_v33 = vld [vmem:[#allocation3 + $0xc] sm:$0x1]  ;;  %v8317_v50 = vsel %vm13961_vm2, %v8256_v15, %v8316_v34 }
 0x678   : > { %8573 = vst [vmem:[#allocation4 + $0x78] sm:$0xf] %v8565_v0  ;;  %v8369_v36 = vshrl.u32 %v8340_v37, 16  ;;  %v8372_v53 = vshll.u32 %v8340_v37, 16  ;;  %v8325_v14 = vld [vmem:[#allocation3 + $0x18] sm:$0xf]  ;;  %v8320_v10 = vsel %vm13258_vm12, %v8257_v25, %v8319_v7  ;;  %v8240_v42 = vor.u32 %v8238_v16, %v8237_v4 }
 0x679   : > { %v8344_v63 = vld [vmem:[#allocation3 + $0x18] sm:$0xf]  ;;  %v8241_v58 = vrot.slane %v8237_v4, 4  ;;  %8555 = vst [vmem:[#allocation4 + $0x2c] sm:$0xf] %v8521_v45  ;;  %v8378_v38 = vshll.u32 %v8341_v33, 16 }
 0x67a   : > { %v8563_v59 = vld [vmem:[#allocation3 + $0x10] sm:$0xf]  ;;  %8557 = vst [vmem:[#allocation4 + $0x74] sm:$0xf] %v8529_v60  ;;  %8333 = vst [vmem:[#allocation4 + $0x6c] sm:$0xf] %v8325_v14  ;;  %v8305_v41 = vsel %vm13961_vm2, %v8240_v42, %v8304_v2 }
 0x67b   : > { %v8486_v19 = vld [vmem:[#allocation3 + $0x10] sm:$0xe]  ;;  %8321 = vst [vmem:[#allocation3 + $0x44] sm:$0x1] %v8320_v10  ;;  %8318 = vst [vmem:[#allocation3 + $0x40] sm:$0xf] %v8317_v50  ;;  %v8308_v48 = vsel %vm13258_vm12, %v8241_v58, %v8307_v51 }
 0x67c   : > { %8571 = vst [vmem:[#allocation4 + $0x30] sm:$0xf] %v8563_v59  ;;  %v8487_v29 = vld [vmem:[#allocation3 + $0x14] sm:$0x1]  ;;  %v10842_v13 = vrot.slane %v8486_v19, 9  ;;  %v8371_v17 = vrot.slane %v8369_v36, 4 }
 0x67d   : > { %v8374_v28 = vrot.slane %v8372_v53, 5  ;;  %v8524_v35 = vrot.slane %v8487_v29, 5  ;;  %v8324_v47 = vld [vmem:[#allocation3 + $0x10] sm:$0xf]  ;;  %v8397_v46 = vshrl.u32 %v8344_v63, 16  ;;  %v8380_v5 = vrot.slane %v8378_v38, 5 }
 0x67e   : > { %v8342_v52 = vld [vmem:[#allocation3 + $0x10] sm:$0xf]  ;;  %8306 = vst [vmem:[#allocation3 + $0x30] sm:$0xf] %v8305_v41  ;;  %8309 = vst [vmem:[#allocation3 + $0x34] sm:$0x1] %v8308_v48 }
 0x67f   : > { %v8375_v39 = vor.u32 %v8374_v28, %v8371_v17  ;;  %8332 = vst [vmem:[#allocation4 + $0x48] sm:$0xf] %v8324_v47  ;;  %v8343_v44 = vld [vmem:[#allocation3 + $0x14] sm:$0x1]  ;;  %v8345_v6 = vld [vmem:[#allocation3 + $0x1c] sm:$0x1]  ;;  %v8525_v30 = vsel %vm13682_vm0, %v10842_v13, %v8524_v35 }
 0x680   : > { %v8383_v22 = vshrl.u32 %v8342_v52, 16  ;;  %v8386_v23 = vshll.u32 %v8342_v52, 16  ;;  %v8392_v20 = vshll.u32 %v8343_v44, 16  ;;  %v8490_v18 = vld [vmem:[#allocation3 + $0x20] sm:$0xe]  ;;  %v8399_v40 = vrot.slane %v8397_v46, 4 }
 0x681   : > { %8556 = vst [vmem:[#allocation4 + $0x50] sm:$0xf] %v8525_v30  ;;  %v8376_v8 = vrot.slane %v8375_v39, 4  ;;  %v8400_v43 = vshll.u32 %v8344_v63, 16  ;;  %v8491_v31 = vld [vmem:[#allocation3 + $0x24] sm:$0x1] }
 0x682   : > { %v8385_v12 = vrot.slane %v8383_v22, 4  ;;  %v12314_v16 = vld [vmem:[%s15677_s7 + $0x3f8] sm:$0xff]   ;;  %v8388_v49 = vrot.slane %v8386_v23, 5  ;;  %v8406_v27 = vshll.u32 %v8345_v6, 16  ;;  %v8492_v32 = vld [vmem:[#allocation3 + $0x28] sm:$0xe] }
 0x683   : > { %v8493_v21 = vld [vmem:[#allocation3 + $0x2c] sm:$0x1]  ;;  %v8381_v7 = vsel %vm12677_vm7, %v8376_v8, %v8380_v5  ;;  %v12322_v54 = vld [vmem:[%s15677_s7 + $0x430] sm:$0xff]   ;;  %v8394_v26 = vrot.slane %v8392_v20, 5  ;;  %v8402_v9 = vrot.slane %v8400_v43, 5  ;;  %v10844_v37 = vrot.slane %v8490_v18, 9 }
 0x684   : > { %v8566_v15 = vld [vmem:[#allocation3 + $0x28] sm:$0xf]  ;;  %v12308_v25 = vld [vmem:[#allocation4 + $0x8] ss:$36 sps:$4 sm:$0xff]   ;;  %8475 = vst [vmem:[#allocation4 + $0x28] sm:$0xf] %v8381_v7  ;;  %v8389_v0 = vor.u32 %v8388_v49, %v8385_v12 }
 0x685   : > { %v12310_v4 = vld [vmem:[#allocation4 + $0xc] ss:$36 sps:$4 sm:$0xff]   ;;  %v8532_v33 = vrot.slane %v8491_v31, 5  ;;  %8574 = vst [vmem:[#allocation4 + $0x9c] sm:$0xf] %v8566_v15  ;;  %v8403_v2 = vor.u32 %v8402_v9, %v8399_v40  ;;  %v10845_v51 = vrot.slane %v8492_v32, 9 }
 0x686   : > { %v8536_v45 = vrot.slane %v8493_v21, 5  ;;  %v8326_v60 = vld [vmem:[#allocation3 + $0x20] sm:$0xf]  ;;  %v8327_v36 = vld [vmem:[#allocation3 + $0x28] sm:$0xf]  ;;  %9795 = vmatprep.mubr.bf16.mxu0 %v12310_v4  ;;  %v8390_v53 = vrot.slane %v8389_v0, 4 }
 0x687   : > { %v8408_v14 = vrot.slane %v8406_v27, 5  ;;  %v8533_v63 = vsel %vm13682_vm0, %v10844_v37, %v8532_v33  ;;  %v8567_v50 = vld [vmem:[#allocation3 + $0x30] sm:$0xf]  ;;  %8334 = vst [vmem:[#allocation4 + $0x90] sm:$0xf] %v8326_v60  ;;  %9796 = vmatmul.mubr.bf16.vlgmr.msra.gmra.mxu0 %v12308_v25  ;;  %v8404_v42 = vrot.slane %v8403_v2, 4 }
 0x688   : > { %8335 = vst [vmem:[#allocation4 + $0xb4] sm:$0xf] %v8327_v36  ;;  %v8346_v10 = vld [vmem:[#allocation3 + $0x20] sm:$0xf]  ;;  %v8537_v58 = vsel %vm13682_vm0, %v10845_v51, %v8536_v45  ;;  %8558 = vst [vmem:[#allocation4 + $0x98] sm:$0xf] %v8533_v63  ;;  %11695 = vmatpush3.bf16.msra.mxu0 %v12314_v16  ;;  %v8395_v28 = vsel %vm12677_vm7, %v8390_v53, %v8394_v26 }
 0x689   : > { %8575 = vst [vmem:[#allocation4 + $0xc0] sm:$0xf] %v8567_v50  ;;  %v8347_v59 = vld [vmem:[#allocation3 + $0x24] sm:$0x1]  ;;  %v8348_v19 = vld [vmem:[#allocation3 + $0x28] sm:$0xf]  ;;  %11696 = vmatprep.subr.bf16.mxu0 %v12322_v54  ;;  %v8409_v48 = vsel %vm12677_vm7, %v8404_v42, %v8408_v14 }
 0x68a   : > { %v8411_v29 = vshrl.u32 %v8346_v10, 16  ;;  %v12317_v13 = vld [vmem:[#allocation4 + $0x54] ss:$36 sps:$4 sm:$0xff]   ;;  %v12324_v17 = vld [vmem:[%s15677_s7 + $0x3f0] sm:$0xff]   ;;  %8559 = vst [vmem:[#allocation4 + $0xbc] sm:$0xf] %v8537_v58 }
 0x68b   : > { %v8414_v38 = vshll.u32 %v8346_v10, 16  ;;  %v12323_v41 = vld [vmem:[%s15677_s7 + $0x378] sm:$0xff]   ;;  %8476 = vst [vmem:[#allocation4 + $0x4c] sm:$0xf] %v8395_v28  ;;  %v12329_v35 = vld [vmem:[%s15677_s7 + $0x428] sm:$0xff]   ;;  %v8420_v46 = vshll.u32 %v8347_v59, 16  ;;  %9803 = vmatprep.mubr.bf16.mxu0 %v12317_v13 }
 0x68c   : > { %v8349_v47 = vld [vmem:[#allocation3 + $0x2c] sm:$0x1]  ;;  %v8413_v52 = vrot.slane %v8411_v29, 4  ;;  %v8425_v39 = vshrl.u32 %v8348_v19, 16  ;;  %8477 = vst [vmem:[#allocation4 + $0x70] sm:$0xf] %v8409_v48  ;;  %11697 = vmatpush3.bf16.msra.mxu0 %v12324_v17 }
 0x68d   : > { %v12328_v44 = vld [vmem:[%s15677_s7 + $0x3b0] sm:$0xff]   ;;  %v12334_v6 = vld [vmem:[%s15677_s7 + $0x3e8] sm:$0xff]   ;;  %v8416_v22 = vrot.slane %v8414_v38, 5  ;;  %v8428_v30 = vshll.u32 %v8348_v19, 16  ;;  %v12315_v23 = vld [vmem:[#allocation4 + $0x50] ss:$36 sps:$4 sm:$0xff]   ;;  %11698 = vmatprep.subr.bf16.mxu0 %v12329_v35 }
 0x68e   : > { %v8494_v5 = vld [vmem:[#allocation3 + $0x30] sm:$0xe]  ;;  %v12320_v18 = vld [vmem:[#allocation4 + $0x4] ss:$36 sps:$4 sm:$0xff]   ;;  %v8434_v8 = vshll.u32 %v8349_v47, 16  ;;  %v12336_v12 = vld [vmem:[%s15677_s7 + $0x420] sm:$0xff]  }
 0x68f   : > { %v12318_v20 = vld [vmem:[#allocation4] ss:$36 sps:$4 sm:$0xff]   ;;  %v8417_v40 = vor.u32 %v8416_v22, %v8413_v52  ;;  %v8422_v43 = vrot.slane %v8420_v46, 5  ;;  %v8427_v31 = vrot.slane %v8425_v39, 4  ;;  %v8430_v16 = vrot.slane %v8428_v30, 5  ;;  %9730 = vmatprep.mubr.bf16.mxu1 %v12320_v18  ;;  %v12335_v26 = vld [vmem:[%s15677_s7 + $0x3a8] sm:$0xff]   ;;  %9804 = vmatmul.mubr.bf16.gmra.mxu0 %v12315_v23 }
 0x690   : > { %v8495_v49 = vld [vmem:[#allocation3 + $0x34] sm:$0x1]  ;;  %v8496_v32 = vld [vmem:[#allocation3 + $0x38] sm:$0xe]  ;;  %v8497_v21 = vld [vmem:[#allocation3 + $0x3c] sm:$0x1]  ;;  %9731 = vmatmul.mubr.bf16.vlgmr.msra.gmra.mxu1 %v12318_v20  ;;  %11699 = vmatpush3.bf16.msra.mxu0 %v12334_v6 }
 0x691   : > { %v12333_v27 = vld [vmem:[%s15677_s7 + $0x370] sm:$0xff]   ;;  %v10846_v7 = vrot.slane %v8494_v5, 9  ;;  %v8540_v54 = vrot.slane %v8495_v49, 5  ;;  %v8418_v9 = vrot.slane %v8417_v40, 4  ;;  %v8431_v37 = vor.u32 %v8430_v16, %v8427_v31  ;;  %v8568_v4 = vld [vmem:[#allocation3 + $0x38] sm:$0xf]  ;;  %11655 = vmatpush3.bf16.msra.mxu1 %v12323_v41  ;;  %11700 = vmatprep.subr.bf16.mxu0 %v12336_v12 }
 0x692   : > { %v10847_v15 = vrot.slane %v8496_v32, 9  ;;  %v8544_v25 = vrot.slane %v8497_v21, 5  ;;  %v12332_v0 = vld [vmem:[#allocation4 + $0x9c] ss:$36 sps:$4 sm:$0xff]   ;;  %v12338_v33 = vld [vmem:[%s15677_s7 + $0x3e0] sm:$0xff]   ;;  %v8436_v2 = vrot.slane %v8434_v8, 5  ;;  %11656 = vmatprep.subr.bf16.mxu1 %v12328_v44 }
 0x693   : > { %v8541_v51 = vsel %vm13682_vm0, %v10846_v7, %v8540_v54  ;;  %8576 = vst [vmem:[#allocation4 + $0xe4] sm:$0xf] %v8568_v4  ;;  %v8423_v45 = vsel %vm12677_vm7, %v8418_v9, %v8422_v43  ;;  %v8432_v60 = vrot.slane %v8431_v37, 4  ;;  %v8569_v53 = vld [vmem:[#allocation3 + $0x40] sm:$0xf]  ;;  %9811 = vmatprep.mubr.bf16.mxu0 %v12332_v0  ;;  %v12337_v50 = vld [vmem:[%s15677_s7 + $0x368] sm:$0xff]  }
 0x694   : > { %v8545_v36 = vsel %vm13682_vm0, %v10847_v15, %v8544_v25  ;;  %8560 = vst [vmem:[#allocation4 + $0xe0] sm:$0xf] %v8541_v51  ;;  %v8328_v14 = vld [vmem:[#allocation3 + $0x30] sm:$0xf]  ;;  %v12327_v63 = vld [vmem:[#allocation4 + $0x4c] ss:$36 sps:$4 sm:$0xff]   ;;  %11701 = vmatpush3.bf16.msra.mxu0 %v12338_v33 }
 0x695   : > { %8478 = vst [vmem:[#allocation4 + $0x94] sm:$0xf] %v8423_v45  ;;  %v12343_v10 = vld [vmem:[%s15677_s7 + $0x418] sm:$0xff]   ;;  %8561 = vst [vmem:[#allocation4 + $0x104] sm:$0xf] %v8545_v36  ;;  %v8437_v58 = vsel %vm12677_vm7, %v8432_v60, %v8436_v2  ;;  %v12342_v59 = vld [vmem:[%s15677_s7 + $0x3a0] sm:$0xff]   ;;  %9738 = vmatprep.mubr.bf16.mxu1 %v12327_v63  ;;  %11657 = vmatpush3.bf16.msra.mxu1 %v12333_v27 }
 0x696   : > { %8577 = vst [vmem:[#allocation4 + $0x108] sm:$0xf] %v8569_v53  ;;  %8336 = vst [vmem:[#allocation4 + $0xd8] sm:$0xf] %v8328_v14  ;;  %v12325_v42 = vld [vmem:[#allocation4 + $0x48] ss:$36 sps:$4 sm:$0xff]   ;;  %11658 = vmatprep.subr.bf16.mxu1 %v12335_v26  ;;  %11702 = vmatprep.subr.bf16.mxu0 %v12343_v10 }
 0x697   : > { %v12348_v19 = vld [vmem:[%s15677_s7 + $0x3d8] sm:$0xff]   ;;  %v8350_v13 = vld [vmem:[#allocation3 + $0x30] sm:$0xf]  ;;  %v8351_v17 = vld [vmem:[#allocation3 + $0x34] sm:$0x1] }
 0x698   : > { %v8329_v29 = vld [vmem:[#allocation3 + $0x38] sm:$0xf]  ;;  %v12330_v28 = vld [vmem:[#allocation4 + $0x98] ss:$36 sps:$4 sm:$0xff]   ;;  %8479 = vst [vmem:[#allocation4 + $0xb8] sm:$0xf] %v8437_v58  ;;  %9739 = vmatmul.mubr.bf16.gmra.mxu1 %v12325_v42  ;;  %11703 = vmatpush3.bf16.msra.mxu0 %v12348_v19 }
 0x699   : > { %v12350_v38 = vld [vmem:[%s15677_s7 + $0x410] sm:$0xff]   ;;  %8337 = vst [vmem:[#allocation4 + $0xfc] sm:$0xf] %v8329_v29  ;;  %v8352_v41 = vld [vmem:[#allocation3 + $0x38] sm:$0xf]  ;;  %v8439_v35 = vshrl.u32 %v8350_v13, 16  ;;  %11659 = vmatpush3.bf16.msra.mxu1 %v12337_v50  ;;  %9812 = vmatmul.mubr.bf16.gmra.mxu0 %v12330_v28 }
 0x69a   : > { %v8353_v48 = vld [vmem:[#allocation3 + $0x3c] sm:$0x1]  ;;  %v8442_v47 = vshll.u32 %v8350_v13, 16  ;;  %v8448_v52 = vshll.u32 %v8351_v17, 16  ;;  %v8453_v46 = vshrl.u32 %v8352_v41, 16  ;;  %v8456_v39 = vshll.u32 %v8352_v41, 16  ;;  %11660 = vmatprep.subr.bf16.mxu1 %v12342_v59  ;;  %11704 = vmatprep.subr.bf16.mxu0 %v12350_v38 }
 0x69b   : > { %v8462_v44 = vshll.u32 %v8353_v48, 16  ;;  %v8802_v6 = vld [vmem:[#allocation3 + $0x10] sm:$0xf]  ;;  %v8441_v22 = vrot.slane %v8439_v35, 4  ;;  %v8803_v5 = vld [vmem:[#allocation3 + $0x18] sm:$0xf] }
 0x69c   : > { %v8444_v30 = vrot.slane %v8442_v47, 5  ;;  %8810 = vst [vmem:[#allocation4 + $0x18] sm:$0xf] %v8802_v6  ;;  %v8818_v23 = vld [vmem:[#allocation3 + $0x10] sm:$0xf]  ;;  %v12347_v20 = vld [vmem:[%s15677_s7 + $0x360] sm:$0xff]  }
 0x69d   : > { %v12349_v18 = vld [vmem:[%s15677_s7 + $0x398] sm:$0xff]   ;;  %v8455_v8 = vrot.slane %v8453_v46, 4  ;;  %v8458_v12 = vrot.slane %v8456_v39, 5  ;;  %8811 = vst [vmem:[#allocation4 + $0x3c] sm:$0xf] %v8803_v5  ;;  %v12352_v43 = vld [vmem:[%s15677_s7 + $0x3d0] sm:$0xff]   ;;  %11661 = vmatpush3.bf16.msra.mxu1 %v12347_v20 }
 0x69e   : > { %v8819_v40 = vld [vmem:[#allocation3 + $0x14] sm:$0x1]  ;;  %v8445_v31 = vor.u32 %v8444_v30, %v8441_v22  ;;  %v8450_v16 = vrot.slane %v8448_v52, 5  ;;  %v8464_v49 = vrot.slane %v8462_v44, 5  ;;  %v8820_v27 = vld [vmem:[#allocation3 + $0x18] sm:$0xf]  ;;  %11662 = vmatprep.subr.bf16.mxu1 %v12349_v18  ;;  %11705 = vmatpush3.bf16.msra.mxu0 %v12352_v43 }
 0x69f   : > { %v8835_v32 = vshrl.u32 %v8818_v23, 16  ;;  %v8459_v21 = vor.u32 %v8458_v12, %v8455_v8  ;;  %v12357_v7 = vld [vmem:[%s15677_s7 + $0x408] sm:$0xff]   ;;  %v8821_v54 = vld [vmem:[#allocation3 + $0x1c] sm:$0x1]  ;;  %v8838_v26 = vshll.u32 %v8818_v23, 16  ;;  %v8844_v9 = vshll.u32 %v8819_v40, 16 }
 0x6a0   : > { %v12346_v37 = vld [vmem:[#allocation4 + $0xe4] ss:$36 sps:$4 sm:$0xff]   ;;  %v8446_v25 = vrot.slane %v8445_v31, 4  ;;  %v8849_v0 = vshrl.u32 %v8820_v27, 16  ;;  %v8852_v33 = vshll.u32 %v8820_v27, 16  ;;  %v8858_v59 = vshll.u32 %v8821_v54, 16  ;;  %11706 = vmatprep.subr.bf16.mxu0 %v12357_v7 }
 0x6a1   : > { %v12351_v15 = vld [vmem:[%s15677_s7 + $0x358] sm:$0xff]   ;;  %v8837_v4 = vrot.slane %v8835_v32, 4  ;;  %v12339_v2 = vld [vmem:[#allocation4 + $0x90] ss:$36 sps:$4 sm:$0xff]   ;;  %v8460_v45 = vrot.slane %v8459_v21, 4  ;;  %9819 = vmatprep.mubr.bf16.mxu0 %v12346_v37  ;;  %v12356_v53 = vld [vmem:[%s15677_s7 + $0x390] sm:$0xff]  }
 0x6a2   : > { %v12341_v51 = vld [vmem:[#allocation4 + $0x94] ss:$36 sps:$4 sm:$0xff]   ;;  %v12344_v60 = vld [vmem:[#allocation4 + $0xe0] ss:$36 sps:$4 sm:$0xff]   ;;  %v8451_v36 = vsel %vm12677_vm7, %v8446_v25, %v8450_v16  ;;  %v8840_v14 = vrot.slane %v8838_v26, 5  ;;  %v8846_v63 = vrot.slane %v8844_v9, 5  ;;  %11663 = vmatpush3.bf16.msra.mxu1 %v12351_v15 }
 0x6a3   : > { %v8851_v50 = vrot.slane %v8849_v0, 4  ;;  %v8578_v10 = vld [vmem:[#allocation3 + $0x8] sm:$0xf]  ;;  %9746 = vmatprep.mubr.bf16.mxu1 %v12341_v51  ;;  %v8465_v42 = vsel %vm12677_vm7, %v8460_v45, %v8464_v49  ;;  %8480 = vst [vmem:[#allocation4 + $0xdc] sm:$0xf] %v8451_v36  ;;  %v8854_v58 = vrot.slane %v8852_v33, 5  ;;  %9820 = vmatmul.mubr.bf16.gmra.mxu0 %v12344_v60 }
 0x6a4   : > { %v8579_v19 = vld [vmem:[#allocation3 + $0xc] sm:$0x1]  ;;  %v8580_v29 = vld [vmem:[#allocation3 + $0x10] sm:$0xf]  ;;  %8481 = vst [vmem:[#allocation4 + $0x100] sm:$0xf] %v8465_v42  ;;  %v8841_v28 = vor.u32 %v8840_v14, %v8837_v4  ;;  %9747 = vmatmul.mubr.bf16.gmra.mxu1 %v12339_v2  ;;  %11664 = vmatprep.subr.bf16.mxu1 %v12356_v53 }
 0x6a5   : > { %v12358_v13 = vld [vmem:[%s15677_s7 + $0x350] sm:$0xff]   ;;  %v12359_v17 = vld [vmem:[%s15677_s7 + $0x3c8] sm:$0xff]   ;;  %v8595_v41 = vshrl.u32 %v8578_v10, 16  ;;  %v8598_v48 = vshll.u32 %v8578_v10, 16  ;;  %v8604_v35 = vshll.u32 %v8579_v19, 16  ;;  %v8855_v47 = vor.u32 %v8854_v58, %v8851_v50  ;;  %v12364_v39 = vld [vmem:[%s15677_s7 + $0x400] sm:$0xff]  }
 0x6a6   : > { %v8581_v38 = vld [vmem:[#allocation3 + $0x14] sm:$0x1]  ;;  %v8860_v52 = vrot.slane %v8858_v59, 5  ;;  %v12363_v46 = vld [vmem:[%s15677_s7 + $0x388] sm:$0xff]   ;;  %v8609_v44 = vshrl.u32 %v8580_v29, 16  ;;  %v8612_v6 = vshll.u32 %v8580_v29, 16  ;;  %11707 = vmatpush3.bf16.msra.mxu0 %v12359_v17  ;;  %11665 = vmatpush3.bf16.msra.mxu1 %v12358_v13 }
 0x6a7   : > { %v8722_v22 = vld [vmem:[#allocation3 + $0x8] sm:$0xe]  ;;  %v8842_v30 = vrot.slane %v8841_v28, 4  ;;  %v12366_v5 = vld [vmem:[%s15677_s7 + $0x3c0] sm:$0xff]   ;;  %v8597_v23 = vrot.slane %v8595_v41, 4  ;;  %v8600_v20 = vrot.slane %v8598_v48, 5  ;;  %11708 = vmatprep.subr.bf16.mxu0 %v12364_v39  ;;  %11666 = vmatprep.subr.bf16.mxu1 %v12363_v46 }
 0x6a8   : > { %v8606_v18 = vrot.slane %v8604_v35, 5  ;;  %v8723_v8 = vld [vmem:[#allocation3 + $0xc] sm:$0x1]  ;;  %v8856_v12 = vrot.slane %v8855_v47, 4  ;;  %v8611_v40 = vrot.slane %v8609_v44, 4  ;;  %v8614_v43 = vrot.slane %v8612_v6, 5 }
 0x6a9   : > { %v8618_v31 = vshll.u32 %v8581_v38, 16  ;;  %v8724_v16 = vld [vmem:[#allocation3 + $0x10] sm:$0xe]  ;;  %v8847_v49 = vsel %vm12677_vm7, %v8842_v30, %v8846_v63  ;;  %v8601_v27 = vor.u32 %v8600_v20, %v8597_v23  ;;  %v8725_v32 = vld [vmem:[#allocation3 + $0x14] sm:$0x1]  ;;  %v10848_v21 = vrot.slane %v8722_v22, 9 }
 0x6aa   : > { %v8756_v7 = vrot.slane %v8723_v8, 5  ;;  %v8804_v54 = vld [vmem:[#allocation3 + $0x20] sm:$0xf]  ;;  %v8861_v26 = vsel %vm12677_vm7, %v8856_v12, %v8860_v52  ;;  %8954 = vst [vmem:[#allocation4 + $0x1c] sm:$0xf] %v8847_v49  ;;  %v12365_v9 = vld [vmem:[%s15677_s7 + $0x348] sm:$0xff]   ;;  %v8615_v37 = vor.u32 %v8614_v43, %v8611_v40  ;;  %11709 = vmatpush3.bf16.msra.mxu0 %v12366_v5 }
 0x6ab   : > { %v8620_v15 = vrot.slane %v8618_v31, 5  ;;  %v10849_v25 = vrot.slane %v8724_v16, 9  ;;  %v8805_v4 = vld [vmem:[#allocation3 + $0x28] sm:$0xf]  ;;  %8812 = vst [vmem:[#allocation4 + $0x60] sm:$0xf] %v8804_v54  ;;  %11667 = vmatpush3.bf16.msra.mxu1 %v12365_v9 }
 0x6ac   : > { %v8822_v0 = vld [vmem:[#allocation3 + $0x20] sm:$0xf]  ;;  %8955 = vst [vmem:[#allocation4 + $0x40] sm:$0xf] %v8861_v26  ;;  %v8602_v33 = vrot.slane %v8601_v27, 4  ;;  %v8757_v2 = vsel %vm13682_vm0, %v10848_v21, %v8756_v7  ;;  %v8760_v51 = vrot.slane %v8725_v32, 5 }
 0x6ad   : > { %v12370_v45 = vld [vmem:[%s15677_s7 + $0x380] sm:$0xff]   ;;  %8813 = vst [vmem:[#allocation4 + $0x84] sm:$0xf] %v8805_v4  ;;  %v8863_v36 = vshrl.u32 %v8822_v0, 16  ;;  %v12353_v53 = vld [vmem:[#allocation4 + $0xd8] ss:$36 sps:$4 sm:$0xff]  }
 0x6ae   : > { %v8823_v60 = vld [vmem:[#allocation3 + $0x24] sm:$0x1]  ;;  %v12355_v14 = vld [vmem:[#allocation4 + $0xdc] ss:$36 sps:$4 sm:$0xff]   ;;  %v8616_v63 = vrot.slane %v8615_v37, 4  ;;  %v8607_v50 = vsel %vm12677_vm7, %v8602_v33, %v8606_v18  ;;  %v8761_v10 = vsel %vm13682_vm0, %v10849_v25, %v8760_v51  ;;  %v8866_v19 = vshll.u32 %v8822_v0, 16  ;;  %11668 = vmatprep.subr.bf16.mxu1 %v12370_v45 }
 0x6af   : > { %8794 = vst [vmem:[#allocation4 + $0x14] sm:$0xf] %v8757_v2  ;;  %v8824_v42 = vld [vmem:[#allocation3 + $0x28] sm:$0xf]  ;;  %v8825_v58 = vld [vmem:[#allocation3 + $0x2c] sm:$0x1]  ;;  %9754 = vmatprep.mubr.bf16.mxu1 %v12355_v14 }
 0x6b0   : > { %v8865_v59 = vrot.slane %v8863_v36, 4  ;;  %v8621_v29 = vsel %vm12677_vm7, %v8616_v63, %v8620_v15  ;;  %8714 = vst [vmem:[#allocation4 + $0x10] sm:$0xf] %v8607_v50  ;;  %8795 = vst [vmem:[#allocation4 + $0x38] sm:$0xf] %v8761_v10  ;;  %v12371_v13 = vld [vmem:[%s15677_s7 + $0x340] sm:$0xff]   ;;  %9755 = vmatmul.mubr.bf16.gmra.mxu1 %v12353_v53 }
 0x6b1   : > { %v8872_v17 = vshll.u32 %v8823_v60, 16  ;;  %v8877_v28 = vshrl.u32 %v8824_v42, 16  ;;  %v8880_v38 = vshll.u32 %v8824_v42, 16  ;;  %v8582_v41 = vld [vmem:[#allocation3 + $0x18] sm:$0xf]  ;;  %v8868_v48 = vrot.slane %v8866_v19, 5  ;;  %11669 = vmatpush3.bf16.msra.mxu1 %v12371_v13 }
 0x6b2   : > { %8715 = vst [vmem:[#allocation4 + $0x34] sm:$0xf] %v8621_v29  ;;  %v8886_v35 = vshll.u32 %v8825_v58, 16  ;;  %v8583_v47 = vld [vmem:[#allocation3 + $0x1c] sm:$0x1]  ;;  %v8623_v22 = vshrl.u32 %v8582_v41, 16 }
 0x6b3   : > { %v8584_v52 = vld [vmem:[#allocation3 + $0x20] sm:$0xf]  ;;  %v8879_v46 = vrot.slane %v8877_v28, 4  ;;  %v8882_v39 = vrot.slane %v8880_v38, 5  ;;  %v12375_v44 = vld [vmem:[%s15677_s7 + $0x478] sm:$0xff]   ;;  %v8869_v30 = vor.u32 %v8868_v48, %v8865_v59  ;;  %v8874_v5 = vrot.slane %v8872_v17, 5 }
 0x6b4   : > { %v8585_v6 = vld [vmem:[#allocation3 + $0x24] sm:$0x1]  ;;  %v8626_v23 = vshll.u32 %v8582_v41, 16  ;;  %v8632_v20 = vshll.u32 %v8583_v47, 16  ;;  %v8726_v18 = vld [vmem:[#allocation3 + $0x18] sm:$0xe]  ;;  %11850 = vmatprep.subr.bf16.mxu1 %v12375_v44 }
 0x6b5   : > { %v12360_v8 = vld [vmem:[#allocation4 + $0x18] ss:$36 sps:$4 sm:$0xff]   ;;  %v8883_v40 = vor.u32 %v8882_v39, %v8879_v46  ;;  %v8625_v43 = vrot.slane %v8623_v22, 4  ;;  %v8870_v31 = vrot.slane %v8869_v30, 4  ;;  %v8888_v16 = vrot.slane %v8886_v35, 5  ;;  %v12379_v60 = vld [vmem:[%s15677_s7 + $0x470] sm:$0xff]  }
 0x6b6   : > { %v12362_v12 = vld [vmem:[#allocation4 + $0x1c] ss:$36 sps:$4 sm:$0xff]   ;;  %v8628_v49 = vrot.slane %v8626_v23, 5  ;;  %v8637_v27 = vshrl.u32 %v8584_v52, 16  ;;  %v8727_v32 = vld [vmem:[#allocation3 + $0x1c] sm:$0x1] }
 0x6b7   : > { %9925 = vmatprep.mubr.bf16.mxu0 %v12362_v12  ;;  %v8884_v21 = vrot.slane %v8883_v40, 4  ;;  %v8640_v7 = vshll.u32 %v8584_v52, 16  ;;  %v8646_v54 = vshll.u32 %v8585_v6, 16  ;;  %v8728_v26 = vld [vmem:[#allocation3 + $0x20] sm:$0xe]  ;;  %v10850_v9 = vrot.slane %v8726_v18, 9 }
 0x6b8   : > { %9926 = vmatmul.mubr.bf16.vlgmr.msra.gmra.mxu0 %v12360_v8  ;;  %v8875_v37 = vsel %vm12677_vm7, %v8870_v31, %v8874_v5  ;;  %v8629_v15 = vor.u32 %v8628_v49, %v8625_v43  ;;  %v8639_v25 = vrot.slane %v8637_v27, 4  ;;  %v8729_v4 = vld [vmem:[#allocation3 + $0x24] sm:$0x1]  ;;  %v8764_v0 = vrot.slane %v8727_v32, 5  ;;  %v8806_v50 = vld [vmem:[#allocation3 + $0x30] sm:$0xf] }
 0x6b9   : > { %v12369_v33 = vld [vmem:[#allocation4 + $0x14] ss:$36 sps:$4 sm:$0xff]   ;;  %v8889_v2 = vsel %vm12677_vm7, %v8884_v21, %v8888_v16  ;;  %8956 = vst [vmem:[#allocation4 + $0x64] sm:$0xf] %v8875_v37  ;;  %v8634_v51 = vrot.slane %v8632_v20, 5  ;;  %v8642_v45 = vrot.slane %v8640_v7, 5 }
 0x6ba   : > { %v12367_v36 = vld [vmem:[#allocation4 + $0x10] ss:$36 sps:$4 sm:$0xff]   ;;  %8957 = vst [vmem:[#allocation4 + $0x88] sm:$0xf] %v8889_v2  ;;  %v8630_v53 = vrot.slane %v8629_v15, 4  ;;  %v8765_v14 = vsel %vm13682_vm0, %v10850_v9, %v8764_v0  ;;  %v10851_v63 = vrot.slane %v8728_v26, 9  ;;  %9860 = vmatprep.mubr.bf16.mxu1 %v12369_v33 }
 0x6bb   : > { %v8643_v10 = vor.u32 %v8642_v45, %v8639_v25  ;;  %v8648_v42 = vrot.slane %v8646_v54, 5  ;;  %v8768_v58 = vrot.slane %v8729_v4, 5  ;;  %8796 = vst [vmem:[#allocation4 + $0x5c] sm:$0xf] %v8765_v14  ;;  %v8807_v59 = vld [vmem:[#allocation3 + $0x38] sm:$0xf]  ;;  %9861 = vmatmul.mubr.bf16.vlgmr.msra.gmra.mxu1 %v12367_v36 }
 0x6bc   : > { %8814 = vst [vmem:[#allocation4 + $0xa8] sm:$0xf] %v8806_v50  ;;  %v8826_v19 = vld [vmem:[#allocation3 + $0x30] sm:$0xf]  ;;  %v8635_v29 = vsel %vm12677_vm7, %v8630_v53, %v8634_v51  ;;  %8815 = vst [vmem:[#allocation4 + $0xcc] sm:$0xf] %v8807_v59  ;;  %11851 = vmatpush3.bf16.msra.mxu1 %v12375_v44 }
 0x6bd   : > { %v8827_v13 = vld [vmem:[#allocation3 + $0x34] sm:$0x1]  ;;  %v8828_v17 = vld [vmem:[#allocation3 + $0x38] sm:$0xf]  ;;  %v8829_v28 = vld [vmem:[#allocation3 + $0x3c] sm:$0x1]  ;;  %v8769_v41 = vsel %vm13682_vm0, %v10851_v63, %v8768_v58  ;;  %11852 = vmatprep.subr.bf16.mxu1 %v12379_v60 }
 0x6be   : > { %v8644_v38 = vrot.slane %v8643_v10, 4  ;;  %8716 = vst [vmem:[#allocation4 + $0x58] sm:$0xf] %v8635_v29  ;;  %v8891_v48 = vshrl.u32 %v8826_v19, 16  ;;  %v8894_v35 = vshll.u32 %v8826_v19, 16  ;;  %v12383_v47 = vld [vmem:[%s15677_s7 + $0x468] sm:$0xff]  }
 0x6bf   : > { %8797 = vst [vmem:[#allocation4 + $0x80] sm:$0xf] %v8769_v41  ;;  %v8900_v52 = vshll.u32 %v8827_v13, 16  ;;  %v8905_v46 = vshrl.u32 %v8828_v17, 16  ;;  %v8908_v39 = vshll.u32 %v8828_v17, 16  ;;  %v8914_v6 = vshll.u32 %v8829_v28, 16 }
 0x6c0   : > { %v8586_v22 = vld [vmem:[#allocation3 + $0x28] sm:$0xf]  ;;  %v8649_v44 = vsel %vm12677_vm7, %v8644_v38, %v8648_v42  ;;  %v8893_v30 = vrot.slane %v8891_v48, 4  ;;  %v8896_v5 = vrot.slane %v8894_v35, 5  ;;  %v8587_v23 = vld [vmem:[#allocation3 + $0x2c] sm:$0x1]  ;;  %11853 = vmatpush3.bf16.msra.mxu1 %v12379_v60 }
 0x6c1   : > { %v8588_v20 = vld [vmem:[#allocation3 + $0x30] sm:$0xf]  ;;  %8717 = vst [vmem:[#allocation4 + $0x7c] sm:$0xf] %v8649_v44  ;;  %v8902_v18 = vrot.slane %v8900_v52, 5  ;;  %v8907_v8 = vrot.slane %v8905_v46, 4  ;;  %11854 = vmatprep.subr.bf16.mxu1 %v12383_v47 }
 0x6c2   : > { %v8910_v12 = vrot.slane %v8908_v39, 5  ;;  %v8589_v40 = vld [vmem:[#allocation3 + $0x34] sm:$0x1]  ;;  %v8897_v16 = vor.u32 %v8896_v5, %v8893_v30  ;;  %v8651_v49 = vshrl.u32 %v8586_v22, 16  ;;  %v8654_v32 = vshll.u32 %v8586_v22, 16  ;;  %v12387_v26 = vld [vmem:[%s15677_s7 + $0x460] sm:$0xff]  }
 0x6c3   : > { %v12372_v43 = vld [vmem:[#allocation4 + $0x60] ss:$36 sps:$4 sm:$0xff]   ;;  %v8660_v21 = vshll.u32 %v8587_v23, 16  ;;  %v8665_v7 = vshrl.u32 %v8588_v20, 16  ;;  %v8730_v54 = vld [vmem:[#allocation3 + $0x28] sm:$0xe] }
 0x6c4   : > { %v12374_v31 = vld [vmem:[#allocation4 + $0x64] ss:$36 sps:$4 sm:$0xff]   ;;  %v8911_v27 = vor.u32 %v8910_v12, %v8907_v8  ;;  %v8898_v9 = vrot.slane %v8897_v16, 4  ;;  %v8916_v37 = vrot.slane %v8914_v6, 5  ;;  %v8653_v15 = vrot.slane %v8651_v49, 4  ;;  %11855 = vmatpush3.bf16.msra.mxu1 %v12383_v47 }
 0x6c5   : > { %9933 = vmatprep.mubr.bf16.mxu0 %v12374_v31  ;;  %v8668_v25 = vshll.u32 %v8588_v20, 16  ;;  %v8731_v4 = vld [vmem:[#allocation3 + $0x2c] sm:$0x1]  ;;  %v8656_v33 = vrot.slane %v8654_v32, 5  ;;  %v8667_v2 = vrot.slane %v8665_v7, 4  ;;  %v8674_v51 = vshll.u32 %v8589_v40, 16  ;;  %11856 = vmatprep.subr.bf16.mxu1 %v12387_v26 }
 0x6c6   : > { %9934 = vmatmul.mubr.bf16.gmra.mxu0 %v12372_v43  ;;  %v8912_v0 = vrot.slane %v8911_v27, 4  ;;  %v12391_v45 = vld [vmem:[%s15677_s7 + $0x458] sm:$0xff]   ;;  %v8903_v60 = vsel %vm12677_vm7, %v8898_v9, %v8902_v18  ;;  %v8662_v36 = vrot.slane %v8660_v21, 5  ;;  %v8732_v14 = vld [vmem:[#allocation3 + $0x30] sm:$0xe]  ;;  %v10852_v42 = vrot.slane %v8730_v54, 9 }
 0x6c7   : > { %v8670_v53 = vrot.slane %v8668_v25, 5  ;;  %v8733_v63 = vld [vmem:[#allocation3 + $0x34] sm:$0x1]  ;;  %8958 = vst [vmem:[#allocation4 + $0xac] sm:$0xf] %v8903_v60  ;;  %v8657_v10 = vor.u32 %v8656_v33, %v8653_v15  ;;  %v8772_v58 = vrot.slane %v8731_v4, 5 }
 0x6c8   : > { %v8917_v50 = vsel %vm12677_vm7, %v8912_v0, %v8916_v37  ;;  %v8808_v59 = vld [vmem:[#allocation3 + $0x40] sm:$0xf]  ;;  %v12376_v29 = vld [vmem:[#allocation4 + $0x58] ss:$36 sps:$4 sm:$0xff]   ;;  %v10853_v28 = vrot.slane %v8732_v14, 9  ;;  %v8776_v48 = vrot.slane %v8733_v63, 5  ;;  %11857 = vmatpush3.bf16.msra.mxu1 %v12387_v26 }
 0x6c9   : > { %v8830_v19 = vld [vmem:[#allocation3 + $0x40] sm:$0xf]  ;;  %v12378_v13 = vld [vmem:[#allocation4 + $0x5c] ss:$36 sps:$4 sm:$0xff]   ;;  %8959 = vst [vmem:[#allocation4 + $0xd0] sm:$0xf] %v8917_v50  ;;  %v8671_v17 = vor.u32 %v8670_v53, %v8667_v2  ;;  %v8773_v41 = vsel %vm13682_vm0, %v10852_v42, %v8772_v58  ;;  %11858 = vmatprep.subr.bf16.mxu1 %v12391_v45 }
 0x6ca   : > { %8816 = vst [vmem:[#allocation4 + $0xf0] sm:$0xf] %v8808_v59  ;;  %v8658_v38 = vrot.slane %v8657_v10, 4  ;;  %v8831_v35 = vld [vmem:[#allocation3 + $0x44] sm:$0x1]  ;;  %v8919_v47 = vshrl.u32 %v8830_v19, 16  ;;  %9868 = vmatprep.mubr.bf16.mxu1 %v12378_v13  ;;  %v8777_v5 = vsel %vm13682_vm0, %v10853_v28, %v8776_v48 }
 0x6cb   : > { %v12395_v52 = vld [vmem:[%s15677_s7 + $0x450] sm:$0xff]   ;;  %v8672_v46 = vrot.slane %v8671_v17, 4  ;;  %v8676_v39 = vrot.slane %v8674_v51, 5  ;;  %8798 = vst [vmem:[#allocation4 + $0xa4] sm:$0xf] %v8773_v41  ;;  %v8922_v6 = vshll.u32 %v8830_v19, 16  ;;  %9869 = vmatmul.mubr.bf16.gmra.mxu1 %v12376_v29 }
 0x6cc   : > { %v8928_v22 = vshll.u32 %v8831_v35, 16  ;;  %v8590_v44 = vld [vmem:[#allocation3 + $0x38] sm:$0xf]  ;;  %v8663_v30 = vsel %vm12677_vm7, %v8658_v38, %v8662_v36  ;;  %v8921_v23 = vrot.slane %v8919_v47, 4  ;;  %v8591_v20 = vld [vmem:[#allocation3 + $0x3c] sm:$0x1]  ;;  %11859 = vmatpush3.bf16.msra.mxu1 %v12391_v45 }
 0x6cd   : > { %v8592_v18 = vld [vmem:[#allocation3 + $0x40] sm:$0xf]  ;;  %v8679_v8 = vshrl.u32 %v8590_v44, 16  ;;  %v8677_v12 = vsel %vm12677_vm7, %v8672_v46, %v8676_v39  ;;  %8718 = vst [vmem:[#allocation4 + $0xa0] sm:$0xf] %v8663_v30  ;;  %v8924_v40 = vrot.slane %v8922_v6, 5  ;;  %11860 = vmatprep.subr.bf16.mxu1 %v12395_v52 }
 0x6ce   : > { %8799 = vst [vmem:[#allocation4 + $0xc8] sm:$0xf] %v8777_v5  ;;  %v8593_v43 = vld [vmem:[#allocation3 + $0x44] sm:$0x1]  ;;  %v8682_v31 = vshll.u32 %v8590_v44, 16  ;;  %v8688_v49 = vshll.u32 %v8591_v20, 16 }
 0x6cf   : > { %8719 = vst [vmem:[#allocation4 + $0xc4] sm:$0xf] %v8677_v12  ;;  %v8681_v16 = vrot.slane %v8679_v8, 4  ;;  %v8693_v27 = vshrl.u32 %v8592_v18, 16  ;;  %v8696_v32 = vshll.u32 %v8592_v18, 16  ;;  %v12396_v7 = vld [vmem:[%s15677_s7 + $0x448] sm:$0xff]   ;;  %v8925_v54 = vor.u32 %v8924_v40, %v8921_v23 }
 0x6d0   : > { %v8734_v21 = vld [vmem:[#allocation3 + $0x38] sm:$0xe]  ;;  %v8930_v26 = vrot.slane %v8928_v22, 5  ;;  %v8684_v9 = vrot.slane %v8682_v31, 5  ;;  %v8702_v37 = vshll.u32 %v8593_v43, 16  ;;  %v8690_v53 = vrot.slane %v8688_v49, 5  ;;  %11861 = vmatpush3.bf16.msra.mxu1 %v12395_v52 }
 0x6d1   : > { %v8735_v15 = vld [vmem:[#allocation3 + $0x3c] sm:$0x1]  ;;  %v10854_v0 = vrot.slane %v8734_v21, 9  ;;  %v8926_v33 = vrot.slane %v8925_v54, 4  ;;  %v8695_v51 = vrot.slane %v8693_v27, 4  ;;  %v8698_v60 = vrot.slane %v8696_v32, 5  ;;  %11862 = vmatprep.subr.bf16.mxu1 %v12396_v7 }
 0x6d2   : > { %v12380_v25 = vld [vmem:[#allocation4 + $0xa8] ss:$36 sps:$4 sm:$0xff]   ;;  %v8685_v2 = vor.u32 %v8684_v9, %v8681_v16  ;;  %v8736_v36 = vld [vmem:[#allocation3 + $0x40] sm:$0xe]  ;;  %v8704_v14 = vrot.slane %v8702_v37, 5  ;;  %v8780_v50 = vrot.slane %v8735_v15, 5 }
 0x6d3   : > { %v12382_v4 = vld [vmem:[#allocation4 + $0xac] ss:$36 sps:$4 sm:$0xff]   ;;  %v8737_v63 = vld [vmem:[#allocation3 + $0x44] sm:$0x1]  ;;  %v10855_v10 = vrot.slane %v8736_v36, 9  ;;  %v8931_v42 = vsel %vm12677_vm7, %v8926_v33, %v8930_v26  ;;  %v8699_v59 = vor.u32 %v8698_v60, %v8695_v51 }
 0x6d4   : > { %9941 = vmatprep.mubr.bf16.mxu0 %v12382_v4  ;;  %v12398_v45 = vld [vmem:[%s15677_s7 + $0x440] sm:$0xff]   ;;  %v8686_v58 = vrot.slane %v8685_v2, 4  ;;  %v8784_v19 = vrot.slane %v8737_v63, 5  ;;  %v8962_v29 = vld [vmem:[#allocation3 + $0x10] sm:$0xe]  ;;  %v8781_v17 = vsel %vm13682_vm0, %v10854_v0, %v8780_v50  ;;  %11863 = vmatpush3.bf16.msra.mxu1 %v12396_v7 }
 0x6d5   : > { %9942 = vmatmul.mubr.bf16.gmra.mxu0 %v12380_v25  ;;  %v8963_v13 = vld [vmem:[#allocation3 + $0x14] sm:$0x1]  ;;  %8960 = vst [vmem:[#allocation4 + $0xf4] sm:$0xf] %v8931_v42  ;;  %v8964_v28 = vld [vmem:[#allocation3 + $0x18] sm:$0xe]  ;;  %11864 = vmatprep.subr.bf16.mxu1 %v12398_v45 }
 0x6d6   : > { %v8965_v38 = vld [vmem:[#allocation3 + $0x1c] sm:$0x1]  ;;  %v10856_v41 = vrot.slane %v8962_v29, 9  ;;  %v12384_v48 = vld [vmem:[#allocation4 + $0xa0] ss:$36 sps:$4 sm:$0xff]   ;;  %v8691_v47 = vsel %vm12677_vm7, %v8686_v58, %v8690_v53  ;;  %v8700_v46 = vrot.slane %v8699_v59, 4  ;;  %v8785_v39 = vsel %vm13682_vm0, %v10855_v10, %v8784_v19 }
 0x6d7   : > { %v12386_v35 = vld [vmem:[#allocation4 + $0xa4] ss:$36 sps:$4 sm:$0xff]   ;;  %8800 = vst [vmem:[#allocation4 + $0xec] sm:$0xf] %v8781_v17  ;;  %8720 = vst [vmem:[#allocation4 + $0xe8] sm:$0xf] %v8691_v47 }
 0x6d8   : > { %8801 = vst [vmem:[#allocation4 + $0x110] sm:$0xf] %v8785_v39  ;;  %v8996_v52 = vrot.slane %v8963_v13, 5  ;;  %v10857_v6 = vrot.slane %v8964_v28, 9  ;;  %v9000_v22 = vrot.slane %v8965_v38, 5  ;;  %9876 = vmatprep.mubr.bf16.mxu1 %v12386_v35  ;;  %v8705_v30 = vsel %vm12677_vm7, %v8700_v46, %v8704_v14  ;;  %11865 = vmatpush3.bf16.msra.mxu1 %v12398_v45  ;;  %v12402_v45 = vld [vmem:[%s15678_s8 + $0x18] sm:$0xff]  }
 0x6d9   : > { %v8966_v44 = vld [vmem:[#allocation3 + $0x20] sm:$0xe]  ;;  %v8967_v5 = vld [vmem:[#allocation3 + $0x24] sm:$0x1]  ;;  %v8968_v23 = vld [vmem:[#allocation3 + $0x28] sm:$0xe]  ;;  %9877 = vmatmul.mubr.bf16.gmra.mxu1 %v12384_v48  ;;  %11874 = vmatprep.subr.bf16.mxu0 %v12402_v45 }
 0x6da   : > { %v8969_v20 = vld [vmem:[#allocation3 + $0x2c] sm:$0x1]  ;;  %8721 = vst [vmem:[#allocation4 + $0x10c] sm:$0xf] %v8705_v30  ;;  %v8997_v18 = vsel %vm13682_vm0, %v10856_v41, %v8996_v52  ;;  %v9001_v8 = vsel %vm13682_vm0, %v10857_v6, %v9000_v22  ;;  %v10858_v12 = vrot.slane %v8966_v44, 9  ;;  %v9004_v40 = vrot.slane %v8967_v5, 5  ;;  %11886 = vmatprep.subr.bf16.mxu1 %v12402_v45  ;;  %11875 = vmatpush3.bf16.msra.mxu0 %v12402_v45 }
 0x6db   : > { %v8970_v43 = vld [vmem:[#allocation3 + $0x30] sm:$0xe]  ;;  %v8971_v31 = vld [vmem:[#allocation3 + $0x34] sm:$0x1]  ;;  %9034 = vst [vmem:[#allocation4 + $0x20] sm:$0xf] %v8997_v18  ;;  %11876 = vmatprep.subr.bf16.mxu0 %v12403_v57 }
 0x6dc   : > { %9035 = vst [vmem:[#allocation4 + $0x44] sm:$0xf] %v9001_v8  ;;  %v10859_v34 = vrot.slane %v8968_v23, 9  ;;  %v9008_v16 = vrot.slane %v8969_v20, 5  ;;  %v8972_v49 = vld [vmem:[#allocation3 + $0x38] sm:$0xe]  ;;  %v9005_v32 = vsel %vm13682_vm0, %v10858_v12, %v9004_v40 }
 0x6dd   : > { %v8973_v27 = vld [vmem:[#allocation3 + $0x3c] sm:$0x1]  ;;  %v10860_v21 = vrot.slane %v8970_v43, 9  ;;  %v9012_v7 = vrot.slane %v8971_v31, 5  ;;  %v10861_v54 = vrot.slane %v8972_v49, 9 }
 0x6de   : > { %v8974_v26 = vld [vmem:[#allocation3 + $0x40] sm:$0xe]  ;;  %v12390_v9 = vld [vmem:[#allocation4 + $0xf4] ss:$36 sps:$4 sm:$0xff]   ;;  %v9009_v37 = vsel %vm13682_vm0, %v10859_v34, %v9008_v16  ;;  %9036 = vst [vmem:[#allocation4 + $0x68] sm:$0xf] %v9005_v32  ;;  %11877 = vmatpush3.bf16.msra.mxu0 %v12403_v57 }
 0x6df   : > { %v9016_v15 = vrot.slane %v8973_v27, 5  ;;  %v12388_v25 = vld [vmem:[#allocation4 + $0xf0] ss:$36 sps:$4 sm:$0xff]   ;;  %9037 = vst [vmem:[#allocation4 + $0x8c] sm:$0xf] %v9009_v37  ;;  %v9013_v4 = vsel %vm13682_vm0, %v10860_v21, %v9012_v7  ;;  %v10862_v33 = vrot.slane %v8974_v26, 9  ;;  %9949 = vmatprep.mubr.bf16.mxu0 %v12390_v9 }
 0x6e0   : > { %v8975_v0 = vld [vmem:[#allocation3 + $0x44] sm:$0x1]  ;;  %9038 = vst [vmem:[#allocation4 + $0xb0] sm:$0xf] %v9013_v4  ;;  %9950 = vmatmul.mubr.bf16.gmra.mxu0 %v12388_v25  ;;  %v12394_v60 = vld [vmem:[#allocation4 + $0xec] ss:$36 sps:$4 sm:$0xff]  }
 0x6e1   : > { %v9017_v2 = vsel %vm13682_vm0, %v10861_v54, %v9016_v15  ;;  %v9020_v51 = vrot.slane %v8975_v0, 5  ;;  %v12392_v53 = vld [vmem:[#allocation4 + $0xe8] ss:$36 sps:$4 sm:$0xff]   ;;  %9884 = vmatprep.mubr.bf16.mxu1 %v12394_v60 }
 0x6e2   : > { %9039 = vst [vmem:[#allocation4 + $0xd4] sm:$0xf] %v9017_v2  ;;  %9885 = vmatmul.mubr.bf16.gmra.mxu1 %v12392_v53 }
 0x6e3   : > { %v9021_v36 = vsel %vm13682_vm0, %v10862_v33, %v9020_v51  ;;  %v12397_v14 = vld [vmem:[#allocation4 + $0x20] ss:$36 sps:$4 sm:$0xff]  }
 0x6e4   : > { %9040 = vst [vmem:[#allocation4 + $0xf8] sm:$0xf] %v9021_v36  ;;  %11866 = vmatprep.mubr.bf16.mxu1 %v12397_v14 }
 0x6e6   : > { %v12399_v63 = vld [vmem:[#allocation4 + $0x68] ss:$36 sps:$4 sm:$0xff]  }
 0x6e9   : > { %v12400_v50 = vld [vmem:[#allocation4 + $0xb0] ss:$36 sps:$4 sm:$0xff]  }
 0x6ea   : > { %11867 = vmatmul.mubr.bf16.vlgmr.msra.gmra.mxu1 %v12399_v63 }
 0x6eb   : > { %11870 = vmatprep.mubr.bf16.mxu1 %v12400_v50  ;;  %v12401_v10 = vld [vmem:[#allocation4 + $0xf8] ss:$36 sps:$4 sm:$0xff]   ;;  %11888 = vmatpush3.bf16.msra.mxu1 %v12402_v45 }
 0x6ec   : > { %11887 = vmatprep.subr.bf16.mxu1 %v12403_v57 }
 0x6ef   : > { %11889 = vmatpush3.bf16.msra.mxu1 %v12403_v57 }
 0x6f2   : > { %11871 = vmatmul.mubr.bf16.gmra.mxu1 %v12401_v10 }
 0x747   : > { %v15557_v42 = vpop.f32.mrf.mxu0 }
 0x749   : > { %v11631_v58 = vpop.f32.mrf.mxu0 }
 0x74a   : > { %v11632_v1 = vadd.f32 %v11631_v58, %v15557_v42 }
 0x74b   : > { %v15559_v59 = vpop.f32.mrf.mxu0 }
 0x74d   : > { %v15561_v19 = vpop.f32.mrf.mxu0 }
 0x74f   : > { %v15563_v13 = vpop.f32.mrf.mxu0 }
 0x750   : > { %v11590_v29 = vpop.f32.mrf.mxu1 }
 0x751   : > { %v11637_v28 = vpop.f32.mrf.mxu0 }
 0x752   : > { %v11591_v17 = vpop.f32.mrf.mxu1 }
 0x753   : > { %v11639_v41 = vpop.f32.mrf.mxu0  ;;  %v11592_v62 = vadd.f32 %v11591_v17, %v11590_v29 }
 0x754   : > { %v11593_v38 = vpop.f32.mrf.mxu1 }
 0x755   : > { %v11640_v35 = vpop.f32.mrf.mxu0 }
 0x756   : > { %v11594_v48 = vpop.f32.mrf.mxu1 }
 0x757   : > { %v11595_v55 = vadd.f32 %v11594_v48, %v11593_v38 }
 0x758   : > { %v11596_v47 = vpop.f32.mrf.mxu1 }
 0x759   : > { %v15565_v46 = vpop.f32.mrf.mxu0 }
 0x75a   : > { %v11597_v39 = vpop.f32.mrf.mxu1 }
 0x75b   : > { %v15567_v52 = vpop.f32.mrf.mxu0  ;;  %v11598_v61 = vadd.f32 %v11597_v39, %v11596_v47 }
 0x75c   : > { %v11599_v6 = vpop.f32.mrf.mxu1  ;;  %v11644_v42 = vadd.f32 %v15567_v52, %v15565_v46 }
 0x75d   : > { %v11645_v22 = vpop.f32.mrf.mxu0 }
 0x75e   : > { %v11600_v44 = vpop.f32.mrf.mxu1 }
 0x75f   : > { %v11646_v30 = vpop.f32.mrf.mxu0  ;;  %v11601_v11 = vadd.f32 %v11600_v44, %v11599_v6 }
 0x760   : > { %v11647_v58 = vadd.f32 %v11646_v30, %v11645_v22 }
 0x763   : > { %v11648_v23 = vpop.f32.mrf.mxu0 }
 0x764   : > { %v11602_v5 = vpop.f32.mrf.mxu1 }
 0x765   : > { %v11649_v18 = vpop.f32.mrf.mxu0 }
 0x766   : > { %v11603_v20 = vpop.f32.mrf.mxu1  ;;  %v11650_v44 = vadd.f32 %v11649_v18, %v11648_v23 }
 0x767   : > { %v15571_v40 = vpop.f32.mrf.mxu0  ;;  %v11604_v6 = vadd.f32 %v11603_v20, %v11602_v5 }
 0x768   : > { %v15569_v8 = vpop.f32.mrf.mxu1  ;;  %15851 = vst [vmem:[#allocation16_spill] sm:$0xff] %v15571_v40  ;;  %v9798_v40 = vadd.f32 %v11632_v1, %v11592_v62 }
 0x769   : > { %v15575_v31 = vpop.f32.mrf.mxu0 }
 0x76a   : > { %v11606_v12 = vpop.f32.mrf.mxu1  ;;  %15853 = vst [vmem:[#allocation22_spill] sm:$0xff] %v15575_v31 }
 0x770   : > { %v15573_v43 = vpop.f32.mrf.mxu1 }
 0x771   : > { %15852 = vst [vmem:[#allocation18_spill] sm:$0xff] %v15573_v43  ;;  %v11638_v43 = vadd.f32 %v11637_v28, %v15563_v13  ;;  %v11607_v28 = vadd.f32 %v11606_v12, %v15569_v8 }
 0x772   : > { %v15577_v34 = vpop.f32.mrf.mxu1 }
 0x773   : > { %15854 = vst [vmem:[#allocation21_spill] sm:$0xff] %v15577_v34  ;;  %v9806_v48 = vadd.f32 %v11638_v43, %v11598_v61  ;;  %v15860_v61 = vld [vmem:[#allocation22_spill] sm:$0xff] }
 0x774   : > { %v11611_v16 = vpop.f32.mrf.mxu1 }
 0x776   : > { %v11612_v27 = vpop.f32.mrf.mxu1 }
 0x778   : > { %v11710_v49 = vpop.f32.mrf.mxu0 }
 0x77a   : > { %v11711_v32 = vpop.f32.mrf.mxu0 }
 0x77b   : > { %v11670_v7 = vpop.f32.mrf.mxu1  ;;  %v11712_v1 = vadd.f32 %v11711_v32, %v11710_v49 }
 0x77c   : > { %v11713_v21 = vpop.f32.mrf.mxu0 }
 0x77d   : > { %v11671_v54 = vpop.f32.mrf.mxu1 }
 0x77e   : > { %v11714_v26 = vpop.f32.mrf.mxu0 }
 0x77f   : > { %v11673_v9 = vpop.f32.mrf.mxu1  ;;  %v11715_v46 = vadd.f32 %v11714_v26, %v11713_v21  ;;  %v9817_v26 = vadd.f32 %v11647_v58, %v11607_v28 }
 0x781   : > { %v11674_v25 = vpop.f32.mrf.mxu1 }
 0x782   : > { %v11675_v17 = vadd.f32 %v11674_v25, %v11673_v9 }
 0x786   : > { %v11716_v37 = vpop.f32.mrf.mxu0 }
 0x788   : > { %v11717_v15 = vpop.f32.mrf.mxu0 }
 0x789   : > { %v11718_v52 = vadd.f32 %v11717_v15, %v11716_v37 }
 0x78a   : > { %v11719_v4 = vpop.f32.mrf.mxu0 }
 0x78b   : > { %v11676_v0 = vpop.f32.mrf.mxu1 }
 0x78c   : > { %v11720_v2 = vpop.f32.mrf.mxu0 }
 0x78d   : > { %v11677_v33 = vpop.f32.mrf.mxu1  ;;  %v11721_v62 = vadd.f32 %v11720_v2, %v11719_v4 }
 0x78e   : > { %v11678_v31 = vadd.f32 %v11677_v33, %v11676_v0 }
 0x78f   : > { %v11679_v51 = vpop.f32.mrf.mxu1 }
 0x791   : > { %v11680_v36 = vpop.f32.mrf.mxu1 }
 0x792   : > { %v11681_v34 = vadd.f32 %v11680_v36, %v11679_v51 }
 0x795   : > { %v15579_v60 = vpop.f32.mrf.mxu0 }
 0x796   : > { %15855 = vst [vmem:[#allocation24_spill] sm:$0xff] %v15579_v60  ;;  %v11641_v60 = vadd.f32 %v11640_v35, %v11639_v41 }
 0x797   : > { %v15581_v53 = vpop.f32.mrf.mxu0 }
 0x798   : > { %15856 = vst [vmem:[#allocation11_spill] sm:$0xff] %v15581_v53  ;;  %v11672_v53 = vadd.f32 %v11671_v54, %v11670_v7  ;;  %v9809_v29 = vadd.f32 %v11641_v60, %v11601_v11  ;;  %v15861_v7 = vld [vmem:[#allocation18_spill] sm:$0xff]  ;;  %v15862_v54 = vld [vmem:[#allocation21_spill] sm:$0xff] }
 0x799   : > { %v11682_v14 = vpop.f32.mrf.mxu1  ;;  %v15583_v50 = vpop.f32.mrf.mxu0  ;;  %v11610_v9 = vadd.f32 %v15862_v54, %v15861_v7 }
 0x79a   : > { %15857 = vst [vmem:[#allocation12_spill] sm:$0xff] %v15583_v50  ;;  %v11635_v50 = vadd.f32 %v15561_v19, %v15559_v59  ;;  %v9863_v41 = vadd.f32 %v11672_v53, %v9798_v40  ;;  %v9874_v35 = vadd.f32 %v11681_v34, %v9809_v29  ;;  %v11613_v59 = vadd.f32 %v11612_v27, %v11611_v16 }
 0x79b   : > { %v11683_v63 = vpop.f32.mrf.mxu1  ;;  %v15585_v57 = vpop.f32.mrf.mxu0  ;;  %v9871_v19 = vadd.f32 %v11678_v31, %v9806_v48  ;;  %v9814_v40 = vadd.f32 %v11644_v42, %v11604_v6  ;;  %v9822_v25 = vadd.f32 %v11650_v44, %v11610_v9 }
 0x79c   : > { %15858 = vst [vmem:[#allocation9_spill] sm:$0xff] %v15585_v57  ;;  %v9801_v38 = vadd.f32 %v11635_v50, %v11595_v55  ;;  %v15859_v55 = vld [vmem:[#allocation16_spill] sm:$0xff]  ;;  %v11684_v5 = vadd.f32 %v11683_v63, %v11682_v14  ;;  %v9928_v20 = vadd.f32 %v11712_v1, %v9863_v41  ;;  %v9939_v18 = vadd.f32 %v11721_v62, %v9874_v35 }
 0x79d   : > { %v11685_v10 = vpop.f32.mrf.mxu1  ;;  %v11653_v43 = vadd.f32 %v15860_v61, %v15859_v55  ;;  %v9936_v12 = vadd.f32 %v11718_v52, %v9871_v19  ;;  %v15863_v2 = vld [vmem:[#allocation24_spill] sm:$0xff] }
 0x79e   : > { %v9866_v11 = vadd.f32 %v11675_v17, %v9801_v38  ;;  %v9879_v37 = vadd.f32 %v11684_v5, %v9814_v40  ;;  %v15869_v5 = vld [vmem:[#allocation15_spill] sm:$0xff]  ;;  %v15870_v40 = vld [vmem:[#allocation17_spill] sm:$0xff] }
 0x79f   : > { %v11686_v45 = vpop.f32.mrf.mxu1  ;;  %v9825_v31 = vadd.f32 %v11653_v43, %v11613_v59  ;;  %v15864_v51 = vld [vmem:[#allocation11_spill] sm:$0xff]  ;;  %v15867_v43 = vld [vmem:[#allocation14_spill] sm:$0xff] }
 0x7a0   : > { %v15587_v56 = vpop.f32.mrf.mxu0  ;;  %v11687_v16 = vadd.f32 %v11686_v45, %v11685_v10  ;;  %v9931_v32 = vadd.f32 %v11715_v46, %v9866_v11  ;;  %v11724_v60 = vadd.f32 %v15864_v51, %v15863_v2  ;;  %v15868_v46 = vld [vmem:[#allocation13_spill] sm:$0xff] }
 0x7a1   : > { %v15865_v29 = vld [vmem:[#allocation12_spill] sm:$0xff] }
 0x7a2   : > { %v11688_v3 = vpop.f32.mrf.mxu1  ;;  %v11729_v47 = vpop.f32.mrf.mxu0 }
 0x7a3   : > { %v11730_v10 = vadd.f32 %v11729_v47, %v15587_v56  ;;  %v15866_v17 = vld [vmem:[#allocation9_spill] sm:$0xff] }
 0x7a4   : > { %v11689_v24 = vpop.f32.mrf.mxu1  ;;  %v11731_v22 = vpop.f32.mrf.mxu0  ;;  %v11727_v38 = vadd.f32 %v15866_v17, %v15865_v29 }
 0x7a5   : > { %v11690_v8 = vadd.f32 %v11689_v24, %v11688_v3  ;;  %v9882_v3 = vadd.f32 %v11687_v16, %v9817_v26 }
 0x7a6   : > { %v11691_v57 = vpop.f32.mrf.mxu1  ;;  %v11732_v4 = vpop.f32.mrf.mxu0 }
 0x7a7   : > { %v9887_v36 = vadd.f32 %v11690_v8, %v9822_v25  ;;  %v11733_v14 = vadd.f32 %v11732_v4, %v11731_v22  ;;  %v9947_v59 = vadd.f32 %v11727_v38, %v9882_v3 }
 0x7a8   : > { %v11692_v39 = vpop.f32.mrf.mxu1 }
 0x7a9   : > { %v11693_v23 = vadd.f32 %v11692_v39, %v11691_v57  ;;  %v9944_v39 = vadd.f32 %v11724_v60, %v9879_v37  ;;  %v9952_v41 = vadd.f32 %v11730_v10, %v9887_v36 }
 0x7aa   : > { %v11868_v13 = vpop.f32.mrf.mxu1 }
 0x7ab   : > { %v10001_v0 = vadd.f32 %v11868_v13, %v9936_v12  ;;  %v9890_v15 = vadd.f32 %v11693_v23, %v9825_v31 }
 0x7ac   : > { %v9992_v30 = vpop.f32.mrf.mxu1 }
 0x7ad   : > { %v9993_v49 = vadd.f32 %v9992_v30, %v9928_v20  ;;  %v10025_v45 = vmax.f32 %v10001_v0, 0.0  ;;  %v9955_v42 = vadd.f32 %v11733_v14, %v9890_v15 }
 0x7ae   : > { %v11869_v34 = vpop.f32.mrf.mxu1 }
 0x7af   : > { %v10004_v27 = vadd.f32 %v11869_v34, %v9939_v18  ;;  %v10023_v63 = vmax.f32 %v9993_v49, 0.0  ;;  %v15871_v34 = vld [vmem:[#allocation23_spill] sm:$0xff] }
 0x7b0   : > { %v9995_v21 = vpop.f32.mrf.mxu1 }
 0x7b1   : > { %v9996_v33 = vadd.f32 %v9995_v21, %v9931_v32  ;;  %v10026_v53 = vmax.f32 %v10004_v27, 0.0  ;;  %v15872_v32 = vld [vmem:[#allocation25_spill] sm:$0xff]  ;;  %v15873_v21 = vld [vmem:[#allocation26_spill] sm:$0xff] }
 0x7b2   : > { %v11872_v24 = vpop.f32.mrf.mxu1 }
 0x7b3   : > { %v10024_v50 = vmax.f32 %v9996_v33, 0.0  ;;  %v10032_v58 = vpack.c.bf16 %v10026_v53, %v10025_v45  ;;  %v10017_v19 = vadd.f32 %v11872_v24, %v9952_v41  ;;  %v15874_v33 = vld [vmem:[#allocation27_spill] sm:$0xff] }
 0x7b4   : > { %v10008_v57 = vpop.f32.mrf.mxu1 }
 0x7b5   : > { %v10031_v48 = vpack.c.bf16 %v10024_v50, %v10023_v63  ;;  %v10009_v6 = vadd.f32 %v10008_v57, %v9944_v39  ;;  %v10029_v11 = vmax.f32 %v10017_v19, 0.0 }
 0x7b6   : > { %v11873_v35 = vpop.f32.mrf.mxu1 }
 0x7b7   : > { %v10020_v44 = vadd.f32 %v11873_v35, %v9955_v42  ;;  %11878 = vmatprep.mubr.msk.bf16.mxu0 %vm7931_vm3, %v10031_v48  ;;  %v10027_v28 = vmax.f32 %v10009_v6, 0.0 }
 0x7b8   : > { %v10011_v56 = vpop.f32.mrf.mxu1  ;;  %11879 = vmatmul.mubr.msk.bf16.vlgmr.msra.gmra.mxu0 %vm7931_vm3, %v10032_v58 }
 0x7b9   : > { %v10012_v47 = vadd.f32 %v10011_v56, %v9947_v59  ;;  %v10030_v13 = vmax.f32 %v10020_v44, 0.0 }
 0x7bb   : > { %v10028_v1 = vmax.f32 %v10012_v47, 0.0  ;;  %v10034_v55 = vpack.c.bf16 %v10030_v13, %v10029_v11 }
 0x7bd   : > { %v10033_v62 = vpack.c.bf16 %v10028_v1, %v10027_v28 }
 0x7bf   : > { %11882 = vmatprep.mubr.msk.bf16.mxu1 %vm7931_vm3, %v10033_v62 }
 0x7c0   : > { %11883 = vmatmul.mubr.msk.bf16.vlgmr.msra.gmra.mxu1 %vm7931_vm3, %v10034_v55 }
 0x878   : > { %v11880_v61 = vpop.f32.mrf.mxu0 }
 0x879   : > { %v10131_v7 = vadd.f32 %v11880_v61, %v15867_v43 }
 0x87a   : > { %v10098_v54 = vpop.f32.mrf.mxu0 }
 0x87b   : > { %v10139_v9 = vmax.f32 %v10131_v7, 0.0  ;;  %v10129_v52 = vadd.f32 %v10098_v54, %v15868_v46 }
 0x87c   : > { %v11881_v22 = vpop.f32.mrf.mxu0 }
 0x87d   : > { %10147 = vst [vmem:[%s325_s28 + $0x10] sm:$0xff] %v10139_v9  ;;  %v10137_v30 = vmax.f32 %v10129_v52, 0.0  ;;  %v10132_v23 = vadd.f32 %v11881_v22, %v15869_v5 }
 0x87e   : > { %v10101_v20 = vpop.f32.mrf.mxu0 }
 0x87f   : > { %10145 = vst [vmem:[%s325_s28] sm:$0xff] %v10137_v30  ;;  %v10140_v18 = vmax.f32 %v10132_v23, 0.0  ;;  %v10130_v31 = vadd.f32 %v10101_v20, %v15870_v40 }
 0x880   : > { %v11884_v8 = vpop.f32.mrf.mxu1 }
 0x881   : > { %10148 = vst [vmem:[%s325_s28 + $0x18] sm:$0xff] %v10140_v18  ;;  %v10138_v12 = vmax.f32 %v10130_v31, 0.0  ;;  %v10135_v16 = vadd.f32 %v11884_v8, %v15871_v34 }
 0x882   : > { %v10114_v49 = vpop.f32.mrf.mxu1 }
 0x883   : > { %10146 = vst [vmem:[%s325_s28 + $0x8] sm:$0xff] %v10138_v12  ;;  %v10143_v27 = vmax.f32 %v10135_v16, 0.0  ;;  %v10133_v25 = vadd.f32 %v10114_v49, %v15872_v32 }
 0x884   : > { %v11885_v4 = vpop.f32.mrf.mxu1 }
 0x885   : > { %10151 = vst [vmem:[%s325_s28 + $0x30] sm:$0xff] %v10143_v27  ;;  %v10141_v0 = vmax.f32 %v10133_v25, 0.0  ;;  %v10136_v26 = vadd.f32 %v11885_v4, %v15873_v21 }
 0x886   : > { %v10117_v37 = vpop.f32.mrf.mxu1 }
 0x887   : > { %10149 = vst [vmem:[%s325_s28 + $0x20] sm:$0xff] %v10141_v0  ;;  %v10144_v15 = vmax.f32 %v10136_v26, 0.0  ;;  %v10134_v2 = vadd.f32 %v10117_v37, %v15874_v33 }
 0x889   : > { %10152 = vst [vmem:[%s325_s28 + $0x38] sm:$0xff] %v10144_v15  ;;  %v10142_v51 = vmax.f32 %v10134_v2, 0.0 }
 0x88b   : > { %10150 = vst [vmem:[%s325_s28 + $0x28] sm:$0xff] %v10142_v51 }
 0x88c   : > { %12418 = shalt.err (!%p12415_p3)
}
 0x88d   : > { %s12419_s26 = scalar_lea.hbm %s15624_s22, 1024  ;;  %s12423_s29 = scalar_lea.hbm %s15679_s9, 2048 }
 0x88e   : > { %p12420_p4 = scmp.ne.s32.totalorder %s15624_s22, %s12419_s26  ;;  %p12424_p9 = scmp.lt.s32.totalorder %s15624_s22, %s15679_s9 }
 0x88f   : > { %p12425_p10 = scmp.lt.s32.totalorder %s12423_s29, %s12419_s26 }
 0x890   : > { %p12421_p7 = pnand %p12420_p4, %p12560_p5 }
 0x891   : > { %p12426_p11 = por %p12425_p10, %p12424_p9 }
 0x892   : > { %p12422_p8 = pneg %p12421_p7 }
 0x894   : > { %p12427_p12 = pnand %p12426_p11, %p12422_p8 }
 0x896   : > { %12430 = shalt.err (!%p12427_p12)
}
 0x897   : > { %s12470_s23 = smov 128   ;;  %s12471_s24 = smov 8  }
 0x898   : > { %11890 = dma.vmem_to_hbm [thread:$0]  (%p12560_p5), %s15626_s14, 1024, %s15624_s22, %s15630_s13, %s12470_s23, %s12470_s23, %s12471_s24  }
 0x899 PF: > { %p11896_p13 = scmp.ge.s32.totalorder %s12465_s12, 2  ;;  %s10182_s17 = sand.u32 1, %s12453_s30  }
 0x89a   : > { %s10183_s25 = scalar_lea.sflag [#allocation6], %s10182_s17 }
 0x89b   : > { %p11893_p0 = pnand %p11896_p13, %p12564_p6 }
 0x89d   : > { %p11894_p1 = pneg %p11893_p0 }
 0x89f   : > { %12448 = dma.done.wait (%p11894_p1), %s10183_s25, 1024  }
 0x8a0   : > { %12450 = vsyncadd (%p11894_p1), %s10183_s25, 4294966272  ;;  %p19_p2 = scmp.ge.s32.totalorder %s12547_s15, 4   ;;  %s15875_s30 = smov %s12457_s10 }
 0x8a1   : > { %s15876_s10 = smov %s12461_s11  ;;  %s15877_s11 = smov %s12558_s18 }
 0x8a2   : > { %s15878_s12 = smov %s12547_s15  ;;  %21 = sbr.rel (!%p19_p2) target bundleno = 3 (0x3), region = 104 }
 0x8a7   :  { %10188 = vsyncpa [#allocation6], 1 }
 0x8a8   :  { %10190 = vsyncpa [#allocation6 + $0x1], 1 }

</bundles_post_ra>
